<compile_context>
chip_gen: v7x
topology: tpu7x:2x2x1
jax: 0.10.0
libtpu: 0.0.40
codegen_flags: <defaults>
</compile_context>

<pallas_src>
import numpy as np
import jax
import jax.numpy as jnp
from jax.experimental import pallas as pl
from jax.experimental.pallas import tpu as pltpu

# ---------------- static model config (mirrors CombinedNGPNeRFW.__init__) ----------
T = 512                         # hash table size (power of two)
NL = (2, 4, 8, 16)              # multi-resolution grid sizes Nl
L = 4                           # positional-encoding bands -> d_enc width = 3 + 6*L = 27
AABB_SCALE = 2.0
N_VOCAB = 100
N_A = 48
N_TAU = 16
BETA_MIN = 0.1
F = 2
NLEV = len(NL)
FEAT = F * NLEV                 # hash feature width (= 8)
DENC = 3 + 6 * L                # 27
PI1, PI2, PI3 = 1, 2654435761, 805459861

MASK_COL = DENC + N_A + N_TAU   # column 91 of the (B,128) per-sample slab
SLAB_W = 128

_CORNER_OFFSETS = np.array(
    [[0, 0, 0], [1, 0, 0], [0, 1, 0], [1, 1, 0],
     [0, 0, 1], [1, 0, 1], [0, 1, 1], [1, 1, 1]], dtype=np.int32)


def _sigmoid(v):
    return 1.0 / (1.0 + jnp.exp(-v))


def _softplus(v):
    # torch.nn.Softplus(beta=1, threshold=20)
    return jnp.where(v > 20.0, v, jnp.log(1.0 + jnp.exp(jnp.minimum(v, 20.0))))


# ----------------------------- Pallas kernel ---------------------------------------
def combined_kernel(hw_ref, slab_ref,
                    wd1r, bd1, wd2, bd2,
                    w1h, w1s, b1, w2, b2, w3, b3, w4, b4,
                    out_ref):
    f32 = jnp.float32
    bf16 = jnp.bfloat16

    def dotw(a, w_ref):
        # bf16 x bf16 MXU matmul with f32 accumulation.
        return jnp.dot(a.astype(bf16), w_ref[...], preferred_element_type=f32)

    slab = slab_ref[...]                                        # (Tb, 128) bf16
    mask = slab[:, MASK_COL:MASK_COL + 1].astype(f32) > 0.5     # (Tb, 1) bool (0/1 flag)

    # --- density MLP (trilinear lerp fused into first matmul: hw = cfp*wtp, wrapper) --
    h1 = jnp.maximum(dotw(hw_ref[...], wd1r) + bd1[...], 0.0)   # (Tb, 64)
    h = dotw(h1, wd2) + bd2[...]                                # (Tb, 16)

    # --- fused static/transient layer 1: a1 = [z1 | zt1] ------------------------------
    a1 = jnp.maximum(dotw(h, w1h) + dotw(slab, w1s) + b1[...], 0.0)   # (Tb, 128)
    # --- fused layer 2: block-diag(ws2, wt2) ------------------------------------------
    a2 = jnp.maximum(dotw(a1, w2) + b2[...], 0.0)                     # (Tb, 128)
    # --- fused layer 3: static rgb head (cols 0:3) | transient layer-3 (cols 64:128) --
    a3 = dotw(a2, w3) + b3[...]                                       # (Tb, 128)
    # --- fused transient heads over relu(a3); static half nullified by zero w4 rows ---
    th = dotw(jnp.maximum(a3, 0.0), w4) + b4[...]                     # (Tb, 16)

    rgb_s = _sigmoid(a3[:, 0:3])
    rgb_t = _sigmoid(th[:, 4:7])
    sigma_s = jnp.exp(h[:, 0:1])
    # exp(softplus(v)) == where(v>20, exp(v), 1+exp(v)) -- saves a log + exp per sample
    tsv = th[:, 7:8]
    sigma_t = jnp.where(tsv > 20.0, jnp.exp(tsv), 1.0 + jnp.exp(jnp.minimum(tsv, 20.0)))
    beta_t = _softplus(th[:, 8:9]) + BETA_MIN

    # --- lane-dense packed output (Tb, 16): one store / one writeback DMA per tile ----
    # cols 0:3 static rgb | 3 static sigma | 4:7 transient rgb | 7 transient sigma
    #      8 transient beta | 9:16 padding
    out = jnp.concatenate([
        jnp.where(mask, rgb_s, 0.0),
        jnp.where(mask, sigma_s, 0.0),
        jnp.where(mask, rgb_t, 0.0),
        jnp.where(mask, sigma_t, 0.0),
        jnp.where(mask, beta_t, BETA_MIN),
        jnp.zeros((slab.shape[0], 7), f32),
    ], axis=1)
    out_ref[...] = out


# ------------------------- JAX glue: hashing + gathers ------------------------------
# TODO(synk): hash-table / embedding gathers stay in JAX (data-dependent gather); the
# 4 LUTs total ~16 KB so an in-kernel VMEM gather is possible but not done here.
def _prepare_hash_inputs(x, luts):
    """Integer hashing + table gather; returns trilinearly-weighted corner features
    packed lane-major as (B, 64) (8 corners x 8 features): hw = cfp * wtp."""
    xn = x.astype(jnp.float32) / AABB_SCALE + 0.5
    weighted = []
    for j in range(8):
        off = _CORNER_OFFSETS[j]
        per_level = []
        for i, n_res in enumerate(NL):
            scaled = xn * float(n_res)
            floor = jnp.floor(scaled)
            local = scaled - floor
            vfloor = floor.astype(jnp.int32)
            v = (vfloor + off[None, :]).astype(jnp.uint32)
            h = ((v[:, 0] * jnp.uint32(PI1)) ^
                 (v[:, 1] * jnp.uint32(PI2)) ^
                 (v[:, 2] * jnp.uint32(PI3))) % jnp.uint32(T)
            feat = luts[i][h.astype(jnp.int32)]                        # (B, F)
            wx = local[:, 0:1] if off[0] else 1.0 - local[:, 0:1]
            wy = local[:, 1:2] if off[1] else 1.0 - local[:, 1:2]
            wz = local[:, 2:3] if off[2] else 1.0 - local[:, 2:3]
            per_level.append(feat * (wx * wy * wz))                    # (B, F)
        weighted.append(jnp.concatenate(per_level, axis=1))            # (B, 8)
    return jnp.concatenate(weighted, axis=1)                           # (B, 64)


def _pack_params(params):
    """Fuse / pad / replicate weights into 128-wide block-structured matrices so the
    kernel runs 7 MXU ops (instead of 11 skinny ones) and never slices weights at
    unaligned offsets; cast matmul weights to bf16 (biases stay f32)."""
    bf16 = jnp.bfloat16
    f32 = jnp.float32
    ws1 = params["ws1"].astype(f32)          # (16 + 27 + N_A, 64) = (91, 64)
    wt1 = params["wt1"].astype(f32)          # (16 + N_TAU, 64)    = (32, 64)

    # density layer 1, replicated per corner (fused trilinear interpolation)
    wd1r = jnp.concatenate([params["wd1"]] * 8, axis=0)                # (64, 64)

    # fused layer 1: dot(h, w1h) + dot(slab, w1s)
    w1h = jnp.concatenate([ws1[:16], wt1[:16]], axis=1)                # (16, 128)
    w1s = jnp.zeros((SLAB_W, 128), f32)
    w1s = w1s.at[0:75, 0:64].set(ws1[16:91])                           # denc + a_emb
    w1s = w1s.at[75:91, 64:128].set(wt1[16:32])                        # t_emb
    b1 = jnp.concatenate([params["bs1"], params["bt1"]], axis=1)       # (1, 128)

    # fused layer 2: block-diag(ws2, wt2)
    w2 = jnp.zeros((128, 128), f32)
    w2 = w2.at[0:64, 0:64].set(params["ws2"])
    w2 = w2.at[64:128, 64:128].set(params["wt2"])
    b2 = jnp.concatenate([params["bs2"], params["bt2"]], axis=1)       # (1, 128)

    # fused layer 3: static rgb head (cols 0:3) and transient layer-3 (cols 64:128)
    w3 = jnp.zeros((128, 128), f32)
    w3 = w3.at[0:64, 0:3].set(params["ws3"])
    w3 = w3.at[64:128, 64:128].set(params["wt3"])
    b3 = jnp.zeros((1, 128), f32)
    b3 = b3.at[:, 0:3].set(params["bs3"])
    b3 = b3.at[:, 64:128].set(params["bt3"])

    # fused transient heads (applied to relu(a3); static rows zeroed)
    w4 = jnp.zeros((128, 16), f32)
    w4 = w4.at[64:128, 4:7].set(params["wtr"])
    w4 = w4.at[64:128, 7:8].set(params["wtd"])
    w4 = w4.at[64:128, 8:9].set(params["wtb"])
    b4 = jnp.zeros((1, 16), f32)
    b4 = b4.at[:, 4:7].set(params["btr"])
    b4 = b4.at[:, 7:8].set(params["btd"])
    b4 = b4.at[:, 8:9].set(params["btb"])

    return [wd1r.astype(bf16), params["bd1"].astype(f32),
            params["wd2"].astype(bf16), params["bd2"].astype(f32),
            w1h.astype(bf16), w1s.astype(bf16), b1.astype(f32),
            w2.astype(bf16), b2.astype(f32),
            w3.astype(bf16), b3.astype(f32),
            w4.astype(bf16), b4.astype(f32)]


def combined_forward(x, d, appearance_idx, transient_idx, params, tile_b=2048):
    """tile_b: batch tile; sweep 1024-4096 (keep n_tiles >= 2 on v7x for megacore)."""
    B = x.shape[0]
    f32 = jnp.float32
    bf16 = jnp.bfloat16
    x = x.astype(f32)
    d = d.astype(f32)

    # shrink the tile for tiny batches so we don't pad a 300-row test to 2048 rows
    tile_b = int(min(tile_b, ((B + 7) // 8) * 8))

    hw = _prepare_hash_inputs(x, params["luts"])                       # (B, 64) f32
    if appearance_idx is not None:
        a_emb = params["emb_a"][appearance_idx]
    else:
        a_emb = jnp.zeros((B, N_A), f32)
    if transient_idx is not None:
        t_emb = params["emb_t"][transient_idx]
    else:
        t_emb = jnp.zeros((B, N_TAU), f32)

    # viewdir positional encoding, same row order as ws1[16:]
    denc = jnp.concatenate(
        [d] + [fn((2.0 ** j) * d) for j in range(L) for fn in (jnp.sin, jnp.cos)],
        axis=1)                                                        # (B, 27)

    # AABB mask computed in f32, shipped as an exact 0/1 bf16 lane
    xn = x / AABB_SCALE
    mask_f = ((jnp.abs(xn[:, 0:1]) < 0.5) &
              (jnp.abs(xn[:, 1:2]) < 0.5) &
              (jnp.abs(xn[:, 2:3]) < 0.5)).astype(f32)                 # (B, 1)

    # one lane-dense per-sample slab: [denc(27) | a_emb(48) | t_emb(16) | mask(1) | pad]
    slab = jnp.concatenate(
        [denc, a_emb, t_emb, mask_f,
         jnp.zeros((B, SLAB_W - MASK_COL - 1), f32)], axis=1)          # (B, 128)

    n_tiles = int(pl.cdiv(B, tile_b))
    Bp = n_tiles * tile_b

    def padb(a):
        return a if Bp == B else jnp.pad(a, ((0, Bp - B), (0, 0)))

    per_sample = [padb(hw).astype(bf16),        # (Bp, 64)  bf16 weighted corner feats
                  padb(slab).astype(bf16)]      # (Bp, 128) bf16 posenc|a_emb|t_emb|mask
    weights = _pack_params(params)

    def batch_spec(w):
        return pl.BlockSpec((tile_b, w), lambda i: (i, 0))

    def const_spec(a):
        return pl.BlockSpec(a.shape, lambda i: (0, 0))   # VMEM-resident across grid

    in_specs = ([batch_spec(a.shape[1]) for a in per_sample] +
                [const_spec(w) for w in weights])

    out = pl.pallas_call(
        combined_kernel,
        out_shape=jax.ShapeDtypeStruct((Bp, 16), f32),
        grid=(n_tiles,),
        in_specs=in_specs,
        out_specs=pl.BlockSpec((tile_b, 16), lambda i: (i, 0)),
        compiler_params=pltpu.CompilerParams(
            dimension_semantics=("parallel",),
            vmem_limit_bytes=32 * 1024 * 1024),
    )(*per_sample, *weights)

    out = out[:B]
    return (out[:, 0:3], out[:, 3], out[:, 4:7], out[:, 7], out[:, 8])


# ------------------------- pure-JAX reference (for validation) ----------------------
def reference_forward(x, d, a_idx, t_idx, params):
    x = x.astype(jnp.float32)
    d = d.astype(jnp.float32)
    xn = x / AABB_SCALE
    mask = ((jnp.abs(xn[:, 0]) < 0.5) & (jnp.abs(xn[:, 1]) < 0.5) & (jnp.abs(xn[:, 2]) < 0.5))
    hw = _prepare_hash_inputs(x, params["luts"])
    feats = hw.reshape(x.shape[0], 8, FEAT).sum(axis=1)                # trilinear interp
    relu = lambda v: jnp.maximum(v, 0.0)
    h = relu(feats @ params["wd1"] + params["bd1"]) @ params["wd2"] + params["bd2"]
    denc = jnp.concatenate(
        [d] + [f((2.0 ** j) * d) for j in range(L) for f in (jnp.sin, jnp.cos)], axis=1)
    a_emb = params["emb_a"][a_idx]
    t_emb = params["emb_t"][t_idx]
    z = relu(jnp.concatenate([h, denc, a_emb], axis=1) @ params["ws1"] + params["bs1"])
    z = relu(z @ params["ws2"] + params["bs2"])
    rgb_s = _sigmoid(z @ params["ws3"] + params["bs3"])
    zt = relu(jnp.concatenate([h, t_emb], axis=1) @ params["wt1"] + params["bt1"])
    zt = relu(zt @ params["wt2"] + params["bt2"])
    tfeat = relu(zt @ params["wt3"] + params["bt3"])
    tsig = _softplus(tfeat @ params["wtd"] + params["btd"])[:, 0]
    trgb = _sigmoid(tfeat @ params["wtr"] + params["btr"])
    tbeta = _softplus(tfeat @ params["wtb"] + params["btb"])[:, 0] + BETA_MIN
    m = mask[:, None]
    return (jnp.where(m, rgb_s, 0.0),
            jnp.where(mask, jnp.exp(h[:, 0]), 0.0),
            jnp.where(m, trgb, 0.0),
            jnp.where(mask, jnp.exp(tsig), 0.0),
            jnp.where(mask, tbeta, BETA_MIN))


# ------------------------------- parameter init -------------------------------------
def init_params(key):
    keys = list(jax.random.split(key, 40))
    ki = iter(keys)

    def linear(fan_in, fan_out):
        bound = 1.0 / np.sqrt(fan_in)
        w = jax.random.uniform(next(ki), (fan_in, fan_out), jnp.float32, -bound, bound)
        b = jax.random.uniform(next(ki), (1, fan_out), jnp.float32, -bound, bound)
        return w, b

    p = {}
    p["luts"] = [(jax.random.uniform(next(ki), (T, F), jnp.float32) * 2.0 - 1.0) * 1e-4
                 for _ in range(NLEV)]
    p["emb_a"] = jax.random.normal(next(ki), (N_VOCAB, N_A), jnp.float32)
    p["emb_t"] = jax.random.normal(next(ki), (N_VOCAB, N_TAU), jnp.float32)
    p["wd1"], p["bd1"] = linear(FEAT, 64)
    p["wd2"], p["bd2"] = linear(64, 16)
    p["ws1"], p["bs1"] = linear(16 + DENC + N_A, 64)
    p["ws2"], p["bs2"] = linear(64, 64)
    p["ws3"], p["bs3"] = linear(64, 3)
    p["wt1"], p["bt1"] = linear(16 + N_TAU, 64)
    p["wt2"], p["bt2"] = linear(64, 64)
    p["wt3"], p["bt3"] = linear(64, 64)
    p["wtd"], p["btd"] = linear(64, 1)
    p["wtr"], p["btr"] = linear(64, 3)
    p["wtb"], p["btb"] = linear(64, 1)
    return p


# ------------------------------------ main -------------------------------------------
if __name__ == "__main__":
    key = jax.random.PRNGKey(0)
    kp, kx, kd, ka, kt = jax.random.split(key, 5)
    params = init_params(kp)

    B = 300                                                     # non-multiple of the tile
    x = jax.random.uniform(kx, (B, 3), jnp.float32, -1.5, 1.5)  # mix of in/out of aabb
    d = jax.random.uniform(kd, (B, 3), jnp.float32, -1.0, 1.0)
    a_idx = jax.random.randint(ka, (B,), 0, N_VOCAB)
    t_idx = jax.random.randint(kt, (B,), 0, N_VOCAB)

    outs = combined_forward(x, d, a_idx, t_idx, params)
    outs = jax.block_until_ready(outs)

    refs = reference_forward(x, d, a_idx, t_idx, params)
    for o, r in zip(outs, refs):
        assert o.shape == r.shape and o.dtype == r.dtype
        err = float(jnp.max(jnp.abs(o - r) / (1.0 + jnp.abs(r))))
        assert err < 5e-2, err

    print("KERNEL_OK")
</pallas_src>

<mosaic_0001>
module attributes {stable_mosaic.version = 11 : i64} {
  func.func @combined_kernel(%arg0: i32, %arg1: memref<304x64xbf16, #tpu.memory_space<vmem>>, %arg2: memref<304x128xbf16, #tpu.memory_space<vmem>>, %arg3: memref<64x64xbf16, #tpu.memory_space<vmem>>, %arg4: memref<1x64xf32, #tpu.memory_space<vmem>>, %arg5: memref<64x16xbf16, #tpu.memory_space<vmem>>, %arg6: memref<1x16xf32, #tpu.memory_space<vmem>>, %arg7: memref<16x128xbf16, #tpu.memory_space<vmem>>, %arg8: memref<128x128xbf16, #tpu.memory_space<vmem>>, %arg9: memref<1x128xf32, #tpu.memory_space<vmem>>, %arg10: memref<128x128xbf16, #tpu.memory_space<vmem>>, %arg11: memref<1x128xf32, #tpu.memory_space<vmem>>, %arg12: memref<128x128xbf16, #tpu.memory_space<vmem>>, %arg13: memref<1x128xf32, #tpu.memory_space<vmem>>, %arg14: memref<128x16xbf16, #tpu.memory_space<vmem>>, %arg15: memref<1x16xf32, #tpu.memory_space<vmem>>, %arg16: memref<304x16xf32, #tpu.memory_space<vmem>>) attributes {dimension_semantics = [#tpu.dimension_semantics<parallel>], iteration_bounds = array<i64: 1>, scalar_prefetch = 0 : i64, scratch_operands = 0 : i64, tpu.core_type = #tpu.core_type<tc>, window_params = [{transform_indices = @transform_0, window_bounds = array<i64: 304, 64>}, {transform_indices = @transform_1, window_bounds = array<i64: 304, 128>}, {pipeline_mode = #tpu.pipeline_mode<synchronous>, transform_indices = @transform_2, window_bounds = array<i64: 64, 64>}, {pipeline_mode = #tpu.pipeline_mode<synchronous>, transform_indices = @transform_3, window_bounds = array<i64: 1, 64>}, {pipeline_mode = #tpu.pipeline_mode<synchronous>, transform_indices = @transform_4, window_bounds = array<i64: 64, 16>}, {pipeline_mode = #tpu.pipeline_mode<synchronous>, transform_indices = @transform_5, window_bounds = array<i64: 1, 16>}, {pipeline_mode = #tpu.pipeline_mode<synchronous>, transform_indices = @transform_6, window_bounds = array<i64: 16, 128>}, {pipeline_mode = #tpu.pipeline_mode<synchronous>, transform_indices = @transform_7, window_bounds = array<i64: 128, 128>}, {pipeline_mode = #tpu.pipeline_mode<synchronous>, transform_indices = @transform_8, window_bounds = array<i64: 1, 128>}, {pipeline_mode = #tpu.pipeline_mode<synchronous>, transform_indices = @transform_9, window_bounds = array<i64: 128, 128>}, {pipeline_mode = #tpu.pipeline_mode<synchronous>, transform_indices = @transform_10, window_bounds = array<i64: 1, 128>}, {pipeline_mode = #tpu.pipeline_mode<synchronous>, transform_indices = @transform_11, window_bounds = array<i64: 128, 128>}, {pipeline_mode = #tpu.pipeline_mode<synchronous>, transform_indices = @transform_12, window_bounds = array<i64: 1, 128>}, {pipeline_mode = #tpu.pipeline_mode<synchronous>, transform_indices = @transform_13, window_bounds = array<i64: 128, 16>}, {pipeline_mode = #tpu.pipeline_mode<synchronous>, transform_indices = @transform_14, window_bounds = array<i64: 1, 16>}, {transform_indices = @transform_15, window_bounds = array<i64: 304, 16>}]} {
    %c0 = arith.constant 0 : index
    %c0_0 = arith.constant 0 : index
    %0 = vector.load %arg2[%c0, %c0_0] : memref<304x128xbf16, #tpu.memory_space<vmem>>, vector<304x128xbf16>
    %1 = vector.extract_strided_slice %0 {offsets = [0, 91], sizes = [304, 1], strides = [1, 1]} : vector<304x128xbf16> to vector<304x1xbf16>
    %2 = arith.extf %1 : vector<304x1xbf16> to vector<304x1xf32>
    %cst = arith.constant 5.000000e-01 : f32
    %3 = vector.broadcast %cst : f32 to vector<304x1xf32>
    %4 = arith.cmpf ogt, %2, %3 : vector<304x1xf32>
    %c0_1 = arith.constant 0 : index
    %c0_2 = arith.constant 0 : index
    %5 = vector.load %arg1[%c0_1, %c0_2] : memref<304x64xbf16, #tpu.memory_space<vmem>>, vector<304x64xbf16>
    %c0_3 = arith.constant 0 : index
    %c0_4 = arith.constant 0 : index
    %6 = vector.load %arg3[%c0_3, %c0_4] : memref<64x64xbf16, #tpu.memory_space<vmem>>, vector<64x64xbf16>
    %cst_5 = arith.constant dense<0.000000e+00> : vector<304x64xf32>
    %7 = tpu.matmul %5, %6, %cst_5 {dimension_numbers = #tpu.dot_dimension_numbers<[1], [0], [0], [1], [0, 0, 1, 1], [], []>} : vector<304x64xbf16>, vector<64x64xbf16>, vector<304x64xf32> -> vector<304x64xf32>
    %c0_6 = arith.constant 0 : index
    %c0_7 = arith.constant 0 : index
    %8 = vector.load %arg4[%c0_6, %c0_7] : memref<1x64xf32, #tpu.memory_space<vmem>>, vector<1x64xf32>
    %9 = vector.broadcast %8 : vector<1x64xf32> to vector<304x64xf32>
    %10 = arith.addf %7, %9 : vector<304x64xf32>
    %cst_8 = arith.constant 0.000000e+00 : f32
    %11 = vector.broadcast %cst_8 : f32 to vector<304x64xf32>
    %12 = arith.maximumf %10, %11 : vector<304x64xf32>
    %13 = arith.truncf %12 : vector<304x64xf32> to vector<304x64xbf16>
    %c0_9 = arith.constant 0 : index
    %c0_10 = arith.constant 0 : index
    %14 = vector.load %arg5[%c0_9, %c0_10] : memref<64x16xbf16, #tpu.memory_space<vmem>>, vector<64x16xbf16>
    %cst_11 = arith.constant dense<0.000000e+00> : vector<304x16xf32>
    %15 = tpu.matmul %13, %14, %cst_11 {dimension_numbers = #tpu.dot_dimension_numbers<[1], [0], [0], [1], [0, 0, 1, 1], [], []>} : vector<304x64xbf16>, vector<64x16xbf16>, vector<304x16xf32> -> vector<304x16xf32>
    %c0_12 = arith.constant 0 : index
    %c0_13 = arith.constant 0 : index
    %16 = vector.load %arg6[%c0_12, %c0_13] : memref<1x16xf32, #tpu.memory_space<vmem>>, vector<1x16xf32>
    %17 = vector.broadcast %16 : vector<1x16xf32> to vector<304x16xf32>
    %18 = arith.addf %15, %17 : vector<304x16xf32>
    %19 = arith.truncf %18 : vector<304x16xf32> to vector<304x16xbf16>
    %c0_14 = arith.constant 0 : index
    %c0_15 = arith.constant 0 : index
    %20 = vector.load %arg7[%c0_14, %c0_15] : memref<16x128xbf16, #tpu.memory_space<vmem>>, vector<16x128xbf16>
    %cst_16 = arith.constant dense<0.000000e+00> : vector<304x128xf32>
    %21 = tpu.matmul %19, %20, %cst_16 {dimension_numbers = #tpu.dot_dimension_numbers<[1], [0], [0], [1], [0, 0, 1, 1], [], []>} : vector<304x16xbf16>, vector<16x128xbf16>, vector<304x128xf32> -> vector<304x128xf32>
    %c0_17 = arith.constant 0 : index
    %c0_18 = arith.constant 0 : index
    %22 = vector.load %arg8[%c0_17, %c0_18] : memref<128x128xbf16, #tpu.memory_space<vmem>>, vector<128x128xbf16>
    %cst_19 = arith.constant dense<0.000000e+00> : vector<304x128xf32>
    %23 = tpu.matmul %0, %22, %cst_19 {dimension_numbers = #tpu.dot_dimension_numbers<[1], [0], [0], [1], [0, 0, 1, 1], [], []>} : vector<304x128xbf16>, vector<128x128xbf16>, vector<304x128xf32> -> vector<304x128xf32>
    %24 = arith.addf %21, %23 : vector<304x128xf32>
    %c0_20 = arith.constant 0 : index
    %c0_21 = arith.constant 0 : index
    %25 = vector.load %arg9[%c0_20, %c0_21] : memref<1x128xf32, #tpu.memory_space<vmem>>, vector<1x128xf32>
    %26 = vector.broadcast %25 : vector<1x128xf32> to vector<304x128xf32>
    %27 = arith.addf %24, %26 : vector<304x128xf32>
    %cst_22 = arith.constant 0.000000e+00 : f32
    %28 = vector.broadcast %cst_22 : f32 to vector<304x128xf32>
    %29 = arith.maximumf %27, %28 : vector<304x128xf32>
    %30 = arith.truncf %29 : vector<304x128xf32> to vector<304x128xbf16>
    %c0_23 = arith.constant 0 : index
    %c0_24 = arith.constant 0 : index
    %31 = vector.load %arg10[%c0_23, %c0_24] : memref<128x128xbf16, #tpu.memory_space<vmem>>, vector<128x128xbf16>
    %cst_25 = arith.constant dense<0.000000e+00> : vector<304x128xf32>
    %32 = tpu.matmul %30, %31, %cst_25 {dimension_numbers = #tpu.dot_dimension_numbers<[1], [0], [0], [1], [0, 0, 1, 1], [], []>} : vector<304x128xbf16>, vector<128x128xbf16>, vector<304x128xf32> -> vector<304x128xf32>
    %c0_26 = arith.constant 0 : index
    %c0_27 = arith.constant 0 : index
    %33 = vector.load %arg11[%c0_26, %c0_27] : memref<1x128xf32, #tpu.memory_space<vmem>>, vector<1x128xf32>
    %34 = vector.broadcast %33 : vector<1x128xf32> to vector<304x128xf32>
    %35 = arith.addf %32, %34 : vector<304x128xf32>
    %cst_28 = arith.constant 0.000000e+00 : f32
    %36 = vector.broadcast %cst_28 : f32 to vector<304x128xf32>
    %37 = arith.maximumf %35, %36 : vector<304x128xf32>
    %38 = arith.truncf %37 : vector<304x128xf32> to vector<304x128xbf16>
    %c0_29 = arith.constant 0 : index
    %c0_30 = arith.constant 0 : index
    %39 = vector.load %arg12[%c0_29, %c0_30] : memref<128x128xbf16, #tpu.memory_space<vmem>>, vector<128x128xbf16>
    %cst_31 = arith.constant dense<0.000000e+00> : vector<304x128xf32>
    %40 = tpu.matmul %38, %39, %cst_31 {dimension_numbers = #tpu.dot_dimension_numbers<[1], [0], [0], [1], [0, 0, 1, 1], [], []>} : vector<304x128xbf16>, vector<128x128xbf16>, vector<304x128xf32> -> vector<304x128xf32>
    %c0_32 = arith.constant 0 : index
    %c0_33 = arith.constant 0 : index
    %41 = vector.load %arg13[%c0_32, %c0_33] : memref<1x128xf32, #tpu.memory_space<vmem>>, vector<1x128xf32>
    %42 = vector.broadcast %41 : vector<1x128xf32> to vector<304x128xf32>
    %43 = arith.addf %40, %42 : vector<304x128xf32>
    %cst_34 = arith.constant 0.000000e+00 : f32
    %44 = vector.broadcast %cst_34 : f32 to vector<304x128xf32>
    %45 = arith.maximumf %43, %44 : vector<304x128xf32>
    %46 = arith.truncf %45 : vector<304x128xf32> to vector<304x128xbf16>
    %c0_35 = arith.constant 0 : index
    %c0_36 = arith.constant 0 : index
    %47 = vector.load %arg14[%c0_35, %c0_36] : memref<128x16xbf16, #tpu.memory_space<vmem>>, vector<128x16xbf16>
    %cst_37 = arith.constant dense<0.000000e+00> : vector<304x16xf32>
    %48 = tpu.matmul %46, %47, %cst_37 {dimension_numbers = #tpu.dot_dimension_numbers<[1], [0], [0], [1], [0, 0, 1, 1], [], []>} : vector<304x128xbf16>, vector<128x16xbf16>, vector<304x16xf32> -> vector<304x16xf32>
    %c0_38 = arith.constant 0 : index
    %c0_39 = arith.constant 0 : index
    %49 = vector.load %arg15[%c0_38, %c0_39] : memref<1x16xf32, #tpu.memory_space<vmem>>, vector<1x16xf32>
    %50 = vector.broadcast %49 : vector<1x16xf32> to vector<304x16xf32>
    %51 = arith.addf %48, %50 : vector<304x16xf32>
    %52 = vector.extract_strided_slice %43 {offsets = [0, 0], sizes = [304, 3], strides = [1, 1]} : vector<304x128xf32> to vector<304x3xf32>
    %cst_40 = arith.constant 0.000000e+00 : f32
    %53 = vector.broadcast %cst_40 : f32 to vector<304x3xf32>
    %54 = arith.subf %53, %52 : vector<304x3xf32>
    %55 = math.exp %54 : vector<304x3xf32>
    %cst_41 = arith.constant 1.000000e+00 : f32
    %56 = vector.broadcast %cst_41 : f32 to vector<304x3xf32>
    %57 = arith.addf %56, %55 : vector<304x3xf32>
    %cst_42 = arith.constant 1.000000e+00 : f32
    %58 = vector.broadcast %cst_42 : f32 to vector<304x3xf32>
    %59 = arith.divf %58, %57 : vector<304x3xf32>
    %60 = vector.extract_strided_slice %51 {offsets = [0, 4], sizes = [304, 3], strides = [1, 1]} : vector<304x16xf32> to vector<304x3xf32>
    %cst_43 = arith.constant 0.000000e+00 : f32
    %61 = vector.broadcast %cst_43 : f32 to vector<304x3xf32>
    %62 = arith.subf %61, %60 : vector<304x3xf32>
    %63 = math.exp %62 : vector<304x3xf32>
    %cst_44 = arith.constant 1.000000e+00 : f32
    %64 = vector.broadcast %cst_44 : f32 to vector<304x3xf32>
    %65 = arith.addf %64, %63 : vector<304x3xf32>
    %cst_45 = arith.constant 1.000000e+00 : f32
    %66 = vector.broadcast %cst_45 : f32 to vector<304x3xf32>
    %67 = arith.divf %66, %65 : vector<304x3xf32>
    %68 = vector.extract_strided_slice %18 {offsets = [0, 0], sizes = [304, 1], strides = [1, 1]} : vector<304x16xf32> to vector<304x1xf32>
    %69 = math.exp %68 : vector<304x1xf32>
    %70 = vector.extract_strided_slice %51 {offsets = [0, 7], sizes = [304, 1], strides = [1, 1]} : vector<304x16xf32> to vector<304x1xf32>
    %cst_46 = arith.constant 2.000000e+01 : f32
    %71 = vector.broadcast %cst_46 : f32 to vector<304x1xf32>
    %72 = arith.cmpf ogt, %70, %71 : vector<304x1xf32>
    %73 = math.exp %70 : vector<304x1xf32>
    %cst_47 = arith.constant 2.000000e+01 : f32
    %74 = vector.broadcast %cst_47 : f32 to vector<304x1xf32>
    %75 = arith.minimumf %70, %74 : vector<304x1xf32>
    %76 = math.exp %75 : vector<304x1xf32>
    %cst_48 = arith.constant 1.000000e+00 : f32
    %77 = vector.broadcast %cst_48 : f32 to vector<304x1xf32>
    %78 = arith.addf %77, %76 : vector<304x1xf32>
    %79 = arith.select %72, %73, %78 : vector<304x1xi1>, vector<304x1xf32>
    %80 = vector.extract_strided_slice %51 {offsets = [0, 8], sizes = [304, 1], strides = [1, 1]} : vector<304x16xf32> to vector<304x1xf32>
    %cst_49 = arith.constant 2.000000e+01 : f32
    %81 = vector.broadcast %cst_49 : f32 to vector<304x1xf32>
    %82 = arith.cmpf ogt, %80, %81 : vector<304x1xf32>
    %cst_50 = arith.constant 2.000000e+01 : f32
    %83 = vector.broadcast %cst_50 : f32 to vector<304x1xf32>
    %84 = arith.minimumf %80, %83 : vector<304x1xf32>
    %85 = math.exp %84 : vector<304x1xf32>
    %cst_51 = arith.constant 1.000000e+00 : f32
    %86 = vector.broadcast %cst_51 : f32 to vector<304x1xf32>
    %87 = arith.addf %86, %85 : vector<304x1xf32>
    %88 = math.log %87 : vector<304x1xf32>
    %89 = arith.select %82, %80, %88 : vector<304x1xi1>, vector<304x1xf32>
    %cst_52 = arith.constant 1.000000e-01 : f32
    %90 = vector.broadcast %cst_52 : f32 to vector<304x1xf32>
    %91 = arith.addf %89, %90 : vector<304x1xf32>
    %cst_53 = arith.constant 0.000000e+00 : f32
    %92 = vector.shape_cast %4 : vector<304x1xi1> to vector<304x1xi1>
    %93 = vector.broadcast %92 : vector<304x1xi1> to vector<304x3xi1>
    %94 = vector.broadcast %cst_53 : f32 to vector<304x3xf32>
    %95 = arith.select %93, %59, %94 : vector<304x3xi1>, vector<304x3xf32>
    %cst_54 = arith.constant 0.000000e+00 : f32
    %96 = vector.broadcast %cst_54 : f32 to vector<304x1xf32>
    %97 = arith.select %4, %69, %96 : vector<304x1xi1>, vector<304x1xf32>
    %cst_55 = arith.constant 0.000000e+00 : f32
    %98 = vector.shape_cast %4 : vector<304x1xi1> to vector<304x1xi1>
    %99 = vector.broadcast %98 : vector<304x1xi1> to vector<304x3xi1>
    %100 = vector.broadcast %cst_55 : f32 to vector<304x3xf32>
    %101 = arith.select %99, %67, %100 : vector<304x3xi1>, vector<304x3xf32>
    %cst_56 = arith.constant 0.000000e+00 : f32
    %102 = vector.broadcast %cst_56 : f32 to vector<304x1xf32>
    %103 = arith.select %4, %79, %102 : vector<304x1xi1>, vector<304x1xf32>
    %cst_57 = arith.constant 1.000000e-01 : f32
    %104 = vector.broadcast %cst_57 : f32 to vector<304x1xf32>
    %105 = arith.select %4, %91, %104 : vector<304x1xi1>, vector<304x1xf32>
    %cst_58 = arith.constant 0.000000e+00 : f32
    %106 = vector.broadcast %cst_58 : f32 to vector<304x7xf32>
    %107 = tpu.concatenate %95, %97, %101, %103, %105, %106 in 1 : vector<304x3xf32>, vector<304x1xf32>, vector<304x3xf32>, vector<304x1xf32>, vector<304x1xf32>, vector<304x7xf32> -> vector<304x16xf32>
    %c0_59 = arith.constant 0 : index
    %c0_60 = arith.constant 0 : index
    %108 = vector.load %arg16[%c0_59, %c0_60] : memref<304x16xf32, #tpu.memory_space<vmem>>, vector<304x16xf32>
    tpu.vector_store %arg16[%c0_59, %c0_60], %107 {strides = array<i32>} : memref<304x16xf32, #tpu.memory_space<vmem>>, vector<304x16xf32>,
    return
  }
  func.func @transform_0(%arg0: i32) -> (i32, i32) {
    %c0_i32 = arith.constant 0 : i32
    %c0_i32_0 = arith.constant 0 : i32
    return %arg0, %c0_i32 : i32, i32
  }
  func.func @transform_1(%arg0: i32) -> (i32, i32) {
    %c0_i32 = arith.constant 0 : i32
    %c0_i32_0 = arith.constant 0 : i32
    return %arg0, %c0_i32 : i32, i32
  }
  func.func @transform_2(%arg0: i32) -> (i32, i32) {
    %c0_i32 = arith.constant 0 : i32
    %c0_i32_0 = arith.constant 0 : i32
    %c0_i32_1 = arith.constant 0 : i32
    return %c0_i32, %c0_i32_0 : i32, i32
  }
  func.func @transform_3(%arg0: i32) -> (i32, i32) {
    %c0_i32 = arith.constant 0 : i32
    %c0_i32_0 = arith.constant 0 : i32
    %c0_i32_1 = arith.constant 0 : i32
    return %c0_i32, %c0_i32_0 : i32, i32
  }
  func.func @transform_4(%arg0: i32) -> (i32, i32) {
    %c0_i32 = arith.constant 0 : i32
    %c0_i32_0 = arith.constant 0 : i32
    %c0_i32_1 = arith.constant 0 : i32
    return %c0_i32, %c0_i32_0 : i32, i32
  }
  func.func @transform_5(%arg0: i32) -> (i32, i32) {
    %c0_i32 = arith.constant 0 : i32
    %c0_i32_0 = arith.constant 0 : i32
    %c0_i32_1 = arith.constant 0 : i32
    return %c0_i32, %c0_i32_0 : i32, i32
  }
  func.func @transform_6(%arg0: i32) -> (i32, i32) {
    %c0_i32 = arith.constant 0 : i32
    %c0_i32_0 = arith.constant 0 : i32
    %c0_i32_1 = arith.constant 0 : i32
    return %c0_i32, %c0_i32_0 : i32, i32
  }
  func.func @transform_7(%arg0: i32) -> (i32, i32) {
    %c0_i32 = arith.constant 0 : i32
    %c0_i32_0 = arith.constant 0 : i32
    %c0_i32_1 = arith.constant 0 : i32
    return %c0_i32, %c0_i32_0 : i32, i32
  }
  func.func @transform_8(%arg0: i32) -> (i32, i32) {
    %c0_i32 = arith.constant 0 : i32
    %c0_i32_0 = arith.constant 0 : i32
    %c0_i32_1 = arith.constant 0 : i32
    return %c0_i32, %c0_i32_0 : i32, i32
  }
  func.func @transform_9(%arg0: i32) -> (i32, i32) {
    %c0_i32 = arith.constant 0 : i32
    %c0_i32_0 = arith.constant 0 : i32
    %c0_i32_1 = arith.constant 0 : i32
    return %c0_i32, %c0_i32_0 : i32, i32
  }
  func.func @transform_10(%arg0: i32) -> (i32, i32) {
    %c0_i32 = arith.constant 0 : i32
    %c0_i32_0 = arith.constant 0 : i32
    %c0_i32_1 = arith.constant 0 : i32
    return %c0_i32, %c0_i32_0 : i32, i32
  }
  func.func @transform_11(%arg0: i32) -> (i32, i32) {
    %c0_i32 = arith.constant 0 : i32
    %c0_i32_0 = arith.constant 0 : i32
    %c0_i32_1 = arith.constant 0 : i32
    return %c0_i32, %c0_i32_0 : i32, i32
  }
  func.func @transform_12(%arg0: i32) -> (i32, i32) {
    %c0_i32 = arith.constant 0 : i32
    %c0_i32_0 = arith.constant 0 : i32
    %c0_i32_1 = arith.constant 0 : i32
    return %c0_i32, %c0_i32_0 : i32, i32
  }
  func.func @transform_13(%arg0: i32) -> (i32, i32) {
    %c0_i32 = arith.constant 0 : i32
    %c0_i32_0 = arith.constant 0 : i32
    %c0_i32_1 = arith.constant 0 : i32
    return %c0_i32, %c0_i32_0 : i32, i32
  }
  func.func @transform_14(%arg0: i32) -> (i32, i32) {
    %c0_i32 = arith.constant 0 : i32
    %c0_i32_0 = arith.constant 0 : i32
    %c0_i32_1 = arith.constant 0 : i32
    return %c0_i32, %c0_i32_0 : i32, i32
  }
  func.func @transform_15(%arg0: i32) -> (i32, i32) {
    %c0_i32 = arith.constant 0 : i32
    %c0_i32_0 = arith.constant 0 : i32
    return %arg0, %c0_i32 : i32, i32
  }
}

</mosaic_0001>

<bundles_post_ra>
// kernel: tpu_custom_call.1
= control target key start
LH: loop header
LB: loop body
LE: loop exit
PB: predicated region body
PF: predicated region fallthrough
CT: control target
= control target key end

     0   :  { %20 = vsyncpa [#allocation3], 0  ;;  %s10747_s0 = inlined_call_operand.vmem [shape: bf16[304,64], index: 0, kind: input, shape index: {}]   ;;  %s10748_s1 = inlined_call_operand.vmem [shape: bf16[304,128], index: 1, kind: input, shape index: {}]   ;;  %s10749_s2 = inlined_call_operand.vmem [shape: bf16[64,64], index: 2, kind: input, shape index: {}]   ;;  %s10750_s3 = inlined_call_operand.vmem [shape: f32[1,64], index: 3, kind: input, shape index: {}]   ;;  %s10751_s4 = inlined_call_operand.vmem [shape: bf16[64,16], index: 4, kind: input, shape index: {}]   ;;  %s10752_s5 = inlined_call_operand.vmem [shape: f32[1,16], index: 5, kind: input, shape index: {}]   ;;  %s10753_s6 = inlined_call_operand.vmem [shape: bf16[16,128], index: 6, kind: input, shape index: {}]   ;;  %s10754_s7 = inlined_call_operand.vmem [shape: bf16[128,128], index: 7, kind: input, shape index: {}]   ;;  %s10755_s8 = inlined_call_operand.vmem [shape: f32[1,128], index: 8, kind: input, shape index: {}]   ;;  %s10756_s9 = inlined_call_operand.hbm [shape: bf16[128,128], index: 9, kind: input, shape index: {}]   ;;  %s10757_s10 = inlined_call_operand.vmem [shape: f32[1,128], index: 10, kind: input, shape index: {}]   ;;  %s10758_s11 = inlined_call_operand.hbm [shape: bf16[128,128], index: 11, kind: input, shape index: {}]   ;;  %s10759_s12 = inlined_call_operand.vmem [shape: f32[1,128], index: 12, kind: input, shape index: {}]   ;;  %s10760_s13 = inlined_call_operand.vmem [shape: bf16[128,16], index: 13, kind: input, shape index: {}]   ;;  %s10761_s14 = inlined_call_operand.vmem [shape: f32[1,16], index: 14, kind: input, shape index: {}]   ;;  %s10762_s15 = inlined_call_operand.vmem [shape: f32[304,16], index: 15, kind: output, shape index: {}]  }
   0x1   :  { %21 = vsyncpa [#allocation5], 0  ;;  %s6791_s18 = smov [#allocation2]   ;;  %s6743_s22 = scalar_lea.hbm %s10756_s9, 1024 }
   0x2   :  { %s45_s19 = sshll.u32 %s6791_s18, 4  ;;  %p6744_p0 = scmp.ne.s32.totalorder %s10756_s9, %s6743_s22  ;;  %s46_s19 = int_to_ptr.vmem [resolvable:$true] %s45_s19 }
   0x3   :  { %p6747_p1 = scmp.lt.u32.totalorder %s6743_s22, %s10756_s9 }
   0x5   :  { %p6749_p2 = pnand %p6747_p1, %p6744_p0 }
   0x7   :  { %6752 = shalt.err (!%p6749_p2)
}
   0x8   :  { %s6753_s27 = scalar_lea.vmem %s46_s19, 1024  ;;  %p6758_p4 = scmp.lt.s32.totalorder %s46_s19, %s46_s19 }
   0x9   :  { %p6754_p3 = scmp.ne.s32.totalorder %s46_s19, %s6753_s27  ;;  %p6759_p5 = scmp.lt.s32.totalorder %s6753_s27, %s6753_s27 }
   0xb   :  { %p6760_p6 = por %p6759_p5, %p6758_p4 }
   0xd   :  { %p6761_p7 = pnand %p6760_p6, %p6754_p3 }
   0xf   :  { %6764 = shalt.err (!%p6761_p7)
}
  0x10   :  { %s6792_s28 = smov 64   ;;  %s6793_s29 = smov 4  }
  0x11   :  { %51 = dma.hbm_to_vmem [thread:$0]  %s10756_s9, 1024, %s46_s19, [#allocation3], %s6792_s28, %s6792_s28, %s6793_s29  }
  0x12   :  { %s6794_s17 = smov [#allocation4]   ;;  %s6765_s22 = scalar_lea.hbm %s10758_s11, 1024 }
  0x13   :  { %s59_s18 = sshll.u32 %s6794_s17, 4  ;;  %p6766_p8 = scmp.ne.s32.totalorder %s10758_s11, %s6765_s22  ;;  %s60_s18 = int_to_ptr.vmem [resolvable:$true] %s59_s18 }
  0x14   :  { %p6769_p9 = scmp.lt.u32.totalorder %s6765_s22, %s10758_s11 }
  0x16   :  { %p6771_p10 = pnand %p6769_p9, %p6766_p8 }
  0x18   :  { %6774 = shalt.err (!%p6771_p10)
}
  0x19   :  { %s6775_s27 = scalar_lea.vmem %s60_s18, 1024  ;;  %p6780_p12 = scmp.lt.s32.totalorder %s60_s18, %s60_s18 }
  0x1a   :  { %p6776_p11 = scmp.ne.s32.totalorder %s60_s18, %s6775_s27  ;;  %p6781_p13 = scmp.lt.s32.totalorder %s6775_s27, %s6775_s27 }
  0x1c   :  { %p6782_p0 = por %p6781_p13, %p6780_p12 }
  0x1e   :  { %p6783_p1 = pnand %p6782_p0, %p6776_p11 }
  0x20   :  { %6786 = shalt.err (!%p6783_p1)
}
  0x21   :  { %65 = dma.hbm_to_vmem [thread:$0]  %s10758_s11, 1024, %s60_s18, [#allocation5], %s6792_s28, %s6792_s28, %s6793_s29  }
  0x22   :  { %6787 = dma.done.wait [#allocation3], 1024  }
  0x23   :  { %6788 = vsyncadd [#allocation3], 4294966272 }
  0x24   :  { %6789 = dma.done.wait [#allocation5], 1024  }
  0x25   :  { %6790 = vsyncadd [#allocation5], 4294966272  ;;  %v10798_v0 = vmov 0.0   ;;  %vm10765_vm0 = vmmov 0   ;;  %v6036_v1 = vld [vmem:[%s10749_s2] sm:$0xff]   ;;  %v6037_v2 = vld [vmem:[%s10749_s2 + $0x8] sm:$0xff]  }
  0x26   :  { %5398 = vmatprep.subr.bf16.mxu0 %v10798_v0  ;;  %5406 = vmatprep.mubr.msk.bf16.mxu0 %vm10765_vm0, %v10798_v0  ;;  %v6038_v3 = vld [vmem:[%s10749_s2 + $0x10] sm:$0xff]   ;;  %v6039_v4 = vld [vmem:[%s10749_s2 + $0x18] sm:$0xff]   ;;  %v6040_v5 = vld [vmem:[%s10747_s0] sm:$0xff]   ;;  %vm10767_vm1 = vcmask 523264   ;;  %s6800_s22 = smov 40   ;;  %s6801_s20 = smov 84  }
  0x27   :  { %6012 = vmatprep.subr.bf16.mxu1 %v10798_v0  ;;  %5446 = vmatprep.mubr.msk.bf16.mxu1 %vm10765_vm0, %v10798_v0  ;;  %v6050_v6 = vld [vmem:[%s10747_s0 + $0x50] sm:$0xff]   ;;  %v6041_v7 = vld [vmem:[%s10747_s0 + $0x8] sm:$0xff]   ;;  %v6051_v8 = vld [vmem:[%s10747_s0 + $0x58] sm:$0xff]  }
  0x28   :  { %5399 = vmatpush3.bf16.msra.mxu0 %v6036_v1  ;;  %6016 = vmatpush3.bf16.msra.mxu1 %v6036_v1  ;;  %v6059_v9 = vld [vmem:[%s10751_s4] sm:$0xff]   ;;  %v6042_v10 = vld [vmem:[%s10747_s0 + $0x10] sm:$0xff]   ;;  %v6060_v12 = vld [vmem:[%s10751_s4 + $0x8] sm:$0xff]  }
  0x29   :  { %5400 = vmatprep.subr.bf16.mxu0 %v10798_v0  ;;  %6013 = vmatprep.subr.bf16.mxu1 %v10798_v0  ;;  %v6052_v11 = vld [vmem:[%s10747_s0 + $0x60] sm:$0xff]   ;;  %v6061_v13 = vld [vmem:[%s10751_s4 + $0x10] sm:$0xff]   ;;  %v6062_v14 = vld [vmem:[%s10751_s4 + $0x18] sm:$0xff]  }
  0x2a   :  { %v6043_v15 = vld [vmem:[%s10747_s0 + $0x18] sm:$0xff]   ;;  %v6053_v16 = vld [vmem:[%s10747_s0 + $0x68] sm:$0xff]   ;;  %v6044_v17 = vld [vmem:[%s10747_s0 + $0x20] sm:$0xff]  }
  0x2b   :  { %v6054_v18 = vld [vmem:[%s10747_s0 + $0x70] sm:$0xff]   ;;  %v6045_v19 = vld [vmem:[%s10747_s0 + $0x28] sm:$0xff]   ;;  %v6055_v20 = vld [vmem:[%s10747_s0 + $0x78] sm:$0xff]  }
  0x2c   :  { %5401 = vmatpush3.bf16.msra.mxu0 %v6037_v2  ;;  %6017 = vmatpush3.bf16.msra.mxu1 %v6037_v2  ;;  %v6046_v21 = vld [vmem:[%s10747_s0 + $0x30] sm:$0xff]   ;;  %v6056_v22 = vld [vmem:[%s10747_s0 + $0x80] sm:$0xff]   ;;  %v6047_v23 = vld [vmem:[%s10747_s0 + $0x38] sm:$0xff]  }
  0x2d   :  { %5402 = vmatprep.subr.bf16.mxu0 %v10798_v0  ;;  %6014 = vmatprep.subr.bf16.mxu1 %v10798_v0  ;;  %v6057_v24 = vld [vmem:[%s10747_s0 + $0x88] sm:$0xff]   ;;  %v6048_v25 = vld [vmem:[%s10747_s0 + $0x40] sm:$0xff]   ;;  %v6058_v26 = vld [vmem:[%s10747_s0 + $0x90] sm:$0xff]  }
  0x2e   :  { %v6049_v27 = vld [vmem:[%s10747_s0 + $0x48] sm:$0xff]   ;;  %v7068_v28 = vld [vmem:[%s10750_s3] ss:$0 sm:$0xff] }
  0x2f   :  { %v6063_v45 = vld [vmem:[%s10753_s6] sm:$0xff]  }
  0x30   :  { %5403 = vmatpush3.bf16.msra.mxu0 %v6038_v3  ;;  %6018 = vmatpush3.bf16.msra.mxu1 %v6038_v3  ;;  %v7090_v1 = vld [vmem:[%s10748_s1] sm:$0xff]  }
  0x31   :  { %5404 = vmatprep.subr.bf16.mxu0 %v10798_v0  ;;  %6015 = vmatprep.subr.bf16.mxu1 %v10798_v0 }
  0x34   :  { %5405 = vmatpush3.bf16.msra.mxu0 %v6039_v4  ;;  %6019 = vmatpush3.bf16.msra.mxu1 %v6039_v4  ;;  %v117_v4 = vunpack.c.l.bf16 %v7090_v1 }
  0x35   :  { %5482 = vmatprep.subr.bf16.mxu1 %v10798_v0  ;;  %5566 = vmatprep.subr.bf16.mxu0 %v10798_v0 }
  0x36   :  { %vm7106_vm2 = vcmp.gt.f32.partialorder %v117_v4, 0.5  ;;  %v11032_v4 = vmov 0 }
  0x37   :  { %5407 = vmatmul.mubr.msk.bf16.vlgmr.msra.gmra.mrb[0].mxu0 %vm10767_vm1, %v6040_v5  ;;  %5447 = vmatmul.mubr.msk.bf16.vlgmr.msra.gmra.mrb[0].mxu1 %vm10767_vm1, %v6050_v6 }
  0x38   :  { %5410 = vmatprep.mubr.msk.bf16.mxu0 %vm10765_vm0, %v10798_v0  ;;  %5450 = vmatprep.mubr.msk.bf16.mxu1 %vm10765_vm0, %v10798_v0 }
  0x39   :  { %5483 = vmatpush3.bf16.msra.mxu1 %v6059_v9 }
  0x3a   :  { %5484 = vmatprep.subr.bf16.mxu1 %v10798_v0 }
  0x3d   :  { %5485 = vmatpush3.bf16.msra.mxu1 %v6060_v12  ;;  %v6064_v12 = vld [vmem:[%s10754_s7] sm:$0xff]  }
  0x3e   :  { %5486 = vmatprep.subr.bf16.mxu1 %v10798_v0  ;;  %5567 = vmatpush3.bf16.msra.mxu0 %v6064_v12 }
  0x3f   :  { %5411 = vmatmul.mubr.msk.bf16.gmra.mrb[4].mxu0 %vm10767_vm1, %v6041_v7  ;;  %5451 = vmatmul.mubr.msk.bf16.gmra.mrb[4].mxu1 %vm10767_vm1, %v6051_v8  ;;  %v7098_v7 = vld [vmem:[%s10748_s1 + $0x8] sm:$0xff]  }
  0x40   :  { %5414 = vmatprep.mubr.msk.bf16.mxu0 %vm10765_vm0, %v10798_v0  ;;  %5454 = vmatprep.mubr.msk.bf16.mxu1 %vm10765_vm0, %v10798_v0 }
  0x41   :  { %5487 = vmatpush3.bf16.msra.mxu1 %v6061_v13  ;;  %v11017_v13 = vmov 0  ;;  %5568 = vmatprep.subr.bf16.mxu0 %v10798_v0 }
  0x42   :  { %5488 = vmatprep.subr.bf16.mxu1 %v10798_v0  ;;  %v11018_v13 = vsel %vm7106_vm2, 4294967295, %v11017_v13 }
  0x43   :  { %11019 = vst [vmem:[#allocation8_spill] sm:$0xff] %v11018_v13 }
  0x45   :  { %5489 = vmatpush3.bf16.msra.mxu1 %v6062_v14 }
  0x46   :  { %5658 = vmatprep.subr.bf16.mxu1 %v10798_v0 }
  0x47   :  { %5415 = vmatmul.mubr.msk.bf16.gmra.mrb[8].mxu0 %vm10767_vm1, %v6042_v10  ;;  %5455 = vmatmul.mubr.msk.bf16.gmra.mrb[8].mxu1 %vm10767_vm1, %v6052_v11 }
  0x48   :  { %5418 = vmatprep.mubr.msk.bf16.mxu0 %vm10765_vm0, %v10798_v0  ;;  %5458 = vmatprep.mubr.msk.bf16.mxu1 %vm10765_vm0, %v10798_v0 }
  0x4f   :  { %5419 = vmatmul.mubr.msk.bf16.gmra.mrb[12].mxu0 %vm10767_vm1, %v6043_v15  ;;  %5459 = vmatmul.mubr.msk.bf16.gmra.mrb[12].mxu1 %vm10767_vm1, %v6053_v16  ;;  %v6797_v16 = vmov 91  }
  0x50   :  { %5422 = vmatprep.mubr.msk.bf16.mxu0 %vm10765_vm0, %v10798_v0  ;;  %5462 = vmatprep.mubr.msk.bf16.mxu1 %vm10765_vm0, %v10798_v0 }
  0x51   :  { %6034 = vset.pattern.permute.xlu0 %v6797_v16  ;;  %6035 = vset.pattern.permute.xlu1 %v6797_v16 }
  0x57   :  { %5423 = vmatmul.mubr.msk.bf16.gmra.mrb[16].mxu0 %vm10767_vm1, %v6044_v17  ;;  %5463 = vmatmul.mubr.msk.bf16.gmra.mrb[16].mxu1 %vm10767_vm1, %v6054_v18  ;;  %v119_v17 = vunpack.c.l.bf16 %v7098_v7  ;;  %v118_v18 = vunpack.c.h.bf16 %v7090_v1 }
  0x58   :  { %5426 = vmatprep.mubr.msk.bf16.mxu0 %vm10765_vm0, %v10798_v0  ;;  %5466 = vmatprep.mubr.msk.bf16.mxu1 %vm10765_vm0, %v10798_v0 }
  0x59   :  { %vm7119_vm3 = vcmp.gt.f32.partialorder %v119_v17, 0.5  ;;  %vm7123_vm4 = vcmp.gt.f32.partialorder %v118_v18, 0.5 }
  0x5f   :  { %5427 = vmatmul.mubr.msk.bf16.gmra.mrb[20].mxu0 %vm10767_vm1, %v6045_v19  ;;  %5467 = vmatmul.mubr.msk.bf16.gmra.mrb[20].mxu1 %vm10767_vm1, %v6055_v20 }
  0x60   :  { %5430 = vmatprep.mubr.msk.bf16.mxu0 %vm10765_vm0, %v10798_v0  ;;  %5470 = vmatprep.mubr.msk.bf16.mxu1 %vm10765_vm0, %v10798_v0 }
  0x67   :  { %5431 = vmatmul.mubr.msk.bf16.gmra.mrb[24].mxu0 %vm10767_vm1, %v6046_v21  ;;  %5471 = vmatmul.mubr.msk.bf16.gmra.mrb[24].mxu1 %vm10767_vm1, %v6056_v22 }
  0x68   :  { %5434 = vmatprep.mubr.msk.bf16.mxu0 %vm10765_vm0, %v10798_v0  ;;  %5474 = vmatprep.mubr.msk.bf16.mxu1 %vm10765_vm0, %v10798_v0 }
  0x6f   :  { %5435 = vmatmul.mubr.msk.bf16.gmra.mrb[28].mxu0 %vm10767_vm1, %v6047_v23  ;;  %5475 = vmatmul.mubr.msk.bf16.gmra.mrb[28].mxu1 %vm10767_vm1, %v6057_v24  ;;  %v10790_v24 = vmov 0  }
  0x70   :  { %5438 = vmatprep.mubr.msk.bf16.mxu0 %vm10765_vm0, %v10798_v0  ;;  %5478 = vmatprep.mubr.msk.bf16.mxu1 %vm10765_vm0, %v10798_v0 }
  0x77   :  { %5439 = vmatmul.mubr.msk.bf16.gmra.mrb[32].mxu0 %vm10767_vm1, %v6048_v25  ;;  %5479 = vmatmul.mubr.msk.bf16.gmra.mrb[32].mxu1 %vm10767_vm1, %v6058_v26  ;;  %v3551_v25 = vsel %vm7106_vm2, 1, %v10790_v24  ;;  %v11020_v26 = vmov 0 }
  0x78   :  { %5442 = vmatprep.mubr.msk.bf16.mxu0 %vm10765_vm0, %v10798_v0  ;;  %5490 = vmatprep.mubr.msk.bf16.mxu1 %vm10765_vm0, %v10798_v0  ;;  %v11021_v26 = vsel %vm7119_vm3, 4294967295, %v11020_v26 }
  0x79   :  { %11022 = vst [vmem:[#allocation9_spill] sm:$0xff] %v11021_v26  ;;  %3590 = vperm.xlu0 %6034, %v3551_v25  }
  0x7f   :  { %5443 = vmatmul.mubr.msk.bf16.gmra.mrb[36].mxu0 %vm10767_vm1, %v6049_v27  ;;  %v11023_v27 = vmov 0 }
  0x80   :  { %5582 = vmatprep.mubr.msk.bf16.mxu0 %vm10765_vm0, %v10798_v0  ;;  %v11024_v27 = vsel %vm7123_vm4, 4294967295, %v11023_v27 }
  0x81   :  { %11025 = vst [vmem:[#allocation10_spill] sm:$0xff] %v11024_v27 }
 0x10a   :  { %v457_v29 = vpop.f32.mrb[0].mxu0  ;;  %v537_v30 = vpop.f32.mrb[0].mxu1 }
 0x10b   :  { %v458_v31 = vadd.f32 %v7068_v28, %v457_v29  ;;  %v5408_v32 = vpop.f32.mrb[1].mxu0  ;;  %v538_v33 = vadd.f32 %v7068_v28, %v537_v30  ;;  %v5448_v34 = vpop.f32.mrb[1].mxu1 }
 0x10c   :  { %v460_v35 = vpop.f32.mrb[2].mxu0  ;;  %v540_v36 = vpop.f32.mrb[2].mxu1  ;;  %v3553_v32 = vsel %vm7119_vm3, 1, %v10790_v24  ;;  %v120_v34 = vunpack.c.h.bf16 %v7098_v7 }
 0x10d   :  { %v461_v37 = vadd.f32 %v7068_v28, %v460_v35  ;;  %v5409_v38 = vpop.f32.mrb[3].mxu0  ;;  %v628_v39 = vmax.f32 %v538_v33, 0.0  ;;  %v541_v40 = vadd.f32 %v7068_v28, %v540_v36  ;;  %v5449_v41 = vpop.f32.mrb[3].mxu1  ;;  %v608_v42 = vmax.f32 %v458_v31, 0.0  ;;  %3596 = vperm.xlu1 %6035, %v3553_v32   ;;  %v7138_v35 = vld [vmem:[%s10748_s1 + $0x10] sm:$0xff]  }
 0x10e   :  { %v3552_v33 = vsel %vm7123_vm4, 1, %v10790_v24  ;;  %v121_v38 = vunpack.c.l.bf16 %v7138_v35  ;;  %vm7143_vm5 = vcmp.gt.f32.partialorder %v120_v34, 0.5  ;;  %v11026_v41 = vmov 0 }
 0x10f   :  { %v609_v43 = vmax.f32 %v461_v37, 0.0  ;;  %v629_v44 = vmax.f32 %v541_v40, 0.0  ;;  %v11027_v41 = vsel %vm7143_vm5, 4294967295, %v11026_v41  ;;  %3593 = vperm.xlu0 %6034, %v3552_v33  }
 0x110   :  { %11028 = vst [vmem:[#allocation11_spill] sm:$0xff] %v11027_v41  ;;  %vm7153_vm6 = vcmp.gt.f32.partialorder %v121_v38, 0.5 }
 0x111   :  { %v646_v46 = vpack.c.bf16 %v609_v43, %v608_v42  ;;  %v7077_v47 = vpack.c.bf16 %v629_v44, %v628_v39 }
 0x112   :  { %v465_v48 = vpop.f32.mrb[4].mxu0  ;;  %v545_v49 = vpop.f32.mrb[4].mxu1 }
 0x113   :  { %v466_v50 = vadd.f32 %v7068_v28, %v465_v48  ;;  %v5412_v51 = vpop.f32.mrb[5].mxu0  ;;  %5491 = vmatmul.mubr.msk.bf16.vlgmr.msra.gmra.mrb[36].mxu1 %vm10767_vm1, %v646_v46  ;;  %v546_v52 = vadd.f32 %v7068_v28, %v545_v49  ;;  %v5452_v53 = vpop.f32.mrb[5].mxu1  ;;  %v3554_v46 = vsel %vm7143_vm5, 1, %v10790_v24  ;;  %v11029_v48 = vmov 0  ;;  %v6066_v49 = vld [vmem:[%s10754_s7 + $0x8] sm:$0xff]  }
 0x114   :  { %v468_v54 = vpop.f32.mrb[6].mxu0  ;;  %5494 = vmatprep.mubr.msk.bf16.mxu1 %vm10765_vm0, %v10798_v0  ;;  %5659 = vmatpush3.bf16.msra.mxu1 %v6063_v45  ;;  %v548_v55 = vpop.f32.mrb[6].mxu1  ;;  %v11030_v48 = vsel %vm7153_vm6, 4294967295, %v11029_v48  ;;  %v3555_v53 = vsel %vm7153_vm6, 1, %v10790_v24 }
 0x115   :  { %v469_v56 = vadd.f32 %v7068_v28, %v468_v54  ;;  %v5413_v57 = vpop.f32.mrb[7].mxu0  ;;  %v630_v58 = vmax.f32 %v546_v52, 0.0  ;;  %v549_v59 = vadd.f32 %v7068_v28, %v548_v55  ;;  %v5453_v60 = vpop.f32.mrb[7].mxu1  ;;  %5828 = vmatprep.subr.bf16.mxu1 %v10798_v0  ;;  %v610_v61 = vmax.f32 %v466_v50, 0.0  ;;  %11031 = vst [vmem:[#allocation12_spill] sm:$0xff] %v11030_v48  ;;  %v7163_v50 = vld [vmem:[%s10748_s1 + $0x18] sm:$0xff]   ;;  %3599 = vperm.xlu1 %6035, %v3554_v46  }
 0x116   :  { %v122_v54 = vunpack.c.h.bf16 %v7138_v35  ;;  %v123_v55 = vunpack.c.l.bf16 %v7163_v50  ;;  %v7176_v57 = vld [vmem:[%s10748_s1 + $0x20] sm:$0xff]   ;;  %5569 = vmatpush3.bf16.msra.mxu0 %v6066_v49  ;;  %3602 = vperm.xlu0 %6034, %v3555_v53   ;;  %v7255_v53 = vld [vmem:[%s10748_s1 + $0x38] sm:$0xff]  }
 0x117   :  { %v611_v62 = vmax.f32 %v469_v56, 0.0  ;;  %v631_v63 = vmax.f32 %v549_v59, 0.0  ;;  %v124_v56 = vunpack.c.h.bf16 %v7163_v50  ;;  %5570 = vmatprep.subr.bf16.mxu0 %v10798_v0 }
 0x118   :  { %vm7188_vm7 = vcmp.gt.f32.partialorder %v122_v54, 0.5  ;;  %vm7192_vm8 = vcmp.gt.f32.partialorder %v123_v55, 0.5  ;;  %v6069_v54 = vld [vmem:[%s10754_s7 + $0x20] sm:$0xff]   ;;  %v11050_v55 = vmov 0 }
 0x119   :  { %v647_v2 = vpack.c.bf16 %v611_v62, %v610_v61  ;;  %v7092_v3 = vpack.c.bf16 %v631_v63, %v630_v58  ;;  %v6067_v63 = vld [vmem:[%s10754_s7 + $0x10] sm:$0xff]   ;;  %v11033_v4 = vsel %vm7188_vm7, 4294967295, %v11032_v4  ;;  %vm7196_vm9 = vcmp.gt.f32.partialorder %v124_v56, 0.5 }
 0x11a   :  { %v473_v5 = vpop.f32.mrb[8].mxu0  ;;  %v553_v6 = vpop.f32.mrb[8].mxu1  ;;  %11034 = vst [vmem:[#allocation13_spill] sm:$0xff] %v11033_v4  ;;  %v3556_v12 = vsel %vm7188_vm7, 1, %v10790_v24  ;;  %5571 = vmatpush3.bf16.msra.mxu0 %v6067_v63  ;;  %v131_v63 = vunpack.c.l.bf16 %v7255_v53 }
 0x11b   :  { %v474_v8 = vadd.f32 %v7068_v28, %v473_v5  ;;  %v5416_v9 = vpop.f32.mrb[9].mxu0  ;;  %5495 = vmatmul.mubr.msk.bf16.gmra.mrb[40].mxu1 %vm10767_vm1, %v647_v2  ;;  %v554_v10 = vadd.f32 %v7068_v28, %v553_v6  ;;  %v5456_v11 = vpop.f32.mrb[9].mxu1  ;;  %v7186_v2 = vld [vmem:[%s10748_s1 + $0x28] sm:$0xff]   ;;  %v11035_v5 = vmov 0  ;;  %v11038_v6 = vmov 0  ;;  %3605 = vperm.xlu1 %6035, %v3556_v12   ;;  %v7286_v12 = vld [vmem:[%s10748_s1 + $0x40] sm:$0xff]  }
 0x11c   :  { %v476_v14 = vpop.f32.mrb[10].mxu0  ;;  %5498 = vmatprep.mubr.msk.bf16.mxu1 %vm10765_vm0, %v10798_v0  ;;  %v556_v15 = vpop.f32.mrb[10].mxu1  ;;  %v11036_v5 = vsel %vm7192_vm8, 4294967295, %v11035_v5  ;;  %v11039_v6 = vsel %vm7196_vm9, 4294967295, %v11038_v6  ;;  %v127_v16 = vunpack.c.l.bf16 %v7186_v2  ;;  %5572 = vmatprep.subr.bf16.mxu0 %v10798_v0 }
 0x11d   :  { %v477_v19 = vadd.f32 %v7068_v28, %v476_v14  ;;  %v5417_v20 = vpop.f32.mrb[11].mxu0  ;;  %v632_v21 = vmax.f32 %v554_v10, 0.0  ;;  %v557_v22 = vadd.f32 %v7068_v28, %v556_v15  ;;  %v5457_v23 = vpop.f32.mrb[11].mxu1  ;;  %v612_v29 = vmax.f32 %v474_v8, 0.0  ;;  %11037 = vst [vmem:[#allocation14_spill] sm:$0xff] %v11036_v5  ;;  %11040 = vst [vmem:[#allocation15_spill] sm:$0xff] %v11039_v6 }
 0x11e   :  { %v125_v8 = vunpack.c.l.bf16 %v7176_v57  ;;  %v3557_v14 = vsel %vm7192_vm8, 1, %v10790_v24  ;;  %v126_v15 = vunpack.c.h.bf16 %v7176_v57  ;;  %v11041_v20 = vmov 0 }
 0x11f   :  { %v613_v30 = vmax.f32 %v477_v19, 0.0  ;;  %v633_v31 = vmax.f32 %v557_v22, 0.0  ;;  %v3558_v19 = vsel %vm7196_vm9, 1, %v10790_v24  ;;  %v6068_v22 = vld [vmem:[%s10754_s7 + $0x18] sm:$0xff]   ;;  %3608 = vperm.xlu0 %6034, %v3557_v14   ;;  %vm7241_vm12 = vcmp.gt.f32.partialorder %v127_v16, 0.5  ;;  %v6070_v14 = vld [vmem:[%s10754_s7 + $0x28] sm:$0xff]  }
 0x120   :  { %vm7215_vm10 = vcmp.gt.f32.partialorder %v125_v8, 0.5  ;;  %vm7227_vm11 = vcmp.gt.f32.partialorder %v126_v15, 0.5  ;;  %3611 = vperm.xlu1 %6035, %v3558_v19   ;;  %5573 = vmatpush3.bf16.msra.mxu0 %v6068_v22 }
 0x121   :  { %v648_v36 = vpack.c.bf16 %v613_v30, %v612_v29  ;;  %v7140_v37 = vpack.c.bf16 %v633_v31, %v632_v21  ;;  %v11042_v20 = vsel %vm7215_vm10, 4294967295, %v11041_v20  ;;  %v7222_v21 = vld [vmem:[%s10748_s1 + $0x30] sm:$0xff]   ;;  %v11044_v29 = vmov 0  ;;  %5574 = vmatprep.subr.bf16.mxu0 %v10798_v0 }
 0x122   :  { %v481_v39 = vpop.f32.mrb[12].mxu0  ;;  %v561_v40 = vpop.f32.mrb[12].mxu1  ;;  %11043 = vst [vmem:[#allocation16_spill] sm:$0xff] %v11042_v20  ;;  %v11045_v29 = vsel %vm7227_vm11, 4294967295, %v11044_v29  ;;  %v128_v30 = vunpack.c.h.bf16 %v7186_v2 }
 0x123   :  { %v482_v42 = vadd.f32 %v7068_v28, %v481_v39  ;;  %v5420_v43 = vpop.f32.mrb[13].mxu0  ;;  %5499 = vmatmul.mubr.msk.bf16.gmra.mrb[44].mxu1 %vm10767_vm1, %v648_v36  ;;  %v562_v44 = vadd.f32 %v7068_v28, %v561_v40  ;;  %v5460_v45 = vpop.f32.mrb[13].mxu1  ;;  %11046 = vst [vmem:[#allocation17_spill] sm:$0xff] %v11045_v29  ;;  %v3559_v39 = vsel %vm7215_vm10, 1, %v10790_v24  ;;  %v11047_v40 = vmov 0 }
 0x124   :  { %v484_v51 = vpop.f32.mrb[14].mxu0  ;;  %5502 = vmatprep.mubr.msk.bf16.mxu1 %vm10765_vm0, %v10798_v0  ;;  %v564_v52 = vpop.f32.mrb[14].mxu1  ;;  %v11048_v40 = vsel %vm7241_vm12, 4294967295, %v11047_v40  ;;  %v130_v43 = vunpack.c.h.bf16 %v7222_v21  ;;  %vm7260_vm13 = vcmp.gt.f32.partialorder %v128_v30, 0.5  ;;  %3614 = vperm.xlu0 %6034, %v3559_v39  }
 0x125   :  { %v485_v58 = vadd.f32 %v7068_v28, %v484_v51  ;;  %v5421_v59 = vpop.f32.mrb[15].mxu0  ;;  %v634_v60 = vmax.f32 %v562_v44, 0.0  ;;  %v565_v61 = vadd.f32 %v7068_v28, %v564_v52  ;;  %v5461_v62 = vpop.f32.mrb[15].mxu1  ;;  %v614_v9 = vmax.f32 %v482_v42, 0.0  ;;  %11049 = vst [vmem:[#allocation18_spill] sm:$0xff] %v11048_v40  ;;  %5575 = vmatpush3.bf16.msra.mxu0 %v6069_v54 }
 0x126   :  { %v129_v42 = vunpack.c.l.bf16 %v7222_v21  ;;  %v3560_v52 = vsel %vm7227_vm11, 1, %v10790_v24  ;;  %v11051_v55 = vsel %vm7260_vm13, 4294967295, %v11050_v55  ;;  %vm7272_vm15 = vcmp.gt.f32.partialorder %v130_v43, 0.5  ;;  %5576 = vmatprep.subr.bf16.mxu0 %v10798_v0 }
 0x127   :  { %v615_v10 = vmax.f32 %v485_v58, 0.0  ;;  %v635_v11 = vmax.f32 %v565_v61, 0.0  ;;  %11052 = vst [vmem:[#allocation19_spill] sm:$0xff] %v11051_v55  ;;  %3617 = vperm.xlu1 %6035, %v3560_v52   ;;  %v11053_v61 = vmov 0  ;;  %v11056_v62 = vmov 0 }
 0x128   :  { %vm7268_vm14 = vcmp.gt.f32.partialorder %v129_v42, 0.5  ;;  %v11057_v62 = vsel %vm7272_vm15, 4294967295, %v11056_v62 }
 0x129   :  { %v649_v17 = vpack.c.bf16 %v615_v10, %v614_v9  ;;  %v7210_v18 = vpack.c.bf16 %v635_v11, %v634_v60  ;;  %v3561_v60 = vsel %vm7241_vm12, 1, %v10790_v24  ;;  %v11054_v61 = vsel %vm7268_vm14, 4294967295, %v11053_v61  ;;  %11058 = vst [vmem:[#allocation21_spill] sm:$0xff] %v11057_v62  ;;  %5577 = vmatpush3.bf16.msra.mxu0 %v6070_v14  ;;  %v6072_v14 = vld [vmem:[%s10754_s7 + $0x38] sm:$0xff]  }
 0x12a   :  { %v489_v23 = vpop.f32.mrb[16].mxu0  ;;  %v569_v25 = vpop.f32.mrb[16].mxu1  ;;  %11055 = vst [vmem:[#allocation20_spill] sm:$0xff] %v11054_v61  ;;  %v3562_v10 = vsel %vm7260_vm13, 1, %v10790_v24  ;;  %v132_v11 = vunpack.c.h.bf16 %v7255_v53  ;;  %3620 = vperm.xlu0 %6034, %v3561_v60   ;;  %vm7303_vm13 = vcmp.gt.f32.partialorder %v131_v63, 0.5  ;;  %5578 = vmatprep.subr.bf16.mxu0 %v10798_v0 }
 0x12b   :  { %v490_v31 = vadd.f32 %v7068_v28, %v489_v23  ;;  %v5424_v32 = vpop.f32.mrb[17].mxu0  ;;  %5503 = vmatmul.mubr.msk.bf16.gmra.mrb[48].mxu1 %vm10767_vm1, %v649_v17  ;;  %v570_v33 = vadd.f32 %v7068_v28, %v569_v25  ;;  %v5464_v34 = vpop.f32.mrb[17].mxu1  ;;  %v3563_v25 = vsel %vm7268_vm14, 1, %v10790_v24  ;;  %3623 = vperm.xlu1 %6035, %v3562_v10   ;;  %v11068_v10 = vmov 0 }
 0x12c   :  { %v492_v36 = vpop.f32.mrb[18].mxu0  ;;  %5506 = vmatprep.mubr.msk.bf16.mxu1 %vm10765_vm0, %v10798_v0  ;;  %v572_v38 = vpop.f32.mrb[18].mxu1  ;;  %v3564_v32 = vsel %vm7272_vm15, 1, %v10790_v24  ;;  %v133_v34 = vunpack.c.l.bf16 %v7286_v12 }
 0x12d   :  { %v493_v44 = vadd.f32 %v7068_v28, %v492_v36  ;;  %v5425_v45 = vpop.f32.mrb[19].mxu0  ;;  %v636_v46 = vmax.f32 %v570_v33, 0.0  ;;  %v573_v49 = vadd.f32 %v7068_v28, %v572_v38  ;;  %v5465_v51 = vpop.f32.mrb[19].mxu1  ;;  %v616_v56 = vmax.f32 %v490_v31, 0.0 }
 0x12e   :  { %v11059_v33 = vmov 0  ;;  %v134_v36 = vunpack.c.h.bf16 %v7286_v12  ;;  %v11062_v45 = vmov 0  ;;  %3626 = vperm.xlu0 %6034, %v3563_v25  }
 0x12f   :  { %v617_v58 = vmax.f32 %v493_v44, 0.0  ;;  %v637_v59 = vmax.f32 %v573_v49, 0.0  ;;  %v11060_v33 = vsel %vm7303_vm13, 4294967295, %v11059_v33  ;;  %v6071_v49 = vld [vmem:[%s10754_s7 + $0x30] sm:$0xff]   ;;  %3629 = vperm.xlu1 %6035, %v3564_v32  }
 0x130   :  { %11061 = vst [vmem:[#allocation22_spill] sm:$0xff] %v11060_v33  ;;  %vm7337_vm15 = vcmp.gt.f32.partialorder %v134_v36, 0.5  ;;  %5579 = vmatpush3.bf16.msra.mxu0 %v6071_v49  ;;  %v11073_v36 = vmov 0 }
 0x131   :  { %v650_v8 = vpack.c.bf16 %v617_v58, %v616_v56  ;;  %v7277_v9 = vpack.c.bf16 %v637_v59, %v636_v46  ;;  %v7318_v46 = vld [vmem:[%s10748_s1 + $0x48] sm:$0xff]   ;;  %v3565_v56 = vsel %vm7303_vm13, 1, %v10790_v24  ;;  %v11069_v10 = vsel %vm7337_vm15, 4294967295, %v11068_v10  ;;  %5580 = vmatprep.subr.bf16.mxu0 %v10798_v0 }
 0x132   :  { %v497_v15 = vpop.f32.mrb[20].mxu0  ;;  %v577_v16 = vpop.f32.mrb[20].mxu1  ;;  %v135_v59 = vunpack.c.l.bf16 %v7318_v46  ;;  %11070 = vst [vmem:[#allocation25_spill] sm:$0xff] %v11069_v10  ;;  %3632 = vperm.xlu0 %6034, %v3565_v56   ;;  %vm11072_vm13 = vmmov 0  }
 0x133   :  { %v498_v17 = vadd.f32 %v7068_v28, %v497_v15  ;;  %v5428_v19 = vpop.f32.mrb[21].mxu0  ;;  %5507 = vmatmul.mubr.msk.bf16.gmra.mrb[52].mxu1 %vm10767_vm1, %v650_v8  ;;  %v578_v22 = vadd.f32 %v7068_v28, %v577_v16  ;;  %v5468_v23 = vpop.f32.mrb[21].mxu1  ;;  %vm7333_vm1 = vcmp.gt.f32.partialorder %v133_v34, 0.5  ;;  %v11065_v8 = vmov 0 }
 0x134   :  { %v500_v30 = vpop.f32.mrb[22].mxu0  ;;  %5510 = vmatprep.mubr.msk.bf16.mxu1 %vm10765_vm0, %v10798_v0  ;;  %v580_v31 = vpop.f32.mrb[22].mxu1  ;;  %vm7311_vm0 = vcmp.gt.f32.partialorder %v132_v11, 0.5  ;;  %v11066_v8 = vsel %vm7333_vm1, 4294967295, %v11065_v8  ;;  %v7344_v11 = vld [vmem:[%s10748_s1 + $0x50] sm:$0xff]   ;;  %v3567_v32 = vsel %vm7333_vm1, 1, %v10790_v24  ;;  %5581 = vmatpush3.bf16.msra.mxu0 %v6072_v14 }
 0x135   :  { %v501_v38 = vadd.f32 %v7068_v28, %v500_v30  ;;  %v5429_v39 = vpop.f32.mrb[23].mxu0  ;;  %v638_v42 = vmax.f32 %v578_v22, 0.0  ;;  %v581_v43 = vadd.f32 %v7068_v28, %v580_v31  ;;  %v5469_v44 = vpop.f32.mrb[23].mxu1  ;;  %v11063_v45 = vsel %vm7311_vm0, 4294967295, %v11062_v45  ;;  %11067 = vst [vmem:[#allocation24_spill] sm:$0xff] %v11066_v8  ;;  %5736 = vmatprep.subr.bf16.mxu0 %v10798_v0 }
 0x136   :  { %11064 = vst [vmem:[#allocation23_spill] sm:$0xff] %v11063_v45  ;;  %v618_v51 = vmax.f32 %v498_v17, 0.0  ;;  %v3566_v58 = vsel %vm7311_vm0, 1, %v10790_v24  ;;  %v136_v17 = vunpack.c.h.bf16 %v7318_v46  ;;  %vm11071_vm0 = vcmask 523264   ;;  %3638 = vperm.xlu0 %6034, %v3567_v32  }
 0x137   :  { %v619_v52 = vmax.f32 %v501_v38, 0.0  ;;  %v639_v54 = vmax.f32 %v581_v43, 0.0  ;;  %3635 = vperm.xlu1 %6035, %v3566_v58   ;;  %v3568_v34 = vsel %vm7337_vm15, 1, %v10790_v24  ;;  %vm7362_vm14 = vcmp.gt.f32.partialorder %v135_v59, 0.5  ;;  %5583 = vmatmul.mubr.bf16.vlgmr.msra.gmra.mrb[40].mxu0 %v7090_v1  ;;  %v7404_v1 = vld [vmem:[%s10748_s1 + $0x60] sm:$0xff]  }
 0x138   :  { %v11074_v36 = vsel %vm7362_vm14, 4294967295, %v11073_v36  ;;  %v137_v38 = vunpack.c.l.bf16 %v7344_v11  ;;  %5586 = vmatprep.mubr.msk.bf16.mxu0 %vm11072_vm13, %v10798_v0 }
 0x139   :  { %v651_v60 = vpack.c.bf16 %v619_v52, %v618_v51  ;;  %v7331_v63 = vpack.c.bf16 %v639_v54, %v638_v42  ;;  %11075 = vst [vmem:[#allocation26_spill] sm:$0xff] %v11074_v36  ;;  %v138_v51 = vunpack.c.h.bf16 %v7344_v11  ;;  %v7373_v52 = vld [vmem:[%s10748_s1 + $0x58] sm:$0xff]   ;;  %v11076_v54 = vmov 0 }
 0x13a   :  { %v505_v15 = vpop.f32.mrb[24].mxu0  ;;  %v585_v16 = vpop.f32.mrb[24].mxu1  ;;  %vm7383_vm15 = vcmp.gt.f32.partialorder %v137_v38, 0.5  ;;  %v139_v14 = vunpack.c.l.bf16 %v7373_v52 }
 0x13b   :  { %v506_v19 = vadd.f32 %v7068_v28, %v505_v15  ;;  %v5432_v22 = vpop.f32.mrb[25].mxu0  ;;  %5511 = vmatmul.mubr.msk.bf16.gmra.mrb[56].mxu1 %vm11071_vm0, %v651_v60  ;;  %v586_v23 = vadd.f32 %v7068_v28, %v585_v16  ;;  %v5472_v25 = vpop.f32.mrb[25].mxu1  ;;  %vm7375_vm0 = vcmp.gt.f32.partialorder %v136_v17, 0.5  ;;  %3641 = vperm.xlu1 %6035, %v3568_v34   ;;  %v3569_v60 = vsel %vm7362_vm14, 1, %v10790_v24 }
 0x13c   :  { %v508_v30 = vpop.f32.mrb[26].mxu0  ;;  %5514 = vmatprep.mubr.msk.bf16.mxu1 %vm11072_vm13, %v10798_v0  ;;  %v588_v31 = vpop.f32.mrb[26].mxu1  ;;  %v11077_v54 = vsel %vm7375_vm0, 4294967295, %v11076_v54  ;;  %v11079_v15 = vmov 0  ;;  %vm7394_vm1 = vcmp.gt.f32.partialorder %v138_v51, 0.5  ;;  %v11082_v22 = vmov 0  ;;  %3644 = vperm.xlu0 %6034, %v3569_v60  }
 0x13d   :  { %v509_v39 = vadd.f32 %v7068_v28, %v508_v30  ;;  %v5433_v42 = vpop.f32.mrb[27].mxu0  ;;  %v640_v43 = vmax.f32 %v586_v23, 0.0  ;;  %v589_v44 = vadd.f32 %v7068_v28, %v588_v31  ;;  %v5473_v49 = vpop.f32.mrb[27].mxu1  ;;  %11078 = vst [vmem:[#allocation27_spill] sm:$0xff] %v11077_v54  ;;  %v620_v56 = vmax.f32 %v506_v19, 0.0 }
 0x13e   :  { %v11080_v15 = vsel %vm7383_vm15, 4294967295, %v11079_v15  ;;  %v3570_v19 = vsel %vm7375_vm0, 1, %v10790_v24  ;;  %v11083_v22 = vsel %vm7394_vm1, 4294967295, %v11082_v22  ;;  %v140_v30 = vunpack.c.h.bf16 %v7373_v52 }
 0x13f   :  { %v621_v58 = vmax.f32 %v509_v39, 0.0  ;;  %v641_v59 = vmax.f32 %v589_v44, 0.0  ;;  %11081 = vst [vmem:[#allocation28_spill] sm:$0xff] %v11080_v15  ;;  %11084 = vst [vmem:[#allocation29_spill] sm:$0xff] %v11083_v22  ;;  %vm11085_vm0 = vcmask 523264   ;;  %3647 = vperm.xlu1 %6035, %v3570_v19   ;;  %v3572_v44 = vsel %vm7394_vm1, 1, %v10790_v24  ;;  %5587 = vmatmul.mubr.bf16.gmra.mrb[44].mxu0 %v7098_v7 }
 0x140   :  { %vm7417_vm14 = vcmp.gt.f32.partialorder %v139_v14, 0.5  ;;  %v11086_v49 = vmov 0  ;;  %v7427_v19 = vld [vmem:[%s10748_s1 + $0x68] sm:$0xff]   ;;  %v142_v14 = vunpack.c.h.bf16 %v7404_v1  ;;  %v6088_v7 = vld [vmem:[#allocation2 + $0x10] sm:$0xff]  }
 0x141   :  { %v652_v16 = vpack.c.bf16 %v621_v58, %v620_v56  ;;  %v7389_v17 = vpack.c.bf16 %v641_v59, %v640_v43  ;;  %v3571_v43 = vsel %vm7383_vm15, 1, %v10790_v24  ;;  %v11087_v49 = vsel %vm7417_vm14, 4294967295, %v11086_v49 }
 0x142   :  { %v513_v23 = vpop.f32.mrb[28].mxu0  ;;  %v593_v25 = vpop.f32.mrb[28].mxu1  ;;  %11088 = vst [vmem:[#allocation30_spill] sm:$0xff] %v11087_v49  ;;  %3650 = vperm.xlu0 %6034, %v3571_v43   ;;  %v11100_v49 = vmov 0 }
 0x143   :  { %v514_v31 = vadd.f32 %v7068_v28, %v513_v23  ;;  %v5436_v32 = vpop.f32.mrb[29].mxu0  ;;  %5515 = vmatmul.mubr.msk.bf16.gmra.mrb[60].mxu1 %vm11085_vm0, %v652_v16  ;;  %v594_v34 = vadd.f32 %v7068_v28, %v593_v25  ;;  %v5476_v38 = vpop.f32.mrb[29].mxu1  ;;  %v141_v16 = vunpack.c.l.bf16 %v7404_v1  ;;  %vm7429_vm0 = vcmp.gt.f32.partialorder %v140_v30, 0.5  ;;  %3653 = vperm.xlu1 %6035, %v3572_v44  }
 0x144   :  { %v516_v39 = vpop.f32.mrb[30].mxu0  ;;  %5518 = vmatprep.mubr.msk.bf16.mxu1 %vm11072_vm13, %v10798_v0  ;;  %v596_v42 = vpop.f32.mrb[30].mxu1  ;;  %v11089_v23 = vmov 0  ;;  %v3574_v30 = vsel %vm7429_vm0, 1, %v10790_v24 }
 0x145   :  { %v517_v51 = vadd.f32 %v7068_v28, %v516_v39  ;;  %v5437_v56 = vpop.f32.mrb[31].mxu0  ;;  %v642_v58 = vmax.f32 %v594_v34, 0.0  ;;  %v597_v59 = vadd.f32 %v7068_v28, %v596_v42  ;;  %v5477_v60 = vpop.f32.mrb[31].mxu1  ;;  %v11090_v23 = vsel %vm7429_vm0, 4294967295, %v11089_v23 }
 0x146   :  { %11091 = vst [vmem:[#allocation31_spill] sm:$0xff] %v11090_v23  ;;  %v622_v25 = vmax.f32 %v514_v31, 0.0  ;;  %v3573_v34 = vsel %vm7417_vm14, 1, %v10790_v24  ;;  %v143_v39 = vunpack.c.l.bf16 %v7427_v19  ;;  %vm7443_vm1 = vcmp.gt.f32.partialorder %v141_v16, 0.5  ;;  %v7450_v31 = vld [vmem:[%s10748_s1 + $0x70] sm:$0xff]  }
 0x147   :  { %v623_v32 = vmax.f32 %v517_v51, 0.0  ;;  %v643_v38 = vmax.f32 %v597_v59, 0.0  ;;  %v11092_v60 = vmov 0  ;;  %vm7452_vm14 = vcmp.gt.f32.partialorder %v142_v14, 0.5  ;;  %3656 = vperm.xlu0 %6034, %v3573_v34   ;;  %3659 = vperm.xlu1 %6035, %v3574_v30  }
 0x148   :  { %v11093_v60 = vsel %vm7443_vm1, 4294967295, %v11092_v60  ;;  %v11095_v51 = vmov 0  ;;  %vm11098_vm0 = vcmask 523264   ;;  %v11099_v14 = vmov 0  }
 0x149   :  { %v653_v42 = vpack.c.bf16 %v623_v32, %v622_v25  ;;  %v7438_v56 = vpack.c.bf16 %v643_v38, %v642_v58  ;;  %11094 = vst [vmem:[#allocation32_spill] sm:$0xff] %v11093_v60  ;;  %v11096_v51 = vsel %vm7452_vm14, 4294967295, %v11095_v51  ;;  %v144_v58 = vunpack.c.h.bf16 %v7427_v19  ;;  %v7483_v60 = vld [vmem:[%s10748_s1 + $0x78] sm:$0xff]  }
 0x14a   :  { %v521_v43 = vpop.f32.mrb[32].mxu0  ;;  %v601_v44 = vpop.f32.mrb[32].mxu1  ;;  %11097 = vst [vmem:[#allocation33_spill] sm:$0xff] %v11096_v51  ;;  %v3575_v23 = vsel %vm7443_vm1, 1, %v11099_v14  ;;  %vm7465_vm15 = vcmp.gt.f32.partialorder %v143_v39, 0.5  ;;  %v3576_v30 = vsel %vm7452_vm14, 1, %v11099_v14  ;;  %v146_v39 = vunpack.c.h.bf16 %v7450_v31 }
 0x14b   :  { %v522_v59 = vadd.f32 %v7068_v28, %v521_v43  ;;  %v5440_v25 = vpop.f32.mrb[33].mxu0  ;;  %5519 = vmatmul.mubr.msk.bf16.gmra.mrb[64].mxu1 %vm11098_vm0, %v653_v42  ;;  %v602_v16 = vadd.f32 %v7068_v28, %v601_v44  ;;  %v5480_v32 = vpop.f32.mrb[33].mxu1  ;;  %v11101_v49 = vsel %vm7465_vm15, 4294967295, %v11100_v49  ;;  %v145_v42 = vunpack.c.l.bf16 %v7450_v31  ;;  %3662 = vperm.xlu0 %6034, %v3575_v23  }
 0x14c   :  { %v524_v38 = vpop.f32.mrb[34].mxu0  ;;  %5522 = vmatprep.mubr.msk.bf16.mxu1 %vm11072_vm13, %v10798_v0  ;;  %v604_v24 = vpop.f32.mrb[34].mxu1  ;;  %11102 = vst [vmem:[#allocation34_spill] sm:$0xff] %v11101_v49  ;;  %vm7475_vm0 = vcmp.gt.f32.partialorder %v144_v58, 0.5  ;;  %v11103_v0 = vmov 0  ;;  %3665 = vperm.xlu1 %6035, %v3576_v30   ;;  %v11106_v58 = vmov 0 }
 0x14d   :  { %v525_v43 = vadd.f32 %v7068_v28, %v524_v38  ;;  %v5441_v44 = vpop.f32.mrb[35].mxu0  ;;  %v644_v34 = vmax.f32 %v602_v16, 0.0  ;;  %v605_v25 = vadd.f32 %v7068_v28, %v604_v24  ;;  %v5481_v32 = vpop.f32.mrb[35].mxu1  ;;  %v11104_v0 = vsel %vm7475_vm0, 4294967295, %v11103_v0  ;;  %v11197_v5 = vld [vmem:[#allocation31_spill] sm:$0xff] }
 0x14e   :  { %11105 = vst [vmem:[#allocation35_spill] sm:$0xff] %v11104_v0  ;;  %v624_v38 = vmax.f32 %v522_v59, 0.0  ;;  %v3577_v24 = vsel %vm7465_vm15, 1, %v11099_v14  ;;  %vm7488_vm14 = vcmp.gt.f32.partialorder %v145_v42, 0.5  ;;  %v3578_v22 = vsel %vm7475_vm0, 1, %v11099_v14  ;;  %v7506_v42 = vld [vmem:[%s10748_s1 + $0x80] sm:$0xff]  }
 0x14f   :  { %v625_v16 = vmax.f32 %v525_v43, 0.0  ;;  %v645_v44 = vmax.f32 %v605_v25, 0.0  ;;  %v11107_v58 = vsel %vm7488_vm14, 4294967295, %v11106_v58  ;;  %v147_v59 = vunpack.c.l.bf16 %v7483_v60  ;;  %3668 = vperm.xlu0 %6034, %v3577_v24  }
 0x150   :  { %11108 = vst [vmem:[#allocation36_spill] sm:$0xff] %v11107_v58  ;;  %vm7498_vm1 = vcmp.gt.f32.partialorder %v146_v39, 0.5  ;;  %v11109_v23 = vmov 0  ;;  %v148_v25 = vunpack.c.h.bf16 %v7483_v60  ;;  %vm11112_vm15 = vcmask 523264   ;;  %3671 = vperm.xlu1 %6035, %v3578_v22  }
 0x151   :  { %v654_v32 = vpack.c.bf16 %v625_v16, %v624_v38  ;;  %v7492_v51 = vpack.c.bf16 %v645_v44, %v644_v34  ;;  %v11110_v23 = vsel %vm7498_vm1, 4294967295, %v11109_v23  ;;  %v11113_v16 = vmov 0.0  }
 0x152   :  { %v529_v43 = vpop.f32.mrb[36].mxu0  ;;  %11111 = vst [vmem:[#allocation37_spill] sm:$0xff] %v11110_v23  ;;  %v3579_v39 = vsel %vm7488_vm14, 1, %v11099_v14  ;;  %vm7519_vm0 = vcmp.gt.f32.partialorder %v147_v59, 0.5  ;;  %v149_v24 = vunpack.c.l.bf16 %v7506_v42  ;;  %v150_v22 = vunpack.c.h.bf16 %v7506_v42  ;;  %5590 = vmatprep.mubr.msk.bf16.mxu0 %vm11072_vm13, %v11113_v16 }
 0x153   :  { %v530_v34 = vadd.f32 %v7068_v28, %v529_v43  ;;  %v5444_v30 = vpop.f32.mrb[37].mxu0  ;;  %5523 = vmatmul.mubr.msk.bf16.gmra.mrb[68].mxu1 %vm11112_vm15, %v654_v32  ;;  %v3580_v43 = vsel %vm7498_vm1, 1, %v11099_v14  ;;  %vm7524_vm15 = vcmp.gt.f32.partialorder %v148_v25, 0.5  ;;  %v11117_v32 = vmov 0  ;;  %3674 = vperm.xlu0 %6034, %v3579_v39  }
 0x154   :  { %v532_v38 = vpop.f32.mrb[38].mxu0  ;;  %5526 = vmatprep.mubr.msk.bf16.mxu1 %vm11072_vm13, %v11113_v16  ;;  %v11114_v30 = vmov 0  ;;  %v11118_v32 = vsel %vm7524_vm15, 4294967295, %v11117_v32  ;;  %3677 = vperm.xlu1 %6035, %v3580_v43   ;;  %v3581_v59 = vsel %vm7519_vm0, 1, %v11099_v14  ;;  %v3582_v25 = vsel %vm7524_vm15, 1, %v11099_v14 }
 0x155   :  { %v533_v44 = vadd.f32 %v7068_v28, %v532_v38  ;;  %v5445_v0 = vpop.f32.mrb[39].mxu0  ;;  %v11115_v30 = vsel %vm7519_vm0, 4294967295, %v11114_v30  ;;  %11119 = vst [vmem:[#allocation39_spill] sm:$0xff] %v11118_v32  ;;  %v626_v28 = vmax.f32 %v530_v34, 0.0  ;;  %vm7540_vm1 = vcmp.gt.f32.partialorder %v149_v24, 0.5  ;;  %5591 = vmatmul.mubr.bf16.gmra.mrb[48].mxu0 %v7138_v35 }
 0x156   :  { %11116 = vst [vmem:[#allocation38_spill] sm:$0xff] %v11115_v30  ;;  %v7532_v0 = vld [vmem:[%s10748_s1 + $0x88] sm:$0xff]   ;;  %v11120_v58 = vmov 0  ;;  %vm7545_vm14 = vcmp.gt.f32.partialorder %v150_v22, 0.5  ;;  %v11123_v34 = vmov 0  ;;  %vm11126_vm0 = vcmask 523264   ;;  %5594 = vmatprep.mubr.msk.bf16.mxu0 %vm11072_vm13, %v11113_v16 }
 0x157   :  { %v627_v38 = vmax.f32 %v533_v44, 0.0  ;;  %v11121_v58 = vsel %vm7540_vm1, 4294967295, %v11120_v58  ;;  %v151_v49 = vunpack.c.l.bf16 %v7532_v0  ;;  %v11124_v34 = vsel %vm7545_vm14, 4294967295, %v11123_v34  ;;  %v7553_v44 = vld [vmem:[%s10748_s1 + $0x90] sm:$0xff]   ;;  %3680 = vperm.xlu0 %6034, %v3581_v59   ;;  %v7678_v35 = vld [vmem:[%s10752_s5] ss:$0 sm:$0xff] }
 0x158   :  { %11122 = vst [vmem:[#allocation40_spill] sm:$0xff] %v11121_v58  ;;  %11125 = vst [vmem:[#allocation41_spill] sm:$0xff] %v11124_v34  ;;  %v152_v39 = vunpack.c.h.bf16 %v7532_v0  ;;  %3683 = vperm.xlu1 %6035, %v3582_v25   ;;  %v3583_v43 = vsel %vm7540_vm1, 1, %v11099_v14  ;;  %v3584_v24 = vsel %vm7545_vm14, 1, %v11099_v14  ;;  %v11127_v22 = vmov 0  ;;  %s6799_s5 = smov 91  }
 0x159   :  { %v655_v23 = vpack.c.bf16 %v627_v38, %v626_v28  ;;  %vm7564_vm15 = vcmp.gt.f32.partialorder %v151_v49, 0.5  ;;  %v153_v28 = vunpack.c.l.bf16 %v7553_v44  ;;  %v11133_v49 = vmov 0  ;;  %s6802_s1 = smov 83  }
 0x15a   :  { %v11128_v22 = vsel %vm7564_vm15, 4294967295, %v11127_v22  ;;  %v3585_v38 = vsel %vm7564_vm15, 1, %v11099_v14  ;;  %vm11136_vm1 = vcmask 523264   ;;  %v154_v25 = vunpack.c.h.bf16 %v7553_v44 }
 0x15b   :  { %5527 = vmatmul.mubr.msk.bf16.gmra.mrb[72].mxu1 %vm11126_vm0, %v655_v23  ;;  %11129 = vst [vmem:[#allocation42_spill] sm:$0xff] %v11128_v22  ;;  %vm7569_vm0 = vcmp.gt.f32.partialorder %v152_v39, 0.5  ;;  %v11130_v23 = vmov 0  ;;  %3686 = vperm.xlu0 %6034, %v3583_v43   ;;  %vm7579_vm14 = vcmp.gt.f32.partialorder %v153_v28, 0.5  ;;  %v11137_v43 = vmov 0 }
 0x15c   :  { %5530 = vmatprep.mubr.msk.bf16.mxu1 %vm11072_vm13, %v11113_v16  ;;  %v11131_v23 = vsel %vm7569_vm0, 4294967295, %v11130_v23  ;;  %3689 = vperm.xlu1 %6035, %v3584_v24   ;;  %v3586_v59 = vsel %vm7569_vm0, 1, %v11099_v14  ;;  %v11134_v49 = vsel %vm7579_vm14, 4294967295, %v11133_v49  ;;  %v3587_v39 = vsel %vm7579_vm14, 1, %v11099_v14  ;;  %vm11140_vm14 = vmmov %vm11136_vm1 }
 0x15d   :  { %11132 = vst [vmem:[#allocation43_spill] sm:$0xff] %v11131_v23  ;;  %11135 = vst [vmem:[#allocation44_spill] sm:$0xff] %v11134_v49  ;;  %vm7591_vm15 = vcmp.gt.f32.partialorder %v154_v25, 0.5  ;;  %5595 = vmatmul.mubr.bf16.gmra.mrb[52].mxu0 %v7163_v50 }
 0x15e   :  { %v11138_v43 = vsel %vm7591_vm15, 4294967295, %v11137_v43  ;;  %v3588_v24 = vsel %vm7591_vm15, 1, %v11099_v14  ;;  %vm11141_vm15 = vmmov %vm11136_vm1  ;;  %5598 = vmatprep.mubr.msk.bf16.mxu0 %vm11072_vm13, %v11113_v16 }
 0x15f   :  { %3692 = vperm.xlu0 %6034, %v3585_v38   ;;  %11139 = vst [vmem:[#allocation45_spill] sm:$0xff] %v11138_v43 }
 0x160   :  { %3695 = vperm.xlu1 %6035, %v3586_v59  }
 0x163   :  { %5531 = vmatmul.mubr.msk.bf16.gmra.mrb[76].mxu1 %vm11136_vm1, %v7077_v47  ;;  %3698 = vperm.xlu0 %6034, %v3587_v39   ;;  %v6082_v47 = vld [vmem:[#allocation2] sm:$0xff]  }
 0x164   :  { %5534 = vmatprep.mubr.msk.bf16.mxu1 %vm11072_vm13, %v11113_v16  ;;  %3701 = vperm.xlu1 %6035, %v3588_v24  }
 0x165   :  { %5599 = vmatmul.mubr.bf16.gmra.mrb[56].mxu0 %v7176_v57 }
 0x166   :  { %5602 = vmatprep.mubr.msk.bf16.mxu0 %vm11072_vm13, %v11113_v16  ;;  %5737 = vmatpush3.bf16.msra.mxu0 %v6082_v47 }
 0x167   :  { %5738 = vmatprep.subr.bf16.mxu0 %v11113_v16 }
 0x16b   :  { %5535 = vmatmul.mubr.msk.bf16.gmra.mrb[80].mxu1 %vm11136_vm1, %v7092_v3  ;;  %v6085_v3 = vld [vmem:[#allocation2 + $0x8] sm:$0xff]  }
 0x16c   :  { %5538 = vmatprep.mubr.msk.bf16.mxu1 %vm11072_vm13, %v11113_v16  ;;  %5739 = vmatpush3.bf16.msra.mxu0 %v6085_v3 }
 0x16d   :  { %5603 = vmatmul.mubr.bf16.gmra.mrb[60].mxu0 %v7186_v2  ;;  %5740 = vmatprep.subr.bf16.mxu0 %v11113_v16 }
 0x16e   :  { %5606 = vmatprep.mubr.msk.bf16.mxu0 %vm11072_vm13, %v11113_v16 }
 0x170   :  { %5741 = vmatpush3.bf16.msra.mxu0 %v6088_v7 }
 0x171   :  { %5742 = vmatprep.subr.bf16.mxu0 %v11113_v16 }
 0x173   :  { %5539 = vmatmul.mubr.msk.bf16.gmra.mrb[84].mxu1 %vm11140_vm14, %v7140_v37  ;;  %vm11142_vm14 = vmmov %vm11136_vm1 }
 0x174   :  { %5542 = vmatprep.mubr.msk.bf16.mxu1 %vm11072_vm13, %v11113_v16 }
 0x175   :  { %5607 = vmatmul.mubr.bf16.gmra.mrb[64].mxu0 %v7222_v21 }
 0x176   :  { %5610 = vmatprep.mubr.msk.bf16.mxu0 %vm11072_vm13, %v11113_v16 }
 0x17b   :  { %5543 = vmatmul.mubr.msk.bf16.gmra.mrb[88].mxu1 %vm11141_vm15, %v7210_v18  ;;  %vm11143_vm15 = vmmov %vm11136_vm1 }
 0x17c   :  { %5546 = vmatprep.mubr.msk.bf16.mxu1 %vm11072_vm13, %v11113_v16 }
 0x17d   :  { %5611 = vmatmul.mubr.bf16.gmra.mrb[68].mxu0 %v7255_v53 }
 0x17e   :  { %5614 = vmatprep.mubr.msk.bf16.mxu0 %vm11072_vm13, %v11113_v16 }
 0x183   :  { %5547 = vmatmul.mubr.msk.bf16.gmra.mrb[92].mxu1 %vm11142_vm14, %v7277_v9  ;;  %vm11144_vm14 = vmmov %vm11136_vm1 }
 0x184   :  { %5550 = vmatprep.mubr.msk.bf16.mxu1 %vm11072_vm13, %v11113_v16 }
 0x185   :  { %5615 = vmatmul.mubr.bf16.gmra.mrb[72].mxu0 %v7286_v12 }
 0x186   :  { %5618 = vmatprep.mubr.msk.bf16.mxu0 %vm11072_vm13, %v11113_v16 }
 0x18b   :  { %5551 = vmatmul.mubr.msk.bf16.gmra.mrb[96].mxu1 %vm11143_vm15, %v7331_v63  ;;  %vm11145_vm15 = vmmov %vm11136_vm1 }
 0x18c   :  { %5554 = vmatprep.mubr.msk.bf16.mxu1 %vm11072_vm13, %v11113_v16 }
 0x18d   :  { %5619 = vmatmul.mubr.bf16.gmra.mrb[76].mxu0 %v7318_v46  ;;  %v6091_v46 = vld [vmem:[#allocation2 + $0x18] sm:$0xff]  }
 0x18e   :  { %5622 = vmatprep.mubr.msk.bf16.mxu0 %vm11072_vm13, %v11113_v16  ;;  %5743 = vmatpush3.bf16.msra.mxu0 %v6091_v46 }
 0x18f   :  { %5744 = vmatprep.subr.bf16.mxu0 %v11113_v16 }
 0x193   :  { %5555 = vmatmul.mubr.msk.bf16.gmra.mrb[100].mxu1 %vm11136_vm1, %v7389_v17  ;;  %vm10882_vm1 = vcmask 130048  }
 0x194   :  { %5558 = vmatprep.mubr.msk.bf16.mxu1 %vm11072_vm13, %v11113_v16 }
 0x195   :  { %5623 = vmatmul.mubr.bf16.gmra.mrb[80].mxu0 %v7344_v11  ;;  %v7688_v11 = vpop.permute.xlu0 %3590 }
 0x196   :  { %5626 = vmatprep.mubr.msk.bf16.mxu0 %vm11072_vm13, %v11113_v16 }
 0x19b   :  { %5559 = vmatmul.mubr.msk.bf16.gmra.mrb[104].mxu1 %vm11144_vm14, %v7438_v56  ;;  %vm11183_vm14 = vnez %v11051_v55 }
 0x19c   :  { %5562 = vmatprep.mubr.msk.bf16.mxu1 %vm11072_vm13, %v11113_v16 }
 0x19d   :  { %5627 = vmatmul.mubr.bf16.gmra.mrb[84].mxu0 %v7373_v52 }
 0x19e   :  { %5630 = vmatprep.mubr.msk.bf16.mxu0 %vm11072_vm13, %v11113_v16 }
 0x1a3   :  { %5563 = vmatmul.mubr.msk.bf16.gmra.mrb[108].mxu1 %vm11145_vm15, %v7492_v51  ;;  %vm11184_vm15 = vnez %v11054_v61 }
 0x1a4   :  { %5660 = vmatprep.mubr.msk.bf16.mxu1 %vm11072_vm13, %v11113_v16 }
 0x1a5   :  { %5631 = vmatmul.mubr.bf16.gmra.mrb[88].mxu0 %v7404_v1  ;;  %v7692_v1 = vpop.permute.xlu1 %3596 }
 0x1a6   :  { %5634 = vmatprep.mubr.msk.bf16.mxu0 %vm11072_vm13, %v11113_v16  ;;  %11146 = vst [vmem:[#allocation46_spill] sm:$0xff] %v7692_v1 }
 0x1a9   :  { %v7701_v38 = vpop.permute.xlu1 %3599 }
 0x1aa   :  { %11148 = vst [vmem:[#allocation48_spill] sm:$0xff] %v7701_v38 }
 0x1ad   :  { %5635 = vmatmul.mubr.bf16.gmra.mrb[92].mxu0 %v7427_v19 }
 0x1ae   :  { %5638 = vmatprep.mubr.msk.bf16.mxu0 %vm11072_vm13, %v11113_v16 }
 0x1b5   :  { %5639 = vmatmul.mubr.bf16.gmra.mrb[96].mxu0 %v7450_v31 }
 0x1b6   :  { %5642 = vmatprep.mubr.msk.bf16.mxu0 %vm11072_vm13, %v11113_v16 }
 0x1bd   :  { %5643 = vmatmul.mubr.bf16.gmra.mrb[100].mxu0 %v7483_v60 }
 0x1be   :  { %5646 = vmatprep.mubr.msk.bf16.mxu0 %vm11072_vm13, %v11113_v16 }
 0x1c5   :  { %5647 = vmatmul.mubr.bf16.gmra.mrb[104].mxu0 %v7506_v42  ;;  %v7698_v42 = vpop.permute.xlu0 %3593 }
 0x1c6   :  { %5650 = vmatprep.mubr.msk.bf16.mxu0 %vm11072_vm13, %v11113_v16  ;;  %11147 = vst [vmem:[#allocation47_spill] sm:$0xff] %v7698_v42 }
 0x1cd   :  { %5651 = vmatmul.mubr.bf16.gmra.mrb[108].mxu0 %v7532_v0 }
 0x1ce   :  { %5654 = vmatprep.mubr.msk.bf16.mxu0 %vm11072_vm13, %v11113_v16 }
 0x1d5   :  { %5655 = vmatmul.mubr.bf16.gmra.mrb[112].mxu0 %v7553_v44 }
 0x1d6   :  { %5752 = vmatprep.mubr.msk.bf16.mxu0 %vm11072_vm13, %v11113_v16 }
 0x1e6   :  { %v795_v37 = vpop.f32.mrb[36].mxu1 }
 0x1e7   :  { %v796_v50 = vadd.f32 %v7678_v35, %v795_v37  ;;  %v5492_v57 = vpop.f32.mrb[37].mxu1 }
 0x1e8   :  { %v798_v2 = vpop.f32.mrb[38].mxu1 }
 0x1e9   :  { %v3019_v18 = vmul.f32 1.442695, %v796_v50  ;;  %v799_v21 = vadd.f32 %v7678_v35, %v798_v2  ;;  %v5493_v53 = vpop.f32.mrb[39].mxu1 }
 0x1ea   :  { %v6095_v53 = vld [vmem:[#allocation2 + $0x20] sm:$0xff]  }
 0x1eb   :  { %6134 = vpow2.f32 %v3019_v18  ;;  %v946_v9 = vpack.c.bf16 %v799_v21, %v796_v50  ;;  %v3021_v12 = vmul.f32 1.442695, %v799_v21  ;;  %v7712_v50 = vpop.permute.xlu0 %3602  ;;  %v7714_v18 = vpop.permute.xlu1 %3605  ;;  %5745 = vmatpush3.bf16.msra.mxu0 %v6095_v53 }
 0x1ec   :  { %11149 = vst [vmem:[#allocation49_spill] sm:$0xff] %v7712_v50  ;;  %11150 = vst [vmem:[#allocation50_spill] sm:$0xff] %v7714_v18  ;;  %5746 = vmatprep.subr.bf16.mxu0 %v11113_v16 }
 0x1ed   :  { %6136 = vpow2.f32 %v3021_v12  ;;  %5661 = vmatmul.mubr.msk.bf16.vlgmr.msra.gmra.mrb[112].mxu1 %vm10882_vm1, %v946_v9 }
 0x1ee   :  { %v803_v63 = vpop.f32.mrb[40].mxu1  ;;  %5664 = vmatprep.mubr.msk.bf16.mxu1 %vm11072_vm13, %v11113_v16 }
 0x1ef   :  { %v804_v52 = vadd.f32 %v7678_v35, %v803_v63  ;;  %v5496_v17 = vpop.f32.mrb[41].mxu1 }
 0x1f0   :  { %v806_v19 = vpop.f32.mrb[42].mxu1 }
 0x1f1   :  { %v3023_v56 = vmul.f32 1.442695, %v804_v52  ;;  %v807_v60 = vadd.f32 %v7678_v35, %v806_v19  ;;  %v5497_v31 = vpop.f32.mrb[43].mxu1 }
 0x1f3   :  { %6138 = vpow2.f32 %v3023_v56  ;;  %v947_v51 = vpack.c.bf16 %v807_v60, %v804_v52  ;;  %v3025_v14 = vmul.f32 1.442695, %v807_v60  ;;  %v7723_v52 = vpop.permute.xlu0 %3608  ;;  %v7726_v60 = vpop.permute.xlu1 %3611 }
 0x1f4   :  { %11151 = vst [vmem:[#allocation51_spill] sm:$0xff] %v7723_v52  ;;  %11152 = vst [vmem:[#allocation52_spill] sm:$0xff] %v7726_v60 }
 0x1f5   :  { %v6135_v28 = vpop.eup %6134  ;;  %6140 = vpow2.f32 %v3025_v14  ;;  %5665 = vmatmul.mubr.msk.bf16.gmra.mrb[116].mxu1 %vm10882_vm1, %v947_v51 }
 0x1f6   :  { %v811_v59 = vpop.f32.mrb[44].mxu1  ;;  %3817 = vrot.lane.b32.xlu0 %v6135_v28, %s6799_s5  ;;  %5668 = vmatprep.mubr.msk.bf16.mxu1 %vm11072_vm13, %v11113_v16 }
 0x1f7   :  { %v6137_v25 = vpop.eup %6136  ;;  %v812_v39 = vadd.f32 %v7678_v35, %v811_v59  ;;  %v5500_v24 = vpop.f32.mrb[45].mxu1 }
 0x1f8   :  { %v814_v47 = vpop.f32.mrb[46].mxu1  ;;  %3819 = vrot.lane.b32.xlu1 %v6137_v25, %s6799_s5  ;;  %v7735_v28 = vpop.permute.xlu0 %3614 }
 0x1f9   :  { %v3027_v3 = vmul.f32 1.442695, %v812_v39  ;;  %v815_v7 = vadd.f32 %v7678_v35, %v814_v47  ;;  %v5501_v37 = vpop.f32.mrb[47].mxu1  ;;  %11153 = vst [vmem:[#allocation53_spill] sm:$0xff] %v7735_v28  ;;  %v7738_v24 = vpop.permute.xlu1 %3617 }
 0x1fa   :  { %11154 = vst [vmem:[#allocation54_spill] sm:$0xff] %v7738_v24 }
 0x1fb   :  { %6142 = vpow2.f32 %v3027_v3  ;;  %v948_v57 = vpack.c.bf16 %v815_v7, %v812_v39  ;;  %v3029_v2 = vmul.f32 1.442695, %v815_v7 }
 0x1fd   :  { %v6139_v21 = vpop.eup %6138  ;;  %6144 = vpow2.f32 %v3029_v2  ;;  %5669 = vmatmul.mubr.msk.bf16.gmra.mrb[120].mxu1 %vm10882_vm1, %v948_v57  ;;  %v7745_v53 = vpop.permute.xlu1 %3623 }
 0x1fe   :  { %v819_v0 = vpop.f32.mrb[48].mxu1  ;;  %3821 = vrot.lane.b32.xlu0 %v6139_v21, %s6799_s5  ;;  %5672 = vmatprep.mubr.msk.bf16.mxu1 %vm11072_vm13, %v11113_v16  ;;  %v7742_v21 = vpop.permute.xlu0 %3620  ;;  %11156 = vst [vmem:[#allocation56_spill] sm:$0xff] %v7745_v53 }
 0x1ff   :  { %v6141_v9 = vpop.eup %6140  ;;  %v820_v12 = vadd.f32 %v7678_v35, %v819_v0  ;;  %v5504_v46 = vpop.f32.mrb[49].mxu1  ;;  %11155 = vst [vmem:[#allocation55_spill] sm:$0xff] %v7742_v21 }
 0x200   :  { %v822_v63 = vpop.f32.mrb[50].mxu1  ;;  %3823 = vrot.lane.b32.xlu1 %v6141_v9, %s6799_s5 }
 0x201   :  { %v3031_v17 = vmul.f32 1.442695, %v820_v12  ;;  %v823_v19 = vadd.f32 %v7678_v35, %v822_v63  ;;  %v5505_v56 = vpop.f32.mrb[51].mxu1 }
 0x203   :  { %6146 = vpow2.f32 %v3031_v17  ;;  %v949_v31 = vpack.c.bf16 %v823_v19, %v820_v12  ;;  %v3033_v44 = vmul.f32 1.442695, %v823_v19 }
 0x205   :  { %v6143_v51 = vpop.eup %6142  ;;  %6148 = vpow2.f32 %v3033_v44  ;;  %5673 = vmatmul.mubr.msk.bf16.gmra.mrb[124].mxu1 %vm10882_vm1, %v949_v31  ;;  %v7753_v44 = vpop.permute.xlu0 %3626 }
 0x206   :  { %v827_v14 = vpop.f32.mrb[52].mxu1  ;;  %3825 = vrot.lane.b32.xlu0 %v6143_v51, %s6799_s5  ;;  %5676 = vmatprep.mubr.msk.bf16.mxu1 %vm11072_vm13, %v11113_v16  ;;  %11157 = vst [vmem:[#allocation57_spill] sm:$0xff] %v7753_v44  ;;  %v6096_v51 = vld [vmem:[#allocation2 + $0x28] sm:$0xff]  }
 0x207   :  { %v6145_v59 = vpop.eup %6144  ;;  %v828_v25 = vadd.f32 %v7678_v35, %v827_v14  ;;  %v5508_v39 = vpop.f32.mrb[53].mxu1  ;;  %5747 = vmatpush3.bf16.msra.mxu0 %v6096_v51 }
 0x208   :  { %v830_v47 = vpop.f32.mrb[54].mxu1  ;;  %3827 = vrot.lane.b32.xlu1 %v6145_v59, %s6799_s5  ;;  %5748 = vmatprep.subr.bf16.mxu0 %v11113_v16 }
 0x209   :  { %v3035_v3 = vmul.f32 1.442695, %v828_v25  ;;  %v831_v7 = vadd.f32 %v7678_v35, %v830_v47  ;;  %v5509_v37 = vpop.f32.mrb[55].mxu1 }
 0x20b   :  { %6150 = vpow2.f32 %v3035_v3  ;;  %v950_v57 = vpack.c.bf16 %v831_v7, %v828_v25  ;;  %v3037_v2 = vmul.f32 1.442695, %v831_v7  ;;  %v7755_v25 = vpop.permute.xlu1 %3629 }
 0x20c   :  { %11158 = vst [vmem:[#allocation58_spill] sm:$0xff] %v7755_v25 }
 0x20d   :  { %v6147_v0 = vpop.eup %6146  ;;  %6152 = vpow2.f32 %v3037_v2  ;;  %5677 = vmatmul.mubr.msk.bf16.gmra.mrb[128].mxu1 %vm10882_vm1, %v950_v57  ;;  %v7764_v2 = vpop.permute.xlu0 %3632 }
 0x20e   :  { %v835_v9 = vpop.f32.mrb[56].mxu1  ;;  %3829 = vrot.lane.b32.xlu0 %v6147_v0, %s6799_s5  ;;  %5680 = vmatprep.mubr.msk.bf16.mxu1 %vm11072_vm13, %v11113_v16  ;;  %11159 = vst [vmem:[#allocation59_spill] sm:$0xff] %v7764_v2 }
 0x20f   :  { %v6149_v12 = vpop.eup %6148  ;;  %v836_v46 = vadd.f32 %v7678_v35, %v835_v9  ;;  %v5512_v63 = vpop.f32.mrb[57].mxu1 }
 0x210   :  { %v838_v17 = vpop.f32.mrb[58].mxu1  ;;  %3831 = vrot.lane.b32.xlu1 %v6149_v12, %s6799_s5 }
 0x211   :  { %v3039_v19 = vmul.f32 1.442695, %v836_v46  ;;  %v839_v56 = vadd.f32 %v7678_v35, %v838_v17  ;;  %v5513_v31 = vpop.f32.mrb[59].mxu1 }
 0x212   :  { %v7773_v31 = vpop.permute.xlu0 %3638 }
 0x213   :  { %6154 = vpow2.f32 %v3039_v19  ;;  %v951_v14 = vpack.c.bf16 %v839_v56, %v836_v46  ;;  %v3041_v59 = vmul.f32 1.442695, %v839_v56  ;;  %v7767_v46 = vpop.permute.xlu1 %3635  ;;  %11161 = vst [vmem:[#allocation61_spill] sm:$0xff] %v7773_v31 }
 0x214   :  { %11160 = vst [vmem:[#allocation60_spill] sm:$0xff] %v7767_v46 }
 0x215   :  { %v6151_v39 = vpop.eup %6150  ;;  %6156 = vpow2.f32 %v3041_v59  ;;  %5681 = vmatmul.mubr.msk.bf16.gmra.mrb[132].mxu1 %vm10882_vm1, %v951_v14 }
 0x216   :  { %v843_v47 = vpop.f32.mrb[60].mxu1  ;;  %3833 = vrot.lane.b32.xlu0 %v6151_v39, %s6799_s5  ;;  %5684 = vmatprep.mubr.msk.bf16.mxu1 %vm11072_vm13, %v11113_v16 }
 0x217   :  { %v6153_v3 = vpop.eup %6152  ;;  %v844_v7 = vadd.f32 %v7678_v35, %v843_v47  ;;  %v5516_v37 = vpop.f32.mrb[61].mxu1 }
 0x218   :  { %v846_v57 = vpop.f32.mrb[62].mxu1  ;;  %3835 = vrot.lane.b32.xlu1 %v6153_v3, %s6799_s5  ;;  %v7776_v39 = vpop.permute.xlu1 %3641 }
 0x219   :  { %v3043_v0 = vmul.f32 1.442695, %v844_v7  ;;  %v847_v9 = vadd.f32 %v7678_v35, %v846_v57  ;;  %v5517_v12 = vpop.f32.mrb[63].mxu1  ;;  %11162 = vst [vmem:[#allocation62_spill] sm:$0xff] %v7776_v39 }
 0x21a   :  { %v6097_v12 = vld [vmem:[#allocation2 + $0x30] sm:$0xff]  }
 0x21b   :  { %6158 = vpow2.f32 %v3043_v0  ;;  %v952_v63 = vpack.c.bf16 %v847_v9, %v844_v7  ;;  %v3045_v17 = vmul.f32 1.442695, %v847_v9  ;;  %v7780_v9 = vpop.permute.xlu0 %3644  ;;  %5749 = vmatpush3.bf16.msra.mxu0 %v6097_v12 }
 0x21c   :  { %11163 = vst [vmem:[#allocation63_spill] sm:$0xff] %v7780_v9  ;;  %5750 = vmatprep.subr.bf16.mxu0 %v11113_v16 }
 0x21d   :  { %v6155_v19 = vpop.eup %6154  ;;  %6160 = vpow2.f32 %v3045_v17  ;;  %5685 = vmatmul.mubr.msk.bf16.gmra.mrb[136].mxu1 %vm10882_vm1, %v952_v63  ;;  %v7783_v17 = vpop.permute.xlu1 %3647 }
 0x21e   :  { %v851_v56 = vpop.f32.mrb[64].mxu1  ;;  %3837 = vrot.lane.b32.xlu0 %v6155_v19, %s6799_s5  ;;  %5688 = vmatprep.mubr.msk.bf16.mxu1 %vm11072_vm13, %v11113_v16  ;;  %11164 = vst [vmem:[#allocation64_spill] sm:$0xff] %v7783_v17 }
 0x21f   :  { %v6157_v51 = vpop.eup %6156  ;;  %v852_v14 = vadd.f32 %v7678_v35, %v851_v56  ;;  %v5520_v59 = vpop.f32.mrb[65].mxu1 }
 0x220   :  { %v854_v47 = vpop.f32.mrb[66].mxu1  ;;  %3839 = vrot.lane.b32.xlu1 %v6157_v51, %s6799_s5 }
 0x221   :  { %v3047_v3 = vmul.f32 1.442695, %v852_v14  ;;  %v855_v7 = vadd.f32 %v7678_v35, %v854_v47  ;;  %v5521_v37 = vpop.f32.mrb[67].mxu1 }
 0x222   :  { %v7792_v37 = vpop.permute.xlu0 %3650 }
 0x223   :  { %6162 = vpow2.f32 %v3047_v3  ;;  %v953_v57 = vpack.c.bf16 %v855_v7, %v852_v14  ;;  %v3049_v0 = vmul.f32 1.442695, %v855_v7  ;;  %11165 = vst [vmem:[#allocation65_spill] sm:$0xff] %v7792_v37 }
 0x225   :  { %v6159_v63 = vpop.eup %6158  ;;  %6164 = vpow2.f32 %v3049_v0  ;;  %5689 = vmatmul.mubr.msk.bf16.gmra.mrb[140].mxu1 %vm10882_vm1, %v953_v57 }
 0x226   :  { %v859_v19 = vpop.f32.mrb[68].mxu1  ;;  %3841 = vrot.lane.b32.xlu0 %v6159_v63, %s6799_s5  ;;  %5692 = vmatprep.mubr.msk.bf16.mxu1 %vm11072_vm13, %v11113_v16  ;;  %v7794_v63 = vpop.permute.xlu1 %3653 }
 0x227   :  { %v6161_v56 = vpop.eup %6160  ;;  %v860_v51 = vadd.f32 %v7678_v35, %v859_v19  ;;  %v5524_v14 = vpop.f32.mrb[69].mxu1  ;;  %11166 = vst [vmem:[#allocation66_spill] sm:$0xff] %v7794_v63  ;;  %v6098_v63 = vld [vmem:[#allocation2 + $0x38] sm:$0xff]  }
 0x228   :  { %v862_v59 = vpop.f32.mrb[70].mxu1  ;;  %3843 = vrot.lane.b32.xlu1 %v6161_v56, %s6799_s5  ;;  %5751 = vmatpush3.bf16.msra.mxu0 %v6098_v63 }
 0x229   :  { %v3051_v47 = vmul.f32 1.442695, %v860_v51  ;;  %v863_v3 = vadd.f32 %v7678_v35, %v862_v59  ;;  %v5525_v7 = vpop.f32.mrb[71].mxu1  ;;  %5920 = vmatprep.subr.bf16.mxu0 %v11113_v16 }
 0x22b   :  { %6166 = vpow2.f32 %v3051_v47  ;;  %v954_v57 = vpack.c.bf16 %v863_v3, %v860_v51  ;;  %v3053_v0 = vmul.f32 1.442695, %v863_v3  ;;  %v7802_v51 = vpop.permute.xlu0 %3656 }
 0x22c   :  { %11167 = vst [vmem:[#allocation67_spill] sm:$0xff] %v7802_v51  ;;  %v7821_v51 = vpop.f32.mrb[40].mxu0 }
 0x22d   :  { %v6163_v17 = vpop.eup %6162  ;;  %6168 = vpow2.f32 %v3053_v0  ;;  %5693 = vmatmul.mubr.msk.bf16.gmra.mrb[144].mxu1 %vm10882_vm1, %v954_v57  ;;  %v7805_v57 = vpop.permute.xlu1 %3659 }
 0x22e   :  { %v867_v12 = vpop.f32.mrb[72].mxu1  ;;  %3845 = vrot.lane.b32.xlu0 %v6163_v17, %s6799_s5  ;;  %5696 = vmatprep.mubr.msk.bf16.mxu1 %vm11072_vm13, %v11113_v16  ;;  %11168 = vst [vmem:[#allocation68_spill] sm:$0xff] %v7805_v57 }
 0x22f   :  { %v6165_v19 = vpop.eup %6164  ;;  %v868_v56 = vadd.f32 %v7678_v35, %v867_v12  ;;  %v5528_v14 = vpop.f32.mrb[73].mxu1 }
 0x230   :  { %v870_v59 = vpop.f32.mrb[74].mxu1  ;;  %3847 = vrot.lane.b32.xlu1 %v6165_v19, %s6799_s5  ;;  %v7811_v19 = vpop.permute.xlu0 %3662 }
 0x231   :  { %v3055_v47 = vmul.f32 1.442695, %v868_v56  ;;  %v871_v3 = vadd.f32 %v7678_v35, %v870_v59  ;;  %v5529_v7 = vpop.f32.mrb[75].mxu1  ;;  %11169 = vst [vmem:[#allocation69_spill] sm:$0xff] %v7811_v19 }
 0x233   :  { %6170 = vpow2.f32 %v3055_v47  ;;  %v955_v17 = vpack.c.bf16 %v871_v3, %v868_v56  ;;  %v3057_v0 = vmul.f32 1.442695, %v871_v3  ;;  %v7814_v47 = vpop.permute.xlu1 %3665 }
 0x234   :  { %11170 = vst [vmem:[#allocation70_spill] sm:$0xff] %v7814_v47  ;;  %v7819_v19 = vpop.permute.xlu0 %3668 }
 0x235   :  { %v6167_v37 = vpop.eup %6166  ;;  %6172 = vpow2.f32 %v3057_v0  ;;  %5697 = vmatmul.mubr.msk.bf16.gmra.mrb[148].mxu1 %vm10882_vm1, %v955_v17  ;;  %11171 = vst [vmem:[#allocation71_spill] sm:$0xff] %v7819_v19 }
 0x236   :  { %v875_v12 = vpop.f32.mrb[76].mxu1  ;;  %3849 = vrot.lane.b32.xlu0 %v6167_v37, %s6799_s5  ;;  %5700 = vmatprep.mubr.msk.bf16.mxu1 %vm11072_vm13, %v11113_v16 }
 0x237   :  { %v6169_v14 = vpop.eup %6168  ;;  %v876_v59 = vadd.f32 %v7678_v35, %v875_v12  ;;  %v5532_v7 = vpop.f32.mrb[77].mxu1 }
 0x238   :  { %v878_v56 = vpop.f32.mrb[78].mxu1  ;;  %3851 = vrot.lane.b32.xlu1 %v6169_v14, %s6799_s5  ;;  %v7824_v63 = vpop.permute.xlu1 %3671 }
 0x239   :  { %v3059_v3 = vmul.f32 1.442695, %v876_v59  ;;  %v879_v37 = vadd.f32 %v7678_v35, %v878_v56  ;;  %v5533_v17 = vpop.f32.mrb[79].mxu1  ;;  %11172 = vst [vmem:[#allocation72_spill] sm:$0xff] %v7824_v63  ;;  %v5584_v14 = vpop.f32.mrb[41].mxu0 }
 0x23a   :  { %v7829_v56 = vpop.f32.mrb[42].mxu0  ;;  %v7834_v47 = vpop.permute.xlu0 %3674 }
 0x23b   :  { %6174 = vpow2.f32 %v3059_v3  ;;  %v956_v0 = vpack.c.bf16 %v879_v37, %v876_v59  ;;  %v3061_v57 = vmul.f32 1.442695, %v879_v37  ;;  %v5585_v17 = vpop.f32.mrb[43].mxu0  ;;  %11173 = vst [vmem:[#allocation73_spill] sm:$0xff] %v7834_v47 }
 0x23c   :  { %v7837_v39 = vpop.permute.xlu1 %3677 }
 0x23d   :  { %v6171_v12 = vpop.eup %6170  ;;  %6176 = vpow2.f32 %v3061_v57  ;;  %5701 = vmatmul.mubr.msk.bf16.gmra.mrb[152].mxu1 %vm10882_vm1, %v956_v0  ;;  %11174 = vst [vmem:[#allocation74_spill] sm:$0xff] %v7837_v39 }
 0x23e   :  { %v883_v7 = vpop.f32.mrb[80].mxu1  ;;  %3853 = vrot.lane.b32.xlu0 %v6171_v12, %s6799_s5  ;;  %5704 = vmatprep.mubr.msk.bf16.mxu1 %vm11072_vm13, %v11113_v16  ;;  %v7849_v31 = vpop.permute.xlu0 %3680 }
 0x23f   :  { %v6173_v59 = vpop.eup %6172  ;;  %v884_v3 = vadd.f32 %v7678_v35, %v883_v7  ;;  %v5536_v37 = vpop.f32.mrb[81].mxu1  ;;  %11175 = vst [vmem:[#allocation75_spill] sm:$0xff] %v7849_v31 }
 0x240   :  { %v886_v19 = vpop.f32.mrb[82].mxu1  ;;  %3855 = vrot.lane.b32.xlu1 %v6173_v59, %s6799_s5  ;;  %v7839_v7 = vpop.f32.mrb[44].mxu0 }
 0x241   :  { %v3063_v57 = vmul.f32 1.442695, %v884_v3  ;;  %v887_v0 = vadd.f32 %v7678_v35, %v886_v19  ;;  %v5537_v14 = vpop.f32.mrb[83].mxu1  ;;  %v5588_v19 = vpop.f32.mrb[45].mxu0 }
 0x242   :  { %v7864_v2 = vpop.permute.xlu0 %3686 }
 0x243   :  { %6178 = vpow2.f32 %v3063_v57  ;;  %v957_v63 = vpack.c.bf16 %v887_v0, %v884_v3  ;;  %v3065_v12 = vmul.f32 1.442695, %v887_v0  ;;  %v7845_v57 = vpop.f32.mrb[46].mxu0  ;;  %11177 = vst [vmem:[#allocation77_spill] sm:$0xff] %v7864_v2 }
 0x245   :  { %v6175_v9 = vpop.eup %6174  ;;  %6180 = vpow2.f32 %v3065_v12  ;;  %5705 = vmatmul.mubr.msk.bf16.gmra.mrb[156].mxu1 %vm10882_vm1, %v957_v63  ;;  %v5589_v63 = vpop.f32.mrb[47].mxu0 }
 0x246   :  { %v891_v37 = vpop.f32.mrb[84].mxu1  ;;  %3857 = vrot.lane.b32.xlu0 %v6175_v9, %s6799_s5  ;;  %5708 = vmatprep.mubr.msk.bf16.mxu1 %vm11072_vm13, %v11113_v16  ;;  %v7879_v44 = vpop.permute.xlu0 %3692 }
 0x247   :  { %v6177_v59 = vpop.eup %6176  ;;  %v892_v3 = vadd.f32 %v7678_v35, %v891_v37  ;;  %v5540_v17 = vpop.f32.mrb[85].mxu1  ;;  %11179 = vst [vmem:[#allocation79_spill] sm:$0xff] %v7879_v44 }
 0x248   :  { %v894_v0 = vpop.f32.mrb[86].mxu1  ;;  %3859 = vrot.lane.b32.xlu1 %v6177_v59, %s6799_s5  ;;  %v7852_v37 = vpop.permute.xlu1 %3683 }
 0x249   :  { %v3067_v14 = vmul.f32 1.442695, %v892_v3  ;;  %v895_v12 = vadd.f32 %v7678_v35, %v894_v0  ;;  %v5541_v39 = vpop.f32.mrb[87].mxu1  ;;  %11176 = vst [vmem:[#allocation76_spill] sm:$0xff] %v7852_v37  ;;  %v7854_v17 = vpop.f32.mrb[48].mxu0 }
 0x24a   :  { %v5592_v39 = vpop.f32.mrb[49].mxu0  ;;  %v7894_v44 = vpop.permute.xlu0 %3698 }
 0x24b   :  { %6182 = vpow2.f32 %v3067_v14  ;;  %v958_v9 = vpack.c.bf16 %v895_v12, %v892_v3  ;;  %v3069_v47 = vmul.f32 1.442695, %v895_v12  ;;  %v7860_v63 = vpop.f32.mrb[50].mxu0  ;;  %11181 = vst [vmem:[#allocation81_spill] sm:$0xff] %v7894_v44 }
 0x24c   :  { %v5593_v14 = vpop.f32.mrb[51].mxu0 }
 0x24d   :  { %v6179_v19 = vpop.eup %6178  ;;  %6184 = vpow2.f32 %v3069_v47  ;;  %5709 = vmatmul.mubr.msk.bf16.gmra.mrb[160].mxu1 %vm10882_vm1, %v958_v9 }
 0x24e   :  { %v899_v46 = vpop.f32.mrb[88].mxu1  ;;  %3861 = vrot.lane.b32.xlu0 %v6179_v19, %s6799_s5  ;;  %5712 = vmatprep.mubr.msk.bf16.mxu1 %vm11072_vm13, %v11113_v16 }
 0x24f   :  { %v6181_v59 = vpop.eup %6180  ;;  %v900_v3 = vadd.f32 %v7678_v35, %v899_v46  ;;  %v5544_v0 = vpop.f32.mrb[89].mxu1 }
 0x250   :  { %v902_v47 = vpop.f32.mrb[90].mxu1  ;;  %3863 = vrot.lane.b32.xlu1 %v6181_v59, %s6799_s5  ;;  %v7867_v46 = vpop.permute.xlu1 %3689 }
 0x251   :  { %v3071_v12 = vmul.f32 1.442695, %v900_v3  ;;  %v903_v9 = vadd.f32 %v7678_v35, %v902_v47  ;;  %v5545_v37 = vpop.f32.mrb[91].mxu1  ;;  %11178 = vst [vmem:[#allocation78_spill] sm:$0xff] %v7867_v46  ;;  %v7869_v0 = vpop.f32.mrb[52].mxu0 }
 0x252   :  { %v5596_v37 = vpop.f32.mrb[53].mxu0 }
 0x253   :  { %6186 = vpow2.f32 %v3071_v12  ;;  %v959_v19 = vpack.c.bf16 %v903_v9, %v900_v3  ;;  %v3073_v31 = vmul.f32 1.442695, %v903_v9  ;;  %v7875_v14 = vpop.f32.mrb[54].mxu0 }
 0x254   :  { %v5597_v12 = vpop.f32.mrb[55].mxu0 }
 0x255   :  { %v6183_v39 = vpop.eup %6182  ;;  %6188 = vpow2.f32 %v3073_v31  ;;  %5713 = vmatmul.mubr.msk.bf16.gmra.mrb[164].mxu1 %vm10882_vm1, %v959_v19 }
 0x256   :  { %v907_v25 = vpop.f32.mrb[92].mxu1  ;;  %3865 = vrot.lane.b32.xlu0 %v6183_v39, %s6799_s5  ;;  %5716 = vmatprep.mubr.msk.bf16.mxu1 %vm11072_vm13, %v11113_v16 }
 0x257   :  { %v6185_v59 = vpop.eup %6184  ;;  %v908_v3 = vadd.f32 %v7678_v35, %v907_v25  ;;  %v5548_v47 = vpop.f32.mrb[93].mxu1 }
 0x258   :  { %v910_v31 = vpop.f32.mrb[94].mxu1  ;;  %3867 = vrot.lane.b32.xlu1 %v6185_v59, %s6799_s5  ;;  %v7882_v25 = vpop.permute.xlu1 %3695 }
 0x259   :  { %v3075_v9 = vmul.f32 1.442695, %v908_v3  ;;  %v911_v19 = vadd.f32 %v7678_v35, %v910_v31  ;;  %v5549_v46 = vpop.f32.mrb[95].mxu1  ;;  %11180 = vst [vmem:[#allocation80_spill] sm:$0xff] %v7882_v25  ;;  %v7884_v47 = vpop.f32.mrb[56].mxu0 }
 0x25a   :  { %v5600_v46 = vpop.f32.mrb[57].mxu0 }
 0x25b   :  { %6190 = vpow2.f32 %v3075_v9  ;;  %v960_v39 = vpack.c.bf16 %v911_v19, %v908_v3  ;;  %v3077_v2 = vmul.f32 1.442695, %v911_v19  ;;  %v7890_v12 = vpop.f32.mrb[58].mxu0 }
 0x25c   :  { %v5601_v9 = vpop.f32.mrb[59].mxu0  ;;  %v7896_v46 = vpop.permute.xlu1 %3701 }
 0x25d   :  { %v6187_v37 = vpop.eup %6186  ;;  %6192 = vpow2.f32 %v3077_v2  ;;  %5717 = vmatmul.mubr.msk.bf16.gmra.mrb[168].mxu1 %vm10882_vm1, %v960_v39  ;;  %11182 = vst [vmem:[#allocation82_spill] sm:$0xff] %v7896_v46 }
 0x25e   :  { %v915_v53 = vpop.f32.mrb[96].mxu1  ;;  %3869 = vrot.lane.b32.xlu0 %v6187_v37, %s6799_s5  ;;  %5720 = vmatprep.mubr.msk.bf16.mxu1 %vm11072_vm13, %v11113_v16 }
 0x25f   :  { %v6189_v59 = vpop.eup %6188  ;;  %v916_v3 = vadd.f32 %v7678_v35, %v915_v53  ;;  %v5552_v31 = vpop.f32.mrb[97].mxu1 }
 0x260   :  { %v918_v2 = vpop.f32.mrb[98].mxu1  ;;  %3871 = vrot.lane.b32.xlu1 %v6189_v59, %s6799_s5  ;;  %v7899_v53 = vpop.f32.mrb[60].mxu0 }
 0x261   :  { %v3079_v19 = vmul.f32 1.442695, %v916_v3  ;;  %v919_v39 = vadd.f32 %v7678_v35, %v918_v2  ;;  %v5553_v25 = vpop.f32.mrb[99].mxu1 }
 0x262   :  { %v5604_v25 = vpop.f32.mrb[61].mxu0 }
 0x263   :  { %6194 = vpow2.f32 %v3079_v19  ;;  %v961_v37 = vpack.c.bf16 %v919_v39, %v916_v3  ;;  %v3081_v21 = vmul.f32 1.442695, %v919_v39  ;;  %v7905_v9 = vpop.f32.mrb[62].mxu0 }
 0x264   :  { %v5605_v44 = vpop.f32.mrb[63].mxu0 }
 0x265   :  { %v6191_v24 = vpop.eup %6190  ;;  %6196 = vpow2.f32 %v3081_v21  ;;  %5721 = vmatmul.mubr.msk.bf16.gmra.mrb[172].mxu1 %vm10882_vm1, %v961_v37 }
 0x266   :  { %v923_v31 = vpop.f32.mrb[100].mxu1  ;;  %3873 = vrot.lane.b32.xlu0 %v6191_v24, %s6799_s5  ;;  %5724 = vmatprep.mubr.msk.bf16.mxu1 %vm11072_vm13, %v11113_v16 }
 0x267   :  { %v6193_v59 = vpop.eup %6192  ;;  %v924_v2 = vadd.f32 %v7678_v35, %v923_v31  ;;  %v5556_v3 = vpop.f32.mrb[101].mxu1 }
 0x268   :  { %v926_v19 = vpop.f32.mrb[102].mxu1  ;;  %3875 = vrot.lane.b32.xlu1 %v6193_v59, %s6799_s5  ;;  %v3818_v21 = vpop.permute.xlu0 %3817 }
 0x269   :  { %v3083_v39 = vmul.f32 1.442695, %v924_v2  ;;  %v927_v37 = vadd.f32 %v7678_v35, %v926_v19  ;;  %v3931_v24 = vsel %vm7106_vm2, %v3818_v21, 0.0  ;;  %v5557_v46 = vpop.f32.mrb[103].mxu1  ;;  %v7916_v19 = vpop.f32.mrb[64].mxu0 }
 0x26a   :  { %v3820_v28 = vpop.permute.xlu1 %3819  ;;  %4425 = vrot.lane.b32.xlu0 %v3931_v24, %s6800_s22  ;;  %v5608_v44 = vpop.f32.mrb[65].mxu0 }
 0x26b   :  { %6198 = vpow2.f32 %v3083_v39  ;;  %v962_v31 = vpack.c.bf16 %v927_v37, %v924_v2  ;;  %v3085_v25 = vmul.f32 1.442695, %v927_v37  ;;  %v3932_v3 = vsel %vm7123_vm4, %v3820_v28, 0.0  ;;  %v7922_v28 = vpop.f32.mrb[66].mxu0 }
 0x26c   :  { %4427 = vrot.lane.b32.xlu1 %v3932_v3, %s6800_s22  ;;  %v5609_v27 = vpop.f32.mrb[67].mxu0 }
 0x26d   :  { %v6195_v59 = vpop.eup %6194  ;;  %6200 = vpow2.f32 %v3085_v25  ;;  %5725 = vmatmul.mubr.msk.bf16.gmra.mrb[176].mxu1 %vm10882_vm1, %v962_v31 }
 0x26e   :  { %v931_v46 = vpop.f32.mrb[104].mxu1  ;;  %3877 = vrot.lane.b32.xlu0 %v6195_v59, %s6799_s5  ;;  %5728 = vmatprep.mubr.msk.bf16.mxu1 %vm11072_vm13, %v11113_v16 }
 0x26f   :  { %v6197_v2 = vpop.eup %6196  ;;  %v932_v21 = vadd.f32 %v7678_v35, %v931_v46  ;;  %v5560_v39 = vpop.f32.mrb[105].mxu1 }
 0x270   :  { %v934_v37 = vpop.f32.mrb[106].mxu1  ;;  %3879 = vrot.lane.b32.xlu1 %v6197_v2, %s6799_s5  ;;  %v3822_v24 = vpop.permute.xlu0 %3821 }
 0x271   :  { %v3087_v31 = vmul.f32 1.442695, %v932_v21  ;;  %v935_v25 = vadd.f32 %v7678_v35, %v934_v37  ;;  %v3933_v3 = vsel %vm7119_vm3, %v3822_v24, 0.0  ;;  %v5561_v59 = vpop.f32.mrb[107].mxu1  ;;  %v7933_v37 = vpop.f32.mrb[68].mxu0 }
 0x272   :  { %v3824_v13 = vpop.permute.xlu1 %3823  ;;  %4429 = vrot.lane.b32.xlu0 %v3933_v3, %s6800_s22  ;;  %v5612_v27 = vpop.f32.mrb[69].mxu0 }
 0x273   :  { %6202 = vpow2.f32 %v3087_v31  ;;  %v963_v46 = vpack.c.bf16 %v935_v25, %v932_v21  ;;  %v3089_v44 = vmul.f32 1.442695, %v935_v25  ;;  %v3934_v39 = vsel %vm7143_vm5, %v3824_v13, 0.0  ;;  %v7939_v13 = vpop.f32.mrb[70].mxu0 }
 0x274   :  { %4431 = vrot.lane.b32.xlu1 %v3934_v39, %s6800_s22  ;;  %v5613_v41 = vpop.f32.mrb[71].mxu0 }
 0x275   :  { %v6199_v2 = vpop.eup %6198  ;;  %6204 = vpow2.f32 %v3089_v44  ;;  %5729 = vmatmul.mubr.msk.bf16.gmra.mrb[180].mxu1 %vm10882_vm1, %v963_v46 }
 0x276   :  { %v939_v24 = vpop.f32.mrb[108].mxu1  ;;  %3881 = vrot.lane.b32.xlu0 %v6199_v2, %s6799_s5  ;;  %5732 = vmatprep.mubr.msk.bf16.mxu1 %vm11072_vm13, %v11113_v16 }
 0x277   :  { %v6201_v21 = vpop.eup %6200  ;;  %v940_v31 = vadd.f32 %v7678_v35, %v939_v24  ;;  %v5564_v25 = vpop.f32.mrb[109].mxu1 }
 0x278   :  { %v942_v3 = vpop.f32.mrb[110].mxu1  ;;  %3883 = vrot.lane.b32.xlu1 %v6201_v21, %s6799_s5  ;;  %v3826_v59 = vpop.permute.xlu0 %3825 }
 0x279   :  { %v3091_v46 = vmul.f32 1.442695, %v940_v31  ;;  %v943_v44 = vadd.f32 %v7678_v35, %v942_v3  ;;  %v3935_v39 = vsel %vm7153_vm6, %v3826_v59, 0.0  ;;  %v5565_v2 = vpop.f32.mrb[111].mxu1  ;;  %v7950_v35 = vpop.f32.mrb[72].mxu0 }
 0x27a   :  { %v3828_v26 = vpop.permute.xlu1 %3827  ;;  %4433 = vrot.lane.b32.xlu0 %v3935_v39, %s6800_s22  ;;  %v5616_v41 = vpop.f32.mrb[73].mxu0 }
 0x27b   :  { %6206 = vpow2.f32 %v3091_v46  ;;  %v964_v24 = vpack.c.bf16 %v943_v44, %v940_v31  ;;  %v3093_v27 = vmul.f32 1.442695, %v943_v44  ;;  %v3936_v25 = vsel %vm7188_vm7, %v3828_v26, 0.0  ;;  %v7955_v31 = vpop.f32.mrb[74].mxu0 }
 0x27c   :  { %4435 = vrot.lane.b32.xlu1 %v3936_v25, %s6800_s22  ;;  %v5617_v59 = vpop.f32.mrb[75].mxu0 }
 0x27d   :  { %v6203_v21 = vpop.eup %6202  ;;  %6208 = vpow2.f32 %v3093_v27  ;;  %5733 = vmatmul.mubr.msk.bf16.gmra.mrb[184].mxu1 %vm10882_vm1, %v964_v24  ;;  %v7964_v24 = vpop.f32.mrb[76].mxu0  ;;  %vm11185_vm1 = vnez %v11057_v62 }
 0x27e   :  { %3885 = vrot.lane.b32.xlu0 %v6203_v21, %s6799_s5  ;;  %5844 = vmatprep.mubr.msk.bf16.mxu1 %vm11072_vm13, %v11113_v16  ;;  %v5620_v27 = vpop.f32.mrb[77].mxu0 }
 0x27f   :  { %v6205_v3 = vpop.eup %6204  ;;  %v7967_v21 = vpop.f32.mrb[78].mxu0  ;;  %v6099_v27 = vld [vmem:[#allocation4] sm:$0xff]  }
 0x280   :  { %3887 = vrot.lane.b32.xlu1 %v6205_v3, %s6799_s5  ;;  %v3830_v26 = vpop.permute.xlu0 %3829  ;;  %v5621_v3 = vpop.f32.mrb[79].mxu0  ;;  %5829 = vmatpush3.bf16.msra.mxu1 %v6099_v27 }
 0x281   :  { %v3937_v46 = vsel %vm7192_vm8, %v3830_v26, 0.0  ;;  %5830 = vmatprep.subr.bf16.mxu1 %v11113_v16 }
 0x282   :  { %v3832_v44 = vpop.permute.xlu1 %3831  ;;  %4437 = vrot.lane.b32.xlu0 %v3937_v46, %s6800_s22 }
 0x283   :  { %v3938_v39 = vsel %vm7196_vm9, %v3832_v44, 0.0  ;;  %v7976_v44 = vpop.f32.mrb[80].mxu0 }
 0x284   :  { %4439 = vrot.lane.b32.xlu1 %v3938_v39, %s6800_s22  ;;  %v5624_v39 = vpop.f32.mrb[81].mxu0 }
 0x285   :  { %v6207_v2 = vpop.eup %6206 }
 0x286   :  { %3889 = vrot.lane.b32.xlu0 %v6207_v2, %s6799_s5  ;;  %v7978_v2 = vpop.f32.mrb[82].mxu0 }
 0x287   :  { %v6209_v25 = vpop.eup %6208  ;;  %v5625_v6 = vpop.f32.mrb[83].mxu0 }
 0x288   :  { %3891 = vrot.lane.b32.xlu1 %v6209_v25, %s6799_s5  ;;  %v3834_v41 = vpop.permute.xlu0 %3833 }
 0x289   :  { %v3939_v26 = vsel %vm7215_vm10, %v3834_v41, 0.0 }
 0x28a   :  { %v3836_v59 = vpop.permute.xlu1 %3835  ;;  %4441 = vrot.lane.b32.xlu0 %v3939_v26, %s6800_s22 }
 0x28b   :  { %v3940_v46 = vsel %vm7227_vm11, %v3836_v59, 0.0  ;;  %v7987_v59 = vpop.f32.mrb[84].mxu0 }
 0x28c   :  { %4443 = vrot.lane.b32.xlu1 %v3940_v46, %s6800_s22  ;;  %v5628_v46 = vpop.f32.mrb[85].mxu0 }
 0x28d   :  { %v7989_v39 = vpop.f32.mrb[86].mxu0 }
 0x28e   :  { %v5629_v29 = vpop.f32.mrb[87].mxu0 }
 0x290   :  { %v3838_v25 = vpop.permute.xlu0 %3837 }
 0x291   :  { %v3941_v3 = vsel %vm7241_vm12, %v3838_v25, 0.0 }
 0x292   :  { %v3840_v41 = vpop.permute.xlu1 %3839  ;;  %4445 = vrot.lane.b32.xlu0 %v3941_v3, %s6800_s22 }
 0x293   :  { %v3942_v26 = vsel %vm11183_vm14, %v3840_v41, 0.0  ;;  %v7997_v41 = vpop.f32.mrb[88].mxu0  ;;  %vm11186_vm14 = vnez %v11060_v33 }
 0x294   :  { %4447 = vrot.lane.b32.xlu1 %v3942_v26, %s6800_s22  ;;  %v5632_v26 = vpop.f32.mrb[89].mxu0 }
 0x295   :  { %v7999_v55 = vpop.f32.mrb[90].mxu0 }
 0x296   :  { %v5633_v40 = vpop.f32.mrb[91].mxu0 }
 0x298   :  { %v3842_v6 = vpop.permute.xlu0 %3841 }
 0x299   :  { %v3943_v27 = vsel %vm11184_vm15, %v3842_v6, 0.0  ;;  %vm11187_vm15 = vnez %v11063_v45 }
 0x29a   :  { %v3844_v25 = vpop.permute.xlu1 %3843  ;;  %4449 = vrot.lane.b32.xlu0 %v3943_v27, %s6800_s22  ;;  %v6100_v27 = vld [vmem:[#allocation4 + $0x8] sm:$0xff]  }
 0x29b   :  { %v3944_v3 = vsel %vm11185_vm1, %v3844_v25, 0.0  ;;  %vm11188_vm1 = vnez %v11066_v8  ;;  %5831 = vmatpush3.bf16.msra.mxu1 %v6100_v27 }
 0x29c   :  { %4451 = vrot.lane.b32.xlu1 %v3944_v3, %s6800_s22  ;;  %v8007_v3 = vpop.f32.mrb[92].mxu0  ;;  %5832 = vmatprep.subr.bf16.mxu1 %v11113_v16 }
 0x29d   :  { %v5636_v40 = vpop.f32.mrb[93].mxu0 }
 0x2a0   :  { %v3846_v46 = vpop.permute.xlu0 %3845 }
 0x2a1   :  { %v3945_v29 = vsel %vm11186_vm14, %v3846_v46, 0.0  ;;  %v8012_v46 = vpop.f32.mrb[94].mxu0  ;;  %vm11191_vm14 = vnez %v11077_v54 }
 0x2a2   :  { %v3848_v61 = vpop.permute.xlu1 %3847  ;;  %4453 = vrot.lane.b32.xlu0 %v3945_v29, %s6800_s22  ;;  %v5637_v29 = vpop.f32.mrb[95].mxu0 }
 0x2a3   :  { %v3946_v6 = vsel %vm11187_vm15, %v3848_v61, 0.0  ;;  %vm11189_vm15 = vnez %v11069_v10  ;;  %v8018_v45 = vpop.f32.mrb[96].mxu0 }
 0x2a4   :  { %4455 = vrot.lane.b32.xlu1 %v3946_v6, %s6800_s22 }
 0x2a8   :  { %v3850_v25 = vpop.permute.xlu0 %3849 }
 0x2a9   :  { %v3947_v26 = vsel %vm11188_vm1, %v3850_v25, 0.0  ;;  %vm11190_vm1 = vnez %v11074_v36  ;;  %v5640_v25 = vpop.f32.mrb[97].mxu0 }
 0x2aa   :  { %v3852_v62 = vpop.permute.xlu1 %3851  ;;  %4457 = vrot.lane.b32.xlu0 %v3947_v26, %s6800_s22  ;;  %v8023_v26 = vpop.f32.mrb[98].mxu0 }
 0x2ab   :  { %v3948_v61 = vsel %vm11189_vm15, %v3852_v62, 0.0  ;;  %v5641_v10 = vpop.f32.mrb[99].mxu0  ;;  %v6101_v62 = vld [vmem:[#allocation4 + $0x10] sm:$0xff]   ;;  %vm11192_vm15 = vnez %v11080_v15 }
 0x2ac   :  { %4459 = vrot.lane.b32.xlu1 %v3948_v61, %s6800_s22  ;;  %v8028_v29 = vpop.f32.mrb[100].mxu0  ;;  %5833 = vmatpush3.bf16.msra.mxu1 %v6101_v62 }
 0x2ad   :  { %5834 = vmatprep.subr.bf16.mxu1 %v11113_v16 }
 0x2b0   :  { %v3854_v6 = vpop.permute.xlu0 %3853 }
 0x2b1   :  { %v3949_v27 = vsel %vm11190_vm1, %v3854_v6, 0.0  ;;  %v5644_v6 = vpop.f32.mrb[101].mxu0  ;;  %vm11228_vm1 = vcmp.eq.s32.totalorder %v7692_v1, 1 }
 0x2b2   :  { %v3856_v40 = vpop.permute.xlu1 %3855  ;;  %4461 = vrot.lane.b32.xlu0 %v3949_v27, %s6800_s22  ;;  %v8033_v27 = vpop.f32.mrb[102].mxu0 }
 0x2b3   :  { %v3950_v8 = vsel %vm11191_vm14, %v3856_v40, 0.0  ;;  %v11193_v40 = vld [vmem:[#allocation29_spill] sm:$0xff] }
 0x2b4   :  { %4463 = vrot.lane.b32.xlu1 %v3950_v8, %s6800_s22  ;;  %vm11194_vm14 = vnez %v11193_v40  ;;  %v5645_v8 = vpop.f32.mrb[103].mxu0 }
 0x2b5   :  { %v8047_v20 = vpop.f32.mrb[104].mxu0 }
 0x2b6   :  { %v5648_v60 = vpop.f32.mrb[105].mxu0 }
 0x2b8   :  { %v3858_v61 = vpop.permute.xlu0 %3857 }
 0x2b9   :  { %v3951_v36 = vsel %vm11192_vm15, %v3858_v61, 0.0  ;;  %v8042_v61 = vld [vmem:[%s10755_s8] ss:$0 sm:$0xff] }
 0x2ba   :  { %v3860_v25 = vpop.permute.xlu1 %3859  ;;  %4465 = vrot.lane.b32.xlu0 %v3951_v36, %s6800_s22  ;;  %v11195_v36 = vld [vmem:[#allocation30_spill] sm:$0xff] }
 0x2bb   :  { %v3952_v10 = vsel %vm11194_vm14, %v3860_v25, 0.0  ;;  %vm11196_vm15 = vnez %v11195_v36  ;;  %vm11198_vm14 = vnez %v11197_v5 }
 0x2bc   :  { %4467 = vrot.lane.b32.xlu1 %v3952_v10, %s6800_s22 }
 0x2c0   :  { %v1428_v54 = vpop.f32.mrb[112].mxu1  ;;  %v3862_v62 = vpop.permute.xlu0 %3861 }
 0x2c1   :  { %v1429_v6 = vadd.f32 %v1428_v54, %v7821_v51  ;;  %v3953_v15 = vsel %vm11196_vm15, %v3862_v62, 0.0  ;;  %v5662_v33 = vpop.f32.mrb[113].mxu1  ;;  %v8055_v54 = vpop.f32.mrb[106].mxu0 }
 0x2c2   :  { %v1431_v40 = vpop.f32.mrb[114].mxu1  ;;  %v3864_v25 = vpop.permute.xlu1 %3863  ;;  %4469 = vrot.lane.b32.xlu0 %v3953_v15, %s6800_s22 }
 0x2c3   :  { %v1586_v10 = vadd.f32 %v8042_v61, %v1429_v6  ;;  %v1432_v8 = vadd.f32 %v1431_v40, %v7829_v56  ;;  %v3954_v4 = vsel %vm11198_vm14, %v3864_v25, 0.0  ;;  %v5663_v48 = vpop.f32.mrb[115].mxu1  ;;  %v5649_v51 = vpop.f32.mrb[107].mxu0  ;;  %v11199_v56 = vld [vmem:[#allocation32_spill] sm:$0xff] }
 0x2c4   :  { %4471 = vrot.lane.b32.xlu1 %v3954_v4, %s6800_s22  ;;  %vm11200_vm15 = vnez %v11199_v56  ;;  %v11201_v51 = vld [vmem:[#allocation33_spill] sm:$0xff] }
 0x2c5   :  { %v1587_v33 = vadd.f32 %v8042_v61, %v1432_v8  ;;  %v1624_v62 = vmax.f32 %v1586_v10, 0.0  ;;  %vm11202_vm14 = vnez %v11201_v51 }
 0x2c7   :  { %v1625_v36 = vmax.f32 %v1587_v33, 0.0 }
 0x2c8   :  { %v1436_v52 = vpop.f32.mrb[116].mxu1  ;;  %v3866_v15 = vpop.permute.xlu0 %3865 }
 0x2c9   :  { %v1662_v18 = vpack.c.bf16 %v1625_v36, %v1624_v62  ;;  %v1437_v6 = vadd.f32 %v1436_v52, %v7839_v7  ;;  %v3955_v40 = vsel %vm11200_vm15, %v3866_v15, 0.0  ;;  %v5666_v25 = vpop.f32.mrb[117].mxu1  ;;  %v8066_v36 = vpop.f32.mrb[108].mxu0  ;;  %v6102_v62 = vld [vmem:[#allocation4 + $0x18] sm:$0xff]  }
 0x2ca   :  { %v1439_v48 = vpop.f32.mrb[118].mxu1  ;;  %v3868_v60 = vpop.permute.xlu1 %3867  ;;  %4473 = vrot.lane.b32.xlu0 %v3955_v40, %s6800_s22  ;;  %5835 = vmatpush3.bf16.msra.mxu1 %v6102_v62 }
 0x2cb   :  { %v1588_v4 = vadd.f32 %v8042_v61, %v1437_v6  ;;  %v1440_v8 = vadd.f32 %v1439_v48, %v7845_v57  ;;  %v3956_v10 = vsel %vm11202_vm14, %v3868_v60, 0.0  ;;  %v5667_v33 = vpop.f32.mrb[119].mxu1  ;;  %5753 = vmatmul.mubr.bf16.vlgmr.msra.gmra.mrb[116].mxu0 %v1662_v18  ;;  %v5652_v52 = vpop.f32.mrb[109].mxu0  ;;  %5836 = vmatprep.subr.bf16.mxu1 %v11113_v16 }
 0x2cc   :  { %4475 = vrot.lane.b32.xlu1 %v3956_v10, %s6800_s22  ;;  %5756 = vmatprep.mubr.msk.bf16.mxu0 %vm11072_vm13, %v11113_v16  ;;  %v8072_v15 = vpop.f32.mrb[110].mxu0  ;;  %v11203_v10 = vld [vmem:[#allocation34_spill] sm:$0xff] }
 0x2cd   :  { %v1589_v7 = vadd.f32 %v8042_v61, %v1440_v8  ;;  %v5653_v6 = vpop.f32.mrb[111].mxu0  ;;  %v1626_v57 = vmax.f32 %v1588_v4, 0.0  ;;  %vm11204_vm14 = vnez %v11203_v10  ;;  %v6103_v10 = vld [vmem:[#allocation4 + $0x20] sm:$0xff]  }
 0x2ce   :  { %v8083_v5 = vpop.f32.mrb[112].mxu0  ;;  %5837 = vmatpush3.bf16.msra.mxu1 %v6103_v10 }
 0x2cf   :  { %v1627_v40 = vmax.f32 %v1589_v7, 0.0  ;;  %v11205_v7 = vld [vmem:[#allocation35_spill] sm:$0xff]  ;;  %5838 = vmatprep.subr.bf16.mxu1 %v11113_v16 }
 0x2d0   :  { %v1444_v25 = vpop.f32.mrb[120].mxu1  ;;  %v3870_v48 = vpop.permute.xlu0 %3869  ;;  %vm11206_vm15 = vnez %v11205_v7 }
 0x2d1   :  { %v1445_v18 = vadd.f32 %v1444_v25, %v7854_v17  ;;  %v5670_v60 = vpop.f32.mrb[121].mxu1  ;;  %v3957_v33 = vsel %vm11204_vm14, %v3870_v48, 0.0  ;;  %v1663_v52 = vpack.c.bf16 %v1627_v40, %v1626_v57  ;;  %v5656_v17 = vpop.f32.mrb[113].mxu0 }
 0x2d2   :  { %v1447_v51 = vpop.f32.mrb[122].mxu1  ;;  %v3872_v8 = vpop.permute.xlu1 %3871  ;;  %4477 = vrot.lane.b32.xlu0 %v3957_v33, %s6800_s22  ;;  %v11207_v60 = vld [vmem:[#allocation36_spill] sm:$0xff] }
 0x2d3   :  { %v1590_v6 = vadd.f32 %v8042_v61, %v1445_v18  ;;  %v1448_v4 = vadd.f32 %v1447_v51, %v7860_v63  ;;  %v3958_v62 = vsel %vm11206_vm15, %v3872_v8, 0.0  ;;  %v5671_v56 = vpop.f32.mrb[123].mxu1  ;;  %5757 = vmatmul.mubr.bf16.gmra.mrb[120].mxu0 %v1663_v52  ;;  %v8089_v40 = vpop.f32.mrb[114].mxu0  ;;  %vm11208_vm15 = vnez %v11207_v60 }
 0x2d4   :  { %4479 = vrot.lane.b32.xlu1 %v3958_v62, %s6800_s22  ;;  %5760 = vmatprep.mubr.msk.bf16.mxu0 %vm11072_vm13, %v11113_v16  ;;  %v5657_v25 = vpop.f32.mrb[115].mxu0 }
 0x2d5   :  { %v1591_v57 = vadd.f32 %v8042_v61, %v1448_v4  ;;  %v1628_v48 = vmax.f32 %v1590_v6, 0.0  ;;  %v11209_v25 = vld [vmem:[#allocation37_spill] sm:$0xff] }
 0x2d6   :  { %vm11210_vm14 = vnez %v11209_v25 }
 0x2d7   :  { %v1629_v63 = vmax.f32 %v1591_v57, 0.0 }
 0x2d8   :  { %v1452_v51 = vpop.f32.mrb[124].mxu1  ;;  %v3874_v18 = vpop.permute.xlu0 %3873 }
 0x2d9   :  { %v1453_v56 = vadd.f32 %v1452_v51, %v7869_v0  ;;  %v3959_v33 = vsel %vm11208_vm15, %v3874_v18, 0.0  ;;  %v5674_v52 = vpop.f32.mrb[125].mxu1  ;;  %v1664_v8 = vpack.c.bf16 %v1629_v63, %v1628_v48  ;;  %vm11212_vm15 = vnez %v11118_v32 }
 0x2da   :  { %v1455_v62 = vpop.f32.mrb[126].mxu1  ;;  %v3876_v7 = vpop.permute.xlu1 %3875  ;;  %4481 = vrot.lane.b32.xlu0 %v3959_v33, %s6800_s22 }
 0x2db   :  { %v1592_v4 = vadd.f32 %v8042_v61, %v1453_v56  ;;  %v1456_v17 = vadd.f32 %v1455_v62, %v7875_v14  ;;  %v3960_v6 = vsel %vm11210_vm14, %v3876_v7, 0.0  ;;  %v5675_v57 = vpop.f32.mrb[127].mxu1  ;;  %5761 = vmatmul.mubr.bf16.gmra.mrb[124].mxu0 %v1664_v8  ;;  %v6104_v14 = vld [vmem:[#allocation4 + $0x28] sm:$0xff]   ;;  %vm11211_vm14 = vnez %v11115_v30 }
 0x2dc   :  { %4483 = vrot.lane.b32.xlu1 %v3960_v6, %s6800_s22  ;;  %v8100_v0 = vpop.permute.xlu0 %4425  ;;  %5764 = vmatprep.mubr.msk.bf16.mxu0 %vm11072_vm13, %v11113_v16 }
 0x2dd   :  { %v1593_v48 = vadd.f32 %v8042_v61, %v1456_v17  ;;  %v1630_v51 = vmax.f32 %v1592_v4, 0.0  ;;  %5839 = vmatpush3.bf16.msra.mxu1 %v6104_v14 }
 0x2de   :  { %v8105_v63 = vpop.permute.xlu1 %4427  ;;  %5840 = vmatprep.subr.bf16.mxu1 %v11113_v16 }
 0x2df   :  { %v1631_v7 = vmax.f32 %v1593_v48, 0.0 }
 0x2e0   :  { %v1460_v18 = vpop.f32.mrb[128].mxu1  ;;  %v3878_v56 = vpop.permute.xlu0 %3877 }
 0x2e1   :  { %v1461_v33 = vadd.f32 %v1460_v18, %v7884_v47  ;;  %v3961_v52 = vsel %vm11211_vm14, %v3878_v56, 0.0  ;;  %v5678_v8 = vpop.f32.mrb[129].mxu1  ;;  %v1665_v62 = vpack.c.bf16 %v1631_v7, %v1630_v51  ;;  %v6105_v7 = vld [vmem:[#allocation4 + $0x30] sm:$0xff]   ;;  %vm11214_vm14 = vnez %v11124_v34 }
 0x2e2   :  { %v1463_v6 = vpop.f32.mrb[130].mxu1  ;;  %v3880_v17 = vpop.permute.xlu1 %3879  ;;  %4485 = vrot.lane.b32.xlu0 %v3961_v52, %s6800_s22  ;;  %5841 = vmatpush3.bf16.msra.mxu1 %v6105_v7 }
 0x2e3   :  { %v1594_v10 = vadd.f32 %v8042_v61, %v1461_v33  ;;  %v1464_v4 = vadd.f32 %v1463_v6, %v7890_v12  ;;  %v3962_v57 = vsel %vm11212_vm15, %v3880_v17, 0.0  ;;  %v5679_v47 = vpop.f32.mrb[131].mxu1  ;;  %5765 = vmatmul.mubr.bf16.gmra.mrb[128].mxu0 %v1665_v62  ;;  %vm11213_vm15 = vnez %v11121_v58  ;;  %5842 = vmatprep.subr.bf16.mxu1 %v11113_v16 }
 0x2e4   :  { %v8117_v48 = vpop.permute.xlu0 %4429  ;;  %4487 = vrot.lane.b32.xlu1 %v3962_v57, %s6800_s22  ;;  %5768 = vmatprep.mubr.msk.bf16.mxu0 %vm11072_vm13, %v11113_v16 }
 0x2e5   :  { %v1595_v14 = vadd.f32 %v8042_v61, %v1464_v4  ;;  %v1632_v18 = vmax.f32 %v1594_v10, 0.0 }
 0x2e6   :  { %v8123_v51 = vpop.permute.xlu1 %4431 }
 0x2e7   :  { %v1633_v56 = vmax.f32 %v1595_v14, 0.0 }
 0x2e8   :  { %v1468_v12 = vpop.f32.mrb[132].mxu1  ;;  %v3882_v33 = vpop.permute.xlu0 %3881 }
 0x2e9   :  { %v1469_v52 = vadd.f32 %v1468_v12, %v7899_v53  ;;  %v3963_v8 = vsel %vm11213_vm15, %v3882_v33, 0.0  ;;  %v5682_v62 = vpop.f32.mrb[133].mxu1  ;;  %v1666_v6 = vpack.c.bf16 %v1633_v56, %v1632_v18  ;;  %v6106_v56 = vld [vmem:[#allocation4 + $0x38] sm:$0xff]  }
 0x2ea   :  { %v1471_v17 = vpop.f32.mrb[134].mxu1  ;;  %v3884_v57 = vpop.permute.xlu1 %3883  ;;  %4489 = vrot.lane.b32.xlu0 %v3963_v8, %s6800_s22  ;;  %5843 = vmatpush3.bf16.msra.mxu1 %v6106_v56 }
 0x2eb   :  { %v1596_v4 = vadd.f32 %v8042_v61, %v1469_v52  ;;  %v1472_v10 = vadd.f32 %v1471_v17, %v7905_v9  ;;  %v3964_v47 = vsel %vm11214_vm14, %v3884_v57, 0.0  ;;  %v5683_v14 = vpop.f32.mrb[135].mxu1  ;;  %5769 = vmatmul.mubr.bf16.gmra.mrb[132].mxu0 %v1666_v6  ;;  %vm11215_vm14 = vnez %v11128_v22 }
 0x2ec   :  { %v8134_v53 = vpop.permute.xlu0 %4433  ;;  %5772 = vmatprep.mubr.msk.bf16.mxu0 %vm11072_vm13, %v11113_v16  ;;  %4491 = vrot.lane.b32.xlu1 %v3964_v47, %s6800_s22 }
 0x2ed   :  { %v1597_v7 = vadd.f32 %v8042_v61, %v1472_v10  ;;  %v1634_v12 = vmax.f32 %v1596_v4, 0.0 }
 0x2ee   :  { %v8140_v18 = vpop.permute.xlu1 %4435 }
 0x2ef   :  { %v1635_v33 = vmax.f32 %v1597_v7, 0.0 }
 0x2f0   :  { %v1476_v9 = vpop.f32.mrb[136].mxu1  ;;  %v3886_v52 = vpop.permute.xlu0 %3885 }
 0x2f1   :  { %v1477_v8 = vadd.f32 %v1476_v9, %v7916_v19  ;;  %v3965_v62 = vsel %vm11215_vm14, %v3886_v52, 0.0  ;;  %v5686_v6 = vpop.f32.mrb[137].mxu1  ;;  %v1667_v17 = vpack.c.bf16 %v1635_v33, %v1634_v12  ;;  %vm11217_vm14 = vnez %v11138_v43 }
 0x2f2   :  { %v1479_v57 = vpop.f32.mrb[138].mxu1  ;;  %v3888_v14 = vpop.permute.xlu1 %3887  ;;  %4493 = vrot.lane.b32.xlu0 %v3965_v62, %s6800_s22 }
 0x2f3   :  { %v1598_v10 = vadd.f32 %v8042_v61, %v1477_v8  ;;  %v1480_v47 = vadd.f32 %v1479_v57, %v7922_v28  ;;  %v3966_v4 = vsel %vm7569_vm0, %v3888_v14, 0.0  ;;  %v5687_v7 = vpop.f32.mrb[139].mxu1  ;;  %5773 = vmatmul.mubr.bf16.gmra.mrb[136].mxu0 %v1667_v17  ;;  %vm11216_vm0 = vnez %v11134_v49 }
 0x2f4   :  { %v8150_v56 = vpop.permute.xlu0 %4437  ;;  %5776 = vmatprep.mubr.msk.bf16.mxu0 %vm11072_vm13, %v11113_v16  ;;  %4495 = vrot.lane.b32.xlu1 %v3966_v4, %s6800_s22 }
 0x2f5   :  { %v1599_v19 = vadd.f32 %v8042_v61, %v1480_v47  ;;  %v1636_v33 = vmax.f32 %v1598_v10, 0.0 }
 0x2f6   :  { %v8156_v12 = vpop.permute.xlu1 %4439 }
 0x2f7   :  { %v1637_v9 = vmax.f32 %v1599_v19, 0.0 }
 0x2f8   :  { %v1484_v52 = vpop.f32.mrb[140].mxu1  ;;  %v3890_v28 = vpop.permute.xlu0 %3889 }
 0x2f9   :  { %v1485_v8 = vadd.f32 %v1484_v52, %v7933_v37  ;;  %v3967_v62 = vsel %vm11216_vm0, %v3890_v28, 0.0  ;;  %v5690_v6 = vpop.f32.mrb[141].mxu1  ;;  %v1668_v17 = vpack.c.bf16 %v1637_v9, %v1636_v33 }
 0x2fa   :  { %v1487_v57 = vpop.f32.mrb[142].mxu1  ;;  %v3892_v14 = vpop.permute.xlu1 %3891  ;;  %4497 = vrot.lane.b32.xlu0 %v3967_v62, %s6800_s22 }
 0x2fb   :  { %v1600_v4 = vadd.f32 %v8042_v61, %v1485_v8  ;;  %v1488_v47 = vadd.f32 %v1487_v57, %v7939_v13  ;;  %v3968_v10 = vsel %vm11217_vm14, %v3892_v14, 0.0  ;;  %v5691_v7 = vpop.f32.mrb[143].mxu1  ;;  %5777 = vmatmul.mubr.bf16.gmra.mrb[140].mxu0 %v1668_v17  ;;  %vm10956_vm14 = vcmask 23552  }
 0x2fc   :  { %5780 = vmatprep.mubr.msk.bf16.mxu0 %vm11072_vm13, %v11113_v16  ;;  %4499 = vrot.lane.b32.xlu1 %v3968_v10, %s6800_s22  ;;  %s6804_s22 = smov 45  }
 0x2fd   :  { %v1601_v37 = vadd.f32 %v8042_v61, %v1488_v47  ;;  %v1638_v19 = vmax.f32 %v1600_v4, 0.0 }
 0x2ff   :  { %v1639_v33 = vmax.f32 %v1601_v37, 0.0 }
 0x300   :  { %v1492_v9 = vpop.f32.mrb[144].mxu1 }
 0x301   :  { %v1493_v52 = vadd.f32 %v1492_v9, %v7950_v35  ;;  %v5694_v28 = vpop.f32.mrb[145].mxu1  ;;  %v1669_v8 = vpack.c.bf16 %v1639_v33, %v1638_v19 }
 0x302   :  { %v1495_v13 = vpop.f32.mrb[146].mxu1 }
 0x303   :  { %v1602_v62 = vadd.f32 %v8042_v61, %v1493_v52  ;;  %v1496_v6 = vadd.f32 %v1495_v13, %v7955_v31  ;;  %v5695_v17 = vpop.f32.mrb[147].mxu1  ;;  %5781 = vmatmul.mubr.bf16.gmra.mrb[144].mxu0 %v1669_v8 }
 0x304   :  { %5784 = vmatprep.mubr.msk.bf16.mxu0 %vm11072_vm13, %v11113_v16 }
 0x305   :  { %v1603_v57 = vadd.f32 %v8042_v61, %v1496_v6  ;;  %v1640_v14 = vmax.f32 %v1602_v62, 0.0 }
 0x307   :  { %v1641_v4 = vmax.f32 %v1603_v57, 0.0 }
 0x308   :  { %v1500_v47 = vpop.f32.mrb[148].mxu1 }
 0x309   :  { %v1501_v10 = vadd.f32 %v1500_v47, %v7964_v24  ;;  %v5698_v35 = vpop.f32.mrb[149].mxu1  ;;  %v1670_v7 = vpack.c.bf16 %v1641_v4, %v1640_v14 }
 0x30a   :  { %v1503_v37 = vpop.f32.mrb[150].mxu1 }
 0x30b   :  { %v1604_v19 = vadd.f32 %v8042_v61, %v1501_v10  ;;  %v1504_v33 = vadd.f32 %v1503_v37, %v7967_v21  ;;  %v5699_v31 = vpop.f32.mrb[151].mxu1  ;;  %5785 = vmatmul.mubr.bf16.gmra.mrb[148].mxu0 %v1670_v7 }
 0x30c   :  { %5788 = vmatprep.mubr.msk.bf16.mxu0 %vm11072_vm13, %v11113_v16 }
 0x30d   :  { %v1605_v9 = vadd.f32 %v8042_v61, %v1504_v33  ;;  %v1642_v52 = vmax.f32 %v1604_v19, 0.0 }
 0x30f   :  { %v1643_v28 = vmax.f32 %v1605_v9, 0.0 }
 0x310   :  { %v1508_v8 = vpop.f32.mrb[152].mxu1 }
 0x311   :  { %v1509_v13 = vadd.f32 %v1508_v8, %v7976_v44  ;;  %v5702_v24 = vpop.f32.mrb[153].mxu1  ;;  %v1671_v62 = vpack.c.bf16 %v1643_v28, %v1642_v52 }
 0x312   :  { %v1511_v6 = vpop.f32.mrb[154].mxu1 }
 0x313   :  { %v1606_v17 = vadd.f32 %v8042_v61, %v1509_v13  ;;  %v1512_v57 = vadd.f32 %v1511_v6, %v7978_v2  ;;  %v5703_v21 = vpop.f32.mrb[155].mxu1  ;;  %5789 = vmatmul.mubr.bf16.gmra.mrb[152].mxu0 %v1671_v62 }
 0x314   :  { %5792 = vmatprep.mubr.msk.bf16.mxu0 %vm11072_vm13, %v11113_v16 }
 0x315   :  { %v1607_v14 = vadd.f32 %v8042_v61, %v1512_v57  ;;  %v1644_v4 = vmax.f32 %v1606_v17, 0.0 }
 0x317   :  { %v1645_v47 = vmax.f32 %v1607_v14, 0.0 }
 0x318   :  { %v1516_v10 = vpop.f32.mrb[156].mxu1 }
 0x319   :  { %v1517_v35 = vadd.f32 %v1516_v10, %v7987_v59  ;;  %v5706_v44 = vpop.f32.mrb[157].mxu1  ;;  %v1672_v7 = vpack.c.bf16 %v1645_v47, %v1644_v4 }
 0x31a   :  { %v1519_v37 = vpop.f32.mrb[158].mxu1 }
 0x31b   :  { %v1608_v19 = vadd.f32 %v8042_v61, %v1517_v35  ;;  %v1520_v33 = vadd.f32 %v1519_v37, %v7989_v39  ;;  %v5707_v2 = vpop.f32.mrb[159].mxu1  ;;  %5793 = vmatmul.mubr.bf16.gmra.mrb[156].mxu0 %v1672_v7 }
 0x31c   :  { %5796 = vmatprep.mubr.msk.bf16.mxu0 %vm11072_vm13, %v11113_v16 }
 0x31d   :  { %v1609_v31 = vadd.f32 %v8042_v61, %v1520_v33  ;;  %v1646_v9 = vmax.f32 %v1608_v19, 0.0 }
 0x31f   :  { %v1647_v52 = vmax.f32 %v1609_v31, 0.0 }
 0x320   :  { %v1524_v28 = vpop.f32.mrb[160].mxu1 }
 0x321   :  { %v1525_v8 = vadd.f32 %v1524_v28, %v7997_v41  ;;  %v5710_v59 = vpop.f32.mrb[161].mxu1  ;;  %v1673_v13 = vpack.c.bf16 %v1647_v52, %v1646_v9 }
 0x322   :  { %v1527_v24 = vpop.f32.mrb[162].mxu1 }
 0x323   :  { %v1610_v62 = vadd.f32 %v8042_v61, %v1525_v8  ;;  %v1528_v6 = vadd.f32 %v1527_v24, %v7999_v55  ;;  %v5711_v39 = vpop.f32.mrb[163].mxu1  ;;  %5797 = vmatmul.mubr.bf16.gmra.mrb[160].mxu0 %v1673_v13 }
 0x324   :  { %5800 = vmatprep.mubr.msk.bf16.mxu0 %vm11072_vm13, %v11113_v16 }
 0x325   :  { %v1611_v17 = vadd.f32 %v8042_v61, %v1528_v6  ;;  %v1648_v57 = vmax.f32 %v1610_v62, 0.0 }
 0x327   :  { %v1649_v21 = vmax.f32 %v1611_v17, 0.0 }
 0x328   :  { %v1532_v14 = vpop.f32.mrb[164].mxu1 }
 0x329   :  { %v1533_v4 = vadd.f32 %v1532_v14, %v8007_v3  ;;  %v5714_v41 = vpop.f32.mrb[165].mxu1  ;;  %v1674_v47 = vpack.c.bf16 %v1649_v21, %v1648_v57 }
 0x32a   :  { %v1535_v10 = vpop.f32.mrb[166].mxu1 }
 0x32b   :  { %v1612_v35 = vadd.f32 %v8042_v61, %v1533_v4  ;;  %v1536_v44 = vadd.f32 %v1535_v10, %v8012_v46  ;;  %v5715_v55 = vpop.f32.mrb[167].mxu1  ;;  %5801 = vmatmul.mubr.bf16.gmra.mrb[164].mxu0 %v1674_v47 }
 0x32c   :  { %5804 = vmatprep.mubr.msk.bf16.mxu0 %vm11072_vm13, %v11113_v16 }
 0x32d   :  { %v1613_v7 = vadd.f32 %v8042_v61, %v1536_v44  ;;  %v1650_v37 = vmax.f32 %v1612_v35, 0.0 }
 0x32f   :  { %v1651_v19 = vmax.f32 %v1613_v7, 0.0 }
 0x330   :  { %v1540_v33 = vpop.f32.mrb[168].mxu1 }
 0x331   :  { %v1541_v2 = vadd.f32 %v1540_v33, %v8018_v45  ;;  %v5718_v3 = vpop.f32.mrb[169].mxu1  ;;  %v1675_v31 = vpack.c.bf16 %v1651_v19, %v1650_v37 }
 0x332   :  { %v1543_v9 = vpop.f32.mrb[170].mxu1 }
 0x333   :  { %v1614_v52 = vadd.f32 %v8042_v61, %v1541_v2  ;;  %v1544_v28 = vadd.f32 %v1543_v9, %v8023_v26  ;;  %v5719_v46 = vpop.f32.mrb[171].mxu1  ;;  %5805 = vmatmul.mubr.bf16.gmra.mrb[168].mxu0 %v1675_v31 }
 0x334   :  { %5808 = vmatprep.mubr.msk.bf16.mxu0 %vm11072_vm13, %v11113_v16 }
 0x335   :  { %v1615_v8 = vadd.f32 %v8042_v61, %v1544_v28  ;;  %v1652_v59 = vmax.f32 %v1614_v52, 0.0 }
 0x337   :  { %v1653_v13 = vmax.f32 %v1615_v8, 0.0 }
 0x338   :  { %v1548_v24 = vpop.f32.mrb[172].mxu1 }
 0x339   :  { %v1549_v62 = vadd.f32 %v1548_v24, %v8028_v29  ;;  %v5722_v45 = vpop.f32.mrb[173].mxu1  ;;  %v1676_v6 = vpack.c.bf16 %v1653_v13, %v1652_v59 }
 0x33a   :  { %v1551_v39 = vpop.f32.mrb[174].mxu1 }
 0x33b   :  { %v1616_v17 = vadd.f32 %v8042_v61, %v1549_v62  ;;  %v1552_v57 = vadd.f32 %v1551_v39, %v8033_v27  ;;  %v5723_v26 = vpop.f32.mrb[175].mxu1  ;;  %5809 = vmatmul.mubr.bf16.gmra.mrb[172].mxu0 %v1676_v6 }
 0x33c   :  { %5812 = vmatprep.mubr.msk.bf16.mxu0 %vm11072_vm13, %v11113_v16 }
 0x33d   :  { %v1654_v21 = vmax.f32 %v1616_v17, 0.0  ;;  %v1617_v14 = vadd.f32 %v8042_v61, %v1552_v57 }
 0x33f   :  { %v1655_v4 = vmax.f32 %v1617_v14, 0.0 }
 0x340   :  { %v1556_v41 = vpop.f32.mrb[176].mxu1 }
 0x341   :  { %v1557_v47 = vadd.f32 %v1556_v41, %v8047_v20  ;;  %v5726_v29 = vpop.f32.mrb[177].mxu1  ;;  %v1677_v10 = vpack.c.bf16 %v1655_v4, %v1654_v21  ;;  %v8253_v21 = vld [vmem:[%s10757_s10] ss:$0 sm:$0xff] }
 0x342   :  { %v1559_v35 = vpop.f32.mrb[178].mxu1 }
 0x343   :  { %v1618_v44 = vadd.f32 %v8042_v61, %v1557_v47  ;;  %v1560_v55 = vadd.f32 %v1559_v35, %v8055_v54  ;;  %5813 = vmatmul.mubr.bf16.gmra.mrb[176].mxu0 %v1677_v10  ;;  %v5727_v27 = vpop.f32.mrb[179].mxu1 }
 0x344   :  { %5816 = vmatprep.mubr.msk.bf16.mxu0 %vm11072_vm13, %v11113_v16  ;;  %v6110_v27 = vld [vmem:[%s10760_s13 + $0x18] sm:$0xff]  }
 0x345   :  { %v1656_v7 = vmax.f32 %v1618_v44, 0.0  ;;  %v1619_v37 = vadd.f32 %v8042_v61, %v1560_v55 }
 0x347   :  { %v1657_v19 = vmax.f32 %v1619_v37, 0.0 }
 0x348   :  { %v1564_v33 = vpop.f32.mrb[180].mxu1 }
 0x349   :  { %v1565_v2 = vadd.f32 %v1564_v33, %v8066_v36  ;;  %v5730_v20 = vpop.f32.mrb[181].mxu1  ;;  %v1678_v3 = vpack.c.bf16 %v1657_v19, %v1656_v7 }
 0x34a   :  { %v1567_v31 = vpop.f32.mrb[182].mxu1 }
 0x34b   :  { %v1620_v9 = vadd.f32 %v8042_v61, %v1565_v2  ;;  %v1568_v52 = vadd.f32 %v1567_v31, %v8072_v15  ;;  %5817 = vmatmul.mubr.bf16.gmra.mrb[180].mxu0 %v1678_v3  ;;  %v5731_v54 = vpop.f32.mrb[183].mxu1 }
 0x34c   :  { %5820 = vmatprep.mubr.msk.bf16.mxu0 %vm11072_vm13, %v11113_v16 }
 0x34d   :  { %v1658_v28 = vmax.f32 %v1620_v9, 0.0  ;;  %v1621_v46 = vadd.f32 %v8042_v61, %v1568_v52 }
 0x34f   :  { %v1659_v8 = vmax.f32 %v1621_v46, 0.0 }
 0x350   :  { %v1572_v59 = vpop.f32.mrb[184].mxu1 }
 0x351   :  { %v1573_v13 = vadd.f32 %v1572_v59, %v8083_v5  ;;  %v5734_v36 = vpop.f32.mrb[185].mxu1  ;;  %v1679_v24 = vpack.c.bf16 %v1659_v8, %v1658_v28  ;;  %v6107_v5 = vld [vmem:[%s10760_s13] sm:$0xff]  }
 0x352   :  { %v1575_v62 = vpop.f32.mrb[186].mxu1  ;;  %5921 = vmatpush3.bf16.msra.mxu0 %v6107_v5 }
 0x353   :  { %v1622_v45 = vadd.f32 %v8042_v61, %v1573_v13  ;;  %v1576_v6 = vadd.f32 %v1575_v62, %v8089_v40  ;;  %5821 = vmatmul.mubr.bf16.gmra.mrb[184].mxu0 %v1679_v24  ;;  %v5735_v15 = vpop.f32.mrb[187].mxu1  ;;  %5922 = vmatprep.subr.bf16.mxu0 %v11113_v16  ;;  %v6108_v40 = vld [vmem:[%s10760_s13 + $0x8] sm:$0xff]  }
 0x354   :  { %5824 = vmatprep.mubr.msk.bf16.mxu0 %vm11072_vm13, %v11113_v16  ;;  %v6111_v15 = vld [vmem:[%s10760_s13 + $0x20] sm:$0xff]  }
 0x355   :  { %v1660_v39 = vmax.f32 %v1622_v45, 0.0  ;;  %v1623_v17 = vadd.f32 %v8042_v61, %v1576_v6  ;;  %v6109_v61 = vld [vmem:[%s10760_s13 + $0x10] sm:$0xff]  }
 0x356   :  { %5923 = vmatpush3.bf16.msra.mxu0 %v6108_v40 }
 0x357   :  { %v1661_v57 = vmax.f32 %v1623_v17, 0.0  ;;  %5924 = vmatprep.subr.bf16.mxu0 %v11113_v16 }
 0x359   :  { %v1680_v26 = vpack.c.bf16 %v1661_v57, %v1660_v39 }
 0x35a   :  { %5925 = vmatpush3.bf16.msra.mxu0 %v6109_v61 }
 0x35b   :  { %5825 = vmatmul.mubr.bf16.gmra.mrb[188].mxu0 %v1680_v26  ;;  %5926 = vmatprep.subr.bf16.mxu0 %v11113_v16  ;;  %v6112_v26 = vld [vmem:[%s10760_s13 + $0x28] sm:$0xff]  }
 0x35c   :  { %5936 = vmatprep.mubr.msk.bf16.mxu0 %vm11072_vm13, %v11113_v16 }
 0x35e   :  { %5927 = vmatpush3.bf16.msra.mxu0 %v6110_v27 }
 0x35f   :  { %5928 = vmatprep.subr.bf16.mxu0 %v11113_v16 }
 0x362   :  { %5929 = vmatpush3.bf16.msra.mxu0 %v6111_v15 }
 0x363   :  { %5930 = vmatprep.subr.bf16.mxu0 %v11113_v16 }
 0x366   :  { %5931 = vmatpush3.bf16.msra.mxu0 %v6112_v26 }
 0x367   :  { %5932 = vmatprep.subr.bf16.mxu0 %v11113_v16 }
 0x39e   :  { %v1786_v14 = vpop.f32.mrb[116].mxu0 }
 0x39f   :  { %v1787_v4 = vadd.f32 %v8253_v21, %v1786_v14  ;;  %v5754_v41 = vpop.f32.mrb[117].mxu0  ;;  %v6113_v14 = vld [vmem:[%s10760_s13 + $0x30] sm:$0xff]  }
 0x3a0   :  { %v1789_v47 = vpop.f32.mrb[118].mxu0  ;;  %5933 = vmatpush3.bf16.msra.mxu0 %v6113_v14 }
 0x3a1   :  { %v1790_v29 = vadd.f32 %v8253_v21, %v1789_v47  ;;  %v5755_v10 = vpop.f32.mrb[119].mxu0  ;;  %v1937_v35 = vmax.f32 %v1787_v4, 0.0  ;;  %5934 = vmatprep.subr.bf16.mxu0 %v11113_v16 }
 0x3a3   :  { %v1938_v44 = vmax.f32 %v1790_v29, 0.0 }
 0x3a5   :  { %v1975_v55 = vpack.c.bf16 %v1938_v44, %v1937_v35  ;;  %v6114_v44 = vld [vmem:[%s10760_s13 + $0x38] sm:$0xff]  }
 0x3a6   :  { %v1794_v7 = vpop.f32.mrb[120].mxu0  ;;  %5935 = vmatpush3.bf16.msra.mxu0 %v6114_v44 }
 0x3a7   :  { %v1795_v37 = vadd.f32 %v8253_v21, %v1794_v7  ;;  %v5758_v19 = vpop.f32.mrb[121].mxu0  ;;  %5845 = vmatmul.mubr.bf16.vlgmr.msra.gmra.mrb[188].mxu1 %v1975_v55 }
 0x3a8   :  { %v1797_v33 = vpop.f32.mrb[122].mxu0  ;;  %5848 = vmatprep.mubr.msk.bf16.mxu1 %vm11072_vm13, %v11113_v16 }
 0x3a9   :  { %v1798_v2 = vadd.f32 %v8253_v21, %v1797_v33  ;;  %v5759_v20 = vpop.f32.mrb[123].mxu0  ;;  %v1939_v3 = vmax.f32 %v1795_v37, 0.0 }
 0x3ab   :  { %v1940_v31 = vmax.f32 %v1798_v2, 0.0 }
 0x3ad   :  { %v1976_v9 = vpack.c.bf16 %v1940_v31, %v1939_v3 }
 0x3ae   :  { %v1802_v52 = vpop.f32.mrb[124].mxu0 }
 0x3af   :  { %v1803_v54 = vadd.f32 %v8253_v21, %v1802_v52  ;;  %v5762_v28 = vpop.f32.mrb[125].mxu0  ;;  %5849 = vmatmul.mubr.bf16.gmra.mrb[192].mxu1 %v1976_v9 }
 0x3b0   :  { %v1805_v46 = vpop.f32.mrb[126].mxu0  ;;  %5852 = vmatprep.mubr.msk.bf16.mxu1 %vm11072_vm13, %v11113_v16 }
 0x3b1   :  { %v1806_v8 = vadd.f32 %v8253_v21, %v1805_v46  ;;  %v5763_v59 = vpop.f32.mrb[127].mxu0  ;;  %v1941_v13 = vmax.f32 %v1803_v54, 0.0 }
 0x3b3   :  { %v1942_v36 = vmax.f32 %v1806_v8, 0.0 }
 0x3b5   :  { %v1977_v24 = vpack.c.bf16 %v1942_v36, %v1941_v13 }
 0x3b6   :  { %v1810_v62 = vpop.f32.mrb[128].mxu0 }
 0x3b7   :  { %v1811_v45 = vadd.f32 %v8253_v21, %v1810_v62  ;;  %v5766_v6 = vpop.f32.mrb[129].mxu0  ;;  %5853 = vmatmul.mubr.bf16.gmra.mrb[196].mxu1 %v1977_v24 }
 0x3b8   :  { %v1813_v39 = vpop.f32.mrb[130].mxu0  ;;  %5856 = vmatprep.mubr.msk.bf16.mxu1 %vm11072_vm13, %v11113_v16 }
 0x3b9   :  { %v1814_v17 = vadd.f32 %v8253_v21, %v1813_v39  ;;  %v5767_v57 = vpop.f32.mrb[131].mxu0  ;;  %v1943_v5 = vmax.f32 %v1811_v45, 0.0 }
 0x3bb   :  { %v1944_v40 = vmax.f32 %v1814_v17, 0.0 }
 0x3bd   :  { %v1978_v61 = vpack.c.bf16 %v1944_v40, %v1943_v5 }
 0x3be   :  { %v1818_v4 = vpop.f32.mrb[132].mxu0 }
 0x3bf   :  { %v1819_v41 = vadd.f32 %v8253_v21, %v1818_v4  ;;  %v5770_v47 = vpop.f32.mrb[133].mxu0  ;;  %5857 = vmatmul.mubr.bf16.gmra.mrb[200].mxu1 %v1978_v61 }
 0x3c0   :  { %v1821_v29 = vpop.f32.mrb[134].mxu0  ;;  %5860 = vmatprep.mubr.msk.bf16.mxu1 %vm11072_vm13, %v11113_v16 }
 0x3c1   :  { %v1822_v10 = vadd.f32 %v8253_v21, %v1821_v29  ;;  %v5771_v35 = vpop.f32.mrb[135].mxu0  ;;  %v1945_v55 = vmax.f32 %v1819_v41, 0.0 }
 0x3c3   :  { %v1946_v27 = vmax.f32 %v1822_v10, 0.0 }
 0x3c5   :  { %v1979_v7 = vpack.c.bf16 %v1946_v27, %v1945_v55 }
 0x3c6   :  { %v1826_v37 = vpop.f32.mrb[136].mxu0 }
 0x3c7   :  { %v1827_v19 = vadd.f32 %v8253_v21, %v1826_v37  ;;  %v5774_v33 = vpop.f32.mrb[137].mxu0  ;;  %5861 = vmatmul.mubr.bf16.gmra.mrb[204].mxu1 %v1979_v7 }
 0x3c8   :  { %v1829_v2 = vpop.f32.mrb[138].mxu0  ;;  %5864 = vmatprep.mubr.msk.bf16.mxu1 %vm11072_vm13, %v11113_v16 }
 0x3c9   :  { %v1830_v20 = vadd.f32 %v8253_v21, %v1829_v2  ;;  %v5775_v3 = vpop.f32.mrb[139].mxu0  ;;  %v1947_v31 = vmax.f32 %v1827_v19, 0.0 }
 0x3cb   :  { %v1948_v9 = vmax.f32 %v1830_v20, 0.0 }
 0x3cd   :  { %v1980_v52 = vpack.c.bf16 %v1948_v9, %v1947_v31 }
 0x3ce   :  { %v1834_v54 = vpop.f32.mrb[140].mxu0 }
 0x3cf   :  { %v1835_v28 = vadd.f32 %v8253_v21, %v1834_v54  ;;  %v5778_v46 = vpop.f32.mrb[141].mxu0  ;;  %5865 = vmatmul.mubr.bf16.gmra.mrb[208].mxu1 %v1980_v52 }
 0x3d0   :  { %v1837_v8 = vpop.f32.mrb[142].mxu0  ;;  %5868 = vmatprep.mubr.msk.bf16.mxu1 %vm11072_vm13, %v11113_v16 }
 0x3d1   :  { %v1838_v59 = vadd.f32 %v8253_v21, %v1837_v8  ;;  %v5779_v13 = vpop.f32.mrb[143].mxu0  ;;  %v1949_v36 = vmax.f32 %v1835_v28, 0.0 }
 0x3d3   :  { %v1950_v24 = vmax.f32 %v1838_v59, 0.0 }
 0x3d5   :  { %v1981_v62 = vpack.c.bf16 %v1950_v24, %v1949_v36 }
 0x3d6   :  { %v1842_v45 = vpop.f32.mrb[144].mxu0 }
 0x3d7   :  { %v1843_v6 = vadd.f32 %v8253_v21, %v1842_v45  ;;  %v5782_v15 = vpop.f32.mrb[145].mxu0  ;;  %5869 = vmatmul.mubr.bf16.gmra.mrb[212].mxu1 %v1981_v62 }
 0x3d8   :  { %v1845_v39 = vpop.f32.mrb[146].mxu0  ;;  %5872 = vmatprep.mubr.msk.bf16.mxu1 %vm11072_vm13, %v11113_v16 }
 0x3d9   :  { %v1846_v17 = vadd.f32 %v8253_v21, %v1845_v39  ;;  %v5783_v57 = vpop.f32.mrb[147].mxu0  ;;  %v1951_v26 = vmax.f32 %v1843_v6, 0.0 }
 0x3db   :  { %v1952_v5 = vmax.f32 %v1846_v17, 0.0 }
 0x3dd   :  { %v1982_v40 = vpack.c.bf16 %v1952_v5, %v1951_v26 }
 0x3de   :  { %v1850_v61 = vpop.f32.mrb[148].mxu0 }
 0x3df   :  { %v1851_v14 = vadd.f32 %v8253_v21, %v1850_v61  ;;  %v5786_v4 = vpop.f32.mrb[149].mxu0  ;;  %5873 = vmatmul.mubr.bf16.gmra.mrb[216].mxu1 %v1982_v40 }
 0x3e0   :  { %v1853_v41 = vpop.f32.mrb[150].mxu0  ;;  %5876 = vmatprep.mubr.msk.bf16.mxu1 %vm11072_vm13, %v11113_v16 }
 0x3e1   :  { %v1854_v47 = vadd.f32 %v8253_v21, %v1853_v41  ;;  %v5787_v29 = vpop.f32.mrb[151].mxu0  ;;  %v1953_v10 = vmax.f32 %v1851_v14, 0.0 }
 0x3e3   :  { %v1954_v35 = vmax.f32 %v1854_v47, 0.0 }
 0x3e5   :  { %v1983_v44 = vpack.c.bf16 %v1954_v35, %v1953_v10 }
 0x3e6   :  { %v1858_v55 = vpop.f32.mrb[152].mxu0 }
 0x3e7   :  { %v1859_v27 = vadd.f32 %v8253_v21, %v1858_v55  ;;  %v5790_v7 = vpop.f32.mrb[153].mxu0  ;;  %5877 = vmatmul.mubr.bf16.gmra.mrb[220].mxu1 %v1983_v44 }
 0x3e8   :  { %v1861_v37 = vpop.f32.mrb[154].mxu0  ;;  %5880 = vmatprep.mubr.msk.bf16.mxu1 %vm11072_vm13, %v11113_v16 }
 0x3e9   :  { %v1862_v19 = vadd.f32 %v8253_v21, %v1861_v37  ;;  %v5791_v33 = vpop.f32.mrb[155].mxu0  ;;  %v1955_v2 = vmax.f32 %v1859_v27, 0.0 }
 0x3eb   :  { %v1956_v20 = vmax.f32 %v1862_v19, 0.0 }
 0x3ed   :  { %v1984_v3 = vpack.c.bf16 %v1956_v20, %v1955_v2 }
 0x3ee   :  { %v1866_v31 = vpop.f32.mrb[156].mxu0 }
 0x3ef   :  { %v1867_v9 = vadd.f32 %v8253_v21, %v1866_v31  ;;  %v5794_v52 = vpop.f32.mrb[157].mxu0  ;;  %5881 = vmatmul.mubr.bf16.gmra.mrb[224].mxu1 %v1984_v3 }
 0x3f0   :  { %v1869_v54 = vpop.f32.mrb[158].mxu0  ;;  %5884 = vmatprep.mubr.msk.bf16.mxu1 %vm11072_vm13, %v11113_v16 }
 0x3f1   :  { %v1870_v28 = vadd.f32 %v8253_v21, %v1869_v54  ;;  %v5795_v46 = vpop.f32.mrb[159].mxu0  ;;  %v1957_v8 = vmax.f32 %v1867_v9, 0.0 }
 0x3f3   :  { %v1958_v59 = vmax.f32 %v1870_v28, 0.0 }
 0x3f5   :  { %v1985_v13 = vpack.c.bf16 %v1958_v59, %v1957_v8 }
 0x3f6   :  { %v1874_v36 = vpop.f32.mrb[160].mxu0 }
 0x3f7   :  { %v1875_v24 = vadd.f32 %v8253_v21, %v1874_v36  ;;  %v5798_v62 = vpop.f32.mrb[161].mxu0  ;;  %5885 = vmatmul.mubr.bf16.gmra.mrb[228].mxu1 %v1985_v13 }
 0x3f8   :  { %v1877_v45 = vpop.f32.mrb[162].mxu0  ;;  %5888 = vmatprep.mubr.msk.bf16.mxu1 %vm11072_vm13, %v11113_v16 }
 0x3f9   :  { %v1878_v6 = vadd.f32 %v8253_v21, %v1877_v45  ;;  %v5799_v15 = vpop.f32.mrb[163].mxu0  ;;  %v1959_v39 = vmax.f32 %v1875_v24, 0.0 }
 0x3fb   :  { %v1960_v17 = vmax.f32 %v1878_v6, 0.0 }
 0x3fd   :  { %v1986_v57 = vpack.c.bf16 %v1960_v17, %v1959_v39 }
 0x3fe   :  { %v1882_v26 = vpop.f32.mrb[164].mxu0 }
 0x3ff   :  { %v1883_v5 = vadd.f32 %v8253_v21, %v1882_v26  ;;  %v5802_v40 = vpop.f32.mrb[165].mxu0  ;;  %5889 = vmatmul.mubr.bf16.gmra.mrb[232].mxu1 %v1986_v57 }
 0x400   :  { %v1885_v61 = vpop.f32.mrb[166].mxu0  ;;  %5892 = vmatprep.mubr.msk.bf16.mxu1 %vm11072_vm13, %v11113_v16 }
 0x401   :  { %v1886_v14 = vadd.f32 %v8253_v21, %v1885_v61  ;;  %v5803_v4 = vpop.f32.mrb[167].mxu0  ;;  %v1961_v41 = vmax.f32 %v1883_v5, 0.0 }
 0x403   :  { %v1962_v47 = vmax.f32 %v1886_v14, 0.0 }
 0x405   :  { %v1987_v29 = vpack.c.bf16 %v1962_v47, %v1961_v41 }
 0x406   :  { %v1890_v10 = vpop.f32.mrb[168].mxu0 }
 0x407   :  { %v1891_v35 = vadd.f32 %v8253_v21, %v1890_v10  ;;  %v5806_v44 = vpop.f32.mrb[169].mxu0  ;;  %5893 = vmatmul.mubr.bf16.gmra.mrb[236].mxu1 %v1987_v29 }
 0x408   :  { %v1893_v55 = vpop.f32.mrb[170].mxu0  ;;  %5896 = vmatprep.mubr.msk.bf16.mxu1 %vm11072_vm13, %v11113_v16 }
 0x409   :  { %v1894_v27 = vadd.f32 %v8253_v21, %v1893_v55  ;;  %v5807_v7 = vpop.f32.mrb[171].mxu0  ;;  %v1963_v37 = vmax.f32 %v1891_v35, 0.0 }
 0x40b   :  { %v1964_v19 = vmax.f32 %v1894_v27, 0.0 }
 0x40d   :  { %v1988_v33 = vpack.c.bf16 %v1964_v19, %v1963_v37 }
 0x40e   :  { %v1898_v2 = vpop.f32.mrb[172].mxu0 }
 0x40f   :  { %v1899_v20 = vadd.f32 %v8253_v21, %v1898_v2  ;;  %v5810_v3 = vpop.f32.mrb[173].mxu0  ;;  %5897 = vmatmul.mubr.bf16.gmra.mrb[240].mxu1 %v1988_v33 }
 0x410   :  { %v1901_v31 = vpop.f32.mrb[174].mxu0  ;;  %5900 = vmatprep.mubr.msk.bf16.mxu1 %vm11072_vm13, %v11113_v16 }
 0x411   :  { %v1902_v9 = vadd.f32 %v8253_v21, %v1901_v31  ;;  %v5811_v52 = vpop.f32.mrb[175].mxu0  ;;  %v1965_v54 = vmax.f32 %v1899_v20, 0.0 }
 0x413   :  { %v1966_v28 = vmax.f32 %v1902_v9, 0.0 }
 0x415   :  { %v1989_v46 = vpack.c.bf16 %v1966_v28, %v1965_v54  ;;  %v8351_v54 = vld [vmem:[%s10759_s12] ss:$0 sm:$0xff] }
 0x416   :  { %v1906_v8 = vpop.f32.mrb[176].mxu0 }
 0x417   :  { %v1907_v59 = vadd.f32 %v8253_v21, %v1906_v8  ;;  %v5814_v13 = vpop.f32.mrb[177].mxu0  ;;  %5901 = vmatmul.mubr.bf16.gmra.mrb[244].mxu1 %v1989_v46 }
 0x418   :  { %v1909_v36 = vpop.f32.mrb[178].mxu0  ;;  %5904 = vmatprep.mubr.msk.bf16.mxu1 %vm11072_vm13, %v11113_v16 }
 0x419   :  { %v1967_v24 = vmax.f32 %v1907_v59, 0.0  ;;  %v1910_v62 = vadd.f32 %v8253_v21, %v1909_v36  ;;  %v5815_v45 = vpop.f32.mrb[179].mxu0 }
 0x41b   :  { %v1968_v6 = vmax.f32 %v1910_v62, 0.0 }
 0x41d   :  { %v1990_v15 = vpack.c.bf16 %v1968_v6, %v1967_v24 }
 0x41e   :  { %v1914_v39 = vpop.f32.mrb[180].mxu0 }
 0x41f   :  { %v1915_v17 = vadd.f32 %v8253_v21, %v1914_v39  ;;  %v5818_v57 = vpop.f32.mrb[181].mxu0  ;;  %5905 = vmatmul.mubr.bf16.gmra.mrb[248].mxu1 %v1990_v15 }
 0x420   :  { %v1917_v26 = vpop.f32.mrb[182].mxu0  ;;  %5908 = vmatprep.mubr.msk.bf16.mxu1 %vm11072_vm13, %v11113_v16 }
 0x421   :  { %v1969_v5 = vmax.f32 %v1915_v17, 0.0  ;;  %v1918_v40 = vadd.f32 %v8253_v21, %v1917_v26  ;;  %v5819_v61 = vpop.f32.mrb[183].mxu0 }
 0x423   :  { %v1970_v14 = vmax.f32 %v1918_v40, 0.0 }
 0x425   :  { %v1991_v4 = vpack.c.bf16 %v1970_v14, %v1969_v5 }
 0x426   :  { %v1922_v41 = vpop.f32.mrb[184].mxu0 }
 0x427   :  { %v1923_v47 = vadd.f32 %v8253_v21, %v1922_v41  ;;  %v5822_v29 = vpop.f32.mrb[185].mxu0  ;;  %5909 = vmatmul.mubr.bf16.gmra.mrb[252].mxu1 %v1991_v4 }
 0x428   :  { %v1925_v10 = vpop.f32.mrb[186].mxu0  ;;  %5912 = vmatprep.mubr.msk.bf16.mxu1 %vm11072_vm13, %v11113_v16 }
 0x429   :  { %v1971_v35 = vmax.f32 %v1923_v47, 0.0  ;;  %v1926_v44 = vadd.f32 %v8253_v21, %v1925_v10  ;;  %v5823_v55 = vpop.f32.mrb[187].mxu0 }
 0x42b   :  { %v1972_v27 = vmax.f32 %v1926_v44, 0.0 }
 0x42d   :  { %v1992_v7 = vpack.c.bf16 %v1972_v27, %v1971_v35 }
 0x42e   :  { %v1930_v37 = vpop.f32.mrb[188].mxu0 }
 0x42f   :  { %v1931_v19 = vadd.f32 %v8253_v21, %v1930_v37  ;;  %v5826_v33 = vpop.f32.mrb[189].mxu0  ;;  %5913 = vmatmul.mubr.bf16.gmra.mrb[0].mxu1 %v1992_v7 }
 0x430   :  { %v1933_v2 = vpop.f32.mrb[190].mxu0  ;;  %5916 = vmatprep.mubr.msk.bf16.mxu1 %vm11072_vm13, %v11113_v16 }
 0x431   :  { %v1973_v20 = vmax.f32 %v1931_v19, 0.0  ;;  %v1934_v3 = vadd.f32 %v8253_v21, %v1933_v2  ;;  %v5827_v31 = vpop.f32.mrb[191].mxu0 }
 0x433   :  { %v1974_v9 = vmax.f32 %v1934_v3, 0.0 }
 0x435   :  { %v1993_v52 = vpack.c.bf16 %v1974_v9, %v1973_v20 }
 0x437   :  { %5917 = vmatmul.mubr.bf16.gmra.mrb[4].mxu1 %v1993_v52 }
 0x47a   :  { %v2099_v28 = vpop.f32.mrb[188].mxu1 }
 0x47b   :  { %v8354_v46 = vadd.f32 %v8351_v54, %v2099_v28  ;;  %v5846_v8 = vpop.f32.mrb[189].mxu1 }
 0x47c   :  { %v2102_v59 = vpop.f32.mrb[190].mxu1 }
 0x47d   :  { %v8357_v13 = vadd.f32 %v8351_v54, %v2102_v59  ;;  %v5847_v36 = vpop.f32.mrb[191].mxu1  ;;  %v2250_v21 = vmax.f32 %v8354_v46, 0.0 }
 0x47f   :  { %v2251_v24 = vmax.f32 %v8357_v13, 0.0 }
 0x481   :  { %v2288_v62 = vpack.c.bf16 %v2251_v24, %v2250_v21 }
 0x482   :  { %v2107_v45 = vpop.f32.mrb[192].mxu1 }
 0x483   :  { %v8362_v6 = vadd.f32 %v8351_v54, %v2107_v45  ;;  %v5850_v15 = vpop.f32.mrb[193].mxu1  ;;  %5937 = vmatmul.mubr.bf16.vlgmr.msra.gmra.mrb[192].mxu0 %v2288_v62 }
 0x484   :  { %v2110_v39 = vpop.f32.mrb[194].mxu1  ;;  %5940 = vmatprep.mubr.msk.bf16.mxu0 %vm11072_vm13, %v11113_v16 }
 0x485   :  { %v8367_v17 = vadd.f32 %v8351_v54, %v2110_v39  ;;  %v5851_v57 = vpop.f32.mrb[195].mxu1  ;;  %v2252_v26 = vmax.f32 %v8362_v6, 0.0 }
 0x487   :  { %v2253_v5 = vmax.f32 %v8367_v17, 0.0 }
 0x489   :  { %v2289_v40 = vpack.c.bf16 %v2253_v5, %v2252_v26 }
 0x48a   :  { %v2115_v61 = vpop.f32.mrb[196].mxu1 }
 0x48b   :  { %v8372_v14 = vadd.f32 %v8351_v54, %v2115_v61  ;;  %v5854_v4 = vpop.f32.mrb[197].mxu1  ;;  %5941 = vmatmul.mubr.bf16.gmra.mrb[196].mxu0 %v2289_v40 }
 0x48c   :  { %v2118_v41 = vpop.f32.mrb[198].mxu1  ;;  %5944 = vmatprep.mubr.msk.bf16.mxu0 %vm11072_vm13, %v11113_v16 }
 0x48d   :  { %v8377_v47 = vadd.f32 %v8351_v54, %v2118_v41  ;;  %v5855_v29 = vpop.f32.mrb[199].mxu1  ;;  %v2254_v10 = vmax.f32 %v8372_v14, 0.0 }
 0x48f   :  { %v2255_v35 = vmax.f32 %v8377_v47, 0.0 }
 0x491   :  { %v2290_v44 = vpack.c.bf16 %v2255_v35, %v2254_v10 }
 0x492   :  { %v2123_v55 = vpop.f32.mrb[200].mxu1 }
 0x493   :  { %v8382_v27 = vadd.f32 %v8351_v54, %v2123_v55  ;;  %v5858_v7 = vpop.f32.mrb[201].mxu1  ;;  %5945 = vmatmul.mubr.bf16.gmra.mrb[200].mxu0 %v2290_v44 }
 0x494   :  { %v2126_v37 = vpop.f32.mrb[202].mxu1  ;;  %5948 = vmatprep.mubr.msk.bf16.mxu0 %vm11072_vm13, %v11113_v16 }
 0x495   :  { %v8387_v19 = vadd.f32 %v8351_v54, %v2126_v37  ;;  %v5859_v33 = vpop.f32.mrb[203].mxu1  ;;  %v2256_v2 = vmax.f32 %v8382_v27, 0.0 }
 0x497   :  { %v2257_v20 = vmax.f32 %v8387_v19, 0.0 }
 0x499   :  { %v2291_v3 = vpack.c.bf16 %v2257_v20, %v2256_v2 }
 0x49a   :  { %v2131_v31 = vpop.f32.mrb[204].mxu1 }
 0x49b   :  { %v8392_v9 = vadd.f32 %v8351_v54, %v2131_v31  ;;  %v5862_v52 = vpop.f32.mrb[205].mxu1  ;;  %5949 = vmatmul.mubr.bf16.gmra.mrb[204].mxu0 %v2291_v3 }
 0x49c   :  { %v2134_v28 = vpop.f32.mrb[206].mxu1  ;;  %5952 = vmatprep.mubr.msk.bf16.mxu0 %vm11072_vm13, %v11113_v16 }
 0x49d   :  { %v8397_v8 = vadd.f32 %v8351_v54, %v2134_v28  ;;  %v5863_v59 = vpop.f32.mrb[207].mxu1  ;;  %v2258_v36 = vmax.f32 %v8392_v9, 0.0 }
 0x49f   :  { %v2259_v21 = vmax.f32 %v8397_v8, 0.0 }
 0x4a1   :  { %v2292_v24 = vpack.c.bf16 %v2259_v21, %v2258_v36 }
 0x4a2   :  { %v2139_v62 = vpop.f32.mrb[208].mxu1 }
 0x4a3   :  { %v8402_v45 = vadd.f32 %v8351_v54, %v2139_v62  ;;  %v5866_v15 = vpop.f32.mrb[209].mxu1  ;;  %5953 = vmatmul.mubr.bf16.gmra.mrb[208].mxu0 %v2292_v24 }
 0x4a4   :  { %v2142_v39 = vpop.f32.mrb[210].mxu1  ;;  %5956 = vmatprep.mubr.msk.bf16.mxu0 %vm11072_vm13, %v11113_v16 }
 0x4a5   :  { %v8407_v57 = vadd.f32 %v8351_v54, %v2142_v39  ;;  %v5867_v26 = vpop.f32.mrb[211].mxu1  ;;  %v2260_v5 = vmax.f32 %v8402_v45, 0.0 }
 0x4a7   :  { %v2261_v40 = vmax.f32 %v8407_v57, 0.0 }
 0x4a9   :  { %v2293_v61 = vpack.c.bf16 %v2261_v40, %v2260_v5 }
 0x4aa   :  { %v2147_v4 = vpop.f32.mrb[212].mxu1 }
 0x4ab   :  { %v8412_v41 = vadd.f32 %v8351_v54, %v2147_v4  ;;  %v5870_v29 = vpop.f32.mrb[213].mxu1  ;;  %5957 = vmatmul.mubr.bf16.gmra.mrb[212].mxu0 %v2293_v61 }
 0x4ac   :  { %v2150_v10 = vpop.f32.mrb[214].mxu1  ;;  %5960 = vmatprep.mubr.msk.bf16.mxu0 %vm11072_vm13, %v11113_v16 }
 0x4ad   :  { %v8417_v35 = vadd.f32 %v8351_v54, %v2150_v10  ;;  %v5871_v44 = vpop.f32.mrb[215].mxu1  ;;  %v2262_v55 = vmax.f32 %v8412_v41, 0.0 }
 0x4af   :  { %v2263_v7 = vmax.f32 %v8417_v35, 0.0 }
 0x4b1   :  { %v2294_v37 = vpack.c.bf16 %v2263_v7, %v2262_v55 }
 0x4b2   :  { %v2155_v33 = vpop.f32.mrb[216].mxu1 }
 0x4b3   :  { %v8422_v2 = vadd.f32 %v8351_v54, %v2155_v33  ;;  %v5874_v20 = vpop.f32.mrb[217].mxu1  ;;  %5961 = vmatmul.mubr.bf16.gmra.mrb[216].mxu0 %v2294_v37 }
 0x4b4   :  { %v2158_v3 = vpop.f32.mrb[218].mxu1  ;;  %5964 = vmatprep.mubr.msk.bf16.mxu0 %vm11072_vm13, %v11113_v16 }
 0x4b5   :  { %v8427_v31 = vadd.f32 %v8351_v54, %v2158_v3  ;;  %v5875_v52 = vpop.f32.mrb[219].mxu1  ;;  %v2264_v28 = vmax.f32 %v8422_v2, 0.0 }
 0x4b7   :  { %v2265_v59 = vmax.f32 %v8427_v31, 0.0 }
 0x4b9   :  { %v2295_v36 = vpack.c.bf16 %v2265_v59, %v2264_v28 }
 0x4ba   :  { %v2163_v21 = vpop.f32.mrb[220].mxu1 }
 0x4bb   :  { %v8432_v24 = vadd.f32 %v8351_v54, %v2163_v21  ;;  %v5878_v62 = vpop.f32.mrb[221].mxu1  ;;  %5965 = vmatmul.mubr.bf16.gmra.mrb[220].mxu0 %v2295_v36 }
 0x4bc   :  { %v2166_v15 = vpop.f32.mrb[222].mxu1  ;;  %5968 = vmatprep.mubr.msk.bf16.mxu0 %vm11072_vm13, %v11113_v16 }
 0x4bd   :  { %v8437_v39 = vadd.f32 %v8351_v54, %v2166_v15  ;;  %v5879_v26 = vpop.f32.mrb[223].mxu1  ;;  %v2266_v5 = vmax.f32 %v8432_v24, 0.0 }
 0x4bf   :  { %v2267_v40 = vmax.f32 %v8437_v39, 0.0 }
 0x4c1   :  { %v2296_v61 = vpack.c.bf16 %v2267_v40, %v2266_v5 }
 0x4c2   :  { %v2171_v4 = vpop.f32.mrb[224].mxu1 }
 0x4c3   :  { %v8442_v29 = vadd.f32 %v8351_v54, %v2171_v4  ;;  %v5882_v10 = vpop.f32.mrb[225].mxu1  ;;  %5969 = vmatmul.mubr.bf16.gmra.mrb[224].mxu0 %v2296_v61 }
 0x4c4   :  { %v2174_v44 = vpop.f32.mrb[226].mxu1  ;;  %5972 = vmatprep.mubr.msk.bf16.mxu0 %vm11072_vm13, %v11113_v16 }
 0x4c5   :  { %v8447_v55 = vadd.f32 %v8351_v54, %v2174_v44  ;;  %v5883_v7 = vpop.f32.mrb[227].mxu1  ;;  %v2268_v37 = vmax.f32 %v8442_v29, 0.0 }
 0x4c7   :  { %v2269_v33 = vmax.f32 %v8447_v55, 0.0 }
 0x4c9   :  { %v2297_v20 = vpack.c.bf16 %v2269_v33, %v2268_v37 }
 0x4ca   :  { %v2179_v3 = vpop.f32.mrb[228].mxu1 }
 0x4cb   :  { %v8452_v52 = vadd.f32 %v8351_v54, %v2179_v3  ;;  %v5886_v28 = vpop.f32.mrb[229].mxu1  ;;  %5973 = vmatmul.mubr.bf16.gmra.mrb[228].mxu0 %v2297_v20 }
 0x4cc   :  { %v2182_v59 = vpop.f32.mrb[230].mxu1  ;;  %5976 = vmatprep.mubr.msk.bf16.mxu0 %vm11072_vm13, %v11113_v16 }
 0x4cd   :  { %v8457_v36 = vadd.f32 %v8351_v54, %v2182_v59  ;;  %v5887_v21 = vpop.f32.mrb[231].mxu1  ;;  %v2270_v62 = vmax.f32 %v8452_v52, 0.0 }
 0x4cf   :  { %v2271_v15 = vmax.f32 %v8457_v36, 0.0 }
 0x4d1   :  { %v2298_v26 = vpack.c.bf16 %v2271_v15, %v2270_v62 }
 0x4d2   :  { %v2187_v5 = vpop.f32.mrb[232].mxu1 }
 0x4d3   :  { %v8462_v40 = vadd.f32 %v8351_v54, %v2187_v5  ;;  %v5890_v61 = vpop.f32.mrb[233].mxu1  ;;  %5977 = vmatmul.mubr.bf16.gmra.mrb[232].mxu0 %v2298_v26 }
 0x4d4   :  { %v2190_v4 = vpop.f32.mrb[234].mxu1  ;;  %5980 = vmatprep.mubr.msk.bf16.mxu0 %vm11072_vm13, %v11113_v16 }
 0x4d5   :  { %v8467_v10 = vadd.f32 %v8351_v54, %v2190_v4  ;;  %v5891_v44 = vpop.f32.mrb[235].mxu1  ;;  %v2272_v7 = vmax.f32 %v8462_v40, 0.0 }
 0x4d7   :  { %v2273_v37 = vmax.f32 %v8467_v10, 0.0 }
 0x4d9   :  { %v2299_v33 = vpack.c.bf16 %v2273_v37, %v2272_v7 }
 0x4da   :  { %v2195_v20 = vpop.f32.mrb[236].mxu1 }
 0x4db   :  { %v8472_v3 = vadd.f32 %v8351_v54, %v2195_v20  ;;  %v5894_v28 = vpop.f32.mrb[237].mxu1  ;;  %5981 = vmatmul.mubr.bf16.gmra.mrb[236].mxu0 %v2299_v33 }
 0x4dc   :  { %v2198_v59 = vpop.f32.mrb[238].mxu1  ;;  %5984 = vmatprep.mubr.msk.bf16.mxu0 %vm11072_vm13, %v11113_v16 }
 0x4dd   :  { %v8477_v21 = vadd.f32 %v8351_v54, %v2198_v59  ;;  %v5895_v62 = vpop.f32.mrb[239].mxu1  ;;  %v2274_v15 = vmax.f32 %v8472_v3, 0.0 }
 0x4df   :  { %v2275_v26 = vmax.f32 %v8477_v21, 0.0 }
 0x4e1   :  { %v2300_v5 = vpack.c.bf16 %v2275_v26, %v2274_v15 }
 0x4e2   :  { %v2203_v61 = vpop.f32.mrb[240].mxu1 }
 0x4e3   :  { %v8482_v4 = vadd.f32 %v8351_v54, %v2203_v61  ;;  %v5898_v44 = vpop.f32.mrb[241].mxu1  ;;  %5985 = vmatmul.mubr.bf16.gmra.mrb[240].mxu0 %v2300_v5 }
 0x4e4   :  { %v2206_v7 = vpop.f32.mrb[242].mxu1  ;;  %5988 = vmatprep.mubr.msk.bf16.mxu0 %vm11072_vm13, %v11113_v16 }
 0x4e5   :  { %v8487_v37 = vadd.f32 %v8351_v54, %v2206_v7  ;;  %v5899_v33 = vpop.f32.mrb[243].mxu1  ;;  %v2276_v20 = vmax.f32 %v8482_v4, 0.0 }
 0x4e7   :  { %v2277_v28 = vmax.f32 %v8487_v37, 0.0 }
 0x4e9   :  { %v2301_v59 = vpack.c.bf16 %v2277_v28, %v2276_v20 }
 0x4ea   :  { %v2211_v62 = vpop.f32.mrb[244].mxu1 }
 0x4eb   :  { %v8492_v15 = vadd.f32 %v8351_v54, %v2211_v62  ;;  %v5902_v26 = vpop.f32.mrb[245].mxu1  ;;  %5989 = vmatmul.mubr.bf16.gmra.mrb[244].mxu0 %v2301_v59 }
 0x4ec   :  { %v2214_v5 = vpop.f32.mrb[246].mxu1  ;;  %5992 = vmatprep.mubr.msk.bf16.mxu0 %vm11072_vm13, %v11113_v16 }
 0x4ed   :  { %v8497_v61 = vadd.f32 %v8351_v54, %v2214_v5  ;;  %v5903_v44 = vpop.f32.mrb[247].mxu1  ;;  %v2278_v7 = vmax.f32 %v8492_v15, 0.0 }
 0x4ef   :  { %v2279_v33 = vmax.f32 %v8497_v61, 0.0 }
 0x4f1   :  { %v2302_v43 = vpack.c.bf16 %v2279_v33, %v2278_v7 }
 0x4f2   :  { %v2219_v20 = vpop.f32.mrb[248].mxu1 }
 0x4f3   :  { %v8502_v28 = vadd.f32 %v8351_v54, %v2219_v20  ;;  %v5906_v62 = vpop.f32.mrb[249].mxu1  ;;  %5993 = vmatmul.mubr.bf16.gmra.mrb[248].mxu0 %v2302_v43 }
 0x4f4   :  { %v2222_v59 = vpop.f32.mrb[250].mxu1  ;;  %5996 = vmatprep.mubr.msk.bf16.mxu0 %vm11072_vm13, %v11113_v16 }
 0x4f5   :  { %v8507_v26 = vadd.f32 %v8351_v54, %v2222_v59  ;;  %v5907_v5 = vpop.f32.mrb[251].mxu1  ;;  %v2280_v44 = vmax.f32 %v8502_v28, 0.0 }
 0x4f7   :  { %v2281_v49 = vmax.f32 %v8507_v26, 0.0 }
 0x4f9   :  { %v2303_v23 = vpack.c.bf16 %v2281_v49, %v2280_v44 }
 0x4fa   :  { %v2227_v7 = vpop.f32.mrb[252].mxu1 }
 0x4fb   :  { %v8512_v33 = vadd.f32 %v8351_v54, %v2227_v7  ;;  %v5910_v20 = vpop.f32.mrb[253].mxu1  ;;  %5997 = vmatmul.mubr.bf16.gmra.mrb[252].mxu0 %v2303_v23 }
 0x4fc   :  { %v2230_v43 = vpop.f32.mrb[254].mxu1  ;;  %6000 = vmatprep.mubr.msk.bf16.mxu0 %vm11072_vm13, %v11113_v16 }
 0x4fd   :  { %v2282_v62 = vmax.f32 %v8512_v33, 0.0  ;;  %v8518_v59 = vadd.f32 %v8351_v54, %v2230_v43  ;;  %v5911_v5 = vpop.f32.mrb[255].mxu1 }
 0x4ff   :  { %v2283_v22 = vmax.f32 %v8518_v59, 0.0 }
 0x501   :  { %v2304_v34 = vpack.c.bf16 %v2283_v22, %v2282_v62  ;;  %v2563_v22 = vsub.f32 0.0, %v8354_v46  ;;  %v2564_v46 = vsub.f32 0.0, %v8357_v13  ;;  %v2570_v13 = vsub.f32 0.0, %v8387_v19 }
 0x502   :  { %v2235_v49 = vpop.f32.mrb[0].mxu1  ;;  %v2575_v19 = vsub.f32 0.0, %v8412_v41 }
 0x503   :  { %v8522_v44 = vadd.f32 %v8351_v54, %v2235_v49  ;;  %v5914_v7 = vpop.f32.mrb[1].mxu1  ;;  %6001 = vmatmul.mubr.bf16.gmra.mrb[0].mxu0 %v2304_v34  ;;  %v2601_v30 = vmul.f32 1.442695, %v2563_v22 }
 0x504   :  { %v2238_v23 = vpop.f32.mrb[2].mxu1  ;;  %6004 = vmatprep.mubr.msk.bf16.mxu0 %vm11072_vm13, %v11113_v16 }
 0x505   :  { %v2284_v20 = vmax.f32 %v8522_v44, 0.0  ;;  %v8528_v58 = vadd.f32 %v8351_v54, %v2238_v23  ;;  %v5915_v43 = vpop.f32.mrb[3].mxu1  ;;  %6210 = vpow2.f32 %v2601_v30 }
 0x507   :  { %v2285_v5 = vmax.f32 %v8528_v58, 0.0 }
 0x509   :  { %v2305_v62 = vpack.c.bf16 %v2285_v5, %v2284_v20  ;;  %v2565_v20 = vsub.f32 0.0, %v8362_v6  ;;  %v2566_v5 = vsub.f32 0.0, %v8367_v17  ;;  %v2571_v6 = vsub.f32 0.0, %v8392_v9 }
 0x50a   :  { %v2243_v32 = vpop.f32.mrb[4].mxu1 }
 0x50b   :  { %v8533_v49 = vadd.f32 %v8351_v54, %v2243_v32  ;;  %v5918_v34 = vpop.f32.mrb[5].mxu1  ;;  %6005 = vmatmul.mubr.bf16.gmra.mrb[4].mxu0 %v2305_v62  ;;  %v2567_v62 = vsub.f32 0.0, %v8372_v14  ;;  %v2605_v22 = vmul.f32 1.442695, %v2565_v20  ;;  %v2607_v60 = vmul.f32 1.442695, %v2566_v5 }
 0x50c   :  { %v2246_v7 = vpop.f32.mrb[6].mxu1  ;;  %6008 = vmatprep.mubr.msk.bf16.mxu0 %vm11072_vm13, %v11113_v16  ;;  %v2603_v16 = vmul.f32 1.442695, %v2564_v46  ;;  %v2615_v14 = vmul.f32 1.442695, %v2570_v13  ;;  %v2572_v20 = vsub.f32 0.0, %v8397_v8 }
 0x50d   :  { %v2286_v23 = vmax.f32 %v8533_v49, 0.0  ;;  %v8539_v43 = vadd.f32 %v8351_v54, %v2246_v7  ;;  %v5919_v25 = vpop.f32.mrb[7].mxu1  ;;  %v2568_v54 = vsub.f32 0.0, %v8377_v47  ;;  %v2609_v7 = vmul.f32 1.442695, %v2567_v62 }
 0x50e   :  { %v2569_v25 = vsub.f32 0.0, %v8382_v27  ;;  %6212 = vpow2.f32 %v2603_v16  ;;  %v2617_v46 = vmul.f32 1.442695, %v2571_v6  ;;  %v2573_v47 = vsub.f32 0.0, %v8402_v45 }
 0x50f   :  { %v2287_v32 = vmax.f32 %v8539_v43, 0.0  ;;  %6214 = vpow2.f32 %v2605_v22  ;;  %v2611_v30 = vmul.f32 1.442695, %v2568_v54  ;;  %v2574_v27 = vsub.f32 0.0, %v8407_v57 }
 0x510   :  { %6216 = vpow2.f32 %v2607_v60  ;;  %v2613_v17 = vmul.f32 1.442695, %v2569_v25  ;;  %v2619_v60 = vmul.f32 1.442695, %v2572_v20  ;;  %v2621_v5 = vmul.f32 1.442695, %v2573_v47 }
 0x511   :  { %v2306_v34 = vpack.c.bf16 %v2287_v32, %v2286_v23  ;;  %6218 = vpow2.f32 %v2609_v7  ;;  %v6211_v23 = vpop.eup %6210  ;;  %v2625_v22 = vmul.f32 1.442695, %v2575_v19  ;;  %v2576_v45 = vsub.f32 0.0, %v8417_v35 }
 0x512   :  { %6220 = vpow2.f32 %v2611_v30  ;;  %v2677_v32 = vadd.f32 1.0, %v6211_v23  ;;  %v2577_v57 = vsub.f32 0.0, %v8422_v2  ;;  %v2578_v35 = vsub.f32 0.0, %v8427_v31 }
 0x513   :  { %6009 = vmatmul.mubr.bf16.gmra.mrb[8].mxu0 %v2306_v34  ;;  %6222 = vpow2.f32 %v2613_v17  ;;  %v2623_v34 = vmul.f32 1.442695, %v2574_v27  ;;  %v2627_v30 = vmul.f32 1.442695, %v2576_v45  ;;  %v2579_v2 = vsub.f32 0.0, %v8432_v24 }
 0x514   :  { %6224 = vpow2.f32 %v2615_v14  ;;  %v2629_v14 = vmul.f32 1.442695, %v2577_v57  ;;  %v2580_v27 = vsub.f32 0.0, %v8437_v39  ;;  %v2583_v57 = vsub.f32 0.0, %v8452_v52 }
 0x515   :  { %6226 = vpow2.f32 %v2617_v46  ;;  %vm10936_vm13 = vcmp.eq.s32.totalorder %v7688_v11, 1 }
 0x516   :  { %6228 = vrcp.f32 %v2677_v32  ;;  %v2635_v31 = vmul.f32 1.442695, %v2580_v27 }
 0x517   :  { %6230 = vpow2.f32 %v2619_v60 }
 0x518   :  { %v6213_v9 = vpop.eup %6212  ;;  %6232 = vpow2.f32 %v2621_v5 }
 0x519   :  { %v6215_v62 = vpop.eup %6214  ;;  %v2678_v54 = vadd.f32 1.0, %v6213_v9  ;;  %6234 = vpow2.f32 %v2623_v34  ;;  %v2631_v9 = vmul.f32 1.442695, %v2578_v35  ;;  %v2586_v35 = vsub.f32 0.0, %v8467_v10 }
 0x51a   :  { %v6217_v16 = vpop.eup %6216  ;;  %v2679_v7 = vadd.f32 1.0, %v6215_v62  ;;  %6236 = vpow2.f32 %v2625_v22  ;;  %v2633_v62 = vmul.f32 1.442695, %v2579_v2  ;;  %v2581_v22 = vsub.f32 0.0, %v8442_v29 }
 0x51b   :  { %v6219_v8 = vpop.eup %6218  ;;  %v2680_v25 = vadd.f32 1.0, %v6217_v16  ;;  %6238 = vrcp.f32 %v2678_v54  ;;  %v2582_v54 = vsub.f32 0.0, %v8447_v55  ;;  %v2587_v2 = vsub.f32 0.0, %v8472_v3 }
 0x51c   :  { %v6221_v41 = vpop.eup %6220  ;;  %v2681_v13 = vadd.f32 1.0, %v6219_v8  ;;  %6240 = vrcp.f32 %v2679_v7  ;;  %v2637_v29 = vmul.f32 1.442695, %v2581_v22  ;;  %v2589_v3 = vsub.f32 0.0, %v8482_v4 }
 0x51d   :  { %v6223_v6 = vpop.eup %6222  ;;  %6242 = vrcp.f32 %v2680_v25  ;;  %v2682_v46 = vadd.f32 1.0, %v6221_v41 }
 0x51e   :  { %v6225_v17 = vpop.eup %6224  ;;  %6244 = vrcp.f32 %v2681_v13  ;;  %v2683_v20 = vadd.f32 1.0, %v6223_v6  ;;  %v2584_v13 = vsub.f32 0.0, %v8457_v36  ;;  %v2653_v4 = vmul.f32 1.442695, %v2589_v3 }
 0x51f   :  { %v6227_v23 = vpop.eup %6226  ;;  %v2684_v47 = vadd.f32 1.0, %v6225_v17  ;;  %6246 = vpow2.f32 %v2627_v30  ;;  %v2639_v17 = vmul.f32 1.442695, %v2582_v54  ;;  %v2591_v54 = vsub.f32 0.0, %v8492_v15 }
 0x520   :  { %v8559_v32 = vpop.eup %6228  ;;  %v2685_v19 = vadd.f32 1.0, %v6227_v23  ;;  %6248 = vpow2.f32 %v2629_v14  ;;  %v2641_v14 = vmul.f32 1.442695, %v2583_v57  ;;  %v2585_v23 = vsub.f32 0.0, %v8462_v40 }
 0x521   :  { %v6231_v60 = vpop.eup %6230  ;;  %6250 = vrcp.f32 %v2682_v46  ;;  %v2643_v52 = vmul.f32 1.442695, %v2584_v13 }
 0x522   :  { %v6233_v5 = vpop.eup %6232  ;;  %6252 = vrcp.f32 %v2683_v20  ;;  %v2686_v24 = vadd.f32 1.0, %v6231_v60  ;;  %v2645_v40 = vmul.f32 1.442695, %v2585_v23 }
 0x523   :  { %v6235_v34 = vpop.eup %6234  ;;  %6254 = vrcp.f32 %v2684_v47  ;;  %v2687_v39 = vadd.f32 1.0, %v6233_v5  ;;  %v2647_v5 = vmul.f32 1.442695, %v2586_v35 }
 0x524   :  { %v6237_v16 = vpop.eup %6236  ;;  %6256 = vrcp.f32 %v2685_v19  ;;  %v2688_v7 = vadd.f32 1.0, %v6235_v34  ;;  %v2588_v19 = vsub.f32 0.0, %v8477_v21  ;;  %v2590_v21 = vsub.f32 0.0, %v8487_v37 }
 0x525   :  { %v8562_v8 = vpop.eup %6238  ;;  %6258 = vpow2.f32 %v2631_v9  ;;  %v2689_v41 = vadd.f32 1.0, %v6237_v16 }
 0x526   :  { %v8565_v45 = vpop.eup %6240  ;;  %6260 = vpow2.f32 %v2633_v62  ;;  %v2649_v62 = vmul.f32 1.442695, %v2587_v2 }
 0x527   :  { %v8568_v25 = vpop.eup %6242  ;;  %6262 = vpow2.f32 %v2635_v31  ;;  %v2651_v31 = vmul.f32 1.442695, %v2588_v19 }
 0x528   :  { %v8571_v6 = vpop.eup %6244  ;;  %6264 = vrcp.f32 %v2686_v24 }
 0x529   :  { %v6247_v30 = vpop.eup %6246  ;;  %6266 = vrcp.f32 %v2687_v39 }
 0x52a   :  { %v6249_v55 = vpop.eup %6248  ;;  %6268 = vrcp.f32 %v2688_v7  ;;  %v2690_v36 = vadd.f32 1.0, %v6247_v30  ;;  %v2655_v30 = vmul.f32 1.442695, %v2590_v21 }
 0x52b   :  { %v8574_v46 = vpop.eup %6250  ;;  %6270 = vrcp.f32 %v2689_v41  ;;  %v2691_v27 = vadd.f32 1.0, %v6249_v55  ;;  %v2592_v41 = vsub.f32 0.0, %v8497_v61 }
 0x52c   :  { %v8577_v20 = vpop.eup %6252  ;;  %6272 = vpow2.f32 %v2637_v29 }
 0x52d   :  { %v8580_v47 = vpop.eup %6254  ;;  %6274 = vpow2.f32 %v2639_v17  ;;  %v2657_v17 = vmul.f32 1.442695, %v2591_v54  ;;  %v2597_v54 = vsub.f32 0.0, %v8522_v44 }
 0x52e   :  { %v8583_v60 = vpop.eup %6256  ;;  %6276 = vpow2.f32 %v2641_v14  ;;  %v2659_v14 = vmul.f32 1.442695, %v2592_v41 }
 0x52f   :  { %v6259_v9 = vpop.eup %6258  ;;  %6278 = vpow2.f32 %v2643_v52  ;;  %v2593_v52 = vsub.f32 0.0, %v8502_v28 }
 0x530   :  { %v6261_v10 = vpop.eup %6260  ;;  %6280 = vrcp.f32 %v2690_v36  ;;  %v2692_v24 = vadd.f32 1.0, %v6259_v9  ;;  %v2594_v36 = vsub.f32 0.0, %v8507_v26 }
 0x531   :  { %v6263_v34 = vpop.eup %6262  ;;  %6282 = vrcp.f32 %v2691_v27  ;;  %v2693_v39 = vadd.f32 1.0, %v6261_v10 }
 0x532   :  { %v8586_v16 = vpop.eup %6264  ;;  %6284 = vpow2.f32 %v2645_v40  ;;  %v2694_v57 = vadd.f32 1.0, %v6263_v34 }
 0x533   :  { %v8589_v22 = vpop.eup %6266  ;;  %6286 = vpow2.f32 %v2647_v5  ;;  %v2661_v5 = vmul.f32 1.442695, %v2593_v52 }
 0x534   :  { %v8592_v7 = vpop.eup %6268  ;;  %6288 = vpow2.f32 %v2649_v62  ;;  %v2663_v62 = vmul.f32 1.442695, %v2594_v36  ;;  %v2600_v36 = vsub.f32 0.0, %v8539_v43 }
 0x535   :  { %v8595_v13 = vpop.eup %6270  ;;  %6290 = vpow2.f32 %v2651_v31  ;;  %v2595_v31 = vsub.f32 0.0, %v8512_v33 }
 0x536   :  { %v6273_v29 = vpop.eup %6272  ;;  %6292 = vrcp.f32 %v2692_v24  ;;  %v2596_v24 = vsub.f32 0.0, %v8518_v59 }
 0x537   :  { %v6275_v37 = vpop.eup %6274  ;;  %6294 = vrcp.f32 %v2693_v39  ;;  %v2695_v23 = vadd.f32 1.0, %v6273_v29  ;;  %v2665_v29 = vmul.f32 1.442695, %v2595_v31 }
 0x538   :  { %v6277_v55 = vpop.eup %6276  ;;  %6296 = vrcp.f32 %v2694_v57  ;;  %v2696_v61 = vadd.f32 1.0, %v6275_v37 }
 0x539   :  { %v6279_v15 = vpop.eup %6278  ;;  %6298 = vpow2.f32 %v2653_v4  ;;  %v2697_v27 = vadd.f32 1.0, %v6277_v55 }
 0x53a   :  { %v8598_v35 = vpop.eup %6280  ;;  %6300 = vpow2.f32 %v2655_v30  ;;  %v2698_v40 = vadd.f32 1.0, %v6279_v15  ;;  %v2667_v30 = vmul.f32 1.442695, %v2596_v24 }
 0x53b   :  { %v8601_v2 = vpop.eup %6282  ;;  %6302 = vpow2.f32 %v2657_v17  ;;  %v2669_v17 = vmul.f32 1.442695, %v2597_v54 }
 0x53c   :  { %v6285_v19 = vpop.eup %6284  ;;  %6304 = vpow2.f32 %v2659_v14  ;;  %v2598_v14 = vsub.f32 0.0, %v8528_v58 }
 0x53d   :  { %v6287_v9 = vpop.eup %6286  ;;  %6306 = vrcp.f32 %v2695_v23  ;;  %v2699_v34 = vadd.f32 1.0, %v6285_v19  ;;  %v2599_v23 = vsub.f32 0.0, %v8533_v49 }
 0x53e   :  { %v6289_v10 = vpop.eup %6288  ;;  %6308 = vrcp.f32 %v2696_v61  ;;  %v2700_v26 = vadd.f32 1.0, %v6287_v9  ;;  %v2671_v9 = vmul.f32 1.442695, %v2598_v14 }
 0x53f   :  { %v6291_v28 = vpop.eup %6290  ;;  %6310 = vrcp.f32 %v2697_v27  ;;  %v2701_v39 = vadd.f32 1.0, %v6289_v10  ;;  %v8622_v27 = vld [vmem:[%s10761_s14] ss:$0 sm:$0xff]  ;;  %v2673_v10 = vmul.f32 1.442695, %v2599_v23 }
 0x540   :  { %v8604_v3 = vpop.eup %6292  ;;  %6312 = vrcp.f32 %v2698_v40  ;;  %v2702_v41 = vadd.f32 1.0, %v6291_v28 }
 0x541   :  { %v8607_v21 = vpop.eup %6294  ;;  %6314 = vpow2.f32 %v2661_v5 }
 0x542   :  { %v8610_v57 = vpop.eup %6296  ;;  %6316 = vpow2.f32 %v2663_v62 }
 0x543   :  { %v6299_v4 = vpop.eup %6298  ;;  %6318 = vrcp.f32 %v2699_v34  ;;  %v2675_v34 = vmul.f32 1.442695, %v2600_v36 }
 0x544   :  { %v6301_v33 = vpop.eup %6300  ;;  %6320 = vrcp.f32 %v2700_v26  ;;  %v2703_v55 = vadd.f32 1.0, %v6299_v4 }
 0x545   :  { %v6303_v37 = vpop.eup %6302  ;;  %6322 = vrcp.f32 %v2701_v39  ;;  %v2704_v44 = vadd.f32 1.0, %v6301_v33 }
 0x546   :  { %v6305_v59 = vpop.eup %6304  ;;  %6324 = vrcp.f32 %v2702_v41  ;;  %v2705_v61 = vadd.f32 1.0, %v6303_v37 }
 0x547   :  { %v8613_v15 = vpop.eup %6306  ;;  %6326 = vpow2.f32 %v2665_v29  ;;  %v2706_v58 = vadd.f32 1.0, %v6305_v59 }
 0x548   :  { %v8616_v52 = vpop.eup %6308  ;;  %6328 = vpow2.f32 %v2667_v30 }
 0x549   :  { %v8624_v19 = vpop.eup %6310  ;;  %6330 = vpow2.f32 %v2669_v17 }
 0x54a   :  { %v8626_v40 = vpop.eup %6312  ;;  %6332 = vrcp.f32 %v2703_v55 }
 0x54b   :  { %v6315_v5 = vpop.eup %6314  ;;  %6334 = vrcp.f32 %v2704_v44 }
 0x54c   :  { %v6317_v28 = vpop.eup %6316  ;;  %6336 = vrcp.f32 %v2705_v61  ;;  %v2707_v4 = vadd.f32 1.0, %v6315_v5 }
 0x54d   :  { %v8631_v26 = vpop.eup %6318  ;;  %6338 = vrcp.f32 %v2706_v58  ;;  %v2708_v30 = vadd.f32 1.0, %v6317_v28 }
 0x54e   :  { %v8637_v41 = vpop.eup %6320  ;;  %6340 = vpow2.f32 %v2671_v9 }
 0x54f   :  { %v8640_v33 = vpop.eup %6322  ;;  %6342 = vpow2.f32 %v2673_v10 }
 0x550   :  { %v8642_v17 = vpop.eup %6324  ;;  %6344 = vpow2.f32 %v2675_v34 }
 0x551   :  { %11218 = vst [vmem:[#allocation83_spill] sm:$0xff] %v8642_v17  ;;  %v6327_v14 = vpop.eup %6326 }
 0x552   :  { %v6329_v44 = vpop.eup %6328 }
 0x553   :  { %v6331_v58 = vpop.eup %6330 }
 0x554   :  { %v8650_v10 = vpop.eup %6332 }
 0x555   :  { %11219 = vst [vmem:[#allocation84_spill] sm:$0xff] %v8650_v10  ;;  %v8652_v34 = vpop.eup %6334 }
 0x556   :  { %v2412_v49 = vpop.f32.mrb[192].mxu0  ;;  %11220 = vst [vmem:[#allocation85_spill] sm:$0xff] %v8652_v34 }
 0x557   :  { %v8629_v62 = vadd.f32 %v8622_v27, %v2412_v49  ;;  %v5938_v43 = vpop.f32.mrb[193].mxu0 }
 0x558   :  { %v2415_v31 = vpop.f32.mrb[194].mxu0  ;;  %v2709_v43 = vadd.f32 1.0, %v6327_v14 }
 0x559   :  { %v2791_v24 = vsub.f32 0.0, %v8629_v62  ;;  %v8635_v39 = vadd.f32 %v8622_v27, %v2415_v31  ;;  %v5939_v54 = vpop.f32.mrb[195].mxu0  ;;  %v3209_v29 = vmin.f32 %v8629_v62, 20.0  ;;  %v3133_v23 = vmul.f32 1.442695, %v8629_v62 }
 0x55a   :  { %v2710_v31 = vadd.f32 1.0, %v6329_v44  ;;  %vm10934_vm0 = vcmp.gt.f32.partialorder %v8629_v62, 20.0 }
 0x55b   :  { %v2829_v37 = vmul.f32 1.442695, %v2791_v24  ;;  %v3247_v59 = vmul.f32 1.442695, %v3209_v29  ;;  %v3210_v55 = vmin.f32 %v8635_v39, 20.0  ;;  %v2711_v29 = vadd.f32 1.0, %v6331_v58 }
 0x55c   :  { %v3135_v9 = vmul.f32 1.442695, %v8635_v39  ;;  %vm10935_vm15 = vcmp.gt.f32.partialorder %v8635_v39, 20.0 }
 0x55d   :  { %6346 = vpow2.f32 %v2829_v37  ;;  %v3249_v36 = vmul.f32 1.442695, %v3210_v55 }
 0x55e   :  { %6348 = vrcp.f32 %v2707_v4  ;;  %v2420_v61 = vpop.f32.mrb[196].mxu0  ;;  %v8657_v4 = vpop.eup %6336 }
 0x55f   :  { %6350 = vrcp.f32 %v2708_v30  ;;  %v8648_v49 = vadd.f32 %v8622_v27, %v2420_v61  ;;  %v5942_v5 = vpop.f32.mrb[197].mxu0  ;;  %11221 = vst [vmem:[#allocation86_spill] sm:$0xff] %v8657_v4  ;;  %v8660_v37 = vpop.eup %6338 }
 0x560   :  { %v2423_v28 = vpop.f32.mrb[198].mxu0  ;;  %6352 = vpow2.f32 %v3247_v59  ;;  %11222 = vst [vmem:[#allocation87_spill] sm:$0xff] %v8660_v37  ;;  %v6341_v59 = vpop.eup %6340 }
 0x561   :  { %v8655_v24 = vadd.f32 %v8622_v27, %v2423_v28  ;;  %v5943_v54 = vpop.f32.mrb[199].mxu0  ;;  %6354 = vpow2.f32 %v3249_v36  ;;  %v3211_v30 = vmin.f32 %v8648_v49, 20.0  ;;  %v3137_v55 = vmul.f32 1.442695, %v8648_v49  ;;  %v6343_v61 = vpop.eup %6342 }
 0x562   :  { %6356 = vpow2.f32 %v3133_v23  ;;  %v6345_v5 = vpop.eup %6344  ;;  %v2792_v23 = vsub.f32 0.0, %v8635_v39 }
 0x563   :  { %6358 = vpow2.f32 %v3135_v9  ;;  %v3251_v14 = vmul.f32 1.442695, %v3211_v30  ;;  %v3212_v44 = vmin.f32 %v8655_v24, 20.0  ;;  %v3139_v54 = vmul.f32 1.442695, %v8655_v24 }
 0x564   :  { %6360 = vrcp.f32 %v2709_v43  ;;  %v2712_v30 = vadd.f32 1.0, %v6341_v59  ;;  %v2831_v59 = vmul.f32 1.442695, %v2792_v23 }
 0x565   :  { %6362 = vrcp.f32 %v2710_v31  ;;  %v3253_v28 = vmul.f32 1.442695, %v3212_v44 }
 0x566   :  { %6364 = vrcp.f32 %v2711_v29  ;;  %v2428_v36 = vpop.f32.mrb[200].mxu0  ;;  %v2713_v29 = vadd.f32 1.0, %v6343_v61 }
 0x567   :  { %v6347_v58 = vpop.eup %6346  ;;  %6366 = vpow2.f32 %v3137_v55  ;;  %v8667_v9 = vadd.f32 %v8622_v27, %v2428_v36  ;;  %v5946_v37 = vpop.f32.mrb[201].mxu0  ;;  %v2714_v36 = vadd.f32 1.0, %v6345_v5 }
 0x568   :  { %v8669_v43 = vpop.eup %6348  ;;  %v2905_v4 = vadd.f32 1.0, %v6347_v58  ;;  %v2431_v34 = vpop.f32.mrb[202].mxu0  ;;  %6368 = vpow2.f32 %v3251_v14  ;;  %v2793_v58 = vsub.f32 0.0, %v8648_v49 }
 0x569   :  { %11223 = vst [vmem:[#allocation88_spill] sm:$0xff] %v8669_v43  ;;  %v8671_v31 = vpop.eup %6350  ;;  %v8674_v44 = vadd.f32 %v8622_v27, %v2431_v34  ;;  %v5947_v10 = vpop.f32.mrb[203].mxu0  ;;  %6370 = vpow2.f32 %v3253_v28  ;;  %v3213_v37 = vmin.f32 %v8667_v9, 20.0 }
 0x56a   :  { %11224 = vst [vmem:[#allocation89_spill] sm:$0xff] %v8671_v31  ;;  %v6353_v55 = vpop.eup %6352  ;;  %6372 = vrcp.f32 %v2905_v4  ;;  %v3741_v10 = vsel %vm10936_vm13, %v8559_v32, 0.0  ;;  %vm10945_vm13 = vcmp.gt.f32.partialorder %v8648_v49, 20.0 }
 0x56b   :  { %v6355_v43 = vpop.eup %6354  ;;  %6374 = vpow2.f32 %v3139_v54  ;;  %v3323_v61 = vadd.f32 1.0, %v6353_v55  ;;  %v3214_v4 = vmin.f32 %v8674_v44, 20.0 }
 0x56c   :  { %v6357_v14 = vpop.eup %6356  ;;  %6376 = vrcp.f32 %v2712_v30  ;;  %v3324_v34 = vadd.f32 1.0, %v6355_v43  ;;  %v3255_v30 = vmul.f32 1.442695, %v3213_v37 }
 0x56d   :  { %v6359_v28 = vpop.eup %6358  ;;  %6378 = vrcp.f32 %v2713_v29  ;;  %v3361_v23 = vsel %vm10934_vm0, %v6357_v14, %v3323_v61  ;;  %v2833_v29 = vmul.f32 1.442695, %v2793_v58  ;;  %v3257_v14 = vmul.f32 1.442695, %v3214_v4 }
 0x56e   :  { %v8685_v5 = vpop.eup %6360  ;;  %6380 = vrcp.f32 %v2714_v36  ;;  %v3362_v54 = vsel %vm10935_vm15, %v6359_v28, %v3324_v34  ;;  %v2436_v43 = vpop.f32.mrb[204].mxu0  ;;  %4045 = vrot.lane.b32.xlu0 %v3361_v23, %s6801_s20  ;;  %vm10941_vm15 = vcmp.eq.s32.totalorder %v7698_v42, 1  ;;  %v3141_v58 = vmul.f32 1.442695, %v8667_v9 }
 0x56f   :  { %11225 = vst [vmem:[#allocation90_spill] sm:$0xff] %v8685_v5  ;;  %v8691_v32 = vpop.eup %6362  ;;  %6382 = vpow2.f32 %v2831_v59  ;;  %4047 = vrot.lane.b32.xlu1 %v3362_v54, %s6801_s20  ;;  %v8696_v55 = vadd.f32 %v8622_v27, %v2436_v43  ;;  %v5950_v36 = vpop.f32.mrb[205].mxu0  ;;  %v4844_v54 = vsel %vm10956_vm14, %v3741_v10, %v8100_v0  ;;  %v3742_v4 = vsel %vm10941_vm15, %v8562_v8, 0.0 }
 0x570   :  { %11226 = vst [vmem:[#allocation91_spill] sm:$0xff] %v8691_v32  ;;  %v8698_v5 = vpop.eup %6364  ;;  %6384 = vlog2.f32 %v3323_v61  ;;  %v2439_v37 = vpop.f32.mrb[206].mxu0  ;;  %v2794_v0 = vsub.f32 0.0, %v8655_v24  ;;  %v3143_v10 = vmul.f32 1.442695, %v8674_v44  ;;  %vm10943_vm0 = vcmask 31744  }
 0x571   :  { %11227 = vst [vmem:[#allocation92_spill] sm:$0xff] %v8698_v5  ;;  %v6367_v59 = vpop.eup %6366  ;;  %6386 = vlog2.f32 %v3324_v34  ;;  %v8704_v28 = vadd.f32 %v8622_v27, %v2439_v37  ;;  %v5951_v23 = vpop.f32.mrb[207].mxu0  ;;  %v3215_v61 = vmin.f32 %v8696_v55, 20.0  ;;  %v3743_v34 = vsel %vm11228_vm1, %v8565_v45, 0.0  ;;  %v11229_v37 = vld [vmem:[#allocation50_spill] sm:$0xff] }
 0x572   :  { %v6369_v43 = vpop.eup %6368  ;;  %6388 = vpow2.f32 %v3255_v30  ;;  %vm10944_vm12 = vcmp.eq.s32.totalorder %v11229_v37, 1  ;;  %v2795_v42 = vsub.f32 0.0, %v8667_v9  ;;  %vm10942_vm1 = vcmp.gt.f32.partialorder %v8655_v24, 20.0 }
 0x573   :  { %v6371_v36 = vpop.eup %6370  ;;  %6390 = vpow2.f32 %v2833_v29  ;;  %v3325_v23 = vadd.f32 1.0, %v6369_v43  ;;  %v3216_v45 = vmin.f32 %v8704_v28, 20.0  ;;  %v3259_v43 = vmul.f32 1.442695, %v3215_v61  ;;  %v11235_v61 = vld [vmem:[#allocation51_spill] sm:$0xff] }
 0x574   :  { %v6373_v30 = vpop.eup %6372  ;;  %v3326_v5 = vadd.f32 1.0, %v6371_v36  ;;  %6392 = vpow2.f32 %v3257_v14  ;;  %vm11231_vm15 = vcmp.eq.s32.totalorder %v7688_v11, 1 }
 0x575   :  { %v6375_v8 = vpop.eup %6374  ;;  %6394 = vpow2.f32 %v3141_v58  ;;  %v3363_v1 = vsel %vm10945_vm13, %v6367_v59, %v3325_v23  ;;  %v3969_v14 = vsel %vm11231_vm15, %v6373_v30, 0.0  ;;  %v2835_v58 = vmul.f32 1.442695, %v2794_v0 }
 0x576   :  { %v8724_v29 = vpop.eup %6376  ;;  %v3364_v32 = vsel %vm10942_vm1, %v6375_v8, %v3326_v5  ;;  %v2444_v31 = vpop.f32.mrb[208].mxu0  ;;  %6396 = vpow2.f32 %v3143_v10  ;;  %4049 = vrot.lane.b32.xlu0 %v3363_v1, %s6801_s20  ;;  %v8740_v17 = vsel %vm10943_vm0, %v4844_v54, %v3969_v14  ;;  %vm10947_vm1 = vcmp.eq.s32.totalorder %v11235_v61, 1  ;;  %v11250_v61 = vld [vmem:[#allocation54_spill] sm:$0xff] }
 0x577   :  { %11230 = vst [vmem:[#allocation93_spill] sm:$0xff] %v8724_v29  ;;  %v8732_v36 = vpop.eup %6378  ;;  %4051 = vrot.lane.b32.xlu1 %v3364_v32, %s6801_s20  ;;  %v8737_v29 = vadd.f32 %v8622_v27, %v2444_v31  ;;  %v5954_v59 = vpop.f32.mrb[209].mxu0  ;;  %11233 = vst [vmem:[#allocation95_spill] sm:$0xff] %v8740_v17  ;;  %6398 = vlog2.f32 %v3325_v23  ;;  %v3261_v30 = vmul.f32 1.442695, %v3216_v45  ;;  %v8747_v0 = vsel %vm10956_vm14, %v3742_v4, %v8105_v63 }
 0x578   :  { %11232 = vst [vmem:[#allocation94_spill] sm:$0xff] %v8732_v36  ;;  %v8742_v8 = vpop.eup %6380  ;;  %v2447_v11 = vpop.f32.mrb[210].mxu0  ;;  %11236 = vst [vmem:[#allocation97_spill] sm:$0xff] %v8747_v0  ;;  %v2837_v32 = vmul.f32 1.442695, %v2795_v42  ;;  %v2796_v31 = vsub.f32 0.0, %v8674_v44  ;;  %6400 = vlog2.f32 %v3326_v5  ;;  %v8754_v54 = vsel %vm10956_vm14, %v3743_v34, %v8117_v48 }
 0x579   :  { %11234 = vst [vmem:[#allocation96_spill] sm:$0xff] %v8742_v8  ;;  %v8749_v1 = vpop.eup %6382  ;;  %v5955_v10 = vpop.f32.mrb[211].mxu0  ;;  %11237 = vst [vmem:[#allocation98_spill] sm:$0xff] %v8754_v54  ;;  %v3145_v23 = vmul.f32 1.442695, %v8696_v55  ;;  %v8758_v45 = vadd.f32 %v8622_v27, %v2447_v11  ;;  %6402 = vpow2.f32 %v3259_v43  ;;  %v3217_v63 = vmin.f32 %v8737_v29, 20.0 }
 0x57a   :  { %v6385_v14 = vpop.eup %6384  ;;  %6404 = vpow2.f32 %v2835_v58  ;;  %v3147_v42 = vmul.f32 1.442695, %v8704_v28  ;;  %vm11238_vm15 = vcmp.eq.s32.totalorder %v7701_v38, 1  ;;  %vm11239_vm0 = vcmp.eq.s32.totalorder %v7712_v50, 1 }
 0x57b   :  { %v6387_v4 = vpop.eup %6386  ;;  %v3744_v5 = vsel %vm11238_vm15, %v8568_v25, 0.0  ;;  %v3745_v48 = vsel %vm11239_vm0, %v8571_v6, 0.0  ;;  %v3400_v59 = vmul.f32 0.6931472, %v6385_v14  ;;  %6406 = vpow2.f32 %v3261_v30 }
 0x57c   :  { %v6389_v34 = vpop.eup %6388  ;;  %v3402_v10 = vmul.f32 0.6931472, %v6387_v4  ;;  %v3746_v43 = vsel %vm10944_vm12, %v8574_v46, 0.0  ;;  %6408 = vpow2.f32 %v2837_v32  ;;  %v2839_v58 = vmul.f32 1.442695, %v2796_v31  ;;  %v11242_v4 = vld [vmem:[#allocation52_spill] sm:$0xff] }
 0x57d   :  { %v8771_v11 = vpop.eup %6390  ;;  %v3327_v17 = vadd.f32 1.0, %v6389_v34  ;;  %v3263_v8 = vmul.f32 1.442695, %v3217_v63  ;;  %6410 = vpow2.f32 %v3145_v23  ;;  %vm11240_vm15 = vcmp.gt.f32.partialorder %v8629_v62, 20.0  ;;  %v11243_v32 = vld [vmem:[#allocation53_spill] sm:$0xff] }
 0x57e   :  { %v6393_v36 = vpop.eup %6392  ;;  %v3475_v25 = vsel %vm11240_vm15, %v8629_v62, %v3400_v59  ;;  %vm11241_vm0 = vcmp.gt.f32.partialorder %v8635_v39, 20.0  ;;  %v2452_v30 = vpop.f32.mrb[212].mxu0  ;;  %v3218_v14 = vmin.f32 %v8758_v45, 20.0  ;;  %vm10953_vm12 = vcmp.eq.s32.totalorder %v11242_v4, 1  ;;  %v11253_v4 = vld [vmem:[#allocation55_spill] sm:$0xff] }
 0x57f   :  { %v3476_v6 = vsel %vm11241_vm0, %v8635_v39, %v3402_v10  ;;  %v6395_v46 = vpop.eup %6394  ;;  %vm10952_vm13 = vcmp.eq.s32.totalorder %v11243_v32, 1  ;;  %v2797_v31 = vsub.f32 0.0, %v8696_v55  ;;  %6412 = vpow2.f32 %v3147_v42  ;;  %v5958_v34 = vpop.f32.mrb[213].mxu0 }
 0x580   :  { %v3513_v23 = vadd.f32 0.1, %v3475_v25  ;;  %v3514_v63 = vadd.f32 0.1, %v3476_v6  ;;  %6414 = vlog2.f32 %v3327_v17  ;;  %v3328_v62 = vadd.f32 1.0, %v6393_v36  ;;  %v2455_v59 = vpop.f32.mrb[214].mxu0  ;;  %v6397_v37 = vpop.eup %6396 }
 0x581   :  { %v8785_v39 = vsel %vm10956_vm14, %v3744_v5, %v8123_v51  ;;  %v8789_v10 = vsel %vm10956_vm14, %v3745_v48, %v8134_v53  ;;  %v8794_v42 = vadd.f32 %v8622_v27, %v2452_v30  ;;  %v5959_v25 = vpop.f32.mrb[215].mxu0  ;;  %6416 = vpow2.f32 %v3263_v8  ;;  %v6399_v53 = vpop.eup %6398 }
 0x582   :  { %11244 = vst [vmem:[#allocation99_spill] sm:$0xff] %v8785_v39  ;;  %11245 = vst [vmem:[#allocation100_spill] sm:$0xff] %v8789_v10  ;;  %4235 = vrot.lane.b32.xlu0 %v3513_v23, %s6802_s1  ;;  %4237 = vrot.lane.b32.xlu1 %v3514_v63, %s6802_s1  ;;  %v8798_v36 = vsel %vm10956_vm14, %v3746_v43, %v8140_v18  ;;  %v3747_v51 = vsel %vm10947_vm1, %v8577_v20, 0.0  ;;  %vm10950_vm15 = vcmp.gt.f32.partialorder %v8667_v9, 20.0  ;;  %vm10948_vm0 = vcmp.gt.f32.partialorder %v8674_v44, 20.0  ;;  %v6401_v48 = vpop.eup %6400  ;;  %v11277_v39 = vld [vmem:[#allocation65_spill] sm:$0xff] }
 0x583   :  { %11246 = vst [vmem:[#allocation101_spill] sm:$0xff] %v8798_v36  ;;  %6418 = vlog2.f32 %v3328_v62  ;;  %v3265_v5 = vmul.f32 1.442695, %v3218_v14  ;;  %v2841_v6 = vmul.f32 1.442695, %v2797_v31  ;;  %v3365_v18 = vsel %vm10950_vm15, %v6395_v46, %v3327_v17  ;;  %v6403_v43 = vpop.eup %6402 }
 0x584   :  { %6420 = vpow2.f32 %v2839_v58  ;;  %v3149_v8 = vmul.f32 1.442695, %v8737_v29  ;;  %v3366_v30 = vsel %vm10948_vm0, %v6397_v37, %v3328_v62  ;;  %v3404_v20 = vmul.f32 0.6931472, %v6399_v53  ;;  %v8810_v63 = vpop.eup %6404 }
 0x585   :  { %v3406_v23 = vmul.f32 0.6931472, %v6401_v48  ;;  %6422 = vpow2.f32 %v3265_v5  ;;  %v2798_v34 = vsub.f32 0.0, %v8704_v28  ;;  %v3151_v14 = vmul.f32 1.442695, %v8758_v45  ;;  %v6407_v46 = vpop.eup %6406 }
 0x586   :  { %4053 = vrot.lane.b32.xlu0 %v3365_v18, %s6801_s20  ;;  %4055 = vrot.lane.b32.xlu1 %v3366_v30, %s6801_s20  ;;  %v3329_v58 = vadd.f32 1.0, %v6403_v43  ;;  %v3219_v17 = vmin.f32 %v8794_v42, 20.0  ;;  %v2799_v31 = vsub.f32 0.0, %v8737_v29  ;;  %v8819_v37 = vadd.f32 %v8622_v27, %v2455_v59  ;;  %v2460_v53 = vpop.f32.mrb[216].mxu0  ;;  %v8827_v5 = vpop.eup %6408 }
 0x587   :  { %vm11247_vm1 = vcmp.gt.f32.partialorder %v8648_v49, 20.0  ;;  %vm11248_vm0 = vcmp.gt.f32.partialorder %v8655_v24, 20.0  ;;  %6424 = vpow2.f32 %v3149_v8  ;;  %v5962_v43 = vpop.f32.mrb[217].mxu0  ;;  %v8831_v30 = vsel %vm10956_vm14, %v3747_v51, %v8150_v56  ;;  %v6411_v59 = vpop.eup %6410 }
 0x588   :  { %v3477_v62 = vsel %vm11247_vm1, %v8648_v49, %v3404_v20  ;;  %v3478_v25 = vsel %vm11248_vm0, %v8655_v24, %v3406_v23  ;;  %11249 = vst [vmem:[#allocation102_spill] sm:$0xff] %v8831_v30  ;;  %vm10957_vm15 = vcmp.eq.s32.totalorder %v11250_v61, 1  ;;  %6426 = vlog2.f32 %v3329_v58  ;;  %v2463_v20 = vpop.f32.mrb[218].mxu0 }
 0x589   :  { %v3515_v48 = vadd.f32 0.1, %v3477_v62  ;;  %v3516_v18 = vadd.f32 0.1, %v3478_v25  ;;  %v3330_v49 = vadd.f32 1.0, %v6407_v46  ;;  %v3748_v24 = vsel %vm10953_vm12, %v8580_v47, 0.0  ;;  %v6413_v23 = vpop.eup %6412 }
 0x58a   :  { %v3749_v8 = vsel %vm10952_vm13, %v8583_v60, 0.0  ;;  %v2843_v62 = vmul.f32 1.442695, %v2798_v34  ;;  %6428 = vpow2.f32 %v3151_v14  ;;  %vm3101_vm1 = vcmp.gt.f32.partialorder %v8696_v55, 20.0  ;;  %v5963_v56 = vpop.f32.mrb[219].mxu0  ;;  %v6415_v46 = vpop.eup %6414 }
 0x58b   :  { %4239 = vrot.lane.b32.xlu0 %v3515_v48, %s6802_s1  ;;  %4241 = vrot.lane.b32.xlu1 %v3516_v18, %s6802_s1  ;;  %v3267_v51 = vmul.f32 1.442695, %v3219_v17  ;;  %v2845_v25 = vmul.f32 1.442695, %v2799_v31  ;;  %v8844_v43 = vadd.f32 %v8622_v27, %v2460_v53  ;;  %6430 = vlog2.f32 %v3330_v49  ;;  %v6417_v60 = vpop.eup %6416 }
 0x58c   :  { %v3220_v47 = vmin.f32 %v8819_v37, 20.0  ;;  %6432 = vpow2.f32 %v2841_v6  ;;  %v3153_v34 = vmul.f32 1.442695, %v8794_v42  ;;  %v3367_v14 = vsel %vm3101_vm1, %v6411_v59, %v3329_v58 }
 0x58d   :  { %vm10955_vm0 = vcmp.gt.f32.partialorder %v8704_v28, 20.0  ;;  %v6419_v48 = vpop.eup %6418  ;;  %v3408_v31 = vmul.f32 0.6931472, %v6415_v46  ;;  %v3331_v18 = vadd.f32 1.0, %v6417_v60  ;;  %6434 = vpow2.f32 %v3267_v51 }
 0x58e   :  { %v3368_v17 = vsel %vm10955_vm0, %v6413_v23, %v3330_v49  ;;  %v8853_v53 = vpop.eup %6420  ;;  %6436 = vpow2.f32 %v2843_v62  ;;  %v2800_v56 = vsub.f32 0.0, %v8758_v45  ;;  %v3410_v6 = vmul.f32 0.6931472, %v6419_v48  ;;  %v2468_v23 = vpop.f32.mrb[220].mxu0 }
 0x58f   :  { %4057 = vrot.lane.b32.xlu0 %v3367_v14, %s6801_s20  ;;  %4059 = vrot.lane.b32.xlu1 %v3368_v17, %s6801_s20  ;;  %v3269_v58 = vmul.f32 1.442695, %v3220_v47  ;;  %v6423_v59 = vpop.eup %6422  ;;  %6438 = vpow2.f32 %v2845_v25  ;;  %v2801_v32 = vsub.f32 0.0, %v8794_v42  ;;  %vm11251_vm13 = vcmp.gt.f32.partialorder %v8667_v9, 20.0  ;;  %v5966_v47 = vpop.f32.mrb[221].mxu0 }
 0x590   :  { %v3479_v49 = vsel %vm11251_vm13, %v8667_v9, %v3408_v31  ;;  %v3221_v51 = vmin.f32 %v8844_v43, 20.0  ;;  %6440 = vpow2.f32 %v3153_v34  ;;  %v3155_v62 = vmul.f32 1.442695, %v8819_v37  ;;  %v4442_v14 = vpop.permute.xlu0 %4441  ;;  %v2471_v9 = vpop.f32.mrb[222].mxu0  ;;  %v11254_v34 = vld [vmem:[#allocation56_spill] sm:$0xff] }
 0x591   :  { %v3517_v46 = vadd.f32 0.1, %v3479_v49  ;;  %vm11252_vm12 = vcmp.gt.f32.partialorder %v8674_v44, 20.0  ;;  %v8868_v25 = vadd.f32 %v8622_v27, %v2463_v20  ;;  %6442 = vlog2.f32 %v3331_v18  ;;  %v6425_v31 = vpop.eup %6424  ;;  %v5967_v49 = vpop.f32.mrb[223].mxu0 }
 0x592   :  { %v3480_v60 = vsel %vm11252_vm12, %v8674_v44, %v3410_v6  ;;  %v3332_v17 = vadd.f32 1.0, %v6423_v59  ;;  %vm10960_vm13 = vcmp.eq.s32.totalorder %v11253_v4, 1  ;;  %6444 = vpow2.f32 %v3269_v58  ;;  %v6427_v59 = vpop.eup %6426 }
 0x593   :  { %v3518_v48 = vadd.f32 0.1, %v3480_v60  ;;  %4243 = vrot.lane.b32.xlu0 %v3517_v46, %s6802_s1  ;;  %v8875_v44 = vsel %vm10956_vm14, %v3748_v24, %v8156_v12  ;;  %v8878_v20 = vsel %vm10956_vm14, %v3749_v8, %v4442_v14  ;;  %v8883_v6 = vsel %vm10957_vm15, %v8586_v16, 0.0  ;;  %v11257_v60 = vld [vmem:[#allocation57_spill] sm:$0xff] }
 0x594   :  { %11255 = vst [vmem:[#allocation103_spill] sm:$0xff] %v8875_v44  ;;  %11256 = vst [vmem:[#allocation104_spill] sm:$0xff] %v8878_v20  ;;  %vm10962_vm12 = vcmp.eq.s32.totalorder %v11257_v60, 1  ;;  %v2847_v47 = vmul.f32 1.442695, %v2800_v56  ;;  %v8888_v58 = vadd.f32 %v8622_v27, %v2468_v23  ;;  %6446 = vlog2.f32 %v3332_v17  ;;  %v6429_v24 = vpop.eup %6428 }
 0x595   :  { %4245 = vrot.lane.b32.xlu1 %v3518_v48, %s6802_s1  ;;  %v3271_v12 = vmul.f32 1.442695, %v3221_v51  ;;  %v2849_v46 = vmul.f32 1.442695, %v2801_v32  ;;  %6448 = vpow2.f32 %v3155_v62  ;;  %vm3103_vm14 = vcmp.gt.f32.partialorder %v8737_v29, 20.0  ;;  %v6431_v16 = vpop.eup %6430 }
 0x596   :  { %vm3104_vm0 = vcmp.gt.f32.partialorder %v8758_v45, 20.0  ;;  %v3369_v8 = vsel %vm3103_vm14, %v6425_v31, %v3331_v18  ;;  %v3412_v14 = vmul.f32 0.6931472, %v6427_v59  ;;  %v3222_v56 = vmin.f32 %v8868_v25, 20.0  ;;  %v8895_v48 = vpop.eup %6432  ;;  %v8906_v31 = vpop.f32.mrb[224].mxu0 }
 0x597   :  { %6450 = vpow2.f32 %v3271_v12  ;;  %v2802_v23 = vsub.f32 0.0, %v8819_v37  ;;  %v3157_v51 = vmul.f32 1.442695, %v8844_v43  ;;  %4061 = vrot.lane.b32.xlu0 %v3369_v8, %s6801_s20  ;;  %v3370_v32 = vsel %vm3104_vm0, %v6429_v24, %v3332_v17  ;;  %v6435_v49 = vpop.eup %6434  ;;  %v5970_v24 = vpop.f32.mrb[225].mxu0 }
 0x598   :  { %v3414_v62 = vmul.f32 0.6931472, %v6431_v16  ;;  %6452 = vpow2.f32 %v2847_v47  ;;  %v3481_v18 = vsel %vm3101_vm1, %v8696_v55, %v3412_v14  ;;  %v3273_v59 = vmul.f32 1.442695, %v3222_v56  ;;  %v8909_v20 = vpop.eup %6436 }
 0x599   :  { %4063 = vrot.lane.b32.xlu1 %v3370_v32, %s6801_s20  ;;  %v3223_v12 = vmin.f32 %v8888_v58, 20.0  ;;  %6454 = vpow2.f32 %v2849_v46  ;;  %v3159_v8 = vmul.f32 1.442695, %v8868_v25  ;;  %v3519_v17 = vadd.f32 0.1, %v3481_v18  ;;  %v8915_v16 = vpop.eup %6438  ;;  %v8920_v32 = vpop.f32.mrb[226].mxu0 }
 0x59a   :  { %vm11258_vm15 = vcmp.gt.f32.partialorder %v8704_v28, 20.0  ;;  %v8918_v55 = vadd.f32 %v8622_v27, %v2471_v9  ;;  %v3333_v56 = vadd.f32 1.0, %v6435_v49  ;;  %6456 = vpow2.f32 %v3273_v59  ;;  %v6441_v61 = vpop.eup %6440  ;;  %v5971_v18 = vpop.f32.mrb[227].mxu0 }
 0x59b   :  { %v3482_v47 = vsel %vm11258_vm15, %v8704_v28, %v3414_v62  ;;  %v2851_v46 = vmul.f32 1.442695, %v2802_v23  ;;  %v2803_v44 = vsub.f32 0.0, %v8844_v43  ;;  %6458 = vpow2.f32 %v3157_v51  ;;  %4247 = vrot.lane.b32.xlu0 %v3519_v17, %s6802_s1  ;;  %v6443_v62 = vpop.eup %6442 }
 0x59c   :  { %v3520_v14 = vadd.f32 0.1, %v3482_v47  ;;  %v3275_v28 = vmul.f32 1.442695, %v3223_v12  ;;  %vm3105_vm15 = vcmp.gt.f32.partialorder %v8794_v42, 20.0  ;;  %6460 = vlog2.f32 %v3333_v56  ;;  %v6445_v49 = vpop.eup %6444  ;;  %v4444_v47 = vpop.permute.xlu1 %4443 }
 0x59d   :  { %v3751_v9 = vsel %vm10960_vm13, %v8589_v22, 0.0  ;;  %vm11259_vm1 = vcmp.eq.s32.totalorder %v11254_v34, 1  ;;  %6462 = vpow2.f32 %v3159_v8  ;;  %v3161_v51 = vmul.f32 1.442695, %v8888_v58  ;;  %v4446_v8 = vpop.permute.xlu0 %4445 }
 0x59e   :  { %4249 = vrot.lane.b32.xlu1 %v3520_v14, %s6802_s1  ;;  %v3752_v23 = vsel %vm11259_vm1, %v8592_v7, 0.0  ;;  %v3371_v59 = vsel %vm3105_vm15, %v6441_v61, %v3333_v56  ;;  %v3753_v12 = vsel %vm10962_vm12, %v8595_v13, 0.0  ;;  %v6447_v17 = vpop.eup %6446  ;;  %v3334_v24 = vadd.f32 1.0, %v6445_v49  ;;  %v11260_v7 = vld [vmem:[#allocation58_spill] sm:$0xff] }
 0x59f   :  { %v3416_v14 = vmul.f32 0.6931472, %v6443_v62  ;;  %6464 = vpow2.f32 %v3275_v28  ;;  %v3224_v22 = vmin.f32 %v8918_v55, 20.0  ;;  %v6449_v18 = vpop.eup %6448  ;;  %vm10966_vm1 = vcmp.eq.s32.totalorder %v11260_v7, 1  ;;  %4065 = vrot.lane.b32.xlu0 %v3371_v59, %s6801_s20  ;;  %v2484_v62 = vpop.f32.mrb[228].mxu0 }
 0x5a0   :  { %6466 = vpow2.f32 %v2851_v46  ;;  %v2853_v34 = vmul.f32 1.442695, %v2803_v44  ;;  %vm10964_vm13 = vcmp.gt.f32.partialorder %v8819_v37, 20.0  ;;  %v3418_v61 = vmul.f32 0.6931472, %v6447_v17  ;;  %v5974_v17 = vpop.f32.mrb[229].mxu0  ;;  %v4448_v4 = vpop.permute.xlu1 %4447 }
 0x5a1   :  { %v6451_v56 = vpop.eup %6450  ;;  %v3372_v13 = vsel %vm10964_vm13, %v6449_v18, %v3334_v24  ;;  %6468 = vlog2.f32 %v3334_v24  ;;  %v3483_v28 = vsel %vm3103_vm14, %v8737_v29, %v3416_v14  ;;  %v3277_v49 = vmul.f32 1.442695, %v3224_v22  ;;  %v11261_v24 = vld [vmem:[#allocation59_spill] sm:$0xff]  ;;  %v2487_v30 = vpop.f32.mrb[230].mxu0 }
 0x5a2   :  { %v2804_v60 = vsub.f32 0.0, %v8868_v25  ;;  %v2805_v44 = vsub.f32 0.0, %v8888_v58  ;;  %4067 = vrot.lane.b32.xlu1 %v3372_v13, %s6801_s20  ;;  %v3521_v46 = vadd.f32 0.1, %v3483_v28  ;;  %v3484_v59 = vsel %vm3104_vm0, %v8758_v45, %v3418_v61  ;;  %v8953_v18 = vpop.eup %6452  ;;  %v4450_v28 = vpop.permute.xlu0 %4449 }
 0x5a3   :  { %6470 = vpow2.f32 %v3161_v51  ;;  %v8958_v29 = vadd.f32 %v8622_v27, %v8906_v31  ;;  %v3522_v14 = vadd.f32 0.1, %v3484_v59  ;;  %v3335_v22 = vadd.f32 1.0, %v6451_v56  ;;  %v8960_v13 = vpop.eup %6454  ;;  %v5975_v61 = vpop.f32.mrb[231].mxu0 }
 0x5a4   :  { %v2806_v36 = vsub.f32 0.0, %v8918_v55  ;;  %v3163_v45 = vmul.f32 1.442695, %v8918_v55  ;;  %4251 = vrot.lane.b32.xlu0 %v3521_v46, %s6802_s1  ;;  %6472 = vpow2.f32 %v3277_v49  ;;  %vm11262_vm14 = vcmask 23552   ;;  %v6457_v31 = vpop.eup %6456 }
 0x5a5   :  { %v8967_v51 = vsel %vm11262_vm14, %v8883_v6, %v4444_v47  ;;  %6474 = vlog2.f32 %v3335_v22  ;;  %vm11264_vm0 = vmmov %vm11262_vm14  ;;  %v6459_v10 = vpop.eup %6458  ;;  %v2855_v50 = vmul.f32 1.442695, %v2804_v60  ;;  %v8980_v49 = vadd.f32 %v8622_v27, %v8920_v32 }
 0x5a6   :  { %11263 = vst [vmem:[#allocation105_spill] sm:$0xff] %v8967_v51  ;;  %v8970_v56 = vsel %vm11264_vm0, %v3751_v9, %v4446_v8  ;;  %vm11266_vm13 = vmmov %vm11264_vm0  ;;  %4253 = vrot.lane.b32.xlu1 %v3522_v14, %s6802_s1  ;;  %vm3107_vm14 = vcmp.gt.f32.partialorder %v8844_v43, 20.0  ;;  %v3336_v6 = vadd.f32 1.0, %v6457_v31  ;;  %v6461_v47 = vpop.eup %6460  ;;  %6476 = vpow2.f32 %v2853_v34 }
 0x5a7   :  { %11265 = vst [vmem:[#allocation106_spill] sm:$0xff] %v8970_v56  ;;  %v8973_v59 = vsel %vm11266_vm13, %v3752_v23, %v4448_v4  ;;  %vm11268_vm12 = vmmov %vm11264_vm0  ;;  %v2857_v9 = vmul.f32 1.442695, %v2805_v44  ;;  %v2807_v4 = vsub.f32 0.0, %v8958_v29  ;;  %v3373_v23 = vsel %vm3107_vm14, %v6459_v10, %v3335_v22  ;;  %v2492_v44 = vpop.f32.mrb[232].mxu0  ;;  %v11276_v56 = vld [vmem:[#allocation64_spill] sm:$0xff] }
 0x5a8   :  { %11267 = vst [vmem:[#allocation107_spill] sm:$0xff] %v8973_v59  ;;  %v8976_v17 = vsel %vm11268_vm12, %v3753_v12, %v4450_v28  ;;  %v6463_v12 = vpop.eup %6462  ;;  %v2859_v8 = vmul.f32 1.442695, %v2806_v36  ;;  %6478 = vpow2.f32 %v3163_v45  ;;  %4069 = vrot.lane.b32.xlu0 %v3373_v23, %s6801_s20  ;;  %vm10967_vm13 = vcmp.gt.f32.partialorder %v8868_v25, 20.0  ;;  %v5978_v45 = vpop.f32.mrb[233].mxu0 }
 0x5a9   :  { %11269 = vst [vmem:[#allocation108_spill] sm:$0xff] %v8976_v17  ;;  %v3420_v60 = vmul.f32 0.6931472, %v6461_v47  ;;  %v6465_v32 = vpop.eup %6464  ;;  %v3165_v46 = vmul.f32 1.442695, %v8958_v29  ;;  %v3374_v34 = vsel %vm10967_vm13, %v6463_v12, %v3336_v6  ;;  %6480 = vlog2.f32 %v3336_v6  ;;  %v9007_v47 = vpop.f32.mrb[234].mxu0 }
 0x5aa   :  { %v8995_v10 = vsel %vm10966_vm1, %v8598_v35, 0.0  ;;  %v8997_v36 = vpop.eup %6466  ;;  %6482 = vpow2.f32 %v2855_v50  ;;  %v2808_v14 = vsub.f32 0.0, %v8980_v49  ;;  %4071 = vrot.lane.b32.xlu1 %v3374_v34, %s6801_s20  ;;  %v3337_v28 = vadd.f32 1.0, %v6465_v32  ;;  %v11270_v50 = vld [vmem:[#allocation60_spill] sm:$0xff]  ;;  %v5979_v12 = vpop.f32.mrb[235].mxu0 }
 0x5ab   :  { %v3485_v22 = vsel %vm3105_vm15, %v8794_v42, %v3420_v60  ;;  %v6469_v61 = vpop.eup %6468  ;;  %6484 = vpow2.f32 %v2857_v9  ;;  %v2861_v31 = vmul.f32 1.442695, %v2807_v4  ;;  %v9005_v6 = vadd.f32 %v8622_v27, %v2484_v62  ;;  %v4452_v59 = vpop.permute.xlu1 %4451 }
 0x5ac   :  { %v3523_v35 = vadd.f32 0.1, %v3485_v22  ;;  %vm10974_vm12 = vcmp.eq.s32.totalorder %v11270_v50, 1  ;;  %6486 = vpow2.f32 %v2859_v8  ;;  %v3422_v23 = vmul.f32 0.6931472, %v6469_v61 }
 0x5ad   :  { %v3225_v34 = vmin.f32 %v8958_v29, 20.0  ;;  %vm11271_vm15 = vcmp.eq.s32.totalorder %v11261_v24, 1  ;;  %v6471_v9 = vpop.eup %6470  ;;  %6488 = vpow2.f32 %v3165_v46  ;;  %v9017_v62 = vadd.f32 %v8622_v27, %v2487_v30  ;;  %v11273_v46 = vld [vmem:[#allocation61_spill] sm:$0xff] }
 0x5ae   :  { %v9014_v42 = vsel %vm11271_vm15, %v8601_v2, 0.0  ;;  %4255 = vrot.lane.b32.xlu0 %v3523_v35, %s6802_s1  ;;  %vm10970_vm0 = vcmp.gt.f32.partialorder %v8888_v58, 20.0  ;;  %v3226_v4 = vmin.f32 %v8980_v49, 20.0  ;;  %v6473_v8 = vpop.eup %6472  ;;  %v2863_v60 = vmul.f32 1.442695, %v2808_v14  ;;  %v11274_v35 = vld [vmem:[#allocation62_spill] sm:$0xff] }
 0x5af   :  { %v3167_v32 = vmul.f32 1.442695, %v8980_v49  ;;  %vm11272_vm1 = vcmp.gt.f32.partialorder %v8819_v37, 20.0  ;;  %6490 = vlog2.f32 %v3337_v28  ;;  %v6475_v22 = vpop.eup %6474  ;;  %vm10975_vm15 = vcmp.eq.s32.totalorder %v11273_v46, 1 }
 0x5b0   :  { %v3486_v2 = vsel %vm11272_vm1, %v8819_v37, %v3422_v23  ;;  %6492 = vpow2.f32 %v2861_v31  ;;  %v3338_v45 = vadd.f32 1.0, %v6473_v8  ;;  %v3227_v61 = vmin.f32 %v9005_v6, 20.0  ;;  %v9032_v17 = vpop.eup %6476  ;;  %v2500_v23 = vpop.f32.mrb[236].mxu0 }
 0x5b1   :  { %v3524_v30 = vadd.f32 0.1, %v3486_v2  ;;  %v2809_v12 = vsub.f32 0.0, %v9005_v6  ;;  %v3375_v14 = vsel %vm10970_vm0, %v6471_v9, %v3337_v28  ;;  %v3424_v24 = vmul.f32 0.6931472, %v6475_v22  ;;  %v5982_v9 = vpop.f32.mrb[237].mxu0 }
 0x5b2   :  { %v3279_v7 = vmul.f32 1.442695, %v3225_v34  ;;  %v2810_v37 = vsub.f32 0.0, %v9017_v62  ;;  %v9037_v31 = vadd.f32 %v8622_v27, %v2492_v44  ;;  %4073 = vrot.lane.b32.xlu0 %v3375_v14, %s6801_s20  ;;  %6494 = vlog2.f32 %v3338_v45  ;;  %v6479_v2 = vpop.eup %6478  ;;  %v9046_v44 = vpop.f32.mrb[238].mxu0 }
 0x5b3   :  { %4257 = vrot.lane.b32.xlu1 %v3524_v30, %s6802_s1  ;;  %v3281_v8 = vmul.f32 1.442695, %v3226_v4  ;;  %6496 = vpow2.f32 %v2863_v60  ;;  %v3169_v28 = vmul.f32 1.442695, %v9005_v6  ;;  %v3487_v34 = vsel %vm3107_vm14, %v8844_v43, %v3424_v24  ;;  %v6481_v30 = vpop.eup %6480  ;;  %v11275_v60 = vld [vmem:[#allocation63_spill] sm:$0xff]  ;;  %v5983_v9 = vpop.f32.mrb[239].mxu0 }
 0x5b4   :  { %v3228_v22 = vmin.f32 %v9017_v62, 20.0  ;;  %6498 = vpow2.f32 %v3167_v32  ;;  %vm10971_vm1 = vcmp.gt.f32.partialorder %v8918_v55, 20.0  ;;  %v3525_v27 = vadd.f32 0.1, %v3487_v34  ;;  %v9048_v14 = vpop.eup %6482 }
 0x5b5   :  { %v3283_v4 = vmul.f32 1.442695, %v3227_v61  ;;  %vm10978_vm0 = vcmp.eq.s32.totalorder %v11275_v60, 1  ;;  %vm10983_vm13 = vcmp.eq.s32.totalorder %v11276_v56, 1  ;;  %v2865_v51 = vmul.f32 1.442695, %v2809_v12  ;;  %v9054_v32 = vpop.eup %6484 }
 0x5b6   :  { %v3376_v43 = vsel %vm10971_vm1, %v6479_v2, %v3338_v45  ;;  %v3426_v24 = vmul.f32 0.6931472, %v6481_v30  ;;  %6500 = vpow2.f32 %v3279_v7  ;;  %vm10980_vm14 = vcmp.eq.s32.totalorder %v11277_v39, 1  ;;  %4259 = vrot.lane.b32.xlu0 %v3525_v27, %s6802_s1  ;;  %v9063_v45 = vpop.eup %6486  ;;  %v4454_v7 = vpop.permute.xlu0 %4453  ;;  %v11294_v39 = vld [vmem:[#allocation67_spill] sm:$0xff] }
 0x5b7   :  { %v2867_v34 = vmul.f32 1.442695, %v2810_v37  ;;  %4075 = vrot.lane.b32.xlu1 %v3376_v43, %s6801_s20  ;;  %6502 = vpow2.f32 %v3281_v8  ;;  %v3229_v61 = vmin.f32 %v9037_v31, 20.0  ;;  %v3756_v12 = vsel %vm10974_vm12, %v8604_v3, 0.0  ;;  %v9069_v43 = vpop.eup %6488  ;;  %v4456_v8 = vpop.permute.xlu1 %4455  ;;  %v9075_v3 = vld [vmem:[%s10761_s14] ss:$0 sm:$0xff] }
 0x5b8   :  { %6504 = vpow2.f32 %v3169_v28  ;;  %v2811_v2 = vsub.f32 0.0, %v9037_v31  ;;  %vm11278_vm1 = vcmp.gt.f32.partialorder %v8868_v25, 20.0  ;;  %v3285_v30 = vmul.f32 1.442695, %v3228_v22  ;;  %s6803_s14 = smov 44  }
 0x5b9   :  { %v3488_v37 = vsel %vm11278_vm1, %v8868_v25, %v3426_v24  ;;  %v3171_v27 = vmul.f32 1.442695, %v9017_v62  ;;  %v9079_v28 = vadd.f32 %v9075_v3, %v9007_v47  ;;  %6506 = vpow2.f32 %v3283_v4  ;;  %v6491_v50 = vpop.eup %6490  ;;  %v9095_v4 = vpop.f32.mrb[240].mxu0 }
 0x5ba   :  { %v3526_v9 = vadd.f32 0.1, %v3488_v37  ;;  %6508 = vpow2.f32 %v2865_v51  ;;  %v3173_v25 = vmul.f32 1.442695, %v9037_v31  ;;  %vm11279_vm1 = vcmask 23552   ;;  %v9089_v38 = vpop.eup %6492 }
 0x5bb   :  { %v9084_v22 = vsel %vm11279_vm1, %v8995_v10, %v4452_v59  ;;  %v3757_v24 = vsel %vm10975_vm15, %v8607_v21, 0.0  ;;  %6510 = vpow2.f32 %v2867_v34  ;;  %v9093_v47 = vadd.f32 %v9075_v3, %v2500_v23  ;;  %v4458_v10 = vpop.permute.xlu0 %4457  ;;  %vm11283_vm15 = vmmov %vm11279_vm1 }
 0x5bc   :  { %11280 = vst [vmem:[#allocation109_spill] sm:$0xff] %v9084_v22  ;;  %4261 = vrot.lane.b32.xlu1 %v3526_v9, %s6802_s1  ;;  %v3287_v51 = vmul.f32 1.442695, %v3229_v61  ;;  %vm11281_vm12 = vcmp.eq.s32.totalorder %v11274_v35, 1  ;;  %v2869_v37 = vmul.f32 1.442695, %v2811_v2  ;;  %6512 = vpow2.f32 %v3285_v30  ;;  %v6495_v23 = vpop.eup %6494  ;;  %v4460_v9 = vpop.permute.xlu1 %4459 }
 0x5bd   :  { %v3758_v59 = vsel %vm11281_vm12, %v8610_v57, 0.0  ;;  %v5986_v22 = vpop.f32.mrb[241].mxu0  ;;  %v9102_v21 = vsel %vm11279_vm1, %v9014_v42, %v4454_v7  ;;  %v9105_v34 = vsel %vm11283_vm15, %v3756_v12, %v4456_v8  ;;  %6514 = vpow2.f32 %v3171_v27  ;;  %v9111_v2 = vpop.eup %6496  ;;  %vm11286_vm12 = vmmov %vm11279_vm1  ;;  %v11290_v8 = vld [vmem:[#allocation66_spill] sm:$0xff] }
 0x5be   :  { %11282 = vst [vmem:[#allocation110_spill] sm:$0xff] %v9102_v21  ;;  %11284 = vst [vmem:[#allocation111_spill] sm:$0xff] %v9105_v34  ;;  %v2812_v61 = vsub.f32 0.0, %v9079_v28  ;;  %v3175_v46 = vmul.f32 1.442695, %v9079_v28  ;;  %v9109_v57 = vpop.f32.mrb[242].mxu0  ;;  %6516 = vpow2.f32 %v3173_v25  ;;  %v9114_v42 = vsel %vm11286_vm12, %v3757_v24, %v4458_v10  ;;  %v6499_v7 = vpop.eup %6498 }
 0x5bf   :  { %v3428_v35 = vmul.f32 0.6931472, %v6491_v50  ;;  %11285 = vst [vmem:[#allocation112_spill] sm:$0xff] %v9111_v2  ;;  %v3430_v30 = vmul.f32 0.6931472, %v6495_v23  ;;  %v5987_v22 = vpop.f32.mrb[243].mxu0  ;;  %vm11288_vm15 = vmmov %vm11279_vm1  ;;  %6518 = vpow2.f32 %v3287_v51  ;;  %v9138_v56 = vadd.f32 %v9075_v3, %v9046_v44 }
 0x5c0   :  { %11287 = vst [vmem:[#allocation113_spill] sm:$0xff] %v9114_v42  ;;  %v9117_v12 = vsel %vm11288_vm15, %v3758_v59, %v4460_v9  ;;  %vm10985_vm1 = vcmp.eq.s32.totalorder %v11290_v8, 1  ;;  %v2813_v27 = vsub.f32 0.0, %v9093_v47  ;;  %v3759_v50 = vsel %vm10978_vm0, %v8613_v15, 0.0  ;;  %v6501_v23 = vpop.eup %6500  ;;  %v4464_v44 = vpop.permute.xlu1 %4463 }
 0x5c1   :  { %11289 = vst [vmem:[#allocation114_spill] sm:$0xff] %v9117_v12  ;;  %v3760_v25 = vsel %vm10983_vm13, %v8616_v52, 0.0  ;;  %6520 = vpow2.f32 %v2869_v37  ;;  %vm3111_vm12 = vcmp.gt.f32.partialorder %v8958_v29, 20.0  ;;  %vm10984_vm15 = vcmp.gt.f32.partialorder %v8980_v49, 20.0  ;;  %v6503_v59 = vpop.eup %6502  ;;  %v4462_v52 = vpop.permute.xlu0 %4461 }
 0x5c2   :  { %v3761_v24 = vsel %vm10980_vm14, %v8624_v19, 0.0  ;;  %v2871_v51 = vmul.f32 1.442695, %v2812_v61  ;;  %6522 = vpow2.f32 %v3175_v46  ;;  %v3339_v10 = vadd.f32 1.0, %v6501_v23  ;;  %v6505_v9 = vpop.eup %6504 }
 0x5c3   :  { %vm11291_vm0 = vcmp.gt.f32.partialorder %v8888_v58, 20.0  ;;  %v3177_v37 = vmul.f32 1.442695, %v9093_v47  ;;  %v3340_v22 = vadd.f32 1.0, %v6503_v59  ;;  %vm11292_vm14 = vcmp.gt.f32.partialorder %v8918_v55, 20.0  ;;  %v6507_v61 = vpop.eup %6506 }
 0x5c4   :  { %v3489_v15 = vsel %vm11291_vm0, %v8888_v58, %v3428_v35  ;;  %v3490_v19 = vsel %vm11292_vm14, %v8918_v55, %v3430_v30  ;;  %v2873_v46 = vmul.f32 1.442695, %v2813_v27  ;;  %v3377_v23 = vsel %vm3111_vm12, %v9069_v43, %v3339_v10  ;;  %v9146_v58 = vpop.f32.mrb[244].mxu0  ;;  %v9149_v59 = vpop.eup %6508 }
 0x5c5   :  { %6524 = vlog2.f32 %v3339_v10  ;;  %v3230_v35 = vmin.f32 %v9079_v28, 20.0  ;;  %11293 = vst [vmem:[#allocation115_spill] sm:$0xff] %v9149_v59  ;;  %vm10988_vm0 = vcmp.eq.s32.totalorder %v11294_v39, 1  ;;  %4077 = vrot.lane.b32.xlu0 %v3377_v23, %s6801_s20  ;;  %v3378_v55 = vsel %vm10984_vm15, %v6499_v7, %v3340_v22  ;;  %v5990_v60 = vpop.f32.mrb[245].mxu0  ;;  %v9155_v43 = vpop.eup %6510 }
 0x5c6   :  { %6526 = vlog2.f32 %v3340_v22  ;;  %v3527_v30 = vadd.f32 0.1, %v3489_v15  ;;  %v3341_v27 = vadd.f32 1.0, %v6507_v61  ;;  %11295 = vst [vmem:[#allocation116_spill] sm:$0xff] %v9155_v43  ;;  %4079 = vrot.lane.b32.xlu1 %v3378_v55, %s6801_s20  ;;  %v3528_v10 = vadd.f32 0.1, %v3490_v19  ;;  %v6513_v34 = vpop.eup %6512  ;;  %v4466_v7 = vpop.permute.xlu0 %4465 }
 0x5c7   :  { %6528 = vpow2.f32 %v2871_v51  ;;  %v9158_v12 = vpop.f32.mrb[246].mxu0  ;;  %vm11296_vm14 = vcmask 23552   ;;  %v2814_v15 = vsub.f32 0.0, %v9138_v56  ;;  %v9169_v60 = vadd.f32 %v9075_v3, %v9095_v4  ;;  %v6515_v19 = vpop.eup %6514 }
 0x5c8   :  { %v9161_v42 = vsel %vm11296_vm14, %v3759_v50, %v4462_v52  ;;  %vm11298_vm13 = vmmov %vm11296_vm14  ;;  %6530 = vlog2.f32 %v3341_v27  ;;  %v5991_v51 = vpop.f32.mrb[247].mxu0  ;;  %v3231_v22 = vmin.f32 %v9093_v47, 20.0  ;;  %v3342_v61 = vadd.f32 1.0, %v6513_v34 }
 0x5c9   :  { %11297 = vst [vmem:[#allocation117_spill] sm:$0xff] %v9161_v42  ;;  %v9164_v23 = vsel %vm11298_vm13, %v3760_v25, %v4464_v44  ;;  %6532 = vpow2.f32 %v3177_v37  ;;  %v3289_v50 = vmul.f32 1.442695, %v3230_v35  ;;  %vm11300_vm14 = vmmov %vm11298_vm13  ;;  %v9175_v25 = vpop.eup %6516  ;;  %4263 = vrot.lane.b32.xlu0 %v3527_v30, %s6802_s1  ;;  %vm3113_vm13 = vcmp.gt.f32.partialorder %v9005_v6, 20.0  ;;  %v11303_v44 = vld [vmem:[#allocation68_spill] sm:$0xff]  ;;  %v11304_v51 = vld [vmem:[#allocation69_spill] sm:$0xff]  ;;  %v4468_v42 = vpop.permute.xlu1 %4467 }
 0x5ca   :  { %11299 = vst [vmem:[#allocation118_spill] sm:$0xff] %v9164_v23  ;;  %v9173_v52 = vsel %vm11300_vm14, %v3761_v24, %v4466_v7  ;;  %6534 = vpow2.f32 %v2873_v46  ;;  %v9181_v4 = vadd.f32 %v9075_v3, %v9109_v57  ;;  %v3762_v37 = vsel %vm10985_vm1, %v8626_v40, 0.0  ;;  %v6519_v34 = vpop.eup %6518  ;;  %4265 = vrot.lane.b32.xlu1 %v3528_v10, %s6802_s1 }
 0x5cb   :  { %11301 = vst [vmem:[#allocation119_spill] sm:$0xff] %v9173_v52  ;;  %v3179_v35 = vmul.f32 1.442695, %v9138_v56  ;;  %vm10989_vm14 = vcmp.gt.f32.partialorder %v9017_v62, 20.0  ;;  %6536 = vlog2.f32 %v3342_v61  ;;  %v3232_v24 = vmin.f32 %v9138_v56, 20.0  ;;  %v9190_v46 = vpop.eup %6520  ;;  %v2524_v52 = vpop.f32.mrb[248].mxu0 }
 0x5cc   :  { %11302 = vst [vmem:[#allocation120_spill] sm:$0xff] %v9190_v46  ;;  %vm10994_vm15 = vcmp.eq.s32.totalorder %v11303_v44, 1  ;;  %v2875_v57 = vmul.f32 1.442695, %v2814_v15  ;;  %v2815_v55 = vsub.f32 0.0, %v9169_v60  ;;  %v9194_v30 = vadd.f32 1.0, %v6519_v34  ;;  %v9196_v7 = vpop.eup %6522 }
 0x5cd   :  { %v3291_v40 = vmul.f32 1.442695, %v3231_v22  ;;  %v3181_v10 = vmul.f32 1.442695, %v9169_v60  ;;  %v3379_v8 = vsel %vm3113_vm13, %v6505_v9, %v3341_v27  ;;  %6538 = vpow2.f32 %v3289_v50  ;;  %v5994_v34 = vpop.f32.mrb[249].mxu0  ;;  %v9228_v39 = vpop.permute.xlu1 %4471 }
 0x5ce   :  { %v3233_v23 = vmin.f32 %v9169_v60, 20.0  ;;  %4081 = vrot.lane.b32.xlu0 %v3379_v8, %s6801_s20  ;;  %v3380_v15 = vsel %vm10989_vm14, %v6515_v19, %v3342_v61  ;;  %v2816_v22 = vsub.f32 0.0, %v9181_v4  ;;  %6540 = vlog2.f32 %v9194_v30  ;;  %v9210_v27 = vpop.f32.mrb[250].mxu0 }
 0x5cf   :  { %v3234_v21 = vmin.f32 %v9181_v4, 20.0  ;;  %v6525_v46 = vpop.eup %6524  ;;  %6542 = vpow2.f32 %v3179_v35  ;;  %4083 = vrot.lane.b32.xlu1 %v3380_v15, %s6801_s20  ;;  %v3293_v9 = vmul.f32 1.442695, %v3232_v24  ;;  %vm11305_vm1 = vcmask 23552   ;;  %v5995_v35 = vpop.f32.mrb[251].mxu0 }
 0x5d0   :  { %v9213_v50 = vsel %vm11305_vm1, %v3762_v37, %v4468_v42  ;;  %v3763_v8 = vsel %vm10988_vm0, %v8631_v26, 0.0  ;;  %v6527_v19 = vpop.eup %6526  ;;  %6544 = vpow2.f32 %v2875_v57  ;;  %v2877_v61 = vmul.f32 1.442695, %v2815_v55  ;;  %v4470_v24 = vpop.permute.xlu0 %4469  ;;  %v11308_v35 = vld [vmem:[#allocation70_spill] sm:$0xff] }
 0x5d1   :  { %11306 = vst [vmem:[#allocation121_spill] sm:$0xff] %v9213_v50  ;;  %v3432_v34 = vmul.f32 0.6931472, %v6525_v46  ;;  %v9220_v43 = vadd.f32 %v9075_v3, %v9146_v58  ;;  %v9222_v15 = vpop.eup %6528  ;;  %v3434_v59 = vmul.f32 0.6931472, %v6527_v19  ;;  %v9226_v42 = vadd.f32 %v9075_v3, %v9158_v12 }
 0x5d2   :  { %11307 = vst [vmem:[#allocation122_spill] sm:$0xff] %v9222_v15  ;;  %6546 = vpow2.f32 %v3291_v40  ;;  %v3295_v37 = vmul.f32 1.442695, %v3233_v23  ;;  %v6531_v26 = vpop.eup %6530  ;;  %v2879_v46 = vmul.f32 1.442695, %v2816_v22  ;;  %vm10993_vm1 = vcmp.eq.s32.totalorder %v11308_v35, 1 }
 0x5d3   :  { %6548 = vpow2.f32 %v3181_v10  ;;  %v3491_v58 = vsel %vm3111_vm12, %v8958_v29, %v3432_v34  ;;  %v3297_v57 = vmul.f32 1.442695, %v3234_v21  ;;  %v9233_v55 = vpop.eup %6532  ;;  %vm11309_vm0 = vcmp.gt.f32.partialorder %v8980_v49, 20.0 }
 0x5d4   :  { %v3529_v19 = vadd.f32 0.1, %v3491_v58  ;;  %v3492_v12 = vsel %vm11309_vm0, %v8980_v49, %v3434_v59  ;;  %v3436_v23 = vmul.f32 0.6931472, %v6531_v26  ;;  %6550 = vpow2.f32 %v3293_v9  ;;  %v9239_v40 = vpop.eup %6534  ;;  %v9245_v34 = vpop.permute.xlu0 %4473 }
 0x5d5   :  { %11310 = vst [vmem:[#allocation123_spill] sm:$0xff] %v9239_v40  ;;  %6552 = vpow2.f32 %v2877_v61  ;;  %v3530_v10 = vadd.f32 0.1, %v3492_v12  ;;  %v2817_v22 = vsub.f32 0.0, %v9220_v43  ;;  %vm11311_vm14 = vcmask 23552   ;;  %v6537_v21 = vpop.eup %6536  ;;  %v9250_v59 = vpop.f32.mrb[252].mxu0 }
 0x5d6   :  { %v9243_v29 = vsel %vm11311_vm14, %v3763_v8, %v4470_v24  ;;  %v3183_v58 = vmul.f32 1.442695, %v9181_v4  ;;  %4267 = vrot.lane.b32.xlu0 %v3529_v19, %s6802_s1  ;;  %v2818_v49 = vsub.f32 0.0, %v9226_v42  ;;  %6554 = vpow2.f32 %v3295_v37  ;;  %v9257_v61 = vpop.permute.xlu1 %4475 }
 0x5d7   :  { %11312 = vst [vmem:[#allocation124_spill] sm:$0xff] %v9243_v29  ;;  %v9255_v9 = vsel %vm10994_vm15, %v8637_v41, 0.0  ;;  %6556 = vpow2.f32 %v2879_v46  ;;  %4269 = vrot.lane.b32.xlu1 %v3530_v10, %s6802_s1  ;;  %v3493_v8 = vsel %vm3113_vm13, %v9005_v6, %v3436_v23  ;;  %v3438_v24 = vmul.f32 0.6931472, %v6537_v21  ;;  %v6539_v37 = vpop.eup %6538  ;;  %v5998_v46 = vpop.f32.mrb[253].mxu0 }
 0x5d8   :  { %vm11313_vm12 = vcmp.eq.s32.totalorder %v11304_v51, 1  ;;  %v3185_v19 = vmul.f32 1.442695, %v9220_v43  ;;  %vm3115_vm0 = vcmp.gt.f32.partialorder %v9037_v31, 20.0  ;;  %v9271_v41 = vadd.f32 %v9075_v3, %v2524_v52  ;;  %v6541_v12 = vpop.eup %6540  ;;  %v9280_v21 = vpop.f32.mrb[254].mxu0 }
 0x5d9   :  { %v9266_v26 = vsel %vm11313_vm12, %v8640_v33, 0.0  ;;  %6558 = vpow2.f32 %v3297_v57  ;;  %v2881_v10 = vmul.f32 1.442695, %v2817_v22  ;;  %v3381_v6 = vsel %vm3115_vm0, %v9175_v25, %v9194_v30  ;;  %v9282_v51 = vpop.eup %6542  ;;  %v9284_v52 = vpop.permute.xlu0 %4477 }
 0x5da   :  { %v3344_v23 = vadd.f32 1.0, %v6539_v37  ;;  %vm11314_vm13 = vcmp.gt.f32.partialorder %v9017_v62, 20.0  ;;  %6560 = vpow2.f32 %v3183_v58  ;;  %4085 = vrot.lane.b32.xlu0 %v3381_v6, %s6801_s20  ;;  %vm3116_vm14 = vcmp.gt.f32.partialorder %v9079_v28, 20.0  ;;  %v5999_v46 = vpop.f32.mrb[255].mxu0  ;;  %v9288_v25 = vpop.eup %6544 }
 0x5db   :  { %v3494_v33 = vsel %vm11314_vm13, %v9017_v62, %v3438_v24  ;;  %v2883_v57 = vmul.f32 1.442695, %v2818_v49  ;;  %v3531_v22 = vadd.f32 0.1, %v3493_v8  ;;  %11315 = vst [vmem:[#allocation125_spill] sm:$0xff] %v9288_v25  ;;  %v9290_v30 = vpop.permute.xlu1 %4479  ;;  %v3235_v37 = vmin.f32 %v9220_v43, 20.0 }
 0x5dc   :  { %v3382_v62 = vsel %vm3116_vm14, %v9196_v7, %v3344_v23  ;;  %6562 = vlog2.f32 %v3344_v23  ;;  %v3440_v24 = vmul.f32 0.6931472, %v6541_v12  ;;  %v6547_v58 = vpop.eup %6546  ;;  %v3187_v49 = vmul.f32 1.442695, %v9226_v42  ;;  %v11316_v12 = vld [vmem:[#allocation83_spill] sm:$0xff] }
 0x5dd   :  { %6564 = vpow2.f32 %v3185_v19  ;;  %4087 = vrot.lane.b32.xlu1 %v3382_v62, %s6801_s20  ;;  %v3532_v8 = vadd.f32 0.1, %v3494_v33  ;;  %v2819_v6 = vsub.f32 0.0, %v9271_v41  ;;  %v9299_v46 = vpop.eup %6548  ;;  %v3345_v44 = vadd.f32 1.0, %v6547_v58  ;;  %v9308_v29 = vpop.permute.xlu0 %4481 }
 0x5de   :  { %6566 = vpow2.f32 %v2881_v10  ;;  %v9303_v7 = vadd.f32 %v9075_v3, %v9210_v27  ;;  %v3766_v23 = vsel %vm10993_vm1, %v11316_v12, 0.0  ;;  %v6551_v19 = vpop.eup %6550  ;;  %4271 = vrot.lane.b32.xlu0 %v3531_v22, %s6802_s1  ;;  %v3189_v33 = vmul.f32 1.442695, %v9271_v41  ;;  %v2540_v10 = vpop.f32.mrb[0].mxu0 }
 0x5df   :  { %6568 = vpow2.f32 %v2883_v57  ;;  %vm3117_vm12 = vcmp.gt.f32.partialorder %v9093_v47, 20.0  ;;  %vm10995_vm13 = vcmp.gt.f32.partialorder %v9138_v56, 20.0  ;;  %v9314_v62 = vpop.eup %6552  ;;  %v9316_v27 = vpop.permute.xlu1 %4483  ;;  %v3346_v58 = vadd.f32 1.0, %v6551_v19  ;;  %v11319_v19 = vld [vmem:[#allocation71_spill] sm:$0xff] }
 0x5e0   :  { %11317 = vst [vmem:[#allocation83_spill] sm:$0xff] %v9314_v62  ;;  %6570 = vlog2.f32 %v3345_v44  ;;  %v3495_v12 = vsel %vm3115_vm0, %v9037_v31, %v3440_v24  ;;  %v3299_v57 = vmul.f32 1.442695, %v3235_v37  ;;  %v6002_v35 = vpop.f32.mrb[1].mxu0  ;;  %v6555_v22 = vpop.eup %6554  ;;  %v2885_v50 = vmul.f32 1.442695, %v2819_v6 }
 0x5e1   :  { %6572 = vpow2.f32 %v3187_v49  ;;  %4273 = vrot.lane.b32.xlu1 %v3532_v8, %s6802_s1  ;;  %v9324_v25 = vadd.f32 %v9075_v3, %v9250_v59  ;;  %v3236_v62 = vmin.f32 %v9226_v42, 20.0  ;;  %v2543_v40 = vpop.f32.mrb[2].mxu0  ;;  %v9327_v15 = vpop.eup %6556  ;;  %vm10996_vm1 = vcmp.eq.s32.totalorder %v11319_v19, 1 }
 0x5e2   :  { %11318 = vst [vmem:[#allocation126_spill] sm:$0xff] %v9327_v15  ;;  %v3383_v31 = vsel %vm3117_vm12, %v9233_v55, %v3345_v44  ;;  %6574 = vlog2.f32 %v3346_v58  ;;  %v2820_v35 = vsub.f32 0.0, %v9303_v7  ;;  %v3347_v24 = vadd.f32 1.0, %v6555_v22  ;;  %v6003_v37 = vpop.f32.mrb[3].mxu0  ;;  %v9334_v8 = vpop.permute.xlu0 %4485 }
 0x5e3   :  { %v6559_v49 = vpop.eup %6558  ;;  %11320 = vst [vmem:[#allocation127_spill] sm:$0xff] %v9334_v8  ;;  %6576 = vpow2.f32 %v3189_v33  ;;  %4089 = vrot.lane.b32.xlu0 %v3383_v31, %s6801_s20  ;;  %v3191_v59 = vmul.f32 1.442695, %v9303_v7  ;;  %v3533_v6 = vadd.f32 0.1, %v3495_v12  ;;  %v3237_v15 = vmin.f32 %v9271_v41, 20.0  ;;  %v9339_v54 = vpop.permute.xlu1 %4487 }
 0x5e4   :  { %11321 = vst [vmem:[#allocation128_spill] sm:$0xff] %v9339_v54  ;;  %v3384_v44 = vsel %vm10995_vm13, %v9282_v51, %v3346_v58  ;;  %6578 = vlog2.f32 %v3347_v24  ;;  %v9344_v55 = vadd.f32 1.0, %v6559_v49  ;;  %v9348_v22 = vadd.f32 %v9075_v3, %v9280_v21  ;;  %v9350_v33 = vpop.eup %6560 }
 0x5e5   :  { %6580 = vpow2.f32 %v2885_v50  ;;  %4091 = vrot.lane.b32.xlu1 %v3384_v44, %s6801_s20  ;;  %v2821_v12 = vsub.f32 0.0, %v9324_v25  ;;  %v3301_v31 = vmul.f32 1.442695, %v3236_v62  ;;  %vm11322_vm0 = vcmask 23552  }
 0x5e6   :  { %v9357_v37 = vsel %vm11322_vm0, %v9255_v9, %v9228_v39  ;;  %v6563_v51 = vpop.eup %6562  ;;  %v2887_v58 = vmul.f32 1.442695, %v2820_v35  ;;  %6582 = vlog2.f32 %v9344_v55  ;;  %vm11324_vm15 = vmmov %vm11322_vm0  ;;  %v9371_v62 = vpop.permute.xlu0 %4489  ;;  %v3193_v9 = vmul.f32 1.442695, %v9324_v25 }
 0x5e7   :  { %11323 = vst [vmem:[#allocation129_spill] sm:$0xff] %v9357_v37  ;;  %v9363_v21 = vsel %vm11324_vm15, %v9266_v26, %v9245_v34  ;;  %vm11326_vm13 = vmmov %vm11322_vm0  ;;  %v9369_v49 = vpop.eup %6564  ;;  %6584 = vpow2.f32 %v3191_v59  ;;  %4275 = vrot.lane.b32.xlu0 %v3533_v6, %s6802_s1  ;;  %v3442_v39 = vmul.f32 0.6931472, %v6563_v51  ;;  %v2548_v35 = vpop.f32.mrb[4].mxu0  ;;  %v3238_v44 = vmin.f32 %v9303_v7, 20.0  ;;  %v11330_v34 = vld [vmem:[#allocation72_spill] sm:$0xff] }
 0x5e8   :  { %11325 = vst [vmem:[#allocation130_spill] sm:$0xff] %v9363_v21  ;;  %v9367_v50 = vsel %vm11326_vm13, %v3766_v23, %v9257_v61  ;;  %11328 = vst [vmem:[#allocation132_spill] sm:$0xff] %v9371_v62  ;;  %v9376_v54 = vpop.eup %6566  ;;  %vm11001_vm15 = vcmp.eq.s32.totalorder %v11330_v34, 1  ;;  %v11331_v26 = vld [vmem:[#allocation73_spill] sm:$0xff]  ;;  %v9380_v61 = vpop.permute.xlu1 %4491  ;;  %v2822_v23 = vsub.f32 0.0, %v9348_v22  ;;  %v9384_v59 = vadd.f32 %v9075_v3, %v2540_v10 }
 0x5e9   :  { %11327 = vst [vmem:[#allocation131_spill] sm:$0xff] %v9367_v50  ;;  %11329 = vst [vmem:[#allocation133_spill] sm:$0xff] %v9376_v54  ;;  %vm11000_vm13 = vcmp.eq.s32.totalorder %v11331_v26, 1  ;;  %6586 = vpow2.f32 %v3299_v57  ;;  %v3303_v6 = vmul.f32 1.442695, %v3237_v15  ;;  %v6006_v51 = vpop.f32.mrb[5].mxu0  ;;  %v9386_v62 = vpop.eup %6568  ;;  %v3496_v8 = vsel %vm3116_vm14, %v9079_v28, %v3442_v39 }
 0x5ea   :  { %11332 = vst [vmem:[#allocation134_spill] sm:$0xff] %v9380_v61  ;;  %11333 = vst [vmem:[#allocation135_spill] sm:$0xff] %v9386_v62  ;;  %v2889_v50 = vmul.f32 1.442695, %v2821_v12  ;;  %vm3119_vm0 = vcmp.gt.f32.partialorder %v9169_v60, 20.0  ;;  %6588 = vpow2.f32 %v3301_v31  ;;  %v9392_v21 = vpop.f32.mrb[6].mxu0  ;;  %v6571_v61 = vpop.eup %6570  ;;  %v9398_v10 = vadd.f32 %v9075_v3, %v2543_v40 }
 0x5eb   :  { %6590 = vpow2.f32 %v2887_v58  ;;  %v3534_v37 = vadd.f32 0.1, %v3496_v8  ;;  %v3385_v15 = vsel %vm3119_vm0, %v9299_v46, %v3347_v24  ;;  %v9400_v57 = vpop.eup %6572  ;;  %v9402_v51 = vpop.permute.xlu0 %4493  ;;  %v3444_v28 = vmul.f32 0.6931472, %v6571_v61  ;;  %v11335_v39 = vld [vmem:[#allocation84_spill] sm:$0xff] }
 0x5ec   :  { %11334 = vst [vmem:[#allocation136_spill] sm:$0xff] %v9402_v51  ;;  %6592 = vpow2.f32 %v3193_v9  ;;  %4093 = vrot.lane.b32.xlu0 %v3385_v15, %s6801_s20  ;;  %v3305_v12 = vmul.f32 1.442695, %v3238_v44  ;;  %v6007_v31 = vpop.f32.mrb[7].mxu0  ;;  %v9408_v8 = vsel %vm10996_vm1, %v11335_v39, 0.0  ;;  %v6575_v58 = vpop.eup %6574  ;;  %vm3120_vm14 = vcmp.gt.f32.partialorder %v9181_v4, 20.0 }
 0x5ed   :  { %v9410_v46 = vpop.permute.xlu1 %4495  ;;  %4277 = vrot.lane.b32.xlu1 %v3534_v37, %s6802_s1  ;;  %v2891_v40 = vmul.f32 1.442695, %v2822_v23  ;;  %v2823_v24 = vsub.f32 0.0, %v9384_v59  ;;  %6594 = vpow2.f32 %v3303_v6  ;;  %v9415_v9 = vpop.eup %6576  ;;  %v3195_v44 = vmul.f32 1.442695, %v9348_v22  ;;  %v11337_v39 = vld [vmem:[#allocation74_spill] sm:$0xff] }
 0x5ee   :  { %11336 = vst [vmem:[#allocation84_spill] sm:$0xff] %v9410_v46  ;;  %6596 = vpow2.f32 %v2889_v50  ;;  %v3497_v61 = vsel %vm3117_vm12, %v9093_v47, %v3444_v28  ;;  %v3446_v15 = vmul.f32 0.6931472, %v6575_v58  ;;  %v6579_v31 = vpop.eup %6578  ;;  %vm11002_vm1 = vcmp.eq.s32.totalorder %v11337_v39, 1 }
 0x5ef   :  { %v3535_v37 = vadd.f32 0.1, %v3497_v61  ;;  %v3197_v46 = vmul.f32 1.442695, %v9384_v59  ;;  %v2824_v23 = vsub.f32 0.0, %v9398_v10  ;;  %v3239_v6 = vmin.f32 %v9324_v25, 20.0  ;;  %v9425_v51 = vpop.eup %6580  ;;  %v9427_v50 = vpop.permute.xlu0 %4497 }
 0x5f0   :  { %11338 = vst [vmem:[#allocation137_spill] sm:$0xff] %v9425_v51  ;;  %11339 = vst [vmem:[#allocation138_spill] sm:$0xff] %v9427_v50  ;;  %v3386_v47 = vsel %vm3120_vm14, %v9350_v33, %v9344_v55  ;;  %vm11340_vm12 = vcmp.gt.f32.partialorder %v9138_v56, 20.0  ;;  %v3448_v58 = vmul.f32 0.6931472, %v6579_v31  ;;  %6598 = vpow2.f32 %v3305_v12  ;;  %v2556_v61 = vpop.f32.mrb[8].mxu0  ;;  %v6583_v19 = vpop.eup %6582 }
 0x5f1   :  { %v3498_v28 = vsel %vm11340_vm12, %v9138_v56, %v3446_v15  ;;  %v9436_v62 = vpop.permute.xlu1 %4499  ;;  %4095 = vrot.lane.b32.xlu1 %v3386_v47, %s6801_s20  ;;  %6600 = vpow2.f32 %v2891_v40  ;;  %4279 = vrot.lane.b32.xlu0 %v3535_v37, %s6802_s1  ;;  %v2893_v51 = vmul.f32 1.442695, %v2823_v24  ;;  %v9441_v54 = vadd.f32 %v9075_v3, %v2548_v35  ;;  %v6010_v55 = vpop.f32.mrb[9].mxu0  ;;  %v11342_v15 = vld [vmem:[#allocation85_spill] sm:$0xff]  ;;  %v11343_v47 = vld [vmem:[#allocation86_spill] sm:$0xff] }
 0x5f2   :  { %11341 = vst [vmem:[#allocation139_spill] sm:$0xff] %v9436_v62  ;;  %v3536_v50 = vadd.f32 0.1, %v3498_v28  ;;  %v9443_v33 = vpop.eup %6584  ;;  %6602 = vpow2.f32 %v3195_v44  ;;  %v3450_v56 = vmul.f32 0.6931472, %v6583_v19  ;;  %v9445_v12 = vpop.f32.mrb[10].mxu0 }
 0x5f3   :  { %v3768_v31 = vsel %vm11001_vm15, %v11342_v15, 0.0  ;;  %v3769_v40 = vsel %vm11000_vm13, %v11343_v47, 0.0  ;;  %v6587_v37 = vpop.eup %6586  ;;  %6604 = vpow2.f32 %v3197_v46  ;;  %vm11004_vm12 = vcmp.gt.f32.partialorder %v9220_v43, 20.0  ;;  %v6011_v62 = vpop.f32.mrb[11].mxu0 }
 0x5f4   :  { %v3307_v35 = vmul.f32 1.442695, %v3239_v6  ;;  %v3240_v24 = vmin.f32 %v9348_v22, 20.0  ;;  %v6589_v28 = vpop.eup %6588  ;;  %v3349_v44 = vadd.f32 1.0, %v6587_v37  ;;  %v2895_v19 = vmul.f32 1.442695, %v2824_v23  ;;  %v9462_v47 = vpop.permute.xlu0 %4045 }
 0x5f5   :  { %v3199_v55 = vmul.f32 1.442695, %v9398_v10  ;;  %v3499_v15 = vsel %vm3119_vm0, %v9169_v60, %v3448_v58  ;;  %v9459_v34 = vpop.eup %6590  ;;  %4281 = vrot.lane.b32.xlu1 %v3536_v50, %s6802_s1  ;;  %6606 = vpow2.f32 %v2893_v51  ;;  %v3350_v46 = vadd.f32 1.0, %v6589_v28  ;;  %v9465_v26 = vpop.permute.xlu1 %4047  ;;  %v11345_v60 = vld [vmem:[#allocation75_spill] sm:$0xff]  ;;  %v11346_v28 = vld [vmem:[#allocation76_spill] sm:$0xff] }
 0x5f6   :  { %11344 = vst [vmem:[#allocation85_spill] sm:$0xff] %v9459_v34  ;;  %v2825_v6 = vsub.f32 0.0, %v9441_v54  ;;  %v9469_v23 = vadd.f32 %v9075_v3, %v9392_v21  ;;  %v9471_v37 = vpop.eup %6592  ;;  %vm11008_vm0 = vcmp.eq.s32.totalorder %v11345_v60, 1  ;;  %v3387_v62 = vsel %vm11004_vm12, %v9369_v49, %v3349_v44 }
 0x5f7   :  { %6608 = vlog2.f32 %v3349_v44  ;;  %v3500_v51 = vsel %vm3120_vm14, %v9181_v4, %v3450_v56  ;;  %v9481_v50 = vadd.f32 %v9075_v3, %v2556_v61  ;;  %v6595_v58 = vpop.eup %6594  ;;  %vm11007_vm13 = vcmp.eq.s32.totalorder %v11346_v28, 1  ;;  %4097 = vrot.lane.b32.xlu0 %v3387_v62, %s6801_s20  ;;  %v11348_v61 = vld [vmem:[#allocation87_spill] sm:$0xff] }
 0x5f8   :  { %vm11003_vm15 = vcmp.gt.f32.partialorder %v9226_v42, 20.0  ;;  %6610 = vlog2.f32 %v3350_v46  ;;  %v3537_v21 = vadd.f32 0.1, %v3499_v15  ;;  %v3309_v34 = vmul.f32 1.442695, %v3240_v24  ;;  %v9486_v0 = vpop.eup %6596  ;;  %v9497_v24 = vpop.permute.xlu0 %4049 }
 0x5f9   :  { %11347 = vst [vmem:[#allocation86_spill] sm:$0xff] %v9486_v0  ;;  %v3388_v49 = vsel %vm11003_vm15, %v9400_v57, %v3350_v46  ;;  %6612 = vpow2.f32 %v2895_v19  ;;  %v3201_v4 = vmul.f32 1.442695, %v9441_v54  ;;  %v3770_v56 = vsel %vm11002_vm1, %v11348_v61, 0.0  ;;  %v9499_v0 = vpop.permute.xlu1 %4051  ;;  %v11349_v57 = vld [vmem:[#allocation77_spill] sm:$0xff]  ;;  %v11354_v61 = vld [vmem:[#allocation78_spill] sm:$0xff] }
 0x5fa   :  { %4099 = vrot.lane.b32.xlu1 %v3388_v49, %s6801_s20  ;;  %v3538_v44 = vadd.f32 0.1, %v3500_v51  ;;  %v3351_v62 = vadd.f32 1.0, %v6595_v58  ;;  %v2826_v15 = vsub.f32 0.0, %v9469_v23  ;;  %6614 = vpow2.f32 %v3307_v35  ;;  %v6599_v2 = vpop.eup %6598 }
 0x5fb   :  { %6616 = vpow2.f32 %v3199_v55  ;;  %v2897_v19 = vmul.f32 1.442695, %v2825_v6  ;;  %v2827_v46 = vsub.f32 0.0, %v9481_v50  ;;  %vm11350_vm1 = vcmask 23552   ;;  %v9508_v51 = vpop.eup %6600  ;;  %4283 = vrot.lane.b32.xlu0 %v3537_v21, %s6802_s1 }
 0x5fc   :  { %v9506_v49 = vsel %vm11350_vm1, %v9408_v8, %v9284_v52  ;;  %v3352_v58 = vadd.f32 1.0, %v6599_v2  ;;  %6618 = vpow2.f32 %v3309_v34  ;;  %vm11351_vm15 = vmmov %vm11350_vm1  ;;  %v9519_v6 = vpop.eup %6602  ;;  %vm11012_vm12 = vcmp.eq.s32.totalorder %v11354_v61, 1 }
 0x5fd   :  { %v9513_v35 = vsel %vm11351_vm15, %v3768_v31, %v9290_v30  ;;  %vm11352_vm14 = vmmov %vm11350_vm1  ;;  %6620 = vpow2.f32 %v3201_v4  ;;  %v3203_v52 = vmul.f32 1.442695, %v9469_v23  ;;  %v3241_v8 = vmin.f32 %v9384_v59, 20.0  ;;  %v9528_v34 = vpop.eup %6604  ;;  %v9532_v30 = vpop.permute.xlu0 %4235 }
 0x5fe   :  { %v9517_v55 = vsel %vm11352_vm14, %v3769_v40, %v9308_v29  ;;  %v9526_v2 = vsel %vm11350_vm1, %v3770_v56, %v9316_v27  ;;  %4285 = vrot.lane.b32.xlu1 %v3538_v44, %s6802_s1  ;;  %vm3123_vm15 = vcmp.gt.f32.partialorder %v9271_v41, 20.0  ;;  %6622 = vlog2.f32 %v3351_v62  ;;  %v9534_v31 = vpop.permute.xlu1 %4237 }
 0x5ff   :  { %11353 = vst [vmem:[#allocation87_spill] sm:$0xff] %v9517_v55  ;;  %11355 = vst [vmem:[#allocation140_spill] sm:$0xff] %v9526_v2  ;;  %v2899_v29 = vmul.f32 1.442695, %v2826_v15  ;;  %v3242_v40 = vmin.f32 %v9398_v10, 20.0  ;;  %6624 = vpow2.f32 %v2897_v19  ;;  %v3389_v27 = vsel %vm3123_vm15, %v9415_v9, %v3351_v62  ;;  %v9544_v56 = vpop.eup %6606  ;;  %v11356_v15 = vld [vmem:[#allocation88_spill] sm:$0xff] }
 0x600   :  { %v2901_v21 = vmul.f32 1.442695, %v2827_v46  ;;  %v9542_v4 = vadd.f32 %v9075_v3, %v9445_v12  ;;  %4101 = vrot.lane.b32.xlu0 %v3389_v27, %s6801_s20  ;;  %vm3124_vm14 = vcmp.gt.f32.partialorder %v9303_v7, 20.0  ;;  %6626 = vlog2.f32 %v3352_v58  ;;  %v11358_v62 = vld [vmem:[#allocation89_spill] sm:$0xff] }
 0x601   :  { %v3205_v44 = vmul.f32 1.442695, %v9481_v50  ;;  %v9552_v19 = vsel %vm11008_vm0, %v11356_v15, 0.0  ;;  %v6609_v9 = vpop.eup %6608  ;;  %v3390_v3 = vsel %vm3124_vm14, %v9443_v33, %v3352_v58  ;;  %6628 = vpow2.f32 %v3203_v52  ;;  %v9564_v60 = vpop.permute.xlu0 %4053 }
 0x602   :  { %11357 = vst [vmem:[#allocation88_spill] sm:$0xff] %v9552_v19  ;;  %v3311_v12 = vmul.f32 1.442695, %v3241_v8  ;;  %v9560_v46 = vsel %vm11007_vm13, %v11358_v62, 0.0  ;;  %v6611_v27 = vpop.eup %6610  ;;  %v2906_v2 = vadd.f32 1.0, %v8749_v1  ;;  %4103 = vrot.lane.b32.xlu1 %v3390_v3, %s6801_s20  ;;  %6630 = vpow2.f32 %v2899_v29  ;;  %v9566_v39 = vpop.permute.xlu1 %4055  ;;  %v11456_v19 = vld [vmem:[#allocation111_spill] sm:$0xff] }
 0x603   :  { %11359 = vst [vmem:[#allocation89_spill] sm:$0xff] %v9560_v46  ;;  %v3452_v15 = vmul.f32 0.6931472, %v6609_v9  ;;  %v3313_v55 = vmul.f32 1.442695, %v3242_v40  ;;  %v9568_v33 = vpop.eup %6612  ;;  %v4159_v52 = vsel %vm7106_vm2, %v9462_v47, 0.0  ;;  %6632 = vpow2.f32 %v2901_v21 }
 0x604   :  { %v3454_v8 = vmul.f32 0.6931472, %v6611_v27  ;;  %v2828_v62 = vsub.f32 0.0, %v9542_v4  ;;  %v6615_v1 = vpop.eup %6614  ;;  %v2907_v3 = vadd.f32 1.0, %v8771_v11  ;;  %4577 = vrot.lane.b32.xlu0 %v4159_v52, %s6803_s14  ;;  %6634 = vpow2.f32 %v3205_v44  ;;  %v11362_v40 = vld [vmem:[#allocation90_spill] sm:$0xff]  ;;  %v11419_v27 = vld [vmem:[#allocation85_spill] sm:$0xff] }
 0x605   :  { %vm11361_vm1 = vcmp.gt.f32.partialorder %v9220_v43, 20.0  ;;  %vm11363_vm13 = vcmp.eq.s32.totalorder %v11349_v57, 1  ;;  %v9584_v47 = vpop.eup %6616  ;;  %v2908_v21 = vadd.f32 1.0, %v8810_v63  ;;  %v4160_v11 = vsel %vm7123_vm4, %v9465_v26, 0.0  ;;  %v11367_v63 = vld [vmem:[#allocation91_spill] sm:$0xff] }
 0x606   :  { %v3501_v29 = vsel %vm11361_vm1, %v9220_v43, %v3452_v15  ;;  %v9582_v9 = vsel %vm11363_vm13, %v11362_v40, 0.0  ;;  %vm11366_vm0 = vcmp.gt.f32.partialorder %v9226_v42, 20.0  ;;  %6636 = vpow2.f32 %v3311_v12  ;;  %v6619_v52 = vpop.eup %6618  ;;  %4579 = vrot.lane.b32.xlu1 %v4160_v11, %s6803_s14  ;;  %v9595_v40 = vpop.permute.xlu0 %4239 }
 0x607   :  { %11364 = vst [vmem:[#allocation8_spill] sm:$0xff] %v9582_v9  ;;  %v3502_v44 = vsel %vm11366_vm0, %v9226_v42, %v3454_v8  ;;  %v3539_v43 = vadd.f32 0.1, %v3501_v29  ;;  %v3207_v15 = vmul.f32 1.442695, %v9542_v4  ;;  %v9597_v57 = vpop.permute.xlu1 %4241  ;;  %6638 = vpow2.f32 %v3313_v55  ;;  %v9604_v28 = vpop.eup %6620 }
 0x608   :  { %v9602_v26 = vsel %vm11012_vm12, %v11367_v63, 0.0  ;;  %v2909_v42 = vadd.f32 1.0, %v8827_v5  ;;  %v2903_v12 = vmul.f32 1.442695, %v2828_v62  ;;  %v3353_v8 = vadd.f32 1.0, %v6615_v1  ;;  %v6623_v29 = vpop.eup %6622 }
 0x609   :  { %11368 = vst [vmem:[#allocation90_spill] sm:$0xff] %v9602_v26  ;;  %6640 = vrcp.f32 %v2906_v2  ;;  %v2910_v11 = vadd.f32 1.0, %v8853_v53  ;;  %4287 = vrot.lane.b32.xlu0 %v3539_v43, %s6802_s1  ;;  %v3540_v9 = vadd.f32 0.1, %v3502_v44  ;;  %v3243_v55 = vmin.f32 %v9441_v54, 20.0  ;;  %v9610_v46 = vpop.eup %6624 }
 0x60a   :  { %6642 = vrcp.f32 %v2907_v3  ;;  %v2911_v63 = vadd.f32 1.0, %v8895_v48  ;;  %v9614_v61 = vadd.f32 1.0, %v8909_v20  ;;  %v3354_v5 = vadd.f32 1.0, %v6619_v52  ;;  %v6627_v62 = vpop.eup %6626  ;;  %v9621_v53 = vpop.permute.xlu0 %4057 }
 0x60b   :  { %6644 = vrcp.f32 %v2908_v21  ;;  %v9617_v2 = vadd.f32 1.0, %v8915_v16  ;;  %4289 = vrot.lane.b32.xlu1 %v3540_v9, %s6802_s1  ;;  %vm3125_vm13 = vcmp.gt.f32.partialorder %v9324_v25, 20.0  ;;  %v9623_v1 = vpop.permute.xlu1 %4059  ;;  %v3244_v48 = vmin.f32 %v9469_v23, 20.0  ;;  %v9626_v3 = vpop.eup %6628 }
 0x60c   :  { %6646 = vpow2.f32 %v3207_v15  ;;  %v3391_v20 = vsel %vm3125_vm13, %v9471_v37, %v3353_v8  ;;  %v3456_v16 = vmul.f32 0.6931472, %v6623_v29  ;;  %v3245_v21 = vmin.f32 %v9481_v50, 20.0  ;;  %v9632_v9 = vpop.eup %6630 }
 0x60d   :  { %6648 = vpow2.f32 %v2903_v12  ;;  %4105 = vrot.lane.b32.xlu0 %v3391_v20, %s6801_s20  ;;  %vm11013_vm0 = vcmp.gt.f32.partialorder %v9348_v22, 20.0  ;;  %v3315_v44 = vmul.f32 1.442695, %v3243_v55  ;;  %v3246_v52 = vmin.f32 %v9542_v4, 20.0  ;;  %v9637_v43 = vpop.eup %6632 }
 0x60e   :  { %6650 = vrcp.f32 %v2909_v42  ;;  %v9640_v15 = vadd.f32 1.0, %v8953_v18  ;;  %v3392_v37 = vsel %vm11013_vm0, %v9519_v6, %v3354_v5  ;;  %v3458_v12 = vmul.f32 0.6931472, %v6627_v62  ;;  %v9645_v29 = vpop.eup %6634  ;;  %v9654_v42 = vpop.permute.xlu0 %4243 }
 0x60f   :  { %6652 = vrcp.f32 %v2910_v11  ;;  %v9648_v20 = vadd.f32 1.0, %v8960_v13  ;;  %v9651_v55 = vadd.f32 1.0, %v8997_v36  ;;  %4107 = vrot.lane.b32.xlu1 %v3392_v37, %s6801_s20  ;;  %11369 = vst [vmem:[#allocation10_spill] sm:$0xff] %v9654_v42  ;;  %v3317_v18 = vmul.f32 1.442695, %v3244_v48  ;;  %v9662_v11 = vpop.permute.xlu1 %4245  ;;  %v11376_v42 = vld [vmem:[#allocation112_spill] sm:$0xff] }
 0x610   :  { %6654 = vlog2.f32 %v3353_v8  ;;  %v6637_v26 = vpop.eup %6636  ;;  %v4161_v6 = vsel %vm7119_vm3, %v9497_v24, 0.0  ;;  %v3503_v13 = vsel %vm3123_vm15, %v9271_v41, %v3456_v16  ;;  %11371 = vst [vmem:[#allocation91_spill] sm:$0xff] %v9662_v11  ;;  %v3319_v36 = vmul.f32 1.442695, %v3245_v21 }
 0x611   :  { %6656 = vlog2.f32 %v3354_v5  ;;  %v6639_v62 = vpop.eup %6638  ;;  %v9665_v8 = vadd.f32 1.0, %v9032_v17  ;;  %v9668_v37 = vadd.f32 1.0, %v9048_v14  ;;  %4581 = vrot.lane.b32.xlu0 %v4161_v6, %s6803_s14  ;;  %v3321_v48 = vmul.f32 1.442695, %v3246_v52 }
 0x612   :  { %6658 = vpow2.f32 %v3315_v44  ;;  %v9672_v5 = vadd.f32 1.0, %v9054_v32  ;;  %v4162_v16 = vsel %vm7143_vm5, %v9499_v0, 0.0  ;;  %v3504_v17 = vsel %vm3124_vm14, %v9303_v7, %v3458_v12  ;;  %v9684_v52 = vpop.permute.xlu0 %4061  ;;  %v11374_v32 = vld [vmem:[#allocation47_spill] sm:$0xff] }
 0x613   :  { %v6641_v24 = vpop.eup %6640  ;;  %6660 = vrcp.f32 %v2911_v63  ;;  %v9681_v14 = vadd.f32 1.0, %v9063_v45  ;;  %4583 = vrot.lane.b32.xlu1 %v4162_v16, %s6803_s14  ;;  %v3541_v44 = vadd.f32 0.1, %v3503_v13  ;;  %11373 = vst [vmem:[#allocation9_spill] sm:$0xff] %v9684_v52  ;;  %vm11375_vm15 = vcmp.eq.s32.totalorder %v11374_v32, 1  ;;  %v9694_v12 = vpop.permute.xlu1 %4063  ;;  %v11381_v16 = vld [vmem:[#allocation46_spill] sm:$0xff] }
 0x614   :  { %v6643_v21 = vpop.eup %6642  ;;  %6662 = vpow2.f32 %v3317_v18  ;;  %v3970_v6 = vsel %vm11375_vm15, %v6641_v24, 0.0  ;;  %v9689_v0 = vadd.f32 1.0, %v9089_v38  ;;  %v9692_v7 = vadd.f32 1.0, %v11376_v42  ;;  %11377 = vst [vmem:[#allocation11_spill] sm:$0xff] %v9694_v12  ;;  %v11378_v18 = vld [vmem:[#allocation97_spill] sm:$0xff] }
 0x615   :  { %v6645_v11 = vpop.eup %6644  ;;  %v3355_v63 = vadd.f32 1.0, %v6637_v26  ;;  %6664 = vpow2.f32 %v3319_v36  ;;  %4291 = vrot.lane.b32.xlu0 %v3541_v44, %s6802_s1  ;;  %v3542_v13 = vadd.f32 0.1, %v3504_v17  ;;  %vm11379_vm14 = vcmask 31744   ;;  %v11383_v26 = vld [vmem:[#allocation98_spill] sm:$0xff]  ;;  %v11386_v36 = vld [vmem:[#allocation48_spill] sm:$0xff] }
 0x616   :  { %v9696_v45 = vpop.eup %6646  ;;  %6666 = vpow2.f32 %v3321_v48  ;;  %v9701_v24 = vsel %vm11379_vm14, %v11378_v18, %v3970_v6  ;;  %vm11382_vm1 = vcmp.eq.s32.totalorder %v11381_v16, 1  ;;  %v3356_v42 = vadd.f32 1.0, %v6639_v62  ;;  %vm11384_vm15 = vmmov %vm11379_vm14  ;;  %v11388_v17 = vld [vmem:[#allocation115_spill] sm:$0xff] }
 0x617   :  { %11380 = vst [vmem:[#allocation47_spill] sm:$0xff] %v9701_v24  ;;  %v3971_v38 = vsel %vm11382_vm1, %v6643_v21, 0.0  ;;  %v9705_v32 = vpop.eup %6648  ;;  %vm11387_vm12 = vcmp.eq.s32.totalorder %v11386_v36, 1  ;;  %6668 = vrcp.f32 %v9614_v61  ;;  %v9715_v44 = vadd.f32 1.0, %v11388_v17  ;;  %4293 = vrot.lane.b32.xlu1 %v3542_v13, %s6802_s1  ;;  %v9719_v21 = vpop.permute.xlu0 %4247  ;;  %v11389_v62 = vld [vmem:[#allocation99_spill] sm:$0xff]  ;;  %vm11390_vm1 = vmmov %vm11384_vm15  ;;  %v11393_v13 = vld [vmem:[#allocation49_spill] sm:$0xff] }
 0x618   :  { %v9709_v12 = vsel %vm11384_vm15, %v11383_v26, %v3971_v38  ;;  %v3972_v52 = vsel %vm11387_vm12, %v6645_v11, 0.0  ;;  %v6651_v48 = vpop.eup %6650  ;;  %vm3127_vm14 = vcmp.gt.f32.partialorder %v9384_v59, 20.0  ;;  %6670 = vrcp.f32 %v9617_v2  ;;  %v11392_v11 = vld [vmem:[#allocation116_spill] sm:$0xff]  ;;  %v9732_v38 = vpop.permute.xlu1 %4249  ;;  %v11397_v17 = vld [vmem:[#allocation50_spill] sm:$0xff] }
 0x619   :  { %11385 = vst [vmem:[#allocation112_spill] sm:$0xff] %v9709_v12  ;;  %v9723_v6 = vsel %vm11390_vm1, %v11389_v62, %v3972_v52  ;;  %v6653_v18 = vpop.eup %6652  ;;  %v9727_v16 = vadd.f32 1.0, %v11392_v11  ;;  %v3393_v61 = vsel %vm3127_vm14, %v9528_v34, %v3355_v63  ;;  %vm11394_vm12 = vcmp.eq.s32.totalorder %v11393_v13, 1  ;;  %v11395_v2 = vld [vmem:[#allocation100_spill] sm:$0xff]  ;;  %v11403_v13 = vld [vmem:[#allocation122_spill] sm:$0xff] }
 0x61a   :  { %11391 = vst [vmem:[#allocation97_spill] sm:$0xff] %v9723_v6  ;;  %v3973_v26 = vsel %vm11394_vm12, %v6651_v48, 0.0  ;;  %6672 = vrcp.f32 %v9640_v15  ;;  %v6655_v36 = vpop.eup %6654  ;;  %4109 = vrot.lane.b32.xlu0 %v3393_v61, %s6801_s20  ;;  %vm3128_vm15 = vcmp.gt.f32.partialorder %v9398_v10, 20.0  ;;  %vm11398_vm0 = vcmp.eq.s32.totalorder %v11397_v17, 1  ;;  %v11399_v11 = vld [vmem:[#allocation120_spill] sm:$0xff]  ;;  %vm11401_vm12 = vmmov %vm11390_vm1  ;;  %v11405_v17 = vld [vmem:[#allocation125_spill] sm:$0xff] }
 0x61b   :  { %6674 = vlog2.f32 %v3355_v63  ;;  %v9741_v52 = vsel %vm11390_vm1, %v11395_v2, %v3973_v26  ;;  %v3974_v34 = vsel %vm11398_vm0, %v6653_v18, 0.0  ;;  %v6657_v62 = vpop.eup %6656  ;;  %v9746_v6 = vadd.f32 1.0, %v11399_v11  ;;  %v11400_v63 = vld [vmem:[#allocation101_spill] sm:$0xff]  ;;  %v11404_v2 = vld [vmem:[#allocation123_spill] sm:$0xff] }
 0x61c   :  { %11396 = vst [vmem:[#allocation46_spill] sm:$0xff] %v9741_v52  ;;  %v3394_v15 = vsel %vm3128_vm15, %v9584_v47, %v3356_v42  ;;  %v9753_v48 = vsel %vm11401_vm12, %v11400_v63, %v3974_v34  ;;  %6676 = vrcp.f32 %v9648_v20  ;;  %v6659_v61 = vpop.eup %6658  ;;  %v9757_v26 = vadd.f32 1.0, %v11403_v13  ;;  %v9766_v52 = vpop.permute.xlu0 %4065  ;;  %v11407_v34 = vld [vmem:[#allocation83_spill] sm:$0xff] }
 0x61d   :  { %11402 = vst [vmem:[#allocation98_spill] sm:$0xff] %v9753_v48  ;;  %v9760_v18 = vadd.f32 1.0, %v11404_v2  ;;  %v9763_v11 = vadd.f32 1.0, %v11405_v17  ;;  %4111 = vrot.lane.b32.xlu1 %v3394_v15, %s6801_s20  ;;  %11406 = vst [vmem:[#allocation48_spill] sm:$0xff] %v9766_v52  ;;  %6678 = vrcp.f32 %v9651_v55  ;;  %v6661_v47 = vpop.eup %6660  ;;  %v9770_v63 = vadd.f32 1.0, %v11407_v34  ;;  %v11408_v17 = vld [vmem:[#allocation126_spill] sm:$0xff]  ;;  %v9783_v55 = vpop.permute.xlu1 %4067 }
 0x61e   :  { %v4349_v20 = vsel %vm7106_vm2, %v9532_v30, 0.1  ;;  %v3460_v13 = vmul.f32 0.6931472, %v6655_v36  ;;  %6680 = vrcp.f32 %v9665_v8  ;;  %v6663_v2 = vpop.eup %6662  ;;  %v9777_v48 = vadd.f32 1.0, %v11408_v17  ;;  %v11409_v15 = vld [vmem:[#allocation133_spill] sm:$0xff]  ;;  %vm11417_vm2 = vmmov %vm11390_vm1 }
 0x61f   :  { %v9780_v12 = vadd.f32 1.0, %v11409_v15  ;;  %4729 = vrot.lane.b32.xlu0 %v4349_v20, %s6804_s22  ;;  %11410 = vst [vmem:[#allocation115_spill] sm:$0xff] %v9783_v55  ;;  %v11411_v34 = vld [vmem:[#allocation51_spill] sm:$0xff]  ;;  %6682 = vrcp.f32 %v9668_v37  ;;  %v9788_v30 = vpop.eup %6664  ;;  %v4350_v58 = vsel %vm7123_vm4, %v9534_v31, 0.1  ;;  %v3357_v36 = vadd.f32 1.0, %v6659_v61 }
 0x620   :  { %vm11412_vm0 = vcmp.eq.s32.totalorder %v11411_v34, 1  ;;  %6684 = vlog2.f32 %v3356_v42  ;;  %v3462_v8 = vmul.f32 0.6931472, %v6657_v62  ;;  %v9793_v17 = vpop.eup %6666  ;;  %v11413_v15 = vld [vmem:[#allocation135_spill] sm:$0xff]  ;;  %v11414_v55 = vld [vmem:[#allocation137_spill] sm:$0xff]  ;;  %v9802_v37 = vpop.permute.xlu0 %4251  ;;  %v9810_v42 = vadd.f32 1.0, %v11419_v27 }
 0x621   :  { %v3975_v24 = vsel %vm11412_vm0, %v6661_v47, 0.0  ;;  %v9796_v20 = vadd.f32 1.0, %v11413_v15  ;;  %v9799_v52 = vadd.f32 1.0, %v11414_v55  ;;  %4731 = vrot.lane.b32.xlu1 %v4350_v58, %s6804_s22  ;;  %11415 = vst [vmem:[#allocation99_spill] sm:$0xff] %v9802_v37  ;;  %v11416_v47 = vld [vmem:[#allocation102_spill] sm:$0xff]  ;;  %6686 = vrcp.f32 %v9672_v5  ;;  %v6669_v31 = vpop.eup %6668  ;;  %v11423_v27 = vld [vmem:[#allocation52_spill] sm:$0xff] }
 0x622   :  { %v9806_v34 = vsel %vm11417_vm2, %v11416_v47, %v3975_v24  ;;  %v4163_v61 = vsel %vm7153_vm6, %v9564_v60, 0.0  ;;  %v3505_v55 = vsel %vm3125_vm13, %v9324_v25, %v3460_v13  ;;  %6688 = vrcp.f32 %v9681_v14  ;;  %v6671_v58 = vpop.eup %6670  ;;  %v11421_v15 = vld [vmem:[#allocation86_spill] sm:$0xff]  ;;  %v9826_v47 = vpop.permute.xlu1 %4253  ;;  %v11540_v62 = vld [vmem:[#allocation93_spill] sm:$0xff]  ;;  %v11549_v25 = vld [vmem:[#allocation136_spill] sm:$0xff] }
 0x623   :  { %11418 = vst [vmem:[#allocation116_spill] sm:$0xff] %v9806_v34  ;;  %v9820_v24 = vadd.f32 1.0, %v11421_v15  ;;  %v9823_v5 = vadd.f32 1.0, %v9508_v51  ;;  %4585 = vrot.lane.b32.xlu0 %v4163_v61, %s6803_s14  ;;  %11422 = vst [vmem:[#allocation49_spill] sm:$0xff] %v9826_v47  ;;  %vm11424_vm4 = vcmp.eq.s32.totalorder %v11423_v27, 1  ;;  %6690 = vrcp.f32 %v9689_v0  ;;  %v11427_v51 = vld [vmem:[#allocation103_spill] sm:$0xff] }
 0x624   :  { %v3976_v60 = vsel %vm11424_vm4, %v6669_v31, 0.0  ;;  %v6673_v34 = vpop.eup %6672  ;;  %v4164_v14 = vsel %vm7188_vm7, %v9566_v39, 0.0  ;;  %vm11426_vm13 = vcmp.gt.f32.partialorder %v9348_v22, 20.0  ;;  %6692 = vlog2.f32 %v3357_v36  ;;  %v11428_v27 = vld [vmem:[#allocation53_spill] sm:$0xff]  ;;  %v11430_v47 = vld [vmem:[#allocation54_spill] sm:$0xff]  ;;  %vm11433_vm4 = vmmov %vm11390_vm1 }
 0x625   :  { %v3506_v13 = vsel %vm11426_vm13, %v9348_v22, %v3462_v8  ;;  %v9839_v61 = vsel %vm11390_vm1, %v11427_v51, %v3976_v60  ;;  %v6675_v15 = vpop.eup %6674  ;;  %4587 = vrot.lane.b32.xlu1 %v4164_v14, %s6803_s14  ;;  %v3543_v31 = vadd.f32 0.1, %v3505_v55  ;;  %vm11429_vm12 = vcmp.eq.s32.totalorder %v11428_v27, 1  ;;  %v11432_v22 = vld [vmem:[#allocation104_spill] sm:$0xff]  ;;  %v11434_v60 = vld [vmem:[#allocation105_spill] sm:$0xff]  ;;  %vm11435_vm13 = vmmov %vm11390_vm1 }
 0x626   :  { %v3977_v0 = vsel %vm11429_vm12, %v6671_v58, 0.0  ;;  %vm11431_vm0 = vcmp.eq.s32.totalorder %v11430_v47, 1  ;;  %6694 = vrcp.f32 %v9692_v7  ;;  %v6677_v39 = vpop.eup %6676  ;;  %vm11015_vm2 = vcmp.gt.f32.partialorder %v9441_v54, 20.0  ;;  %v11436_v47 = vld [vmem:[#allocation55_spill] sm:$0xff]  ;;  %vm11439_vm12 = vmmov %vm11433_vm4 }
 0x627   :  { %v3978_v37 = vsel %vm11431_vm0, %v6673_v34, 0.0  ;;  %v9850_v8 = vsel %vm11433_vm4, %v11432_v22, %v3977_v0  ;;  %6696 = vrcp.f32 %v9715_v44  ;;  %v6679_v55 = vpop.eup %6678  ;;  %v9858_v58 = vadd.f32 1.0, %v9544_v56  ;;  %4295 = vrot.lane.b32.xlu0 %v3543_v31, %s6802_s1  ;;  %v9861_v34 = vpop.permute.xlu0 %4069  ;;  %v11438_v44 = vld [vmem:[#allocation106_spill] sm:$0xff]  ;;  %v11440_v56 = vld [vmem:[#allocation56_spill] sm:$0xff] }
 0x628   :  { %v9854_v51 = vsel %vm11435_vm13, %v11434_v60, %v3978_v37  ;;  %v3544_v7 = vadd.f32 0.1, %v3506_v13  ;;  %vm11437_vm1 = vcmp.eq.s32.totalorder %v11436_v47, 1  ;;  %6698 = vrcp.f32 %v9727_v16  ;;  %v6681_v27 = vpop.eup %6680  ;;  %v9868_v37 = vpop.permute.xlu1 %4071  ;;  %v11442_v16 = vld [vmem:[#allocation107_spill] sm:$0xff] }
 0x629   :  { %v3979_v14 = vsel %vm11437_vm1, %v6677_v39, 0.0  ;;  %v9866_v0 = vadd.f32 1.0, %v6663_v2  ;;  %vm11441_vm0 = vcmp.eq.s32.totalorder %v11440_v56, 1  ;;  %6700 = vrcp.f32 %v9746_v6  ;;  %v6683_v13 = vpop.eup %6682  ;;  %v11443_v39 = vld [vmem:[#allocation57_spill] sm:$0xff]  ;;  %vm11446_vm1 = vmmov %vm11433_vm4 }
 0x62a   :  { %v9872_v22 = vsel %vm11439_vm12, %v11438_v44, %v3979_v14  ;;  %v3980_v31 = vsel %vm11441_vm0, %v6679_v55, 0.0  ;;  %v9878_v60 = vadd.f32 1.0, %v9568_v33  ;;  %4297 = vrot.lane.b32.xlu1 %v3544_v7, %s6802_s1  ;;  %vm11444_vm13 = vcmp.eq.s32.totalorder %v11443_v39, 1  ;;  %v6685_v14 = vpop.eup %6684  ;;  %v11445_v55 = vld [vmem:[#allocation108_spill] sm:$0xff]  ;;  %v11447_v44 = vld [vmem:[#allocation58_spill] sm:$0xff] }
 0x62b   :  { %v9883_v2 = vsel %vm11433_vm4, %v11442_v16, %v3980_v31  ;;  %v3981_v47 = vsel %vm11444_vm13, %v6681_v27, 0.0  ;;  %6702 = vrcp.f32 %v9757_v26  ;;  %v3395_v6 = vsel %vm11015_vm2, %v9604_v28, %v3357_v36  ;;  %v6687_v56 = vpop.eup %6686  ;;  %v11449_v26 = vld [vmem:[#allocation109_spill] sm:$0xff]  ;;  %vm11450_vm4 = vmmov %vm11446_vm1 }
 0x62c   :  { %v9893_v33 = vsel %vm11446_vm1, %v11445_v55, %v3981_v47  ;;  %vm11448_vm12 = vcmp.eq.s32.totalorder %v11447_v44, 1  ;;  %6704 = vrcp.f32 %v9760_v18  ;;  %v9899_v31 = vadd.f32 1.0, %v9610_v46  ;;  %4113 = vrot.lane.b32.xlu0 %v3395_v6, %s6801_s20  ;;  %v6689_v36 = vpop.eup %6688  ;;  %v11451_v18 = vld [vmem:[#allocation59_spill] sm:$0xff]  ;;  %v11454_v6 = vld [vmem:[#allocation60_spill] sm:$0xff]  ;;  %v9933_v44 = vpop.permute.xlu1 %4257 }
 0x62d   :  { %v3982_v7 = vsel %vm11448_vm12, %v6683_v13, 0.0  ;;  %vm11014_vm0 = vcmp.gt.f32.partialorder %v9469_v23, 20.0  ;;  %6706 = vrcp.f32 %v9763_v11  ;;  %v9909_v27 = vadd.f32 1.0, %v9632_v9  ;;  %v6691_v16 = vpop.eup %6690  ;;  %v9922_v11 = vpop.permute.xlu0 %4255  ;;  %v11453_v9 = vld [vmem:[#allocation110_spill] sm:$0xff] }
 0x62e   :  { %v9905_v28 = vsel %vm11450_vm4, %v11449_v26, %v3982_v7  ;;  %v3396_v46 = vsel %vm11014_vm0, %v9626_v3, %v9866_v0  ;;  %vm11452_vm13 = vcmp.eq.s32.totalorder %v11451_v18, 1  ;;  %6708 = vrcp.f32 %v9770_v63  ;;  %v9931_v55 = vpop.eup %6692  ;;  %v11458_v7 = vld [vmem:[#allocation61_spill] sm:$0xff] }
 0x62f   :  { %v3983_v13 = vsel %vm11452_vm13, %v6687_v56, 0.0  ;;  %v4351_v39 = vsel %vm7119_vm3, %v9595_v40, 0.1  ;;  %4115 = vrot.lane.b32.xlu1 %v3396_v46, %s6801_s20  ;;  %vm11455_vm12 = vcmp.eq.s32.totalorder %v11454_v6, 1  ;;  %6710 = vrcp.f32 %v9777_v48  ;;  %vm11457_vm3 = vmmov %vm11446_vm1  ;;  %v11466_v6 = vld [vmem:[#allocation63_spill] sm:$0xff] }
 0x630   :  { %v9926_v47 = vsel %vm11446_vm1, %v11453_v9, %v3983_v13  ;;  %v3984_v3 = vsel %vm11455_vm12, %v6689_v36, 0.0  ;;  %v3464_v63 = vmul.f32 0.6931472, %v6675_v15  ;;  %vm11459_vm4 = vcmp.eq.s32.totalorder %v11458_v7, 1  ;;  %v6695_v26 = vpop.eup %6694  ;;  %4733 = vrot.lane.b32.xlu0 %v4351_v39, %s6804_s22  ;;  %v11460_v15 = vld [vmem:[#allocation113_spill] sm:$0xff]  ;;  %v11461_v13 = vld [vmem:[#allocation62_spill] sm:$0xff] }
 0x631   :  { %v9937_v40 = vsel %vm11457_vm3, %v11456_v19, %v3984_v3  ;;  %v3985_v56 = vsel %vm11459_vm4, %v6691_v16, 0.0  ;;  %6712 = vrcp.f32 %v9780_v12  ;;  %v9943_v46 = vadd.f32 1.0, %v9637_v43  ;;  %v6697_v18 = vpop.eup %6696  ;;  %v11464_v9 = vld [vmem:[#allocation114_spill] sm:$0xff]  ;;  %v11468_v3 = vld [vmem:[#allocation117_spill] sm:$0xff]  ;;  %vm11469_vm4 = vmmov %vm11446_vm1 }
 0x632   :  { %v4352_v48 = vsel %vm7143_vm5, %v9597_v57, 0.1  ;;  %vm11016_vm13 = vcmp.gt.f32.partialorder %v9481_v50, 20.0  ;;  %v9952_v36 = vsel %vm11446_vm1, %v11460_v15, %v3985_v56  ;;  %6714 = vrcp.f32 %v9796_v20  ;;  %v6699_v57 = vpop.eup %6698  ;;  %vm11465_vm5 = vmmov %vm11446_vm1  ;;  %v11475_v15 = vld [vmem:[#allocation65_spill] sm:$0xff] }
 0x633   :  { %v9956_v12 = vadd.f32 1.0, %v9705_v32  ;;  %v3466_v43 = vmul.f32 0.6931472, %v6685_v14  ;;  %vm11462_vm12 = vcmp.eq.s32.totalorder %v11461_v13, 1  ;;  %6716 = vrcp.f32 %v9799_v52  ;;  %4735 = vrot.lane.b32.xlu1 %v4352_v48, %s6804_s22  ;;  %v6701_v14 = vpop.eup %6700 }
 0x634   :  { %v3986_v16 = vsel %vm11462_vm12, %v6695_v26, 0.0  ;;  %v4165_v39 = vsel %vm7192_vm8, %v9621_v53, 0.0  ;;  %vm11467_vm3 = vcmp.eq.s32.totalorder %v11466_v6, 1  ;;  %6718 = vrcp.f32 %v9810_v42  ;;  %v11470_v53 = vld [vmem:[#allocation64_spill] sm:$0xff]  ;;  %v9987_v42 = vpop.permute.xlu0 %4073  ;;  %v11481_v6 = vld [vmem:[#allocation79_spill] sm:$0xff] }
 0x635   :  { %v9967_v20 = vsel %vm11465_vm5, %v11464_v9, %v3986_v16  ;;  %v3987_v32 = vsel %vm11467_vm3, %v6697_v18, 0.0  ;;  %v3507_v52 = vsel %vm3127_vm14, %v9384_v59, %v3464_v63  ;;  %vm11471_vm1 = vcmp.eq.s32.totalorder %v11470_v53, 1  ;;  %v6703_v56 = vpop.eup %6702  ;;  %4589 = vrot.lane.b32.xlu0 %v4165_v39, %s6803_s14  ;;  %v11473_v59 = vld [vmem:[#allocation118_spill] sm:$0xff]  ;;  %vm11474_vm14 = vmmov %vm11469_vm4  ;;  %v9998_v16 = vpop.permute.xlu1 %4075 }
 0x636   :  { %v9977_v19 = vsel %vm11469_vm4, %v11468_v3, %v3987_v32  ;;  %v3988_v7 = vsel %vm11471_vm1, %v6699_v57, 0.0  ;;  %6720 = vrcp.f32 %v9820_v24  ;;  %v4166_v48 = vsel %vm7196_vm9, %v9623_v1, 0.0  ;;  %v6705_v13 = vpop.eup %6704  ;;  %v11477_v1 = vld [vmem:[#allocation119_spill] sm:$0xff]  ;;  %vm11478_vm5 = vmmov %vm11469_vm4  ;;  %v11479_v57 = vld [vmem:[#allocation66_spill] sm:$0xff] }
 0x637   :  { %6722 = vlog2.f32 %v9866_v0  ;;  %v9991_v63 = vsel %vm11474_vm14, %v11473_v59, %v3988_v7  ;;  %vm11476_vm12 = vcmp.eq.s32.totalorder %v11475_v15, 1  ;;  %v3508_v24 = vsel %vm3128_vm15, %v9398_v10, %v3466_v43  ;;  %v6707_v9 = vpop.eup %6706  ;;  %4591 = vrot.lane.b32.xlu1 %v4166_v48, %s6803_s14  ;;  %vm11483_vm1 = vmmov %vm11478_vm5  ;;  %v11484_v43 = vld [vmem:[#allocation67_spill] sm:$0xff]  ;;  %v11486_v7 = vld [vmem:[#allocation80_spill] sm:$0xff] }
 0x638   :  { %v3989_v18 = vsel %vm11476_vm12, %v6701_v14, 0.0  ;;  %vm11480_vm3 = vcmp.eq.s32.totalorder %v11479_v57, 1  ;;  %6724 = vrcp.f32 %v9823_v5  ;;  %vm3737_vm4 = vcmp.eq.s32.totalorder %v11481_v6, 1  ;;  %v11482_v14 = vld [vmem:[#allocation121_spill] sm:$0xff]  ;;  %v6709_v53 = vpop.eup %6708  ;;  %v11488_v59 = vld [vmem:[#allocation124_spill] sm:$0xff]  ;;  %v11561_v6 = vld [vmem:[#allocation11_spill] sm:$0xff] }
 0x639   :  { %v10002_v0 = vsel %vm11478_vm5, %v11477_v1, %v3989_v18  ;;  %v3990_v39 = vsel %vm11480_vm3, %v6703_v56, 0.0  ;;  %v3545_v32 = vadd.f32 0.1, %v3507_v52  ;;  %vm11485_vm15 = vcmp.eq.s32.totalorder %v11484_v43, 1  ;;  %v11487_v56 = vld [vmem:[#allocation81_spill] sm:$0xff]  ;;  %vm11489_vm5 = vmmov %vm11483_vm1  ;;  %v11490_v52 = vld [vmem:[#allocation68_spill] sm:$0xff]  ;;  %v6711_v18 = vpop.eup %6710 }
 0x63a   :  { %v10011_v10 = vsel %vm11483_vm1, %v11482_v14, %v3990_v39  ;;  %v3991_v3 = vsel %vm11485_vm15, %v6705_v13, 0.0  ;;  %6726 = vrcp.f32 %v9858_v58  ;;  %vm3738_vm14 = vcmp.eq.s32.totalorder %v11486_v7, 1  ;;  %v11492_v13 = vld [vmem:[#allocation129_spill] sm:$0xff]  ;;  %v11495_v14 = vld [vmem:[#allocation82_spill] sm:$0xff] }
 0x63b   :  { %vm3739_vm12 = vcmp.eq.s32.totalorder %v11487_v56, 1  ;;  %v3359_v5 = vadd.f32 1.0, %v9788_v30  ;;  %v10021_v48 = vsel %vm11489_vm5, %v11488_v59, %v3991_v3  ;;  %vm11491_vm3 = vcmp.eq.s32.totalorder %v11490_v52, 1  ;;  %4299 = vrot.lane.b32.xlu0 %v3545_v32, %s6802_s1  ;;  %v11493_v57 = vld [vmem:[#allocation69_spill] sm:$0xff]  ;;  %v6713_v39 = vpop.eup %6712  ;;  %v11496_v43 = vld [vmem:[#allocation130_spill] sm:$0xff] }
 0x63c   :  { %v3992_v15 = vsel %vm11491_vm3, %v6707_v9, 0.0  ;;  %6728 = vrcp.f32 %v9878_v60  ;;  %v3546_v58 = vadd.f32 0.1, %v3508_v24  ;;  %vm11494_vm15 = vcmp.eq.s32.totalorder %v11493_v57, 1  ;;  %vm11497_vm3 = vmmov %vm11483_vm1  ;;  %v11498_v32 = vld [vmem:[#allocation70_spill] sm:$0xff]  ;;  %v6715_v3 = vpop.eup %6714 }
 0x63d   :  { %v10029_v1 = vsel %vm11483_vm1, %v11492_v13, %v3992_v15  ;;  %v3993_v30 = vsel %vm11494_vm15, %v6709_v53, 0.0  ;;  %6730 = vrcp.f32 %v9899_v31  ;;  %vm3740_vm5 = vcmp.eq.s32.totalorder %v11495_v14, 1  ;;  %v10045_v31 = vpop.permute.xlu0 %4259  ;;  %v11500_v53 = vld [vmem:[#allocation131_spill] sm:$0xff]  ;;  %vm11501_vm15 = vmmov %vm11497_vm3  ;;  %v6717_v15 = vpop.eup %6716  ;;  %v11506_v13 = vld [vmem:[#allocation72_spill] sm:$0xff] }
 0x63e   :  { %v3360_v9 = vadd.f32 1.0, %v9793_v17  ;;  %v10038_v60 = vsel %vm11497_vm3, %v11496_v43, %v3993_v30  ;;  %vm11499_vm0 = vcmp.eq.s32.totalorder %v11498_v32, 1  ;;  %6732 = vrcp.f32 %v9909_v27  ;;  %4301 = vrot.lane.b32.xlu1 %v3546_v58, %s6802_s1  ;;  %v11502_v17 = vld [vmem:[#allocation71_spill] sm:$0xff]  ;;  %v6719_v30 = vpop.eup %6718  ;;  %v11513_v32 = vld [vmem:[#allocation88_spill] sm:$0xff] }
 0x63f   :  { %v3994_v24 = vsel %vm11499_vm0, %v6711_v18, 0.0  ;;  %vm3132_vm1 = vcmp.gt.f32.partialorder %v9542_v4, 20.0  ;;  %vm11503_vm2 = vcmp.eq.s32.totalorder %v11502_v17, 1  ;;  %6734 = vrcp.f32 %v9943_v46  ;;  %v10057_v18 = vpop.permute.xlu1 %4261  ;;  %vm11504_vm0 = vmmov %vm11497_vm3  ;;  %v11512_v43 = vld [vmem:[#allocation127_spill] sm:$0xff] }
 0x640   :  { %v10049_v59 = vsel %vm11501_vm15, %v11500_v53, %v3994_v24  ;;  %v3995_v52 = vsel %vm11503_vm2, %v6713_v39, 0.0  ;;  %v3397_v27 = vsel %vm11016_vm13, %v9645_v29, %v3359_v5  ;;  %vm11507_vm3 = vcmp.eq.s32.totalorder %v11506_v13, 1  ;;  %vm11508_vm2 = vmmov %vm11504_vm0  ;;  %v11510_v39 = vld [vmem:[#allocation73_spill] sm:$0xff]  ;;  %v11515_v24 = vld [vmem:[#allocation128_spill] sm:$0xff]  ;;  %v6721_v17 = vpop.eup %6720 }
 0x641   :  { %v10061_v58 = vsel %vm11504_vm0, %v9506_v49, %v3995_v52  ;;  %v3996_v57 = vsel %vm11507_vm3, %v6715_v3, 0.0  ;;  %6736 = vrcp.f32 %v9956_v12  ;;  %4117 = vrot.lane.b32.xlu0 %v3397_v27, %s6801_s20  ;;  %vm11511_vm15 = vcmp.eq.s32.totalorder %v11510_v39, 1  ;;  %v11516_v53 = vld [vmem:[#allocation89_spill] sm:$0xff]  ;;  %v11518_v52 = vld [vmem:[#allocation87_spill] sm:$0xff]  ;;  %vm11519_vm3 = vmmov %vm11508_vm2 }
 0x642   :  { %11505 = vst [vmem:[#allocation100_spill] sm:$0xff] %v10061_v58  ;;  %v10069_v46 = vsel %vm11508_vm2, %v9513_v35, %v3996_v57  ;;  %v3997_v29 = vsel %vm11511_vm15, %v6717_v15, 0.0  ;;  %vm11514_vm13 = vcmask 23552   ;;  %v3398_v12 = vsel %vm3132_vm1, %v9696_v45, %v3360_v9  ;;  %v11521_v27 = vld [vmem:[#allocation74_spill] sm:$0xff]  ;;  %v11523_v13 = vld [vmem:[#allocation132_spill] sm:$0xff]  ;;  %v11529_v45 = vld [vmem:[#allocation75_spill] sm:$0xff] }
 0x643   :  { %11509 = vst [vmem:[#allocation50_spill] sm:$0xff] %v10069_v46  ;;  %v4874_v49 = vsel %vm11514_vm13, %v11513_v32, %v11512_v43  ;;  %vm11517_vm0 = vmmov %vm11514_vm13  ;;  %v10084_v35 = vsel %vm11519_vm3, %v11518_v52, %v3997_v29  ;;  %vm11522_vm2 = vcmp.eq.s32.totalorder %v11521_v27, 1  ;;  %v11524_v57 = vld [vmem:[#allocation8_spill] sm:$0xff]  ;;  %v6723_v43 = vpop.eup %6722  ;;  %6738 = vlog2.f32 %v3359_v5  ;;  %4119 = vrot.lane.b32.xlu1 %v3398_v12, %s6801_s20  ;;  %v11531_v29 = vld [vmem:[#allocation134_spill] sm:$0xff] }
 0x644   :  { %v4875_v3 = vsel %vm11517_vm0, %v11516_v53, %v11515_v24  ;;  %11520 = vst [vmem:[#allocation120_spill] sm:$0xff] %v10084_v35  ;;  %v3998_v15 = vsel %vm11522_vm2, %v6719_v30, 0.0  ;;  %vm11525_vm15 = vmmov %vm11517_vm0  ;;  %v11526_v32 = vld [vmem:[#allocation140_spill] sm:$0xff]  ;;  %vm11530_vm0 = vcmp.eq.s32.totalorder %v11529_v45, 1  ;;  %v11532_v52 = vld [vmem:[#allocation90_spill] sm:$0xff]  ;;  %v6725_v30 = vpop.eup %6724  ;;  %6740 = vlog2.f32 %v3360_v9 }
 0x645   :  { %v4876_v39 = vsel %vm11525_vm15, %v11524_v57, %v11523_v13  ;;  %vm11527_vm13 = vmmov %vm11519_vm3  ;;  %v3999_v53 = vsel %vm11530_vm0, %v6721_v17, 0.0  ;;  %v11534_v35 = vld [vmem:[#allocation10_spill] sm:$0xff]  ;;  %v3468_v5 = vmul.f32 0.6931472, %v9931_v55  ;;  %v11537_v57 = vld [vmem:[#allocation92_spill] sm:$0xff]  ;;  %v10112_v17 = vpop.permute.xlu0 %4077  ;;  %v3776_v55 = vsel %vm3738_vm14, %v11540_v62, 0.0 }
 0x646   :  { %v10094_v24 = vsel %vm11527_vm13, %v11526_v32, %v3998_v15  ;;  %vm11533_vm3 = vmmov %vm11525_vm15  ;;  %v4353_v13 = vsel %vm7153_vm6, %v11534_v35, 0.1  ;;  %v3775_v15 = vsel %vm3737_vm4, %v11537_v57, 0.0  ;;  %v6727_v32 = vpop.eup %6726  ;;  %v11538_v45 = vld [vmem:[#allocation76_spill] sm:$0xff]  ;;  %v11541_v35 = vld [vmem:[#allocation94_spill] sm:$0xff]  ;;  %v10125_v57 = vpop.permute.xlu1 %4079 }
 0x647   :  { %11528 = vst [vmem:[#allocation101_spill] sm:$0xff] %v10094_v24  ;;  %v4877_v27 = vsel %vm11533_vm3, %v11532_v52, %v11531_v29  ;;  %vm11535_vm2 = vmmov %vm11527_vm13  ;;  %4737 = vrot.lane.b32.xlu0 %v4353_v13, %s6804_s22  ;;  %vm11539_vm15 = vcmp.eq.s32.totalorder %v11538_v45, 1  ;;  %v11542_v52 = vld [vmem:[#allocation91_spill] sm:$0xff]  ;;  %v3470_v13 = vmul.f32 0.6931472, %v6723_v43  ;;  %v11551_v58 = vld [vmem:[#allocation96_spill] sm:$0xff] }
 0x648   :  { %v10106_v12 = vsel %vm11535_vm2, %v4874_v49, %v3999_v53  ;;  %v4000_v29 = vsel %vm11539_vm15, %v6725_v30, 0.0  ;;  %v3777_v49 = vsel %vm3739_vm12, %v11541_v35, 0.0  ;;  %v6729_v53 = vpop.eup %6728  ;;  %v4354_v9 = vsel %vm7188_vm7, %v11542_v52, 0.1  ;;  %vm11543_vm6 = vmmov %vm11535_vm2  ;;  %v11544_v30 = vld [vmem:[#allocation77_spill] sm:$0xff]  ;;  %v11547_v35 = vld [vmem:[#allocation78_spill] sm:$0xff] }
 0x649   :  { %11536 = vst [vmem:[#allocation122_spill] sm:$0xff] %v10106_v12  ;;  %v10128_v12 = vsel %vm11543_vm6, %v4875_v3, %v4000_v29  ;;  %vm11545_vm13 = vcmp.eq.s32.totalorder %v11544_v30, 1  ;;  %v6731_v24 = vpop.eup %6730  ;;  %4739 = vrot.lane.b32.xlu1 %v4354_v9, %s6804_s22  ;;  %vm11546_vm0 = vmmov %vm11535_vm2  ;;  %vm11548_vm3 = vcmp.eq.s32.totalorder %v11547_v35, 1  ;;  %vm11550_vm7 = vcmask 23552   ;;  %v11552_v29 = vld [vmem:[#allocation9_spill] sm:$0xff] }
 0x64a   :  { %v4001_v45 = vsel %vm11545_vm13, %v6727_v32, 0.0  ;;  %v4002_v46 = vsel %vm11548_vm3, %v6729_v53, 0.0  ;;  %v4878_v52 = vsel %vm11550_vm7, %v3775_v15, %v11549_v25  ;;  %v3778_v3 = vsel %vm3740_vm5, %v11551_v58, 0.0  ;;  %v6733_v43 = vpop.eup %6732  ;;  %vm11555_vm15 = vmmov %vm11546_vm0  ;;  %v11557_v25 = vld [vmem:[#allocation84_spill] sm:$0xff]  ;;  %v11580_v30 = vld [vmem:[#allocation21_spill] sm:$0xff] }
 0x64b   :  { %v10134_v62 = vsel %vm11546_vm0, %v4876_v39, %v4001_v45  ;;  %v4167_v32 = vsel %vm7215_vm10, %v11552_v29, 0.0  ;;  %vm11554_vm2 = vcmp.gt.f32.partialorder %v9441_v54, 20.0  ;;  %v10150_v9 = vsel %vm11555_vm15, %v4877_v27, %v4002_v46  ;;  %v6735_v15 = vpop.eup %6734  ;;  %v10155_v45 = vpop.permute.xlu0 %4263  ;;  %vm11556_vm6 = vmmov %vm11546_vm0 }
 0x64c   :  { %v3509_v39 = vsel %vm11554_vm2, %v9441_v54, %v3468_v5  ;;  %v4003_v53 = vsel %vm3737_vm4, %v6731_v24, 0.0  ;;  %4593 = vrot.lane.b32.xlu0 %v4167_v32, %s6803_s14  ;;  %v4004_v35 = vsel %vm3738_vm14, %v6733_v43, 0.0  ;;  %vm11558_vm13 = vmmov %vm11550_vm7  ;;  %v11559_v5 = vld [vmem:[#allocation138_spill] sm:$0xff]  ;;  %v6737_v27 = vpop.eup %6736  ;;  %v4168_v29 = vsel %vm7227_vm11, %v11561_v6, 0.0 }
 0x64d   :  { %v10158_v58 = vsel %vm11556_vm6, %v4878_v52, %v4003_v53  ;;  %v4879_v54 = vsel %vm11558_vm13, %v3776_v55, %v11557_v25  ;;  %vm11560_vm0 = vmmov %vm11550_vm7  ;;  %vm11563_vm4 = vcmp.gt.f32.partialorder %v9469_v23, 20.0  ;;  %v10172_v52 = vpop.permute.xlu1 %4265  ;;  %v4005_v55 = vsel %vm3739_vm12, %v6735_v15, 0.0  ;;  %4595 = vrot.lane.b32.xlu1 %v4168_v29, %s6803_s14  ;;  %v11566_v53 = vld [vmem:[#allocation139_spill] sm:$0xff]  ;;  %v11570_v6 = vld [vmem:[#allocation18_spill] sm:$0xff] }
 0x64e   :  { %v4880_v46 = vsel %vm11560_vm0, %v3777_v49, %v11559_v5  ;;  %v3510_v32 = vsel %vm11563_vm4, %v9469_v23, %v3470_v13  ;;  %vm11564_vm3 = vmmov %vm11556_vm6  ;;  %v3547_v49 = vadd.f32 0.1, %v3509_v39  ;;  %v4006_v23 = vsel %vm3740_vm5, %v6737_v27, 0.0  ;;  %v11569_v27 = vld [vmem:[#allocation48_spill] sm:$0xff] }
 0x64f   :  { %v10175_v7 = vsel %vm11564_vm3, %v4879_v54, %v4004_v35  ;;  %vm11565_vm14 = vmmov %vm11564_vm3  ;;  %v6739_v35 = vpop.eup %6738  ;;  %v3548_v56 = vadd.f32 0.1, %v3510_v32  ;;  %v10191_v15 = vpop.permute.xlu0 %4081  ;;  %v4356_v5 = vsel %vm7196_vm9, %v9732_v38, 0.1  ;;  %vm11571_vm12 = vnez %v11570_v6  ;;  %v11584_v6 = vld [vmem:[#allocation23_spill] sm:$0xff] }
 0x650   :  { %v10181_v43 = vsel %vm11565_vm14, %v4880_v46, %v4005_v55  ;;  %vm11567_vm7 = vmmov %vm11560_vm0  ;;  %4303 = vrot.lane.b32.xlu0 %v3547_v49, %s6802_s1  ;;  %v6741_v54 = vpop.eup %6740  ;;  %v3472_v14 = vmul.f32 0.6931472, %v6739_v35  ;;  %v4169_v29 = vsel %vm11571_vm12, %v11569_v27, 0.0  ;;  %vm11572_vm5 = vcmp.gt.f32.partialorder %v9481_v50, 20.0  ;;  %v11573_v55 = vld [vmem:[#allocation115_spill] sm:$0xff] }
 0x651   :  { %v4881_v25 = vsel %vm11567_vm7, %v3778_v3, %v11566_v53  ;;  %vm11568_vm2 = vmmov %vm11564_vm3  ;;  %4305 = vrot.lane.b32.xlu1 %v3548_v56, %s6802_s1  ;;  %v10194_v39 = vpop.permute.xlu1 %4083  ;;  %v4355_v3 = vsel %vm7192_vm8, %v9719_v21, 0.1  ;;  %v3474_v46 = vmul.f32 0.6931472, %v6741_v54  ;;  %v11574_v49 = vld [vmem:[#allocation19_spill] sm:$0xff] }
 0x652   :  { %v10188_v13 = vsel %vm11568_vm2, %v4881_v25, %v4006_v23  ;;  %v3511_v41 = vsel %vm11572_vm5, %v9481_v50, %v3472_v14  ;;  %vm11575_vm8 = vnez %v11574_v49  ;;  %v11576_v50 = vld [vmem:[#allocation99_spill] sm:$0xff]  ;;  %v4359_v24 = vsel %vm11571_vm12, %v9922_v11, 0.1 }
 0x653   :  { %v4268_v32 = vpop.permute.xlu0 %4267  ;;  %v4170_v26 = vsel %vm11575_vm8, %v11573_v55, 0.0  ;;  %v3512_v38 = vsel %vm3132_vm1, %v9542_v4, %v3474_v46  ;;  %v3549_v53 = vadd.f32 0.1, %v3511_v41  ;;  %v4357_v56 = vsel %vm7215_vm10, %v11576_v50, 0.1  ;;  %v11586_v50 = vld [vmem:[#allocation24_spill] sm:$0xff] }
 0x654   :  { %4741 = vrot.lane.b32.xlu0 %v4355_v3, %s6804_s22  ;;  %v3550_v23 = vadd.f32 0.1, %v3512_v38  ;;  %v11577_v3 = vld [vmem:[#allocation49_spill] sm:$0xff]  ;;  %vm11581_vm10 = vnez %v11580_v30  ;;  %vm11585_vm1 = vnez %v11584_v6  ;;  %vm11587_vm15 = vnez %v11586_v50  ;;  %v11594_v6 = vld [vmem:[#allocation28_spill] sm:$0xff] }
 0x655   :  { %4743 = vrot.lane.b32.xlu1 %v4356_v5, %s6804_s22  ;;  %v4270_v21 = vpop.permute.xlu1 %4269  ;;  %v4358_v4 = vsel %vm7227_vm11, %v11577_v3, 0.1  ;;  %v11578_v5 = vld [vmem:[#allocation20_spill] sm:$0xff]  ;;  %v4174_v11 = vsel %vm11585_vm1, %v9998_v16, 0.0  ;;  %v4175_v16 = vsel %vm11587_vm15, %v10112_v17, 0.0  ;;  %v11588_v3 = vld [vmem:[#allocation25_spill] sm:$0xff]  ;;  %vm11595_vm4 = vnez %v11594_v6 }
 0x656   :  { %vm11579_vm9 = vnez %v11578_v5  ;;  %vm11589_vm6 = vnez %v11588_v3  ;;  %v4364_v17 = vsel %vm11585_vm1, %v10172_v52, 0.1  ;;  %v4365_v52 = vsel %vm11587_vm15, %v4268_v32, 0.1  ;;  %v11598_v3 = vld [vmem:[#allocation30_spill] sm:$0xff] }
 0x657   :  { %v4086_v25 = vpop.permute.xlu0 %4085  ;;  %v4171_v46 = vsel %vm11579_vm9, %v9861_v34, 0.0  ;;  %v4360_v34 = vsel %vm11575_vm8, %v9933_v44, 0.1  ;;  %v4361_v44 = vsel %vm11579_vm9, %v10045_v31, 0.1  ;;  %v4176_v31 = vsel %vm11589_vm6, %v10125_v57, 0.0 }
 0x658   :  { %4597 = vrot.lane.b32.xlu0 %v4169_v29, %s6803_s14  ;;  %v4172_v29 = vsel %vm11581_vm10, %v9868_v37, 0.0  ;;  %v11590_v57 = vld [vmem:[#allocation26_spill] sm:$0xff]  ;;  %vm11599_vm14 = vnez %v11598_v3  ;;  %vm4921_vm5 = vcmask 56320   ;;  %vm4960_vm8 = vcmask 64512  }
 0x659   :  { %4599 = vrot.lane.b32.xlu1 %v4170_v26, %s6803_s14  ;;  %v4088_v35 = vpop.permute.xlu1 %4087  ;;  %v11582_v26 = vld [vmem:[#allocation22_spill] sm:$0xff]  ;;  %vm11591_vm13 = vnez %v11590_v57  ;;  %vm4999_vm9 = vcmask 72704   ;;  %vm11612_vm1 = vcmask 130048  }
 0x65a   :  { %vm11583_vm11 = vnez %v11582_v26  ;;  %v4177_v30 = vsel %vm11591_vm13, %v10191_v15, 0.0  ;;  %v4366_v15 = vsel %vm11589_vm6, %v4270_v21, 0.1  ;;  %vm11613_vm15 = vmmov %vm11612_vm1 }
 0x65b   :  { %v4272_v54 = vpop.permute.xlu0 %4271  ;;  %v4173_v37 = vsel %vm11583_vm11, %v9987_v42, 0.0  ;;  %v4362_v42 = vsel %vm11581_vm10, %v10057_v18, 0.1  ;;  %v4363_v18 = vsel %vm11583_vm11, %v10155_v45, 0.1  ;;  %v11592_v45 = vld [vmem:[#allocation27_spill] sm:$0xff] }
 0x65c   :  { %4307 = vrot.lane.b32.xlu0 %v3549_v53, %s6802_s1  ;;  %vm11593_vm0 = vnez %v11592_v45  ;;  %v4367_v50 = vsel %vm11591_vm13, %v4272_v54, 0.1  ;;  %v11602_v45 = vld [vmem:[#allocation32_spill] sm:$0xff] }
 0x65d   :  { %4309 = vrot.lane.b32.xlu1 %v3550_v23, %s6802_s1  ;;  %v4274_v14 = vpop.permute.xlu1 %4273  ;;  %vm11603_vm2 = vnez %v11602_v45 }
 0x65e   :  { %v4368_v21 = vsel %vm11593_vm0, %v4274_v14, 0.1 }
 0x65f   :  { %v4090_v27 = vpop.permute.xlu0 %4089 }
 0x660   :  { %4745 = vrot.lane.b32.xlu0 %v4357_v56, %s6804_s22 }
 0x661   :  { %4747 = vrot.lane.b32.xlu1 %v4358_v4, %s6804_s22  ;;  %v4092_v41 = vpop.permute.xlu1 %4091 }
 0x663   :  { %v4276_v55 = vpop.permute.xlu0 %4275 }
 0x664   :  { %4601 = vrot.lane.b32.xlu0 %v4171_v46, %s6803_s14  ;;  %v4369_v14 = vsel %vm11595_vm4, %v4276_v55, 0.1 }
 0x665   :  { %4603 = vrot.lane.b32.xlu1 %v4172_v29, %s6803_s14  ;;  %v4278_v53 = vpop.permute.xlu1 %4277 }
 0x667   :  { %v4094_v38 = vpop.permute.xlu0 %4093 }
 0x668   :  { %4749 = vrot.lane.b32.xlu0 %v4359_v24, %s6804_s22  ;;  %v4178_v24 = vsel %vm11593_vm0, %v10194_v39, 0.0  ;;  %v4179_v39 = vsel %vm11595_vm4, %v4086_v25, 0.0 }
 0x669   :  { %4751 = vrot.lane.b32.xlu1 %v4360_v34, %s6804_s22  ;;  %v4096_v49 = vpop.permute.xlu1 %4095 }
 0x66b   :  { %v4280_v23 = vpop.permute.xlu0 %4279 }
 0x66c   :  { %4605 = vrot.lane.b32.xlu0 %v4173_v37, %s6803_s14 }
 0x66d   :  { %4607 = vrot.lane.b32.xlu1 %v4174_v11, %s6803_s14  ;;  %v4282_v56 = vpop.permute.xlu1 %4281 }
 0x66f   :  { %v10268_v4 = vpop.permute.xlu0 %4097 }
 0x670   :  { %4753 = vrot.lane.b32.xlu0 %v4361_v44, %s6804_s22  ;;  %v11596_v44 = vld [vmem:[#allocation29_spill] sm:$0xff] }
 0x671   :  { %4755 = vrot.lane.b32.xlu1 %v4362_v42, %s6804_s22  ;;  %v10273_v5 = vpop.permute.xlu1 %4099  ;;  %vm11597_vm3 = vnez %v11596_v44 }
 0x672   :  { %v4180_v42 = vsel %vm11597_vm3, %v4088_v35, 0.0  ;;  %v4181_v35 = vsel %vm11599_vm14, %v4090_v27, 0.0 }
 0x673   :  { %v10280_v46 = vpop.permute.xlu0 %4283 }
 0x674   :  { %4609 = vrot.lane.b32.xlu0 %v4175_v16, %s6803_s14 }
 0x675   :  { %4611 = vrot.lane.b32.xlu1 %v4176_v31, %s6803_s14  ;;  %v10285_v29 = vpop.permute.xlu1 %4285 }
 0x677   :  { %v10292_v34 = vpop.permute.xlu0 %4101 }
 0x678   :  { %4757 = vrot.lane.b32.xlu0 %v4363_v18, %s6804_s22  ;;  %v11600_v18 = vld [vmem:[#allocation31_spill] sm:$0xff] }
 0x679   :  { %4759 = vrot.lane.b32.xlu1 %v4364_v17, %s6804_s22  ;;  %v10296_v26 = vpop.permute.xlu1 %4103  ;;  %vm11601_vm7 = vnez %v11600_v18 }
 0x67a   :  { %v4182_v54 = vsel %vm11601_vm7, %v4092_v41, 0.0 }
 0x67b   :  { %v4578_v37 = vpop.permute.xlu0 %4577 }
 0x67c   :  { %4613 = vrot.lane.b32.xlu0 %v4177_v30, %s6803_s14  ;;  %v4370_v30 = vsel %vm11597_vm3, %v4278_v53, 0.1  ;;  %v4371_v53 = vsel %vm11599_vm14, %v4280_v23, 0.1  ;;  %vm11624_vm3 = vmmov %vm11612_vm1 }
 0x67d   :  { %4615 = vrot.lane.b32.xlu1 %v4178_v24, %s6803_s14  ;;  %v4580_v11 = vpop.permute.xlu1 %4579  ;;  %v4183_v24 = vsel %vm11603_vm2, %v4094_v38, 0.0  ;;  %v4372_v38 = vsel %vm11601_vm7, %v4282_v56, 0.1  ;;  %v11610_v56 = vld [vmem:[#allocation35_spill] sm:$0xff]  ;;  %vm11625_vm14 = vmmov %vm11612_vm1 }
 0x67e   :  { %vm11611_vm11 = vnez %v11610_v56 }
 0x67f   :  { %v4288_v32 = vpop.permute.xlu0 %4287 }
 0x680   :  { %4761 = vrot.lane.b32.xlu0 %v4365_v52, %s6804_s22  ;;  %v11604_v52 = vld [vmem:[#allocation33_spill] sm:$0xff] }
 0x681   :  { %4763 = vrot.lane.b32.xlu1 %v4366_v15, %s6804_s22  ;;  %v10310_v16 = vpop.permute.xlu1 %4289  ;;  %vm11605_vm12 = vnez %v11604_v52 }
 0x682   :  { %v4184_v55 = vsel %vm11605_vm12, %v4096_v49, 0.0 }
 0x683   :  { %v10316_v25 = vpop.permute.xlu0 %4105 }
 0x684   :  { %4617 = vrot.lane.b32.xlu0 %v4179_v39, %s6803_s14  ;;  %v11606_v39 = vld [vmem:[#allocation95_spill] sm:$0xff] }
 0x685   :  { %4619 = vrot.lane.b32.xlu1 %v4180_v42, %s6803_s14  ;;  %v10320_v31 = vpop.permute.xlu1 %4107  ;;  %v4922_v49 = vsel %vm4921_vm5, %v11606_v39, %v4578_v37  ;;  %v11607_v42 = vld [vmem:[#allocation34_spill] sm:$0xff]  ;;  %v4186_v37 = vsel %vm11611_vm11, %v10273_v5, 0.0 }
 0x686   :  { %vm11608_vm10 = vnez %v11607_v42 }
 0x687   :  { %v4582_v17 = vpop.permute.xlu0 %4581  ;;  %v4185_v23 = vsel %vm11608_vm10, %v10268_v4, 0.0 }
 0x688   :  { %4765 = vrot.lane.b32.xlu0 %v4367_v50, %s6804_s22 }
 0x689   :  { %4767 = vrot.lane.b32.xlu1 %v4368_v21, %s6804_s22  ;;  %v4584_v57 = vpop.permute.xlu1 %4583  ;;  %v11609_v21 = vld [vmem:[#allocation47_spill] sm:$0xff] }
 0x68a   :  { %v4923_v3 = vsel %vm4921_vm5, %v11609_v21, %v4580_v11 }
 0x68b   :  { %v10332_v27 = vpop.permute.xlu0 %4291 }
 0x68c   :  { %4621 = vrot.lane.b32.xlu0 %v4181_v35, %s6803_s14 }
 0x68d   :  { %4623 = vrot.lane.b32.xlu1 %v4182_v54, %s6803_s14  ;;  %v10336_v41 = vpop.permute.xlu1 %4293 }
 0x68f   :  { %v10342_v15 = vpop.permute.xlu0 %4109 }
 0x690   :  { %4769 = vrot.lane.b32.xlu0 %v4369_v14, %s6804_s22  ;;  %v4373_v14 = vsel %vm11603_vm2, %v10280_v46, 0.1 }
 0x691   :  { %4771 = vrot.lane.b32.xlu1 %v4370_v30, %s6804_s22  ;;  %v10346_v6 = vpop.permute.xlu1 %4111  ;;  %v4374_v30 = vsel %vm11605_vm12, %v10285_v29, 0.1  ;;  %v4375_v29 = vsel %vm11608_vm10, %v4288_v32, 0.1  ;;  %v11621_v32 = vld [vmem:[#allocation97_spill] sm:$0xff] }
 0x692   :  { %v4925_v21 = vsel %vm4921_vm5, %v11621_v32, %v4584_v57 }
 0x693   :  { %v4730_v44 = vpop.permute.xlu0 %4729 }
 0x694   :  { %4625 = vrot.lane.b32.xlu0 %v4183_v24, %s6803_s14  ;;  %v4961_v50 = vsel %vm4960_vm8, %v4922_v49, %v4730_v44  ;;  %v11618_v49 = vld [vmem:[#allocation112_spill] sm:$0xff] }
 0x695   :  { %4627 = vrot.lane.b32.xlu1 %v4184_v55, %s6803_s14  ;;  %v5000_v35 = vsel %vm4999_vm9, %v4961_v50, 0.0  ;;  %v4732_v18 = vpop.permute.xlu1 %4731  ;;  %v11614_v55 = vld [vmem:[#allocation36_spill] sm:$0xff]  ;;  %v4924_v44 = vsel %vm4921_vm5, %v11618_v49, %v4582_v17  ;;  %v11631_v49 = vld [vmem:[#allocation42_spill] sm:$0xff] }
 0x696   :  { %5038 = vst.msk [vmem:[%s10762_s15] sm:$0xff] %vm11612_vm1, %v5000_v35  ;;  %v4962_v4 = vsel %vm4960_vm8, %v4923_v3, %v4732_v18  ;;  %vm11615_vm6 = vnez %v11614_v55  ;;  %vm11632_vm12 = vnez %v11631_v49 }
 0x697   :  { %v5001_v54 = vsel %vm4999_vm9, %v4962_v4, 0.0  ;;  %v4586_v11 = vpop.permute.xlu0 %4585  ;;  %v4187_v45 = vsel %vm11615_vm6, %v10292_v34, 0.0  ;;  %v4376_v34 = vsel %vm11611_vm11, %v10310_v16, 0.1  ;;  %v11622_v16 = vld [vmem:[#allocation39_spill] sm:$0xff]  ;;  %vm11636_vm11 = vmmov %vm11612_vm1 }
 0x698   :  { %4773 = vrot.lane.b32.xlu0 %v4371_v53, %s6804_s22  ;;  %5039 = vst.msk [vmem:[%s10762_s15 + $0x8] sm:$0xff] %vm11613_vm15, %v5001_v54  ;;  %v11616_v53 = vld [vmem:[#allocation37_spill] sm:$0xff]  ;;  %vm11623_vm4 = vnez %v11622_v16  ;;  %v4377_v56 = vsel %vm11615_vm6, %v10332_v27, 0.1  ;;  %v11626_v54 = vld [vmem:[#allocation40_spill] sm:$0xff] }
 0x699   :  { %4775 = vrot.lane.b32.xlu1 %v4372_v38, %s6804_s22  ;;  %v4588_v5 = vpop.permute.xlu1 %4587  ;;  %vm11617_vm13 = vnez %v11616_v53  ;;  %v4190_v17 = vsel %vm11623_vm4, %v10320_v31, 0.0  ;;  %vm11627_vm7 = vnez %v11626_v54 }
 0x69a   :  { %v4188_v38 = vsel %vm11617_vm13, %v10296_v26, 0.0  ;;  %v11619_v26 = vld [vmem:[#allocation38_spill] sm:$0xff] }
 0x69b   :  { %v4296_v24 = vpop.permute.xlu0 %4295  ;;  %vm11620_vm0 = vnez %v11619_v26 }
 0x69c   :  { %4629 = vrot.lane.b32.xlu0 %v4185_v23, %s6803_s14  ;;  %v4189_v50 = vsel %vm11620_vm0, %v10316_v25, 0.0 }
 0x69d   :  { %4631 = vrot.lane.b32.xlu1 %v4186_v37, %s6803_s14  ;;  %v4298_v46 = vpop.permute.xlu1 %4297  ;;  %v4378_v37 = vsel %vm11617_vm13, %v10336_v41, 0.1  ;;  %v4379_v41 = vsel %vm11620_vm0, %v4296_v24, 0.1  ;;  %vm11642_vm13 = vmmov %vm11612_vm1 }
 0x69e   :  { %vm11643_vm0 = vmmov %vm11612_vm1 }
 0x69f   :  { %v4114_v39 = vpop.permute.xlu0 %4113 }
 0x6a0   :  { %4777 = vrot.lane.b32.xlu0 %v4373_v14, %s6804_s22  ;;  %v4191_v14 = vsel %vm11627_vm7, %v10342_v15, 0.0  ;;  %v11630_v15 = vld [vmem:[#allocation46_spill] sm:$0xff] }
 0x6a1   :  { %4779 = vrot.lane.b32.xlu1 %v4374_v30, %s6804_s22  ;;  %v4116_v52 = vpop.permute.xlu1 %4115  ;;  %v11628_v30 = vld [vmem:[#allocation41_spill] sm:$0xff] }
 0x6a2   :  { %vm11629_vm2 = vnez %v11628_v30 }
 0x6a3   :  { %v4734_v23 = vpop.permute.xlu0 %4733  ;;  %v4192_v55 = vsel %vm11629_vm2, %v10346_v6, 0.0  ;;  %v4193_v6 = vsel %vm11632_vm12, %v4114_v39, 0.0 }
 0x6a4   :  { %4633 = vrot.lane.b32.xlu0 %v4187_v45, %s6803_s14  ;;  %v4963_v42 = vsel %vm4960_vm8, %v4924_v44, %v4734_v23  ;;  %v11633_v23 = vld [vmem:[#allocation98_spill] sm:$0xff] }
 0x6a5   :  { %4635 = vrot.lane.b32.xlu1 %v4188_v38, %s6803_s14  ;;  %v5002_v3 = vsel %vm4999_vm9, %v4963_v42, 0.0  ;;  %v4736_v35 = vpop.permute.xlu1 %4735  ;;  %v4380_v38 = vsel %vm11623_vm4, %v4298_v46, 0.1  ;;  %v4927_v24 = vsel %vm4921_vm5, %v11633_v23, %v4588_v5  ;;  %v11634_v46 = vld [vmem:[#allocation43_spill] sm:$0xff]  ;;  %vm11644_vm4 = vmmov %vm11643_vm0 }
 0x6a6   :  { %5040 = vst.msk [vmem:[%s10762_s15 + $0x10] sm:$0xff] %vm11624_vm3, %v5002_v3  ;;  %v4964_v25 = vsel %vm4960_vm8, %v4925_v21, %v4736_v35  ;;  %vm11635_vm10 = vnez %v11634_v46  ;;  %v11637_v35 = vld [vmem:[#allocation44_spill] sm:$0xff]  ;;  %vm11645_vm3 = vmmov %vm11643_vm0 }
 0x6a7   :  { %v5003_v18 = vsel %vm4999_vm9, %v4964_v25, 0.0  ;;  %v4590_v57 = vpop.permute.xlu0 %4589  ;;  %v4194_v42 = vsel %vm11635_vm10, %v4116_v52, 0.0  ;;  %vm11638_vm15 = vnez %v11637_v35  ;;  %v11639_v25 = vld [vmem:[#allocation45_spill] sm:$0xff] }
 0x6a8   :  { %4781 = vrot.lane.b32.xlu0 %v4375_v29, %s6804_s22  ;;  %5041 = vst.msk [vmem:[%s10762_s15 + $0x18] sm:$0xff] %vm11625_vm14, %v5003_v18  ;;  %v4926_v29 = vsel %vm4921_vm5, %v11630_v15, %v4586_v11  ;;  %vm11640_vm6 = vnez %v11639_v25  ;;  %vm11646_vm14 = vmmov %vm11643_vm0 }
 0x6a9   :  { %4783 = vrot.lane.b32.xlu1 %v4376_v34, %s6804_s22  ;;  %v4592_v31 = vpop.permute.xlu1 %4591 }
 0x6ac   :  { %4637 = vrot.lane.b32.xlu0 %v4189_v50, %s6803_s14 }
 0x6ad   :  { %4639 = vrot.lane.b32.xlu1 %v4190_v17, %s6803_s14  ;;  %v4300_v4 = vpop.permute.xlu0 %4299 }
 0x6ae   :  { %v4381_v32 = vsel %vm11627_vm7, %v4300_v4, 0.1  ;;  %vm11647_vm7 = vmmov %vm11643_vm0 }
 0x6b0   :  { %4785 = vrot.lane.b32.xlu0 %v4377_v56, %s6804_s22  ;;  %v4302_v27 = vpop.permute.xlu1 %4301  ;;  %v11641_v56 = vld [vmem:[#allocation116_spill] sm:$0xff] }
 0x6b1   :  { %4787 = vrot.lane.b32.xlu1 %v4378_v37, %s6804_s22  ;;  %v4382_v21 = vsel %vm11629_vm2, %v4302_v27, 0.1  ;;  %v4928_v37 = vsel %vm4921_vm5, %v11641_v56, %v4590_v57  ;;  %v4929_v27 = vsel %vm4921_vm5, %v9839_v61, %v4592_v31  ;;  %vm11648_vm2 = vmmov %vm11643_vm0 }
 0x6b3   :  { %v4118_v45 = vpop.permute.xlu0 %4117 }
 0x6b4   :  { %4641 = vrot.lane.b32.xlu0 %v4191_v14, %s6803_s14  ;;  %v4195_v16 = vsel %vm11638_vm15, %v4118_v45, 0.0 }
 0x6b5   :  { %4643 = vrot.lane.b32.xlu1 %v4192_v55, %s6803_s14  ;;  %v4120_v53 = vpop.permute.xlu1 %4119 }
 0x6b6   :  { %v4196_v18 = vsel %vm11640_vm6, %v4120_v53, 0.0 }
 0x6b8   :  { %4789 = vrot.lane.b32.xlu0 %v4379_v41, %s6804_s22 }
 0x6b9   :  { %4791 = vrot.lane.b32.xlu1 %v4380_v38, %s6804_s22  ;;  %v4738_v34 = vpop.permute.xlu0 %4737 }
 0x6ba   :  { %v4965_v44 = vsel %vm4960_vm8, %v4926_v29, %v4738_v34 }
 0x6bb   :  { %v5004_v26 = vsel %vm4999_vm9, %v4965_v44, 0.0  ;;  %v4740_v50 = vpop.permute.xlu1 %4739 }
 0x6bc   :  { %4645 = vrot.lane.b32.xlu0 %v4193_v6, %s6803_s14  ;;  %5042 = vst.msk [vmem:[%s10762_s15 + $0x20] sm:$0xff] %vm11636_vm11, %v5004_v26  ;;  %v4966_v11 = vsel %vm4960_vm8, %v4927_v24, %v4740_v50  ;;  %vm11651_vm11 = vmmov %vm11643_vm0 }
 0x6bd   :  { %v5005_v39 = vsel %vm4999_vm9, %v4966_v11, 0.0  ;;  %4647 = vrot.lane.b32.xlu1 %v4194_v42, %s6803_s14 }
 0x6be   :  { %v4594_v5 = vpop.permute.xlu0 %4593  ;;  %5043 = vst.msk [vmem:[%s10762_s15 + $0x28] sm:$0xff] %vm11612_vm1, %v5005_v39  ;;  %vm11652_vm1 = vmmov %vm11643_vm0 }
 0x6bf   :  { %v4596_v52 = vpop.permute.xlu1 %4595  ;;  %v4930_v34 = vsel %vm4921_vm5, %v9850_v8, %v4594_v5 }
 0x6c0   :  { %4793 = vrot.lane.b32.xlu0 %v4381_v32, %s6804_s22  ;;  %v4931_v44 = vsel %vm4921_vm5, %v9854_v51, %v4596_v52 }
 0x6c1   :  { %4795 = vrot.lane.b32.xlu1 %v4382_v21, %s6804_s22 }
 0x6c2   :  { %v4304_v3 = vpop.permute.xlu0 %4303 }
 0x6c3   :  { %v4306_v17 = vpop.permute.xlu1 %4305  ;;  %v4383_v54 = vsel %vm11632_vm12, %v4304_v3, 0.1  ;;  %vm11649_vm12 = vmmov %vm11643_vm0 }
 0x6c4   :  { %4649 = vrot.lane.b32.xlu0 %v4195_v16, %s6803_s14  ;;  %v4384_v45 = vsel %vm11635_vm10, %v4306_v17, 0.1  ;;  %vm11650_vm10 = vmmov %vm11643_vm0 }
 0x6c5   :  { %4651 = vrot.lane.b32.xlu1 %v4196_v18, %s6803_s14 }
 0x6c6   :  { %v4742_v4 = vpop.permute.xlu0 %4741 }
 0x6c7   :  { %v4967_v14 = vsel %vm4960_vm8, %v4928_v37, %v4742_v4  ;;  %v4744_v55 = vpop.permute.xlu1 %4743 }
 0x6c8   :  { %v5006_v30 = vsel %vm4999_vm9, %v4967_v14, 0.0  ;;  %4797 = vrot.lane.b32.xlu0 %v4383_v54, %s6804_s22  ;;  %v4968_v57 = vsel %vm4960_vm8, %v4929_v27, %v4744_v55 }
 0x6c9   :  { %5044 = vst.msk [vmem:[%s10762_s15 + $0x30] sm:$0xff] %vm11642_vm13, %v5006_v30  ;;  %v5007_v41 = vsel %vm4999_vm9, %v4968_v57, 0.0  ;;  %4799 = vrot.lane.b32.xlu1 %v4384_v45, %s6804_s22  ;;  %vm11655_vm13 = vmmov %vm11643_vm0 }
 0x6ca   :  { %v4598_v61 = vpop.permute.xlu0 %4597  ;;  %5045 = vst.msk [vmem:[%s10762_s15 + $0x38] sm:$0xff] %vm11643_vm0, %v5007_v41 }
 0x6cb   :  { %v4600_v31 = vpop.permute.xlu1 %4599  ;;  %v4932_v51 = vsel %vm4921_vm5, %v9872_v22, %v4598_v61 }
 0x6cc   :  { %v4933_v39 = vsel %vm4921_vm5, %v9883_v2, %v4600_v31 }
 0x6ce   :  { %v4308_v53 = vpop.permute.xlu0 %4307 }
 0x6cf   :  { %v4385_v38 = vsel %vm11638_vm15, %v4308_v53, 0.1  ;;  %v4310_v15 = vpop.permute.xlu1 %4309  ;;  %vm11653_vm15 = vmmov %vm11643_vm0 }
 0x6d0   :  { %4801 = vrot.lane.b32.xlu0 %v4385_v38, %s6804_s22  ;;  %v4386_v29 = vsel %vm11640_vm6, %v4310_v15, 0.1  ;;  %vm11654_vm6 = vmmov %vm11643_vm0 }
 0x6d1   :  { %4803 = vrot.lane.b32.xlu1 %v4386_v29, %s6804_s22 }
 0x6d2   :  { %v4746_v49 = vpop.permute.xlu0 %4745 }
 0x6d3   :  { %v4969_v6 = vsel %vm4960_vm8, %v4930_v34, %v4746_v49  ;;  %v4748_v24 = vpop.permute.xlu1 %4747 }
 0x6d4   :  { %v5008_v23 = vsel %vm4999_vm9, %v4969_v6, 0.0  ;;  %v4970_v26 = vsel %vm4960_vm8, %v4931_v44, %v4748_v24 }
 0x6d5   :  { %5046 = vst.msk [vmem:[%s10762_s15 + $0x40] sm:$0xff] %vm11644_vm4, %v5008_v23  ;;  %v5009_v8 = vsel %vm4999_vm9, %v4970_v26, 0.0  ;;  %vm11656_vm4 = vmmov %vm11643_vm0 }
 0x6d6   :  { %v4602_v50 = vpop.permute.xlu0 %4601  ;;  %5047 = vst.msk [vmem:[%s10762_s15 + $0x48] sm:$0xff] %vm11645_vm3, %v5009_v8  ;;  %vm11657_vm3 = vmmov %vm11643_vm0 }
 0x6d7   :  { %v4604_v46 = vpop.permute.xlu1 %4603  ;;  %v4934_v2 = vsel %vm4921_vm5, %v9893_v33, %v4602_v50 }
 0x6d8   :  { %v4935_v17 = vsel %vm4921_vm5, %v9905_v28, %v4604_v46 }
 0x6da   :  { %v4750_v42 = vpop.permute.xlu0 %4749 }
 0x6db   :  { %v4971_v11 = vsel %vm4960_vm8, %v4932_v51, %v4750_v42  ;;  %v4752_v32 = vpop.permute.xlu1 %4751 }
 0x6dc   :  { %v5010_v5 = vsel %vm4999_vm9, %v4971_v11, 0.0  ;;  %v4972_v52 = vsel %vm4960_vm8, %v4933_v39, %v4752_v32 }
 0x6dd   :  { %5048 = vst.msk [vmem:[%s10762_s15 + $0x50] sm:$0xff] %vm11646_vm14, %v5010_v5  ;;  %v5011_v21 = vsel %vm4999_vm9, %v4972_v52, 0.0  ;;  %vm11658_vm14 = vmmov %vm11643_vm0 }
 0x6de   :  { %v4606_v3 = vpop.permute.xlu0 %4605  ;;  %5049 = vst.msk [vmem:[%s10762_s15 + $0x58] sm:$0xff] %vm11647_vm7, %v5011_v21  ;;  %vm11659_vm7 = vmmov %vm11643_vm0 }
 0x6df   :  { %v4608_v22 = vpop.permute.xlu1 %4607  ;;  %v4936_v28 = vsel %vm4921_vm5, %v9926_v47, %v4606_v3 }
 0x6e0   :  { %v4937_v27 = vsel %vm4921_vm5, %v9937_v40, %v4608_v22 }
 0x6e2   :  { %v4754_v35 = vpop.permute.xlu0 %4753 }
 0x6e3   :  { %v4973_v16 = vsel %vm4960_vm8, %v4934_v2, %v4754_v35  ;;  %v4756_v18 = vpop.permute.xlu1 %4755 }
 0x6e4   :  { %v5012_v25 = vsel %vm4999_vm9, %v4973_v16, 0.0  ;;  %v4974_v56 = vsel %vm4960_vm8, %v4935_v17, %v4756_v18 }
 0x6e5   :  { %5050 = vst.msk [vmem:[%s10762_s15 + $0x60] sm:$0xff] %vm11648_vm2, %v5012_v25  ;;  %v5013_v37 = vsel %vm4999_vm9, %v4974_v56, 0.0  ;;  %vm11660_vm2 = vmmov %vm11643_vm0 }
 0x6e6   :  { %v4610_v4 = vpop.permute.xlu0 %4609  ;;  %5051 = vst.msk [vmem:[%s10762_s15 + $0x68] sm:$0xff] %vm11649_vm12, %v5013_v37  ;;  %vm11663_vm12 = vmmov %vm11643_vm0 }
 0x6e7   :  { %v4612_v33 = vpop.permute.xlu1 %4611  ;;  %v4938_v40 = vsel %vm4921_vm5, %v9952_v36, %v4610_v4 }
 0x6e8   :  { %v4939_v53 = vsel %vm4921_vm5, %v9967_v20, %v4612_v33 }
 0x6ea   :  { %v4758_v54 = vpop.permute.xlu0 %4757 }
 0x6eb   :  { %v4975_v14 = vsel %vm4960_vm8, %v4936_v28, %v4758_v54  ;;  %v4760_v55 = vpop.permute.xlu1 %4759 }
 0x6ec   :  { %v5014_v30 = vsel %vm4999_vm9, %v4975_v14, 0.0  ;;  %v4976_v45 = vsel %vm4960_vm8, %v4937_v27, %v4760_v55 }
 0x6ed   :  { %5052 = vst.msk [vmem:[%s10762_s15 + $0x70] sm:$0xff] %vm11650_vm10, %v5014_v30  ;;  %v5015_v57 = vsel %vm4999_vm9, %v4976_v45, 0.0  ;;  %vm11664_vm10 = vmmov %vm11643_vm0 }
 0x6ee   :  { %v4614_v41 = vpop.permute.xlu0 %4613  ;;  %5053 = vst.msk [vmem:[%s10762_s15 + $0x78] sm:$0xff] %vm11651_vm11, %v5015_v57  ;;  %v11662_v57 = vld [vmem:[#allocation50_spill] sm:$0xff]  ;;  %vm11667_vm11 = vmmov %vm11643_vm0 }
 0x6ef   :  { %v4616_v47 = vpop.permute.xlu1 %4615  ;;  %v4940_v20 = vsel %vm4921_vm5, %v9977_v19, %v4614_v41 }
 0x6f0   :  { %v4941_v23 = vsel %vm4921_vm5, %v9991_v63, %v4616_v47 }
 0x6f2   :  { %v4762_v61 = vpop.permute.xlu0 %4761 }
 0x6f3   :  { %v4977_v31 = vsel %vm4960_vm8, %v4938_v40, %v4762_v61  ;;  %v4764_v15 = vpop.permute.xlu1 %4763 }
 0x6f4   :  { %v5016_v38 = vsel %vm4999_vm9, %v4977_v31, 0.0  ;;  %v4978_v29 = vsel %vm4960_vm8, %v4939_v53, %v4764_v15  ;;  %v11665_v15 = vld [vmem:[#allocation120_spill] sm:$0xff] }
 0x6f5   :  { %5054 = vst.msk [vmem:[%s10762_s15 + $0x80] sm:$0xff] %vm11652_vm1, %v5016_v38  ;;  %v5017_v34 = vsel %vm4999_vm9, %v4978_v29, 0.0  ;;  %vm11668_vm1 = vmmov %vm11643_vm0 }
 0x6f6   :  { %v4618_v49 = vpop.permute.xlu0 %4617  ;;  %5055 = vst.msk [vmem:[%s10762_s15 + $0x88] sm:$0xff] %vm11653_vm15, %v5017_v34  ;;  %vm11670_vm15 = vmmov %vm11643_vm0 }
 0x6f7   :  { %v4620_v36 = vpop.permute.xlu1 %4619  ;;  %v4942_v63 = vsel %vm4921_vm5, %v10002_v0, %v4618_v49 }
 0x6f8   :  { %v4943_v11 = vsel %vm4921_vm5, %v10011_v10, %v4620_v36  ;;  %v11666_v36 = vld [vmem:[#allocation101_spill] sm:$0xff] }
 0x6fa   :  { %v4766_v6 = vpop.permute.xlu0 %4765 }
 0x6fb   :  { %v4979_v44 = vsel %vm4960_vm8, %v4940_v20, %v4766_v6  ;;  %v4768_v26 = vpop.permute.xlu1 %4767 }
 0x6fc   :  { %v5018_v24 = vsel %vm4999_vm9, %v4979_v44, 0.0  ;;  %v4980_v8 = vsel %vm4960_vm8, %v4941_v23, %v4768_v26 }
 0x6fd   :  { %5056 = vst.msk [vmem:[%s10762_s15 + $0x90] sm:$0xff] %vm11654_vm6, %v5018_v24  ;;  %v5019_v50 = vsel %vm4999_vm9, %v4980_v8, 0.0  ;;  %vm11671_vm6 = vmmov %vm11643_vm0 }
 0x6fe   :  { %v4622_v46 = vpop.permute.xlu0 %4621  ;;  %5057 = vst.msk [vmem:[%s10762_s15 + $0x98] sm:$0xff] %vm11655_vm13, %v5019_v50  ;;  %v11669_v50 = vld [vmem:[#allocation122_spill] sm:$0xff]  ;;  %vm11672_vm13 = vmmov %vm11643_vm0 }
 0x6ff   :  { %v4624_v19 = vpop.permute.xlu1 %4623  ;;  %v4944_v10 = vsel %vm4921_vm5, %v10021_v48, %v4622_v46 }
 0x700   :  { %v4945_v2 = vsel %vm4921_vm5, %v10029_v1, %v4624_v19 }
 0x702   :  { %v4770_v51 = vpop.permute.xlu0 %4769 }
 0x703   :  { %v4981_v42 = vsel %vm4960_vm8, %v4942_v63, %v4770_v51  ;;  %v4772_v5 = vpop.permute.xlu1 %4771 }
 0x704   :  { %v5020_v39 = vsel %vm4999_vm9, %v4981_v42, 0.0  ;;  %v4982_v32 = vsel %vm4960_vm8, %v4943_v11, %v4772_v5 }
 0x705   :  { %5058 = vst.msk [vmem:[%s10762_s15 + $0xa0] sm:$0xff] %vm11643_vm0, %v5020_v39  ;;  %v5021_v52 = vsel %vm4999_vm9, %v4982_v32, 0.0 }
 0x706   :  { %v4626_v21 = vpop.permute.xlu0 %4625  ;;  %5059 = vst.msk [vmem:[%s10762_s15 + $0xa8] sm:$0xff] %vm11656_vm4, %v5021_v52  ;;  %vm11673_vm4 = vmmov %vm11643_vm0 }
 0x707   :  { %v4628_v0 = vpop.permute.xlu1 %4627  ;;  %v4946_v1 = vsel %vm4921_vm5, %v10038_v60, %v4626_v21 }
 0x708   :  { %v4947_v4 = vsel %vm4921_vm5, %v10049_v59, %v4628_v0  ;;  %v11661_v59 = vld [vmem:[#allocation100_spill] sm:$0xff] }
 0x70a   :  { %v4774_v3 = vpop.permute.xlu0 %4773 }
 0x70b   :  { %v4983_v22 = vsel %vm4960_vm8, %v4944_v10, %v4774_v3  ;;  %v4776_v16 = vpop.permute.xlu1 %4775 }
 0x70c   :  { %v5022_v35 = vsel %vm4999_vm9, %v4983_v22, 0.0  ;;  %v4984_v17 = vsel %vm4960_vm8, %v4945_v2, %v4776_v16 }
 0x70d   :  { %5060 = vst.msk [vmem:[%s10762_s15 + $0xb0] sm:$0xff] %vm11657_vm3, %v5022_v35  ;;  %v5023_v25 = vsel %vm4999_vm9, %v4984_v17, 0.0  ;;  %vm11674_vm3 = vmmov %vm11643_vm0 }
 0x70e   :  { %v4630_v18 = vpop.permute.xlu0 %4629  ;;  %5061 = vst.msk [vmem:[%s10762_s15 + $0xb8] sm:$0xff] %vm11658_vm14, %v5023_v25  ;;  %vm11675_vm14 = vmmov %vm11643_vm0 }
 0x70f   :  { %v4632_v48 = vpop.permute.xlu1 %4631  ;;  %v4948_v30 = vsel %vm4921_vm5, %v11661_v59, %v4630_v18 }
 0x710   :  { %v4949_v41 = vsel %vm4921_vm5, %v11662_v57, %v4632_v48 }
 0x712   :  { %v4778_v56 = vpop.permute.xlu0 %4777 }
 0x713   :  { %v4985_v37 = vsel %vm4960_vm8, %v4946_v1, %v4778_v56  ;;  %v4780_v28 = vpop.permute.xlu1 %4779 }
 0x714   :  { %v5024_v33 = vsel %vm4999_vm9, %v4985_v37, 0.0  ;;  %v4986_v54 = vsel %vm4960_vm8, %v4947_v4, %v4780_v28 }
 0x715   :  { %5062 = vst.msk [vmem:[%s10762_s15 + $0xc0] sm:$0xff] %vm11659_vm7, %v5024_v33  ;;  %v5025_v14 = vsel %vm4999_vm9, %v4986_v54, 0.0  ;;  %vm11676_vm7 = vmmov %vm11643_vm0 }
 0x716   :  { %v4634_v27 = vpop.permute.xlu0 %4633  ;;  %5063 = vst.msk [vmem:[%s10762_s15 + $0xc8] sm:$0xff] %vm11660_vm2, %v5025_v14 }
 0x717   :  { %v4636_v60 = vpop.permute.xlu1 %4635  ;;  %v4950_v29 = vsel %vm4921_vm5, %v11665_v15, %v4634_v27 }
 0x718   :  { %v4951_v20 = vsel %vm4921_vm5, %v11666_v36, %v4636_v60 }
 0x71a   :  { %v4782_v55 = vpop.permute.xlu0 %4781 }
 0x71b   :  { %v4987_v45 = vsel %vm4960_vm8, %v4948_v30, %v4782_v55  ;;  %v4784_v40 = vpop.permute.xlu1 %4783 }
 0x71c   :  { %v5026_v47 = vsel %vm4999_vm9, %v4987_v45, 0.0  ;;  %v4988_v61 = vsel %vm4960_vm8, %v4949_v41, %v4784_v40 }
 0x71d   :  { %5064 = vst.msk [vmem:[%s10762_s15 + $0xd0] sm:$0xff] %vm11663_vm12, %v5026_v47  ;;  %v5027_v31 = vsel %vm4999_vm9, %v4988_v61, 0.0 }
 0x71e   :  { %v4638_v53 = vpop.permute.xlu0 %4637  ;;  %5065 = vst.msk [vmem:[%s10762_s15 + $0xd8] sm:$0xff] %vm11664_vm10, %v5027_v31 }
 0x71f   :  { %v4640_v38 = vpop.permute.xlu1 %4639  ;;  %v4952_v46 = vsel %vm4921_vm5, %v11669_v50, %v4638_v53 }
 0x720   :  { %v4953_v51 = vsel %vm4921_vm5, %v10128_v12, %v4640_v38 }
 0x722   :  { %v4786_v34 = vpop.permute.xlu0 %4785 }
 0x723   :  { %v4989_v49 = vsel %vm4960_vm8, %v4950_v29, %v4786_v34  ;;  %v4788_v44 = vpop.permute.xlu1 %4787 }
 0x724   :  { %v5028_v6 = vsel %vm4999_vm9, %v4989_v49, 0.0  ;;  %v4990_v23 = vsel %vm4960_vm8, %v4951_v20, %v4788_v44 }
 0x725   :  { %5066 = vst.msk [vmem:[%s10762_s15 + $0xe0] sm:$0xff] %vm11667_vm11, %v5028_v6  ;;  %v5029_v24 = vsel %vm4999_vm9, %v4990_v23, 0.0 }
 0x726   :  { %v4642_v26 = vpop.permute.xlu0 %4641  ;;  %5067 = vst.msk [vmem:[%s10762_s15 + $0xe8] sm:$0xff] %vm11668_vm1, %v5029_v24 }
 0x727   :  { %v4644_v8 = vpop.permute.xlu1 %4643  ;;  %v4954_v12 = vsel %vm4921_vm5, %v10134_v62, %v4642_v26 }
 0x728   :  { %v4955_v10 = vsel %vm4921_vm5, %v10150_v9, %v4644_v8 }
 0x72a   :  { %v4790_v19 = vpop.permute.xlu0 %4789 }
 0x72b   :  { %v4991_v63 = vsel %vm4960_vm8, %v4952_v46, %v4790_v19  ;;  %v4792_v11 = vpop.permute.xlu1 %4791 }
 0x72c   :  { %v5030_v42 = vsel %vm4999_vm9, %v4991_v63, 0.0  ;;  %v4992_v39 = vsel %vm4960_vm8, %v4953_v51, %v4792_v11 }
 0x72d   :  { %5068 = vst.msk [vmem:[%s10762_s15 + $0xf0] sm:$0xff] %vm11670_vm15, %v5030_v42  ;;  %v5031_v5 = vsel %vm4999_vm9, %v4992_v39, 0.0 }
 0x72e   :  { %v4646_v32 = vpop.permute.xlu0 %4645  ;;  %5069 = vst.msk [vmem:[%s10762_s15 + $0xf8] sm:$0xff] %vm11671_vm6, %v5031_v5 }
 0x72f   :  { %v4648_v52 = vpop.permute.xlu1 %4647  ;;  %v4956_v9 = vsel %vm4921_vm5, %v10158_v58, %v4646_v32 }
 0x730   :  { %v4957_v18 = vsel %vm4921_vm5, %v10175_v7, %v4648_v52 }
 0x732   :  { %v4794_v21 = vpop.permute.xlu0 %4793 }
 0x733   :  { %v4993_v0 = vsel %vm4960_vm8, %v4954_v12, %v4794_v21  ;;  %v4796_v22 = vpop.permute.xlu1 %4795 }
 0x734   :  { %v5032_v3 = vsel %vm4999_vm9, %v4993_v0, 0.0  ;;  %v4994_v2 = vsel %vm4960_vm8, %v4955_v10, %v4796_v22 }
 0x735   :  { %5070 = vst.msk [vmem:[%s10762_s15 + $0x100] sm:$0xff] %vm11672_vm13, %v5032_v3  ;;  %v5033_v35 = vsel %vm4999_vm9, %v4994_v2, 0.0 }
 0x736   :  { %v4650_v16 = vpop.permute.xlu0 %4649  ;;  %5071 = vst.msk [vmem:[%s10762_s15 + $0x108] sm:$0xff] %vm11643_vm0, %v5033_v35 }
 0x737   :  { %v4652_v62 = vpop.permute.xlu1 %4651  ;;  %v4958_v58 = vsel %vm4921_vm5, %v10181_v43, %v4650_v16 }
 0x738   :  { %v4959_v33 = vsel %vm4921_vm5, %v10188_v13, %v4652_v62 }
 0x73a   :  { %v4798_v17 = vpop.permute.xlu0 %4797 }
 0x73b   :  { %v4995_v25 = vsel %vm4960_vm8, %v4956_v9, %v4798_v17  ;;  %v4800_v1 = vpop.permute.xlu1 %4799 }
 0x73c   :  { %v5034_v48 = vsel %vm4999_vm9, %v4995_v25, 0.0  ;;  %v4996_v56 = vsel %vm4960_vm8, %v4957_v18, %v4800_v1 }
 0x73d   :  { %5072 = vst.msk [vmem:[%s10762_s15 + $0x110] sm:$0xff] %vm11673_vm4, %v5034_v48  ;;  %v5035_v37 = vsel %vm4999_vm9, %v4996_v56, 0.0 }
 0x73e   :  { %5073 = vst.msk [vmem:[%s10762_s15 + $0x118] sm:$0xff] %vm11674_vm3, %v5035_v37 }
 0x742   :  { %v4802_v7 = vpop.permute.xlu0 %4801 }
 0x743   :  { %v4997_v4 = vsel %vm4960_vm8, %v4958_v58, %v4802_v7  ;;  %v4804_v54 = vpop.permute.xlu1 %4803 }
 0x744   :  { %v5036_v28 = vsel %vm4999_vm9, %v4997_v4, 0.0  ;;  %v4998_v14 = vsel %vm4960_vm8, %v4959_v33, %v4804_v54 }
 0x745   :  { %5074 = vst.msk [vmem:[%s10762_s15 + $0x120] sm:$0xff] %vm11675_vm14, %v5036_v28  ;;  %v5037_v27 = vsel %vm4999_vm9, %v4998_v14, 0.0 }
 0x746   :  { %5075 = vst.msk [vmem:[%s10762_s15 + $0x128] sm:$0xff] %vm11676_vm7, %v5037_v27 }
 0x747   :  { %5080 = vsyncpa [#allocation3], 1 }
 0x748   :  { %5081 = vsyncpa [#allocation5], 1 }

</bundles_post_ra>
